<compile_context>
chip_gen: v7x
topology: tpu7x:2x2x1
jax: 0.10.0
libtpu: 0.0.40
codegen_flags: <defaults>
</compile_context>

<pallas_src>
import functools

import jax
import jax.numpy as jnp
from jax import lax
from jax.experimental import pallas as pl
from jax.experimental.pallas import tpu as pltpu


def _round_up(x, m):
    return ((x + m - 1) // m) * m


# ----------------------------------------------------------------------------
# The single fused kernel (one grid step == one image).
# ----------------------------------------------------------------------------
def _fused_convlayer3_kernel(x1_ref, w1_ref, b1_ref, w2_ref, b2_ref,
                             w3_ref, b3_ref, o_ref, xp2_ref, xp3_ref,
                             *, h, w, num_levels):
    c1 = w1_ref.shape[-1]          # 64
    c2 = w2_ref.shape[-1]          # 256
    cout = o_ref.shape[-1]
    h2, w2 = h // 2, w // 2
    pad3 = num_levels

    def group_matmul(band, col_offs, w_out, w_mat):
        # band: (h_out, Wp, Cin) bf16 row band (already sliced along H - cheap
        # outer-dim slice).  The kw shifts are taken from the in-register band
        # and concatenated along lanes so each MXU push has K = 3 * Cin.
        h_out = band.shape[0]
        parts = [band[:, c0:c0 + w_out, :] for c0 in col_offs]
        op = jnp.concatenate(parts, axis=-1).reshape(h_out * w_out, -1)
        return jnp.dot(op, w_mat, preferred_element_type=jnp.float32)

    # ---- conv1 (3 -> 64) + bn1 + relu  (K = 9 per kh group) -----------------
    acc1 = jnp.zeros((h * w, c1), jnp.float32)
    for kh in range(3):
        band = x1_ref[0, kh:kh + h, :, :]                     # (h, Wp1, 3)
        acc1 = acc1 + group_matmul(band, (0, 1, 2), w, w1_ref[kh])
    y1 = jnp.maximum(acc1 + b1_ref[...], 0.0).reshape(h, w, c1)   # f32

    # ---- maxpool 2x2 fused with zero-pad placement into the conv2 scratch ---
    xp2_ref[...] = jnp.zeros_like(xp2_ref)
    yh = jnp.max(y1.reshape(h2, 2, w, c1), axis=1)            # H-pool (h2, w, c1)
    for j in range(w2):
        col = jnp.maximum(yh[:, 2 * j, :], yh[:, 2 * j + 1, :])   # (h2, c1)
        xp2_ref[1:1 + h2, 1 + j, :] = col.astype(xp2_ref.dtype)

    # ---- conv2 (64 -> 256) + bn2 + relu  (K = 192 per kh group) -------------
    acc2 = jnp.zeros((h2 * w2, c2), jnp.float32)
    for kh in range(3):
        band = xp2_ref[kh:kh + h2, :, :]                      # (h2, Wp2, 64)
        acc2 = acc2 + group_matmul(band, (0, 1, 2), w2, w2_ref[kh])
    y2 = jnp.maximum(acc2 + b2_ref[...], 0.0).reshape(h2, w2, c2)

    # ---- place y2 (bf16) into the dilated-conv padded scratch ---------------
    xp3_ref[...] = jnp.zeros_like(xp3_ref)
    xp3_ref[pad3:pad3 + h2, pad3:pad3 + w2, :] = y2.astype(xp3_ref.dtype)

    # ---- Dy_scale_Conv (sum of dilated 3x3 convs) + bn3 + relu --------------
    #      (K = 768 per (level, kh) group)
    acc3 = jnp.zeros((h2 * w2, cout), jnp.float32)
    for li in range(num_levels):
        d = li + 1
        col_offs = (pad3 - d, pad3, pad3 + d)
        for kh in range(3):
            ro = pad3 - d + kh * d
            band = xp3_ref[ro:ro + h2, :, :]                  # (h2, Wp3, 256)
            acc3 = acc3 + group_matmul(band, col_offs, w2, w3_ref[li * 3 + kh])
    y3 = jnp.maximum(acc3 + b3_ref[...], 0.0).reshape(h2, w2, cout)   # f32

    # ---- final maxpool 2x2 fused into the lane-dense output write -----------
    yh3 = jnp.max(y3.reshape(h2 // 2, 2, w2, cout), axis=1)   # (h2/2, w2, cout)
    for j in range(w2 // 2):
        col = jnp.maximum(yh3[:, 2 * j, :], yh3[:, 2 * j + 1, :])  # (h2/2, cout)
        o_ref[0, :, j, :] = col.astype(o_ref.dtype)


# ----------------------------------------------------------------------------
# Parameter folding (BN scale into weight columns, tap-grouped matrices)
# ----------------------------------------------------------------------------
def bn_fold(gamma, beta, mean, var, conv_bias, eps=1e-5):
    """Fold eval-mode BatchNorm (+ conv bias) into per-channel scale/bias."""
    s = gamma / jnp.sqrt(var + eps)
    b = (conv_bias - mean) * s + beta
    return s, b


def _fold_kh_groups(w_oihw, scale):
    """(O, C, 3, 3) -> (3[kh], 3*C, O) bf16, rows ordered [kw][c], BN folded."""
    o, c = w_oihw.shape[0], w_oihw.shape[1]
    m = jnp.transpose(w_oihw, (2, 3, 1, 0)).reshape(3, 3 * c, o)
    return (m * scale[None, None, :]).astype(jnp.bfloat16)


def _prep_weights(params, num_levels):
    w1, b1 = params["conv1"]
    s1, t1 = bn_fold(*params["bn1"], b1)
    w2, b2 = params["conv2"]
    s2, t2 = bn_fold(*params["bn2"], b2)
    dy = params["dy_conv"]
    bias_sum = sum(d[1] for d in dy)
    s3, t3 = bn_fold(*params["bn3"], bias_sum)

    w1g = _fold_kh_groups(w1, s1)                              # (3, 9, 64)
    w2g = _fold_kh_groups(w2, s2)                              # (3, 192, 256)
    w3g = jnp.concatenate([_fold_kh_groups(d[0], s3) for d in dy], axis=0)
    # w3g: (3*num_levels, 768, Cout), group index = level*3 + kh

    return (w1g, t1.reshape(1, -1).astype(jnp.float32),
            w2g, t2.reshape(1, -1).astype(jnp.float32),
            w3g, t3.reshape(1, -1).astype(jnp.float32))


# ----------------------------------------------------------------------------
# Forward pass (mirrors ConvLayer3.forward)
# ----------------------------------------------------------------------------
@functools.partial(jax.jit, static_argnames=("num_levels",))
def conv_layer3_forward(x_nchw, params, num_levels=3):
    n, _, h, w = x_nchw.shape
    assert h % 4 == 0 and w % 4 == 0
    h2, w2 = h // 2, w // 2
    pad3 = num_levels

    w1g, t1, w2g, t2, w3g, t3 = _prep_weights(params, num_levels)
    c1 = w1g.shape[-1]            # 64
    c2 = w2g.shape[-1]            # 256
    cout = w3g.shape[-1]

    # NCHW -> NHWC bf16, zero-pad for conv1 (width rounded to a multiple of 8).
    x = jnp.transpose(x_nchw, (0, 2, 3, 1)).astype(jnp.bfloat16)
    wp1 = _round_up(w + 2, 8)
    xp1 = jnp.pad(x, ((0, 0), (1, 1), (1, wp1 - w - 1), (0, 0)))

    wp2 = _round_up(w2 + 2, 8)
    wp3 = _round_up(w2 + 2 * pad3, 8)

    kernel = functools.partial(_fused_convlayer3_kernel,
                               h=h, w=w, num_levels=num_levels)
    out = pl.pallas_call(
        kernel,
        out_shape=jax.ShapeDtypeStruct((n, h2 // 2, w2 // 2, cout), jnp.float32),
        grid_spec=pltpu.PrefetchScalarGridSpec(
            num_scalar_prefetch=0,
            grid=(n,),
            in_specs=[
                pl.BlockSpec((1, h + 2, wp1, 3), lambda i: (i, 0, 0, 0)),
                pl.BlockSpec(w1g.shape, lambda i: (0, 0, 0)),
                pl.BlockSpec(t1.shape, lambda i: (0, 0)),
                pl.BlockSpec(w2g.shape, lambda i: (0, 0, 0)),
                pl.BlockSpec(t2.shape, lambda i: (0, 0)),
                pl.BlockSpec(w3g.shape, lambda i: (0, 0, 0)),
                pl.BlockSpec(t3.shape, lambda i: (0, 0)),
            ],
            out_specs=pl.BlockSpec((1, h2 // 2, w2 // 2, cout),
                                   lambda i: (i, 0, 0, 0)),
            scratch_shapes=[
                pltpu.VMEM((h2 + 2, wp2, c1), jnp.bfloat16),           # conv2 pad
                pltpu.VMEM((h2 + 2 * pad3, wp3, c2), jnp.bfloat16),    # dy pad
            ],
        ),
        compiler_params=pltpu.CompilerParams(
            dimension_semantics=("parallel",)),
    )(xp1, w1g, t1, w2g, t2, w3g, t3)

    return jnp.transpose(out, (0, 3, 1, 2))                    # NHWC -> NCHW


# ----------------------------------------------------------------------------
# Pure-JAX reference (mirrors the kernel's precision: bf16 operands, f32 accum)
# ----------------------------------------------------------------------------
def _maxpool2_nchw(x):
    n, c, hh, ww = x.shape
    return x.reshape(n, c, hh // 2, 2, ww // 2, 2).max(axis=(3, 5))


def reference_forward(x_nchw, params, num_levels=3):
    w1, b1 = params["conv1"]
    s1, t1 = bn_fold(*params["bn1"], b1)
    w2, b2 = params["conv2"]
    s2, t2 = bn_fold(*params["bn2"], b2)
    dy = params["dy_conv"]
    bias_sum = sum(d[1] for d in dy)
    s3, t3 = bn_fold(*params["bn3"], bias_sum)

    def conv(x, w_oihw, scale, dil):
        wf = (w_oihw * scale[:, None, None, None]).astype(jnp.bfloat16)
        return lax.conv_general_dilated(
            x.astype(jnp.float32), wf.astype(jnp.float32),
            window_strides=(1, 1), padding=[(dil, dil), (dil, dil)],
            rhs_dilation=(dil, dil),
            dimension_numbers=("NCHW", "OIHW", "NCHW"),
            precision=lax.Precision.HIGHEST)

    y = x_nchw.astype(jnp.bfloat16)
    y = jnp.maximum(conv(y, w1, s1, 1) + t1[None, :, None, None], 0.0)
    y = _maxpool2_nchw(y).astype(jnp.bfloat16)
    y = jnp.maximum(conv(y, w2, s2, 1) + t2[None, :, None, None], 0.0)
    y = y.astype(jnp.bfloat16)
    acc = sum(conv(y, dy[i][0], s3, i + 1) for i in range(num_levels))
    y = jnp.maximum(acc + t3[None, :, None, None], 0.0)
    return _maxpool2_nchw(y)


# ----------------------------------------------------------------------------
# Parameter construction (deterministic, synthetic)
# ----------------------------------------------------------------------------
def make_params(outchannel, num_levels=3, seed=0):
    key = jax.random.PRNGKey(seed)
    ks = jax.random.split(key, 32)
    ki = iter(range(32))

    def conv(cout, cin):
        w = jax.random.normal(ks[next(ki)], (cout, cin, 3, 3), jnp.float32) * 0.05
        b = jax.random.normal(ks[next(ki)], (cout,), jnp.float32) * 0.05
        return w, b

    def bn(c):
        gamma = 1.0 + 0.1 * jax.random.normal(ks[next(ki)], (c,), jnp.float32)
        beta = 0.1 * jax.random.normal(ks[next(ki)], (c,), jnp.float32)
        mean = 0.05 * jax.random.normal(ks[next(ki)], (c,), jnp.float32)
        var = 0.5 + jax.random.uniform(ks[next(ki)], (c,), jnp.float32)
        return gamma, beta, mean, var

    return {
        "conv1": conv(64, 3),
        "bn1": bn(64),
        "conv2": conv(256, 64),
        "bn2": bn(256),
        "dy_conv": [conv(outchannel, 256) for _ in range(num_levels)],
        "bn3": bn(outchannel),
    }


# ----------------------------------------------------------------------------
# Main
# ----------------------------------------------------------------------------
if __name__ == "__main__":
    outchannel = 128
    num_levels = 3
    params = make_params(outchannel, num_levels=num_levels, seed=0)

    key = jax.random.PRNGKey(0)
    x = jax.random.normal(key, (2, 3, 16, 16), jnp.float32)   # NCHW, like torch

    out = conv_layer3_forward(x, params, num_levels=num_levels)
    out = jax.block_until_ready(out)

    expected_shape = (2, outchannel, 4, 4)
    assert out.shape == expected_shape, (out.shape, expected_shape)
    assert bool(jnp.all(jnp.isfinite(out)))
    assert bool(jnp.all(out >= 0.0))          # ReLU precedes the final pool

    # Numerical check against a pure-JAX reference with matching precision.
    ref = reference_forward(x, params, num_levels=num_levels)
    err = float(jnp.max(jnp.abs(out - ref)))
    scale = float(jnp.max(jnp.abs(ref)))
    assert err <= 1e-2 * scale + 1e-2, ("mismatch vs reference", err, scale)

    print("KERNEL_OK")
</pallas_src>

<mosaic_0001>
module attributes {stable_mosaic.version = 11 : i64} {
  func.func @_fused_convlayer3_kernel(%arg0: i32, %arg1: memref<1x18x24x3xbf16, #tpu.memory_space<vmem>>, %arg2: memref<3x9x64xbf16, #tpu.memory_space<vmem>>, %arg3: memref<1x64xf32, #tpu.memory_space<vmem>>, %arg4: memref<3x192x256xbf16, #tpu.memory_space<vmem>>, %arg5: memref<1x256xf32, #tpu.memory_space<vmem>>, %arg6: memref<9x768x128xbf16, #tpu.memory_space<vmem>>, %arg7: memref<1x128xf32, #tpu.memory_space<vmem>>, %arg8: memref<1x4x4x128xf32, #tpu.memory_space<vmem>>, %arg9: memref<10x16x64xbf16, #tpu.memory_space<vmem>>, %arg10: memref<14x16x256xbf16, #tpu.memory_space<vmem>>) attributes {dimension_semantics = [#tpu.dimension_semantics<parallel>], iteration_bounds = array<i64: 2>, scalar_prefetch = 0 : i64, scratch_operands = 2 : i64, tpu.core_type = #tpu.core_type<tc>, window_params = [{transform_indices = @transform_0, window_bounds = array<i64: 1, 18, 24, 3>}, {pipeline_mode = #tpu.pipeline_mode<synchronous>, transform_indices = @transform_1, window_bounds = array<i64: 3, 9, 64>}, {pipeline_mode = #tpu.pipeline_mode<synchronous>, transform_indices = @transform_2, window_bounds = array<i64: 1, 64>}, {pipeline_mode = #tpu.pipeline_mode<synchronous>, transform_indices = @transform_3, window_bounds = array<i64: 3, 192, 256>}, {pipeline_mode = #tpu.pipeline_mode<synchronous>, transform_indices = @transform_4, window_bounds = array<i64: 1, 256>}, {pipeline_mode = #tpu.pipeline_mode<synchronous>, transform_indices = @transform_5, window_bounds = array<i64: 9, 768, 128>}, {pipeline_mode = #tpu.pipeline_mode<synchronous>, transform_indices = @transform_6, window_bounds = array<i64: 1, 128>}, {transform_indices = @transform_7, window_bounds = array<i64: 1, 4, 4, 128>}]} {
    %cst = arith.constant 0.000000e+00 : f32
    %0 = vector.broadcast %cst : f32 to vector<256x64xf32>
    %c0 = arith.constant 0 : index
    %c0_0 = arith.constant 0 : index
    %c0_1 = arith.constant 0 : index
    %c0_2 = arith.constant 0 : index
    %1 = vector.load %arg1[%c0, %c0_0, %c0_1, %c0_2] : memref<1x18x24x3xbf16, #tpu.memory_space<vmem>>, vector<1x16x24x3xbf16>
    %2 = vector.shape_cast %1 : vector<1x16x24x3xbf16> to vector<16x24x3xbf16>
    %c0_3 = arith.constant 0 : index
    %c0_4 = arith.constant 0 : index
    %c0_5 = arith.constant 0 : index
    %3 = vector.load %arg2[%c0_3, %c0_4, %c0_5] : memref<3x9x64xbf16, #tpu.memory_space<vmem>>, vector<1x9x64xbf16>
    %4 = vector.shape_cast %3 : vector<1x9x64xbf16> to vector<9x64xbf16>
    %5 = vector.extract_strided_slice %2 {offsets = [0, 0, 0], sizes = [16, 16, 3], strides = [1, 1, 1]} : vector<16x24x3xbf16> to vector<16x16x3xbf16>
    %6 = vector.extract_strided_slice %2 {offsets = [0, 1, 0], sizes = [16, 16, 3], strides = [1, 1, 1]} : vector<16x24x3xbf16> to vector<16x16x3xbf16>
    %7 = vector.extract_strided_slice %2 {offsets = [0, 2, 0], sizes = [16, 16, 3], strides = [1, 1, 1]} : vector<16x24x3xbf16> to vector<16x16x3xbf16>
    %8 = tpu.concatenate %5, %6, %7 in 2 : vector<16x16x3xbf16>, vector<16x16x3xbf16>, vector<16x16x3xbf16> -> vector<16x16x9xbf16>
    %9 = vector.shape_cast %8 : vector<16x16x9xbf16> to vector<256x9xbf16>
    %cst_6 = arith.constant dense<0.000000e+00> : vector<256x64xf32>
    %10 = tpu.matmul %9, %4, %cst_6 {dimension_numbers = #tpu.dot_dimension_numbers<[1], [0], [0], [1], [0, 0, 1, 1], [], []>} : vector<256x9xbf16>, vector<9x64xbf16>, vector<256x64xf32> -> vector<256x64xf32>
    %11 = arith.addf %0, %10 : vector<256x64xf32>
    %c0_7 = arith.constant 0 : index
    %c1 = arith.constant 1 : index
    %c0_8 = arith.constant 0 : index
    %c0_9 = arith.constant 0 : index
    %12 = vector.load %arg1[%c0_7, %c1, %c0_8, %c0_9] : memref<1x18x24x3xbf16, #tpu.memory_space<vmem>>, vector<1x16x24x3xbf16>
    %13 = vector.shape_cast %12 : vector<1x16x24x3xbf16> to vector<16x24x3xbf16>
    %c1_10 = arith.constant 1 : index
    %c0_11 = arith.constant 0 : index
    %c0_12 = arith.constant 0 : index
    %14 = vector.load %arg2[%c1_10, %c0_11, %c0_12] : memref<3x9x64xbf16, #tpu.memory_space<vmem>>, vector<1x9x64xbf16>
    %15 = vector.shape_cast %14 : vector<1x9x64xbf16> to vector<9x64xbf16>
    %16 = vector.extract_strided_slice %13 {offsets = [0, 0, 0], sizes = [16, 16, 3], strides = [1, 1, 1]} : vector<16x24x3xbf16> to vector<16x16x3xbf16>
    %17 = vector.extract_strided_slice %13 {offsets = [0, 1, 0], sizes = [16, 16, 3], strides = [1, 1, 1]} : vector<16x24x3xbf16> to vector<16x16x3xbf16>
    %18 = vector.extract_strided_slice %13 {offsets = [0, 2, 0], sizes = [16, 16, 3], strides = [1, 1, 1]} : vector<16x24x3xbf16> to vector<16x16x3xbf16>
    %19 = tpu.concatenate %16, %17, %18 in 2 : vector<16x16x3xbf16>, vector<16x16x3xbf16>, vector<16x16x3xbf16> -> vector<16x16x9xbf16>
    %20 = vector.shape_cast %19 : vector<16x16x9xbf16> to vector<256x9xbf16>
    %cst_13 = arith.constant dense<0.000000e+00> : vector<256x64xf32>
    %21 = tpu.matmul %20, %15, %cst_13 {dimension_numbers = #tpu.dot_dimension_numbers<[1], [0], [0], [1], [0, 0, 1, 1], [], []>} : vector<256x9xbf16>, vector<9x64xbf16>, vector<256x64xf32> -> vector<256x64xf32>
    %22 = arith.addf %11, %21 : vector<256x64xf32>
    %c0_14 = arith.constant 0 : index
    %c2 = arith.constant 2 : index
    %c0_15 = arith.constant 0 : index
    %c0_16 = arith.constant 0 : index
    %23 = vector.load %arg1[%c0_14, %c2, %c0_15, %c0_16] : memref<1x18x24x3xbf16, #tpu.memory_space<vmem>>, vector<1x16x24x3xbf16>
    %24 = vector.shape_cast %23 : vector<1x16x24x3xbf16> to vector<16x24x3xbf16>
    %c2_17 = arith.constant 2 : index
    %c0_18 = arith.constant 0 : index
    %c0_19 = arith.constant 0 : index
    %25 = vector.load %arg2[%c2_17, %c0_18, %c0_19] : memref<3x9x64xbf16, #tpu.memory_space<vmem>>, vector<1x9x64xbf16>
    %26 = vector.shape_cast %25 : vector<1x9x64xbf16> to vector<9x64xbf16>
    %27 = vector.extract_strided_slice %24 {offsets = [0, 0, 0], sizes = [16, 16, 3], strides = [1, 1, 1]} : vector<16x24x3xbf16> to vector<16x16x3xbf16>
    %28 = vector.extract_strided_slice %24 {offsets = [0, 1, 0], sizes = [16, 16, 3], strides = [1, 1, 1]} : vector<16x24x3xbf16> to vector<16x16x3xbf16>
    %29 = vector.extract_strided_slice %24 {offsets = [0, 2, 0], sizes = [16, 16, 3], strides = [1, 1, 1]} : vector<16x24x3xbf16> to vector<16x16x3xbf16>
    %30 = tpu.concatenate %27, %28, %29 in 2 : vector<16x16x3xbf16>, vector<16x16x3xbf16>, vector<16x16x3xbf16> -> vector<16x16x9xbf16>
    %31 = vector.shape_cast %30 : vector<16x16x9xbf16> to vector<256x9xbf16>
    %cst_20 = arith.constant dense<0.000000e+00> : vector<256x64xf32>
    %32 = tpu.matmul %31, %26, %cst_20 {dimension_numbers = #tpu.dot_dimension_numbers<[1], [0], [0], [1], [0, 0, 1, 1], [], []>} : vector<256x9xbf16>, vector<9x64xbf16>, vector<256x64xf32> -> vector<256x64xf32>
    %33 = arith.addf %22, %32 : vector<256x64xf32>
    %c0_21 = arith.constant 0 : index
    %c0_22 = arith.constant 0 : index
    %34 = vector.load %arg3[%c0_21, %c0_22] : memref<1x64xf32, #tpu.memory_space<vmem>>, vector<1x64xf32>
    %35 = vector.broadcast %34 : vector<1x64xf32> to vector<256x64xf32>
    %36 = arith.addf %33, %35 : vector<256x64xf32>
    %cst_23 = arith.constant 0.000000e+00 : f32
    %37 = vector.broadcast %cst_23 : f32 to vector<256x64xf32>
    %38 = arith.maximumf %36, %37 : vector<256x64xf32>
    %39 = vector.shape_cast %38 : vector<256x64xf32> to vector<16x16x64xf32>
    %cst_24 = arith.constant 0.000000e+00 : bf16
    %40 = vector.broadcast %cst_24 : bf16 to vector<10x16x64xbf16>
    %c0_25 = arith.constant 0 : index
    %c0_26 = arith.constant 0 : index
    %c0_27 = arith.constant 0 : index
    %41 = vector.load %arg9[%c0_25, %c0_26, %c0_27] : memref<10x16x64xbf16, #tpu.memory_space<vmem>>, vector<10x16x64xbf16>
    tpu.vector_store %arg9[%c0_25, %c0_26, %c0_27], %40 {strides = array<i32>} : memref<10x16x64xbf16, #tpu.memory_space<vmem>>, vector<10x16x64xbf16>,
    %42 = vector.shape_cast %39 : vector<16x16x64xf32> to vector<8x2x16x64xf32>
    %cst_28 = arith.constant dense<0xFF800000> : vector<8x16x64xf32>
    %43 = vector.multi_reduction <maximumf>, %42, %cst_28 [1] : vector<8x2x16x64xf32> to vector<8x16x64xf32>
    %44 = vector.extract_strided_slice %43 {offsets = [0, 0, 0], sizes = [8, 1, 64], strides = [1, 1, 1]} : vector<8x16x64xf32> to vector<8x1x64xf32>
    %45 = vector.shape_cast %44 : vector<8x1x64xf32> to vector<8x64xf32>
    %46 = vector.extract_strided_slice %43 {offsets = [0, 1, 0], sizes = [8, 1, 64], strides = [1, 1, 1]} : vector<8x16x64xf32> to vector<8x1x64xf32>
    %47 = vector.shape_cast %46 : vector<8x1x64xf32> to vector<8x64xf32>
    %48 = arith.maximumf %45, %47 : vector<8x64xf32>
    %49 = arith.truncf %48 : vector<8x64xf32> to vector<8x64xbf16>
    %c1_29 = arith.constant 1 : index
    %c1_30 = arith.constant 1 : index
    %c0_31 = arith.constant 0 : index
    %50 = vector.load %arg9[%c1_29, %c1_30, %c0_31] : memref<10x16x64xbf16, #tpu.memory_space<vmem>>, vector<8x1x64xbf16>
    %51 = vector.shape_cast %50 : vector<8x1x64xbf16> to vector<8x64xbf16>
    %52 = vector.shape_cast %49 : vector<8x64xbf16> to vector<8x1x64xbf16>
    tpu.vector_store %arg9[%c1_29, %c1_30, %c0_31], %52 {strides = array<i32>} : memref<10x16x64xbf16, #tpu.memory_space<vmem>>, vector<8x1x64xbf16>,
    %53 = vector.extract_strided_slice %43 {offsets = [0, 2, 0], sizes = [8, 1, 64], strides = [1, 1, 1]} : vector<8x16x64xf32> to vector<8x1x64xf32>
    %54 = vector.shape_cast %53 : vector<8x1x64xf32> to vector<8x64xf32>
    %55 = vector.extract_strided_slice %43 {offsets = [0, 3, 0], sizes = [8, 1, 64], strides = [1, 1, 1]} : vector<8x16x64xf32> to vector<8x1x64xf32>
    %56 = vector.shape_cast %55 : vector<8x1x64xf32> to vector<8x64xf32>
    %57 = arith.maximumf %54, %56 : vector<8x64xf32>
    %58 = arith.truncf %57 : vector<8x64xf32> to vector<8x64xbf16>
    %c1_32 = arith.constant 1 : index
    %c2_33 = arith.constant 2 : index
    %c0_34 = arith.constant 0 : index
    %59 = vector.load %arg9[%c1_32, %c2_33, %c0_34] : memref<10x16x64xbf16, #tpu.memory_space<vmem>>, vector<8x1x64xbf16>
    %60 = vector.shape_cast %59 : vector<8x1x64xbf16> to vector<8x64xbf16>
    %61 = vector.shape_cast %58 : vector<8x64xbf16> to vector<8x1x64xbf16>
    tpu.vector_store %arg9[%c1_32, %c2_33, %c0_34], %61 {strides = array<i32>} : memref<10x16x64xbf16, #tpu.memory_space<vmem>>, vector<8x1x64xbf16>,
    %62 = vector.extract_strided_slice %43 {offsets = [0, 4, 0], sizes = [8, 1, 64], strides = [1, 1, 1]} : vector<8x16x64xf32> to vector<8x1x64xf32>
    %63 = vector.shape_cast %62 : vector<8x1x64xf32> to vector<8x64xf32>
    %64 = vector.extract_strided_slice %43 {offsets = [0, 5, 0], sizes = [8, 1, 64], strides = [1, 1, 1]} : vector<8x16x64xf32> to vector<8x1x64xf32>
    %65 = vector.shape_cast %64 : vector<8x1x64xf32> to vector<8x64xf32>
    %66 = arith.maximumf %63, %65 : vector<8x64xf32>
    %67 = arith.truncf %66 : vector<8x64xf32> to vector<8x64xbf16>
    %c1_35 = arith.constant 1 : index
    %c3 = arith.constant 3 : index
    %c0_36 = arith.constant 0 : index
    %68 = vector.load %arg9[%c1_35, %c3, %c0_36] : memref<10x16x64xbf16, #tpu.memory_space<vmem>>, vector<8x1x64xbf16>
    %69 = vector.shape_cast %68 : vector<8x1x64xbf16> to vector<8x64xbf16>
    %70 = vector.shape_cast %67 : vector<8x64xbf16> to vector<8x1x64xbf16>
    tpu.vector_store %arg9[%c1_35, %c3, %c0_36], %70 {strides = array<i32>} : memref<10x16x64xbf16, #tpu.memory_space<vmem>>, vector<8x1x64xbf16>,
    %71 = vector.extract_strided_slice %43 {offsets = [0, 6, 0], sizes = [8, 1, 64], strides = [1, 1, 1]} : vector<8x16x64xf32> to vector<8x1x64xf32>
    %72 = vector.shape_cast %71 : vector<8x1x64xf32> to vector<8x64xf32>
    %73 = vector.extract_strided_slice %43 {offsets = [0, 7, 0], sizes = [8, 1, 64], strides = [1, 1, 1]} : vector<8x16x64xf32> to vector<8x1x64xf32>
    %74 = vector.shape_cast %73 : vector<8x1x64xf32> to vector<8x64xf32>
    %75 = arith.maximumf %72, %74 : vector<8x64xf32>
    %76 = arith.truncf %75 : vector<8x64xf32> to vector<8x64xbf16>
    %c1_37 = arith.constant 1 : index
    %c4 = arith.constant 4 : index
    %c0_38 = arith.constant 0 : index
    %77 = vector.load %arg9[%c1_37, %c4, %c0_38] : memref<10x16x64xbf16, #tpu.memory_space<vmem>>, vector<8x1x64xbf16>
    %78 = vector.shape_cast %77 : vector<8x1x64xbf16> to vector<8x64xbf16>
    %79 = vector.shape_cast %76 : vector<8x64xbf16> to vector<8x1x64xbf16>
    tpu.vector_store %arg9[%c1_37, %c4, %c0_38], %79 {strides = array<i32>} : memref<10x16x64xbf16, #tpu.memory_space<vmem>>, vector<8x1x64xbf16>,
    %80 = vector.extract_strided_slice %43 {offsets = [0, 8, 0], sizes = [8, 1, 64], strides = [1, 1, 1]} : vector<8x16x64xf32> to vector<8x1x64xf32>
    %81 = vector.shape_cast %80 : vector<8x1x64xf32> to vector<8x64xf32>
    %82 = vector.extract_strided_slice %43 {offsets = [0, 9, 0], sizes = [8, 1, 64], strides = [1, 1, 1]} : vector<8x16x64xf32> to vector<8x1x64xf32>
    %83 = vector.shape_cast %82 : vector<8x1x64xf32> to vector<8x64xf32>
    %84 = arith.maximumf %81, %83 : vector<8x64xf32>
    %85 = arith.truncf %84 : vector<8x64xf32> to vector<8x64xbf16>
    %c1_39 = arith.constant 1 : index
    %c5 = arith.constant 5 : index
    %c0_40 = arith.constant 0 : index
    %86 = vector.load %arg9[%c1_39, %c5, %c0_40] : memref<10x16x64xbf16, #tpu.memory_space<vmem>>, vector<8x1x64xbf16>
    %87 = vector.shape_cast %86 : vector<8x1x64xbf16> to vector<8x64xbf16>
    %88 = vector.shape_cast %85 : vector<8x64xbf16> to vector<8x1x64xbf16>
    tpu.vector_store %arg9[%c1_39, %c5, %c0_40], %88 {strides = array<i32>} : memref<10x16x64xbf16, #tpu.memory_space<vmem>>, vector<8x1x64xbf16>,
    %89 = vector.extract_strided_slice %43 {offsets = [0, 10, 0], sizes = [8, 1, 64], strides = [1, 1, 1]} : vector<8x16x64xf32> to vector<8x1x64xf32>
    %90 = vector.shape_cast %89 : vector<8x1x64xf32> to vector<8x64xf32>
    %91 = vector.extract_strided_slice %43 {offsets = [0, 11, 0], sizes = [8, 1, 64], strides = [1, 1, 1]} : vector<8x16x64xf32> to vector<8x1x64xf32>
    %92 = vector.shape_cast %91 : vector<8x1x64xf32> to vector<8x64xf32>
    %93 = arith.maximumf %90, %92 : vector<8x64xf32>
    %94 = arith.truncf %93 : vector<8x64xf32> to vector<8x64xbf16>
    %c1_41 = arith.constant 1 : index
    %c6 = arith.constant 6 : index
    %c0_42 = arith.constant 0 : index
    %95 = vector.load %arg9[%c1_41, %c6, %c0_42] : memref<10x16x64xbf16, #tpu.memory_space<vmem>>, vector<8x1x64xbf16>
    %96 = vector.shape_cast %95 : vector<8x1x64xbf16> to vector<8x64xbf16>
    %97 = vector.shape_cast %94 : vector<8x64xbf16> to vector<8x1x64xbf16>
    tpu.vector_store %arg9[%c1_41, %c6, %c0_42], %97 {strides = array<i32>} : memref<10x16x64xbf16, #tpu.memory_space<vmem>>, vector<8x1x64xbf16>,
    %98 = vector.extract_strided_slice %43 {offsets = [0, 12, 0], sizes = [8, 1, 64], strides = [1, 1, 1]} : vector<8x16x64xf32> to vector<8x1x64xf32>
    %99 = vector.shape_cast %98 : vector<8x1x64xf32> to vector<8x64xf32>
    %100 = vector.extract_strided_slice %43 {offsets = [0, 13, 0], sizes = [8, 1, 64], strides = [1, 1, 1]} : vector<8x16x64xf32> to vector<8x1x64xf32>
    %101 = vector.shape_cast %100 : vector<8x1x64xf32> to vector<8x64xf32>
    %102 = arith.maximumf %99, %101 : vector<8x64xf32>
    %103 = arith.truncf %102 : vector<8x64xf32> to vector<8x64xbf16>
    %c1_43 = arith.constant 1 : index
    %c7 = arith.constant 7 : index
    %c0_44 = arith.constant 0 : index
    %104 = vector.load %arg9[%c1_43, %c7, %c0_44] : memref<10x16x64xbf16, #tpu.memory_space<vmem>>, vector<8x1x64xbf16>
    %105 = vector.shape_cast %104 : vector<8x1x64xbf16> to vector<8x64xbf16>
    %106 = vector.shape_cast %103 : vector<8x64xbf16> to vector<8x1x64xbf16>
    tpu.vector_store %arg9[%c1_43, %c7, %c0_44], %106 {strides = array<i32>} : memref<10x16x64xbf16, #tpu.memory_space<vmem>>, vector<8x1x64xbf16>,
    %107 = vector.extract_strided_slice %43 {offsets = [0, 14, 0], sizes = [8, 1, 64], strides = [1, 1, 1]} : vector<8x16x64xf32> to vector<8x1x64xf32>
    %108 = vector.shape_cast %107 : vector<8x1x64xf32> to vector<8x64xf32>
    %109 = vector.extract_strided_slice %43 {offsets = [0, 15, 0], sizes = [8, 1, 64], strides = [1, 1, 1]} : vector<8x16x64xf32> to vector<8x1x64xf32>
    %110 = vector.shape_cast %109 : vector<8x1x64xf32> to vector<8x64xf32>
    %111 = arith.maximumf %108, %110 : vector<8x64xf32>
    %112 = arith.truncf %111 : vector<8x64xf32> to vector<8x64xbf16>
    %c1_45 = arith.constant 1 : index
    %c8 = arith.constant 8 : index
    %c0_46 = arith.constant 0 : index
    %113 = vector.load %arg9[%c1_45, %c8, %c0_46] : memref<10x16x64xbf16, #tpu.memory_space<vmem>>, vector<8x1x64xbf16>
    %114 = vector.shape_cast %113 : vector<8x1x64xbf16> to vector<8x64xbf16>
    %115 = vector.shape_cast %112 : vector<8x64xbf16> to vector<8x1x64xbf16>
    tpu.vector_store %arg9[%c1_45, %c8, %c0_46], %115 {strides = array<i32>} : memref<10x16x64xbf16, #tpu.memory_space<vmem>>, vector<8x1x64xbf16>,
    %cst_47 = arith.constant 0.000000e+00 : f32
    %116 = vector.broadcast %cst_47 : f32 to vector<64x256xf32>
    %c0_48 = arith.constant 0 : index
    %c0_49 = arith.constant 0 : index
    %c0_50 = arith.constant 0 : index
    %117 = vector.load %arg9[%c0_48, %c0_49, %c0_50] : memref<10x16x64xbf16, #tpu.memory_space<vmem>>, vector<8x16x64xbf16>
    %c0_51 = arith.constant 0 : index
    %c0_52 = arith.constant 0 : index
    %c0_53 = arith.constant 0 : index
    %118 = vector.load %arg4[%c0_51, %c0_52, %c0_53] : memref<3x192x256xbf16, #tpu.memory_space<vmem>>, vector<1x192x256xbf16>
    %119 = vector.shape_cast %118 : vector<1x192x256xbf16> to vector<192x256xbf16>
    %120 = vector.extract_strided_slice %117 {offsets = [0, 0, 0], sizes = [8, 8, 64], strides = [1, 1, 1]} : vector<8x16x64xbf16> to vector<8x8x64xbf16>
    %121 = vector.extract_strided_slice %117 {offsets = [0, 1, 0], sizes = [8, 8, 64], strides = [1, 1, 1]} : vector<8x16x64xbf16> to vector<8x8x64xbf16>
    %122 = vector.extract_strided_slice %117 {offsets = [0, 2, 0], sizes = [8, 8, 64], strides = [1, 1, 1]} : vector<8x16x64xbf16> to vector<8x8x64xbf16>
    %123 = tpu.concatenate %120, %121, %122 in 2 : vector<8x8x64xbf16>, vector<8x8x64xbf16>, vector<8x8x64xbf16> -> vector<8x8x192xbf16>
    %124 = vector.shape_cast %123 : vector<8x8x192xbf16> to vector<64x192xbf16>
    %cst_54 = arith.constant dense<0.000000e+00> : vector<64x256xf32>
    %125 = tpu.matmul %124, %119, %cst_54 {dimension_numbers = #tpu.dot_dimension_numbers<[1], [0], [0], [1], [0, 0, 1, 1], [], []>} : vector<64x192xbf16>, vector<192x256xbf16>, vector<64x256xf32> -> vector<64x256xf32>
    %126 = arith.addf %116, %125 : vector<64x256xf32>
    %c1_55 = arith.constant 1 : index
    %c0_56 = arith.constant 0 : index
    %c0_57 = arith.constant 0 : index
    %127 = vector.load %arg9[%c1_55, %c0_56, %c0_57] : memref<10x16x64xbf16, #tpu.memory_space<vmem>>, vector<8x16x64xbf16>
    %c1_58 = arith.constant 1 : index
    %c0_59 = arith.constant 0 : index
    %c0_60 = arith.constant 0 : index
    %128 = vector.load %arg4[%c1_58, %c0_59, %c0_60] : memref<3x192x256xbf16, #tpu.memory_space<vmem>>, vector<1x192x256xbf16>
    %129 = vector.shape_cast %128 : vector<1x192x256xbf16> to vector<192x256xbf16>
    %130 = vector.extract_strided_slice %127 {offsets = [0, 0, 0], sizes = [8, 8, 64], strides = [1, 1, 1]} : vector<8x16x64xbf16> to vector<8x8x64xbf16>
    %131 = vector.extract_strided_slice %127 {offsets = [0, 1, 0], sizes = [8, 8, 64], strides = [1, 1, 1]} : vector<8x16x64xbf16> to vector<8x8x64xbf16>
    %132 = vector.extract_strided_slice %127 {offsets = [0, 2, 0], sizes = [8, 8, 64], strides = [1, 1, 1]} : vector<8x16x64xbf16> to vector<8x8x64xbf16>
    %133 = tpu.concatenate %130, %131, %132 in 2 : vector<8x8x64xbf16>, vector<8x8x64xbf16>, vector<8x8x64xbf16> -> vector<8x8x192xbf16>
    %134 = vector.shape_cast %133 : vector<8x8x192xbf16> to vector<64x192xbf16>
    %cst_61 = arith.constant dense<0.000000e+00> : vector<64x256xf32>
    %135 = tpu.matmul %134, %129, %cst_61 {dimension_numbers = #tpu.dot_dimension_numbers<[1], [0], [0], [1], [0, 0, 1, 1], [], []>} : vector<64x192xbf16>, vector<192x256xbf16>, vector<64x256xf32> -> vector<64x256xf32>
    %136 = arith.addf %126, %135 : vector<64x256xf32>
    %c2_62 = arith.constant 2 : index
    %c0_63 = arith.constant 0 : index
    %c0_64 = arith.constant 0 : index
    %137 = vector.load %arg9[%c2_62, %c0_63, %c0_64] : memref<10x16x64xbf16, #tpu.memory_space<vmem>>, vector<8x16x64xbf16>
    %c2_65 = arith.constant 2 : index
    %c0_66 = arith.constant 0 : index
    %c0_67 = arith.constant 0 : index
    %138 = vector.load %arg4[%c2_65, %c0_66, %c0_67] : memref<3x192x256xbf16, #tpu.memory_space<vmem>>, vector<1x192x256xbf16>
    %139 = vector.shape_cast %138 : vector<1x192x256xbf16> to vector<192x256xbf16>
    %140 = vector.extract_strided_slice %137 {offsets = [0, 0, 0], sizes = [8, 8, 64], strides = [1, 1, 1]} : vector<8x16x64xbf16> to vector<8x8x64xbf16>
    %141 = vector.extract_strided_slice %137 {offsets = [0, 1, 0], sizes = [8, 8, 64], strides = [1, 1, 1]} : vector<8x16x64xbf16> to vector<8x8x64xbf16>
    %142 = vector.extract_strided_slice %137 {offsets = [0, 2, 0], sizes = [8, 8, 64], strides = [1, 1, 1]} : vector<8x16x64xbf16> to vector<8x8x64xbf16>
    %143 = tpu.concatenate %140, %141, %142 in 2 : vector<8x8x64xbf16>, vector<8x8x64xbf16>, vector<8x8x64xbf16> -> vector<8x8x192xbf16>
    %144 = vector.shape_cast %143 : vector<8x8x192xbf16> to vector<64x192xbf16>
    %cst_68 = arith.constant dense<0.000000e+00> : vector<64x256xf32>
    %145 = tpu.matmul %144, %139, %cst_68 {dimension_numbers = #tpu.dot_dimension_numbers<[1], [0], [0], [1], [0, 0, 1, 1], [], []>} : vector<64x192xbf16>, vector<192x256xbf16>, vector<64x256xf32> -> vector<64x256xf32>
    %146 = arith.addf %136, %145 : vector<64x256xf32>
    %c0_69 = arith.constant 0 : index
    %c0_70 = arith.constant 0 : index
    %147 = vector.load %arg5[%c0_69, %c0_70] : memref<1x256xf32, #tpu.memory_space<vmem>>, vector<1x256xf32>
    %148 = vector.broadcast %147 : vector<1x256xf32> to vector<64x256xf32>
    %149 = arith.addf %146, %148 : vector<64x256xf32>
    %cst_71 = arith.constant 0.000000e+00 : f32
    %150 = vector.broadcast %cst_71 : f32 to vector<64x256xf32>
    %151 = arith.maximumf %149, %150 : vector<64x256xf32>
    %152 = vector.shape_cast %151 : vector<64x256xf32> to vector<8x8x256xf32>
    %cst_72 = arith.constant 0.000000e+00 : bf16
    %153 = vector.broadcast %cst_72 : bf16 to vector<14x16x256xbf16>
    %c0_73 = arith.constant 0 : index
    %c0_74 = arith.constant 0 : index
    %c0_75 = arith.constant 0 : index
    %154 = vector.load %arg10[%c0_73, %c0_74, %c0_75] : memref<14x16x256xbf16, #tpu.memory_space<vmem>>, vector<14x16x256xbf16>
    tpu.vector_store %arg10[%c0_73, %c0_74, %c0_75], %153 {strides = array<i32>} : memref<14x16x256xbf16, #tpu.memory_space<vmem>>, vector<14x16x256xbf16>,
    %155 = arith.truncf %152 : vector<8x8x256xf32> to vector<8x8x256xbf16>
    %c3_76 = arith.constant 3 : index
    %c3_77 = arith.constant 3 : index
    %c0_78 = arith.constant 0 : index
    %156 = vector.load %arg10[%c3_76, %c3_77, %c0_78] : memref<14x16x256xbf16, #tpu.memory_space<vmem>>, vector<8x8x256xbf16>
    tpu.vector_store %arg10[%c3_76, %c3_77, %c0_78], %155 {strides = array<i32>} : memref<14x16x256xbf16, #tpu.memory_space<vmem>>, vector<8x8x256xbf16>,
    %cst_79 = arith.constant 0.000000e+00 : f32
    %157 = vector.broadcast %cst_79 : f32 to vector<64x128xf32>
    %c2_80 = arith.constant 2 : index
    %c0_81 = arith.constant 0 : index
    %c0_82 = arith.constant 0 : index
    %158 = vector.load %arg10[%c2_80, %c0_81, %c0_82] : memref<14x16x256xbf16, #tpu.memory_space<vmem>>, vector<8x16x256xbf16>
    %c0_83 = arith.constant 0 : index
    %c0_84 = arith.constant 0 : index
    %c0_85 = arith.constant 0 : index
    %159 = vector.load %arg6[%c0_83, %c0_84, %c0_85] : memref<9x768x128xbf16, #tpu.memory_space<vmem>>, vector<1x768x128xbf16>
    %160 = vector.shape_cast %159 : vector<1x768x128xbf16> to vector<768x128xbf16>
    %161 = vector.extract_strided_slice %158 {offsets = [0, 2, 0], sizes = [8, 8, 256], strides = [1, 1, 1]} : vector<8x16x256xbf16> to vector<8x8x256xbf16>
    %162 = vector.extract_strided_slice %158 {offsets = [0, 3, 0], sizes = [8, 8, 256], strides = [1, 1, 1]} : vector<8x16x256xbf16> to vector<8x8x256xbf16>
    %163 = vector.extract_strided_slice %158 {offsets = [0, 4, 0], sizes = [8, 8, 256], strides = [1, 1, 1]} : vector<8x16x256xbf16> to vector<8x8x256xbf16>
    %164 = tpu.concatenate %161, %162, %163 in 2 : vector<8x8x256xbf16>, vector<8x8x256xbf16>, vector<8x8x256xbf16> -> vector<8x8x768xbf16>
    %165 = vector.shape_cast %164 : vector<8x8x768xbf16> to vector<64x768xbf16>
    %cst_86 = arith.constant dense<0.000000e+00> : vector<64x128xf32>
    %166 = tpu.matmul %165, %160, %cst_86 {dimension_numbers = #tpu.dot_dimension_numbers<[1], [0], [0], [1], [0, 0, 1, 1], [], []>} : vector<64x768xbf16>, vector<768x128xbf16>, vector<64x128xf32> -> vector<64x128xf32>
    %167 = arith.addf %157, %166 : vector<64x128xf32>
    %c3_87 = arith.constant 3 : index
    %c0_88 = arith.constant 0 : index
    %c0_89 = arith.constant 0 : index
    %168 = vector.load %arg10[%c3_87, %c0_88, %c0_89] : memref<14x16x256xbf16, #tpu.memory_space<vmem>>, vector<8x16x256xbf16>
    %c1_90 = arith.constant 1 : index
    %c0_91 = arith.constant 0 : index
    %c0_92 = arith.constant 0 : index
    %169 = vector.load %arg6[%c1_90, %c0_91, %c0_92] : memref<9x768x128xbf16, #tpu.memory_space<vmem>>, vector<1x768x128xbf16>
    %170 = vector.shape_cast %169 : vector<1x768x128xbf16> to vector<768x128xbf16>
    %171 = vector.extract_strided_slice %168 {offsets = [0, 2, 0], sizes = [8, 8, 256], strides = [1, 1, 1]} : vector<8x16x256xbf16> to vector<8x8x256xbf16>
    %172 = vector.extract_strided_slice %168 {offsets = [0, 3, 0], sizes = [8, 8, 256], strides = [1, 1, 1]} : vector<8x16x256xbf16> to vector<8x8x256xbf16>
    %173 = vector.extract_strided_slice %168 {offsets = [0, 4, 0], sizes = [8, 8, 256], strides = [1, 1, 1]} : vector<8x16x256xbf16> to vector<8x8x256xbf16>
    %174 = tpu.concatenate %171, %172, %173 in 2 : vector<8x8x256xbf16>, vector<8x8x256xbf16>, vector<8x8x256xbf16> -> vector<8x8x768xbf16>
    %175 = vector.shape_cast %174 : vector<8x8x768xbf16> to vector<64x768xbf16>
    %cst_93 = arith.constant dense<0.000000e+00> : vector<64x128xf32>
    %176 = tpu.matmul %175, %170, %cst_93 {dimension_numbers = #tpu.dot_dimension_numbers<[1], [0], [0], [1], [0, 0, 1, 1], [], []>} : vector<64x768xbf16>, vector<768x128xbf16>, vector<64x128xf32> -> vector<64x128xf32>
    %177 = arith.addf %167, %176 : vector<64x128xf32>
    %c4_94 = arith.constant 4 : index
    %c0_95 = arith.constant 0 : index
    %c0_96 = arith.constant 0 : index
    %178 = vector.load %arg10[%c4_94, %c0_95, %c0_96] : memref<14x16x256xbf16, #tpu.memory_space<vmem>>, vector<8x16x256xbf16>
    %c2_97 = arith.constant 2 : index
    %c0_98 = arith.constant 0 : index
    %c0_99 = arith.constant 0 : index
    %179 = vector.load %arg6[%c2_97, %c0_98, %c0_99] : memref<9x768x128xbf16, #tpu.memory_space<vmem>>, vector<1x768x128xbf16>
    %180 = vector.shape_cast %179 : vector<1x768x128xbf16> to vector<768x128xbf16>
    %181 = vector.extract_strided_slice %178 {offsets = [0, 2, 0], sizes = [8, 8, 256], strides = [1, 1, 1]} : vector<8x16x256xbf16> to vector<8x8x256xbf16>
    %182 = vector.extract_strided_slice %178 {offsets = [0, 3, 0], sizes = [8, 8, 256], strides = [1, 1, 1]} : vector<8x16x256xbf16> to vector<8x8x256xbf16>
    %183 = vector.extract_strided_slice %178 {offsets = [0, 4, 0], sizes = [8, 8, 256], strides = [1, 1, 1]} : vector<8x16x256xbf16> to vector<8x8x256xbf16>
    %184 = tpu.concatenate %181, %182, %183 in 2 : vector<8x8x256xbf16>, vector<8x8x256xbf16>, vector<8x8x256xbf16> -> vector<8x8x768xbf16>
    %185 = vector.shape_cast %184 : vector<8x8x768xbf16> to vector<64x768xbf16>
    %cst_100 = arith.constant dense<0.000000e+00> : vector<64x128xf32>
    %186 = tpu.matmul %185, %180, %cst_100 {dimension_numbers = #tpu.dot_dimension_numbers<[1], [0], [0], [1], [0, 0, 1, 1], [], []>} : vector<64x768xbf16>, vector<768x128xbf16>, vector<64x128xf32> -> vector<64x128xf32>
    %187 = arith.addf %177, %186 : vector<64x128xf32>
    %c1_101 = arith.constant 1 : index
    %c0_102 = arith.constant 0 : index
    %c0_103 = arith.constant 0 : index
    %188 = vector.load %arg10[%c1_101, %c0_102, %c0_103] : memref<14x16x256xbf16, #tpu.memory_space<vmem>>, vector<8x16x256xbf16>
    %c3_104 = arith.constant 3 : index
    %c0_105 = arith.constant 0 : index
    %c0_106 = arith.constant 0 : index
    %189 = vector.load %arg6[%c3_104, %c0_105, %c0_106] : memref<9x768x128xbf16, #tpu.memory_space<vmem>>, vector<1x768x128xbf16>
    %190 = vector.shape_cast %189 : vector<1x768x128xbf16> to vector<768x128xbf16>
    %191 = vector.extract_strided_slice %188 {offsets = [0, 1, 0], sizes = [8, 8, 256], strides = [1, 1, 1]} : vector<8x16x256xbf16> to vector<8x8x256xbf16>
    %192 = vector.extract_strided_slice %188 {offsets = [0, 3, 0], sizes = [8, 8, 256], strides = [1, 1, 1]} : vector<8x16x256xbf16> to vector<8x8x256xbf16>
    %193 = vector.extract_strided_slice %188 {offsets = [0, 5, 0], sizes = [8, 8, 256], strides = [1, 1, 1]} : vector<8x16x256xbf16> to vector<8x8x256xbf16>
    %194 = tpu.concatenate %191, %192, %193 in 2 : vector<8x8x256xbf16>, vector<8x8x256xbf16>, vector<8x8x256xbf16> -> vector<8x8x768xbf16>
    %195 = vector.shape_cast %194 : vector<8x8x768xbf16> to vector<64x768xbf16>
    %cst_107 = arith.constant dense<0.000000e+00> : vector<64x128xf32>
    %196 = tpu.matmul %195, %190, %cst_107 {dimension_numbers = #tpu.dot_dimension_numbers<[1], [0], [0], [1], [0, 0, 1, 1], [], []>} : vector<64x768xbf16>, vector<768x128xbf16>, vector<64x128xf32> -> vector<64x128xf32>
    %197 = arith.addf %187, %196 : vector<64x128xf32>
    %c3_108 = arith.constant 3 : index
    %c0_109 = arith.constant 0 : index
    %c0_110 = arith.constant 0 : index
    %198 = vector.load %arg10[%c3_108, %c0_109, %c0_110] : memref<14x16x256xbf16, #tpu.memory_space<vmem>>, vector<8x16x256xbf16>
    %c4_111 = arith.constant 4 : index
    %c0_112 = arith.constant 0 : index
    %c0_113 = arith.constant 0 : index
    %199 = vector.load %arg6[%c4_111, %c0_112, %c0_113] : memref<9x768x128xbf16, #tpu.memory_space<vmem>>, vector<1x768x128xbf16>
    %200 = vector.shape_cast %199 : vector<1x768x128xbf16> to vector<768x128xbf16>
    %201 = vector.extract_strided_slice %198 {offsets = [0, 1, 0], sizes = [8, 8, 256], strides = [1, 1, 1]} : vector<8x16x256xbf16> to vector<8x8x256xbf16>
    %202 = vector.extract_strided_slice %198 {offsets = [0, 3, 0], sizes = [8, 8, 256], strides = [1, 1, 1]} : vector<8x16x256xbf16> to vector<8x8x256xbf16>
    %203 = vector.extract_strided_slice %198 {offsets = [0, 5, 0], sizes = [8, 8, 256], strides = [1, 1, 1]} : vector<8x16x256xbf16> to vector<8x8x256xbf16>
    %204 = tpu.concatenate %201, %202, %203 in 2 : vector<8x8x256xbf16>, vector<8x8x256xbf16>, vector<8x8x256xbf16> -> vector<8x8x768xbf16>
    %205 = vector.shape_cast %204 : vector<8x8x768xbf16> to vector<64x768xbf16>
    %cst_114 = arith.constant dense<0.000000e+00> : vector<64x128xf32>
    %206 = tpu.matmul %205, %200, %cst_114 {dimension_numbers = #tpu.dot_dimension_numbers<[1], [0], [0], [1], [0, 0, 1, 1], [], []>} : vector<64x768xbf16>, vector<768x128xbf16>, vector<64x128xf32> -> vector<64x128xf32>
    %207 = arith.addf %197, %206 : vector<64x128xf32>
    %c5_115 = arith.constant 5 : index
    %c0_116 = arith.constant 0 : index
    %c0_117 = arith.constant 0 : index
    %208 = vector.load %arg10[%c5_115, %c0_116, %c0_117] : memref<14x16x256xbf16, #tpu.memory_space<vmem>>, vector<8x16x256xbf16>
    %c5_118 = arith.constant 5 : index
    %c0_119 = arith.constant 0 : index
    %c0_120 = arith.constant 0 : index
    %209 = vector.load %arg6[%c5_118, %c0_119, %c0_120] : memref<9x768x128xbf16, #tpu.memory_space<vmem>>, vector<1x768x128xbf16>
    %210 = vector.shape_cast %209 : vector<1x768x128xbf16> to vector<768x128xbf16>
    %211 = vector.extract_strided_slice %208 {offsets = [0, 1, 0], sizes = [8, 8, 256], strides = [1, 1, 1]} : vector<8x16x256xbf16> to vector<8x8x256xbf16>
    %212 = vector.extract_strided_slice %208 {offsets = [0, 3, 0], sizes = [8, 8, 256], strides = [1, 1, 1]} : vector<8x16x256xbf16> to vector<8x8x256xbf16>
    %213 = vector.extract_strided_slice %208 {offsets = [0, 5, 0], sizes = [8, 8, 256], strides = [1, 1, 1]} : vector<8x16x256xbf16> to vector<8x8x256xbf16>
    %214 = tpu.concatenate %211, %212, %213 in 2 : vector<8x8x256xbf16>, vector<8x8x256xbf16>, vector<8x8x256xbf16> -> vector<8x8x768xbf16>
    %215 = vector.shape_cast %214 : vector<8x8x768xbf16> to vector<64x768xbf16>
    %cst_121 = arith.constant dense<0.000000e+00> : vector<64x128xf32>
    %216 = tpu.matmul %215, %210, %cst_121 {dimension_numbers = #tpu.dot_dimension_numbers<[1], [0], [0], [1], [0, 0, 1, 1], [], []>} : vector<64x768xbf16>, vector<768x128xbf16>, vector<64x128xf32> -> vector<64x128xf32>
    %217 = arith.addf %207, %216 : vector<64x128xf32>
    %c0_122 = arith.constant 0 : index
    %c0_123 = arith.constant 0 : index
    %c0_124 = arith.constant 0 : index
    %218 = vector.load %arg10[%c0_122, %c0_123, %c0_124] : memref<14x16x256xbf16, #tpu.memory_space<vmem>>, vector<8x16x256xbf16>
    %c6_125 = arith.constant 6 : index
    %c0_126 = arith.constant 0 : index
    %c0_127 = arith.constant 0 : index
    %219 = vector.load %arg6[%c6_125, %c0_126, %c0_127] : memref<9x768x128xbf16, #tpu.memory_space<vmem>>, vector<1x768x128xbf16>
    %220 = vector.shape_cast %219 : vector<1x768x128xbf16> to vector<768x128xbf16>
    %221 = vector.extract_strided_slice %218 {offsets = [0, 0, 0], sizes = [8, 8, 256], strides = [1, 1, 1]} : vector<8x16x256xbf16> to vector<8x8x256xbf16>
    %222 = vector.extract_strided_slice %218 {offsets = [0, 3, 0], sizes = [8, 8, 256], strides = [1, 1, 1]} : vector<8x16x256xbf16> to vector<8x8x256xbf16>
    %223 = vector.extract_strided_slice %218 {offsets = [0, 6, 0], sizes = [8, 8, 256], strides = [1, 1, 1]} : vector<8x16x256xbf16> to vector<8x8x256xbf16>
    %224 = tpu.concatenate %221, %222, %223 in 2 : vector<8x8x256xbf16>, vector<8x8x256xbf16>, vector<8x8x256xbf16> -> vector<8x8x768xbf16>
    %225 = vector.shape_cast %224 : vector<8x8x768xbf16> to vector<64x768xbf16>
    %cst_128 = arith.constant dense<0.000000e+00> : vector<64x128xf32>
    %226 = tpu.matmul %225, %220, %cst_128 {dimension_numbers = #tpu.dot_dimension_numbers<[1], [0], [0], [1], [0, 0, 1, 1], [], []>} : vector<64x768xbf16>, vector<768x128xbf16>, vector<64x128xf32> -> vector<64x128xf32>
    %227 = arith.addf %217, %226 : vector<64x128xf32>
    %c3_129 = arith.constant 3 : index
    %c0_130 = arith.constant 0 : index
    %c0_131 = arith.constant 0 : index
    %228 = vector.load %arg10[%c3_129, %c0_130, %c0_131] : memref<14x16x256xbf16, #tpu.memory_space<vmem>>, vector<8x16x256xbf16>
    %c7_132 = arith.constant 7 : index
    %c0_133 = arith.constant 0 : index
    %c0_134 = arith.constant 0 : index
    %229 = vector.load %arg6[%c7_132, %c0_133, %c0_134] : memref<9x768x128xbf16, #tpu.memory_space<vmem>>, vector<1x768x128xbf16>
    %230 = vector.shape_cast %229 : vector<1x768x128xbf16> to vector<768x128xbf16>
    %231 = vector.extract_strided_slice %228 {offsets = [0, 0, 0], sizes = [8, 8, 256], strides = [1, 1, 1]} : vector<8x16x256xbf16> to vector<8x8x256xbf16>
    %232 = vector.extract_strided_slice %228 {offsets = [0, 3, 0], sizes = [8, 8, 256], strides = [1, 1, 1]} : vector<8x16x256xbf16> to vector<8x8x256xbf16>
    %233 = vector.extract_strided_slice %228 {offsets = [0, 6, 0], sizes = [8, 8, 256], strides = [1, 1, 1]} : vector<8x16x256xbf16> to vector<8x8x256xbf16>
    %234 = tpu.concatenate %231, %232, %233 in 2 : vector<8x8x256xbf16>, vector<8x8x256xbf16>, vector<8x8x256xbf16> -> vector<8x8x768xbf16>
    %235 = vector.shape_cast %234 : vector<8x8x768xbf16> to vector<64x768xbf16>
    %cst_135 = arith.constant dense<0.000000e+00> : vector<64x128xf32>
    %236 = tpu.matmul %235, %230, %cst_135 {dimension_numbers = #tpu.dot_dimension_numbers<[1], [0], [0], [1], [0, 0, 1, 1], [], []>} : vector<64x768xbf16>, vector<768x128xbf16>, vector<64x128xf32> -> vector<64x128xf32>
    %237 = arith.addf %227, %236 : vector<64x128xf32>
    %c6_136 = arith.constant 6 : index
    %c0_137 = arith.constant 0 : index
    %c0_138 = arith.constant 0 : index
    %238 = vector.load %arg10[%c6_136, %c0_137, %c0_138] : memref<14x16x256xbf16, #tpu.memory_space<vmem>>, vector<8x16x256xbf16>
    %c8_139 = arith.constant 8 : index
    %c0_140 = arith.constant 0 : index
    %c0_141 = arith.constant 0 : index
    %239 = vector.load %arg6[%c8_139, %c0_140, %c0_141] : memref<9x768x128xbf16, #tpu.memory_space<vmem>>, vector<1x768x128xbf16>
    %240 = vector.shape_cast %239 : vector<1x768x128xbf16> to vector<768x128xbf16>
    %241 = vector.extract_strided_slice %238 {offsets = [0, 0, 0], sizes = [8, 8, 256], strides = [1, 1, 1]} : vector<8x16x256xbf16> to vector<8x8x256xbf16>
    %242 = vector.extract_strided_slice %238 {offsets = [0, 3, 0], sizes = [8, 8, 256], strides = [1, 1, 1]} : vector<8x16x256xbf16> to vector<8x8x256xbf16>
    %243 = vector.extract_strided_slice %238 {offsets = [0, 6, 0], sizes = [8, 8, 256], strides = [1, 1, 1]} : vector<8x16x256xbf16> to vector<8x8x256xbf16>
    %244 = tpu.concatenate %241, %242, %243 in 2 : vector<8x8x256xbf16>, vector<8x8x256xbf16>, vector<8x8x256xbf16> -> vector<8x8x768xbf16>
    %245 = vector.shape_cast %244 : vector<8x8x768xbf16> to vector<64x768xbf16>
    %cst_142 = arith.constant dense<0.000000e+00> : vector<64x128xf32>
    %246 = tpu.matmul %245, %240, %cst_142 {dimension_numbers = #tpu.dot_dimension_numbers<[1], [0], [0], [1], [0, 0, 1, 1], [], []>} : vector<64x768xbf16>, vector<768x128xbf16>, vector<64x128xf32> -> vector<64x128xf32>
    %247 = arith.addf %237, %246 : vector<64x128xf32>
    %c0_143 = arith.constant 0 : index
    %c0_144 = arith.constant 0 : index
    %248 = vector.load %arg7[%c0_143, %c0_144] : memref<1x128xf32, #tpu.memory_space<vmem>>, vector<1x128xf32>
    %249 = vector.broadcast %248 : vector<1x128xf32> to vector<64x128xf32>
    %250 = arith.addf %247, %249 : vector<64x128xf32>
    %cst_145 = arith.constant 0.000000e+00 : f32
    %251 = vector.broadcast %cst_145 : f32 to vector<64x128xf32>
    %252 = arith.maximumf %250, %251 : vector<64x128xf32>
    %253 = vector.shape_cast %252 : vector<64x128xf32> to vector<8x8x128xf32>
    %254 = vector.shape_cast %253 : vector<8x8x128xf32> to vector<4x2x8x128xf32>
    %cst_146 = arith.constant dense<0xFF800000> : vector<4x8x128xf32>
    %255 = vector.multi_reduction <maximumf>, %254, %cst_146 [1] : vector<4x2x8x128xf32> to vector<4x8x128xf32>
    %256 = vector.extract_strided_slice %255 {offsets = [0, 0, 0], sizes = [4, 1, 128], strides = [1, 1, 1]} : vector<4x8x128xf32> to vector<4x1x128xf32>
    %257 = vector.shape_cast %256 : vector<4x1x128xf32> to vector<4x128xf32>
    %258 = vector.extract_strided_slice %255 {offsets = [0, 1, 0], sizes = [4, 1, 128], strides = [1, 1, 1]} : vector<4x8x128xf32> to vector<4x1x128xf32>
    %259 = vector.shape_cast %258 : vector<4x1x128xf32> to vector<4x128xf32>
    %260 = arith.maximumf %257, %259 : vector<4x128xf32>
    %c0_147 = arith.constant 0 : index
    %c0_148 = arith.constant 0 : index
    %c0_149 = arith.constant 0 : index
    %c0_150 = arith.constant 0 : index
    %261 = vector.load %arg8[%c0_147, %c0_148, %c0_149, %c0_150] : memref<1x4x4x128xf32, #tpu.memory_space<vmem>>, vector<1x4x1x128xf32>
    %262 = vector.shape_cast %261 : vector<1x4x1x128xf32> to vector<4x128xf32>
    %263 = vector.shape_cast %260 : vector<4x128xf32> to vector<1x4x1x128xf32>
    tpu.vector_store %arg8[%c0_147, %c0_148, %c0_149, %c0_150], %263 {strides = array<i32>} : memref<1x4x4x128xf32, #tpu.memory_space<vmem>>, vector<1x4x1x128xf32>,
    %264 = vector.extract_strided_slice %255 {offsets = [0, 2, 0], sizes = [4, 1, 128], strides = [1, 1, 1]} : vector<4x8x128xf32> to vector<4x1x128xf32>
    %265 = vector.shape_cast %264 : vector<4x1x128xf32> to vector<4x128xf32>
    %266 = vector.extract_strided_slice %255 {offsets = [0, 3, 0], sizes = [4, 1, 128], strides = [1, 1, 1]} : vector<4x8x128xf32> to vector<4x1x128xf32>
    %267 = vector.shape_cast %266 : vector<4x1x128xf32> to vector<4x128xf32>
    %268 = arith.maximumf %265, %267 : vector<4x128xf32>
    %c0_151 = arith.constant 0 : index
    %c0_152 = arith.constant 0 : index
    %c1_153 = arith.constant 1 : index
    %c0_154 = arith.constant 0 : index
    %269 = vector.load %arg8[%c0_151, %c0_152, %c1_153, %c0_154] : memref<1x4x4x128xf32, #tpu.memory_space<vmem>>, vector<1x4x1x128xf32>
    %270 = vector.shape_cast %269 : vector<1x4x1x128xf32> to vector<4x128xf32>
    %271 = vector.shape_cast %268 : vector<4x128xf32> to vector<1x4x1x128xf32>
    tpu.vector_store %arg8[%c0_151, %c0_152, %c1_153, %c0_154], %271 {strides = array<i32>} : memref<1x4x4x128xf32, #tpu.memory_space<vmem>>, vector<1x4x1x128xf32>,
    %272 = vector.extract_strided_slice %255 {offsets = [0, 4, 0], sizes = [4, 1, 128], strides = [1, 1, 1]} : vector<4x8x128xf32> to vector<4x1x128xf32>
    %273 = vector.shape_cast %272 : vector<4x1x128xf32> to vector<4x128xf32>
    %274 = vector.extract_strided_slice %255 {offsets = [0, 5, 0], sizes = [4, 1, 128], strides = [1, 1, 1]} : vector<4x8x128xf32> to vector<4x1x128xf32>
    %275 = vector.shape_cast %274 : vector<4x1x128xf32> to vector<4x128xf32>
    %276 = arith.maximumf %273, %275 : vector<4x128xf32>
    %c0_155 = arith.constant 0 : index
    %c0_156 = arith.constant 0 : index
    %c2_157 = arith.constant 2 : index
    %c0_158 = arith.constant 0 : index
    %277 = vector.load %arg8[%c0_155, %c0_156, %c2_157, %c0_158] : memref<1x4x4x128xf32, #tpu.memory_space<vmem>>, vector<1x4x1x128xf32>
    %278 = vector.shape_cast %277 : vector<1x4x1x128xf32> to vector<4x128xf32>
    %279 = vector.shape_cast %276 : vector<4x128xf32> to vector<1x4x1x128xf32>
    tpu.vector_store %arg8[%c0_155, %c0_156, %c2_157, %c0_158], %279 {strides = array<i32>} : memref<1x4x4x128xf32, #tpu.memory_space<vmem>>, vector<1x4x1x128xf32>,
    %280 = vector.extract_strided_slice %255 {offsets = [0, 6, 0], sizes = [4, 1, 128], strides = [1, 1, 1]} : vector<4x8x128xf32> to vector<4x1x128xf32>
    %281 = vector.shape_cast %280 : vector<4x1x128xf32> to vector<4x128xf32>
    %282 = vector.extract_strided_slice %255 {offsets = [0, 7, 0], sizes = [4, 1, 128], strides = [1, 1, 1]} : vector<4x8x128xf32> to vector<4x1x128xf32>
    %283 = vector.shape_cast %282 : vector<4x1x128xf32> to vector<4x128xf32>
    %284 = arith.maximumf %281, %283 : vector<4x128xf32>
    %c0_159 = arith.constant 0 : index
    %c0_160 = arith.constant 0 : index
    %c3_161 = arith.constant 3 : index
    %c0_162 = arith.constant 0 : index
    %285 = vector.load %arg8[%c0_159, %c0_160, %c3_161, %c0_162] : memref<1x4x4x128xf32, #tpu.memory_space<vmem>>, vector<1x4x1x128xf32>
    %286 = vector.shape_cast %285 : vector<1x4x1x128xf32> to vector<4x128xf32>
    %287 = vector.shape_cast %284 : vector<4x128xf32> to vector<1x4x1x128xf32>
    tpu.vector_store %arg8[%c0_159, %c0_160, %c3_161, %c0_162], %287 {strides = array<i32>} : memref<1x4x4x128xf32, #tpu.memory_space<vmem>>, vector<1x4x1x128xf32>,
    return
  }
  func.func @transform_0(%arg0: i32) -> (i32, i32, i32, i32) {
    %c0_i32 = arith.constant 0 : i32
    %c0_i32_0 = arith.constant 0 : i32
    %c0_i32_1 = arith.constant 0 : i32
    %c0_i32_2 = arith.constant 0 : i32
    return %arg0, %c0_i32, %c0_i32_0, %c0_i32_1 : i32, i32, i32, i32
  }
  func.func @transform_1(%arg0: i32) -> (i32, i32, i32) {
    %c0_i32 = arith.constant 0 : i32
    %c0_i32_0 = arith.constant 0 : i32
    %c0_i32_1 = arith.constant 0 : i32
    %c0_i32_2 = arith.constant 0 : i32
    return %c0_i32, %c0_i32_0, %c0_i32_1 : i32, i32, i32
  }
  func.func @transform_2(%arg0: i32) -> (i32, i32) {
    %c0_i32 = arith.constant 0 : i32
    %c0_i32_0 = arith.constant 0 : i32
    %c0_i32_1 = arith.constant 0 : i32
    return %c0_i32, %c0_i32_0 : i32, i32
  }
  func.func @transform_3(%arg0: i32) -> (i32, i32, i32) {
    %c0_i32 = arith.constant 0 : i32
    %c0_i32_0 = arith.constant 0 : i32
    %c0_i32_1 = arith.constant 0 : i32
    %c0_i32_2 = arith.constant 0 : i32
    return %c0_i32, %c0_i32_0, %c0_i32_1 : i32, i32, i32
  }
  func.func @transform_4(%arg0: i32) -> (i32, i32) {
    %c0_i32 = arith.constant 0 : i32
    %c0_i32_0 = arith.constant 0 : i32
    %c0_i32_1 = arith.constant 0 : i32
    return %c0_i32, %c0_i32_0 : i32, i32
  }
  func.func @transform_5(%arg0: i32) -> (i32, i32, i32) {
    %c0_i32 = arith.constant 0 : i32
    %c0_i32_0 = arith.constant 0 : i32
    %c0_i32_1 = arith.constant 0 : i32
    %c0_i32_2 = arith.constant 0 : i32
    return %c0_i32, %c0_i32_0, %c0_i32_1 : i32, i32, i32
  }
  func.func @transform_6(%arg0: i32) -> (i32, i32) {
    %c0_i32 = arith.constant 0 : i32
    %c0_i32_0 = arith.constant 0 : i32
    %c0_i32_1 = arith.constant 0 : i32
    return %c0_i32, %c0_i32_0 : i32, i32
  }
  func.func @transform_7(%arg0: i32) -> (i32, i32, i32, i32) {
    %c0_i32 = arith.constant 0 : i32
    %c0_i32_0 = arith.constant 0 : i32
    %c0_i32_1 = arith.constant 0 : i32
    %c0_i32_2 = arith.constant 0 : i32
    return %arg0, %c0_i32, %c0_i32_0, %c0_i32_1 : i32, i32, i32, i32
  }
}

</mosaic_0001>

<bundles_post_ra>
// kernel: conv_layer3_forward.1
= control target key start
LH: loop header
LB: loop body
LE: loop exit
PB: predicated region body
PF: predicated region fallthrough
CT: control target
= control target key end

     0   :  { %12 = vsyncpa [#allocation5], 0  ;;  %s24303_s0 = inlined_call_operand.vmem [shape: bf16[2,18,24,3], index: 0, kind: input, shape index: {}]   ;;  %s24304_s1 = inlined_call_operand.vmem [shape: bf16[3,9,64], index: 1, kind: input, shape index: {}]   ;;  %s24305_s2 = inlined_call_operand.vmem [shape: f32[1,64], index: 2, kind: input, shape index: {}]   ;;  %s24306_s3 = inlined_call_operand.vmem [shape: bf16[3,192,256], index: 3, kind: input, shape index: {}]   ;;  %s24307_s4 = inlined_call_operand.vmem [shape: f32[1,256], index: 4, kind: input, shape index: {}]   ;;  %s24308_s5 = inlined_call_operand.vmem [shape: bf16[9,768,128], index: 5, kind: input, shape index: {}]   ;;  %s24309_s6 = inlined_call_operand.vmem [shape: f32[1,128], index: 6, kind: input, shape index: {}]   ;;  %s24310_s7 = inlined_call_operand.hbm [shape: f32[2,4,4,128], index: 7, kind: output, shape index: {}]  }
   0x1   :  { %14 = vsyncpa [#allocation5 + $0x1], 0  ;;  %s18403_s24 = smov 0   ;;  %s18405_s25 = smov 0  }
   0x2   :  { %s18407_s26 = smov 0   ;;  %s18409_s27 = smov 0  }
   0x3 LB: > { %s18424_s28 = sadd.s32 4294967295, %s18354_s27   ;;  %s13962_s29 = sadd.s32 4294967294, %s18354_s27   ;;  %s18354_s27 = sphi %s18409_s27, %s24817_s27   ;;  %s18350_s26 = sphi %s18407_s26, %s24816_s26   ;;  %s18346_s25 = sphi %s18405_s25, %s24815_s25   ;;  %s18342_s24 = sphi %s18403_s24, %s24814_s24  }
   0x4   : > { %s18428_s30 = sadd.s32 1, %s18354_s27   ;;  %s179_s8 = sadd.s32 1, %s18350_s26 }
   0x5   : > { %s176_s9 = ssub.s32 %s18354_s27, %s18428_s30  ;;  %p189_p0 = scmp.ne.s32.totalorder %s18350_s26, %s18346_s25 }
   0x6   : > { %p177_p1 = scmp.eq.s32.totalorder %s176_s9, 0  ;;  %p190_p2 = scmp.eq.s32.totalorder %s18424_s28, 1 }
   0x7   : > { %p195_p3 = scmp.ne.s32.totalorder %s18346_s25, %s18342_s24  ;;  %p196_p4 = scmp.eq.s32.totalorder %s13962_s29, 1 }
   0x8   : > { %s18439_s10 = scalar_select %p177_p1, %s18350_s26, %s179_s8  }
   0x9   : > { %p18441_p5 = por %p190_p2, %p189_p0  ;;  %p18445_p6 = por %p196_p4, %p195_p3 }
   0xa   : > { %p13965_p7 = scmp.ge.s32.totalorder %s18354_s27, 1  ;;  %p240_p8 = scmp.lt.s32.totalorder %s18354_s27, 3 }
   0xc   : > { %p241_p9 = pnand %p13965_p7, %p240_p8 }
   0xe   : > { %244 = sbr.rel (%p241_p9) target bundleno = 1826 (0x722), region = 48 }
  0x15   : > { %p272_p10 = scmp.lt.s32.totalorder %s18424_s28, 1  ;;  %v17558_v0 = vld [vmem:[%s24304_s1 + $0x8] sm:$0x1f]   ;;  %vm1414_vm0 = vcmask 1043456   ;;  %vm1415_vm1 = vcmask 1044480   ;;  %v18356_v1 = vmov 65535  }
  0x16   : > { %v1416_v2 = vsel %vm1414_vm0, 4294967295, %v18356_v1  ;;  %vm456_vm2 = vsmask.f32 7424  ;;  %vm681_vm3 = vcmask 1046528   ;;  %s18357_s20 = smov 6   ;;  %s18358_s21 = smov 3  }
  0x17   : > { %s273_s13 = scalar_select %p272_p10, %s18424_s28, 1  ;;  %v18456_v3 = vsel %vm1415_vm1, %v1416_v2, 0  ;;  %vm762_vm4 = vcmask 23552   ;;  %vm795_vm5 = vcmask 48128   ;;  %vm1381_vm6 = vcmask 72704  }
  0x18   : > { %v1419_v4 = vand.u32 %v17558_v0, %v18456_v3  ;;  %vm2635_vm7 = vcmask 523264   ;;  %vm2767_vm8 = vcmask 516096   ;;  %vm2794_vm9 = vcmask 517121   ;;  %s18360_s18 = smov 64   ;;  %s269_s23 = sand.u32 1, %s18346_s25  }
  0x19   : > { %s17452_s16 = smul.u32 216, %s273_s13  ;;  %vm2795_vm10 = vsmask.f32 1280  ;;  %vm2768_vm11 = vsmask.f32 7938  ;;  %vm2887_vm13 = vcmask 518146  }
  0x1a   : > { %17254 = vmatprep.subr.bf16.mxu0 %v1419_v4  ;;  %vm2837_vm12 = vsmask.f32 7942  ;;  %vm2888_vm14 = vsmask.f32 2304  ;;  %vm19592_vm15 = vmand %vm2794_vm9, %vm2795_vm10  ;;  %vm3044_vm0 = vcmask 519171   ;;  %s13966_s29 = sshll.u32 %s269_s23, 4 }
  0x1b   : > { %s18462_s19 = scalar_lea.vmem %s24303_s0, %s17452_s16  ;;  %17255 = vmatpush3.bf16.msra.mxu0 %v1419_v4  ;;  %vm3045_vm1 = vsmask.f32 3328  ;;  %s24221_s8 = scalar_lea.vmem [#allocation4], %s13966_s29 }
  0x1c   : > { %v17498_v5 = vld [vmem:[%s18462_s19 + $0xc] sm:$0xff]   ;;  %v17499_v6 = vld [vmem:[%s18462_s19 + $0x14] ss:$0 sps:$4 sm:$0xff]   ;;  %v17500_v7 = vld [vmem:[%s18462_s19 + $0x18] sm:$0xff]   ;;  %s16122_s9 = sshll.u32 %s18424_s28, 8  ;;  %s13900_s13 = sshll.u32 %s24221_s8, 4  ;;  %s24252_s13 = int_to_ptr.vmem [resolvable:$true] %s13900_s13 }
  0x1d   : > { %v1232_v8 = vrot.slane %v17498_v5, 1  ;;  %v1233_v9 = vrot.slane %v17499_v6, 1  ;;  %v1009_v10 = vshrl.u32 %v17498_v5, 16  ;;  %v1011_v11 = vshll.u32 %v17498_v5, 16  ;;  %v17501_v12 = vld [vmem:[%s18462_s19 + $0x20] ss:$0 sps:$4 sm:$0xff]   ;;  %s24250_s16 = scalar_lea.hbm %s24310_s7, %s16122_s9 }
  0x1e   : > { %v1016_v13 = vshll.u32 %v17499_v6, 16  ;;  %v1235_v14 = vrot.slane %v17500_v7, 1  ;;  %v1021_v15 = vshrl.u32 %v17500_v7, 16  ;;  %v1023_v16 = vshll.u32 %v17500_v7, 16  ;;  %v17502_v21 = vld [vmem:[%s18462_s19 + $0x30] sm:$0xff]   ;;  %v17504_v32 = vld [vmem:[%s18462_s19 + $0x24] sm:$0xff]  }
  0x1f   : > { %v1234_v17 = vsel %vm681_vm3, %v1232_v8, %v1233_v9  ;;  %v1013_v18 = vrot.slane %v1011_v11, 1  ;;  %v1236_v19 = vrot.slane %v17501_v12, 1  ;;  %v1028_v20 = vshll.u32 %v17501_v12, 16  ;;  %v17503_v24 = vld [vmem:[%s18462_s19 + $0x38] ss:$0 sps:$4 sm:$0xff]   ;;  %v18477_v35 = vld [vmem:[%s18462_s19 + $0x48] sm:$0xff]  }
  0x20   : > { %1280 = vrot.lane.b32.xlu1 %v1234_v17, %s18357_s20  ;;  %v1018_v22 = vrot.slane %v1016_v13, 1  ;;  %v1025_v23 = vrot.slane %v1023_v16, 1  ;;  %v1045_v29 = vshrl.u32 %v17502_v21, 16  ;;  %v1047_v30 = vshll.u32 %v17502_v21, 16  ;;  %v17505_v34 = vld [vmem:[%s18462_s19 + $0x2c] ss:$0 sps:$4 sm:$0xff]  }
  0x21   : > { %v1014_v25 = vor.u32 %v1013_v18, %v1009_v10  ;;  %v1237_v26 = vsel %vm681_vm3, %v1235_v14, %v1236_v19  ;;  %v1030_v27 = vrot.slane %v1028_v20, 1  ;;  %v1052_v31 = vshll.u32 %v17503_v24, 16  ;;  %v17508_v44 = vld [vmem:[%s18462_s19 + $0x3c] sm:$0xff]   ;;  %v17507_v47 = vld [vmem:[%s18462_s19 + $0x50] ss:$0 sps:$4 sm:$0xff]   ;;  %v18495_v1 = vld [vmem:[%s18462_s19 + $0x54] sm:$0xff]  }
  0x22   : > { %v1026_v28 = vor.u32 %v1025_v23, %v1021_v15  ;;  %v1049_v36 = vrot.slane %v1047_v30, 1  ;;  %v1241_v38 = vrot.slane %v17502_v21, 1  ;;  %v1242_v39 = vrot.slane %v17503_v24, 1  ;;  %v17509_v55 = vld [vmem:[%s18462_s19 + $0x44] ss:$0 sps:$4 sm:$0xff]   ;;  %v18509_v17 = vld [vmem:[%s18462_s19 + $0x78] sm:$0xff]  }
  0x23   : > { %v1019_v33 = vsel %vm456_vm2, %v1014_v25, %v1018_v22  ;;  %v1054_v37 = vrot.slane %v1052_v31, 1  ;;  %v1033_v41 = vshrl.u32 %v17504_v32, 16  ;;  %v1035_v42 = vshll.u32 %v17504_v32, 16  ;;  %v18491_v60 = vld [vmem:[%s18462_s19 + $0x60] sm:$0xff]   ;;  %v17511_v7 = vld [vmem:[%s18462_s19 + $0x68] ss:$0 sps:$4 sm:$0xff]  }
  0x24   : > { %1200 = vrot.lane.b32.xlu0 %v1019_v33, %s18358_s21  ;;  %1282 = vrot.lane.b32.xlu1 %v1237_v26, %s18357_s20  ;;  %v1031_v40 = vsel %vm456_vm2, %v1026_v28, %v1030_v27  ;;  %v1040_v43 = vshll.u32 %v17505_v34, 16  ;;  %v1050_v45 = vor.u32 %v1049_v36, %v1045_v29  ;;  %v1238_v46 = vrot.slane %v17504_v32, 1  ;;  %v17513_v15 = vld [vmem:[%s18462_s19 + $0x5c] ss:$0 sps:$4 sm:$0xff]   ;;  %v17515_v25 = vld [vmem:[%s18462_s19 + $0x80] ss:$0 sps:$4 sm:$0xff]  }
  0x25   : > { %v1069_v48 = vshrl.u32 %v18477_v35, 16  ;;  %v1071_v49 = vshll.u32 %v18477_v35, 16  ;;  %v1037_v50 = vrot.slane %v1035_v42, 1  ;;  %v1076_v54 = vshll.u32 %v17507_v47, 16  ;;  %v18517_v26 = vld [vmem:[%s18462_s19 + $0x6c] sm:$0xff]   ;;  %s24260_s17 = scalar_lea.sflag [#allocation5], %s269_s23 }
  0x26   : > { %v1042_v51 = vrot.slane %v1040_v43, 1  ;;  %v1055_v52 = vsel %vm456_vm2, %v1050_v45, %v1054_v37  ;;  %v1239_v57 = vrot.slane %v17505_v34, 1  ;;  %v1057_v58 = vshrl.u32 %v17508_v44, 16  ;;  %v17517_v36 = vld [vmem:[%s18462_s19 + $0x74] ss:$0 sps:$4 sm:$0xff]   ;;  %s18292_s28 = scalar_lea.vmem %s24252_s13, 256 }
  0x27   : > { %v1073_v53 = vrot.slane %v1071_v49, 1  ;;  %v1038_v56 = vor.u32 %v1037_v50, %v1033_v41  ;;  %v1059_v59 = vshll.u32 %v17508_v44, 16  ;;  %v1243_v61 = vsel %vm681_vm3, %v1241_v38, %v1242_v39  ;;  %v18530_v42 = vld [vmem:[%s18462_s19 + $0x90] sm:$0xff]   ;;  %v17519_v49 = vld [vmem:[%s18462_s19 + $0x98] ss:$0 sps:$4 sm:$0xff]   ;;  %v18539_v50 = vld [vmem:[%s18462_s19 + $0x84] sm:$0xff]   ;;  %p18293_p11 = scmp.ne.s32.totalorder %s24252_s13, %s18292_s28 }
  0x28   : > { %1202 = vrot.lane.b32.xlu0 %v1031_v40, %s18358_s21  ;;  %1206 = vrot.lane.b32.xlu1 %v1055_v52, %s18358_s21  ;;  %v1078_v63 = vrot.slane %v1076_v54, 1  ;;  %v1064_v0 = vshll.u32 %v17509_v55, 16  ;;  %v1247_v5 = vrot.slane %v18477_v35, 1  ;;  %v1248_v6 = vrot.slane %v17507_v47, 1 }
  0x29   : > { %v1074_v62 = vor.u32 %v1073_v53, %v1069_v48  ;;  %v1043_v2 = vsel %vm456_vm2, %v1038_v56, %v1042_v51  ;;  %v1061_v4 = vrot.slane %v1059_v59, 1  ;;  %v1240_v8 = vsel %vm681_vm3, %v1238_v46, %v1239_v57  ;;  %v17521_v57 = vld [vmem:[%s18462_s19 + $0x8c] ss:$0 sps:$4 sm:$0xff]   ;;  %p18294_p12 = pnand %p18293_p11, %p18441_p5 }
  0x2a   : > { %v1066_v10 = vrot.slane %v1064_v0, 1  ;;  %v1095_v11 = vshll.u32 %v18491_v60, 16  ;;  %v1093_v13 = vshrl.u32 %v18491_v60, 16  ;;  %v1100_v14 = vshll.u32 %v17511_v7, 16 }
  0x2b   : > { %v1062_v9 = vor.u32 %v1061_v4, %v1057_v58  ;;  %v1079_v12 = vsel %vm456_vm2, %v1074_v62, %v1078_v63  ;;  %v1083_v16 = vshll.u32 %v18495_v1, 16  ;;  %v1244_v19 = vrot.slane %v17508_v44, 1  ;;  %p18295_p13 = pneg %p18294_p12 }
  0x2c   : > { %1204 = vrot.lane.b32.xlu0 %v1043_v2, %s18358_s21  ;;  %1286 = vrot.lane.b32.xlu1 %v1243_v61, %s18357_s20  ;;  %v1097_v18 = vrot.slane %v1095_v11, 1  ;;  %v1245_v20 = vrot.slane %v17509_v55, 1  ;;  %v1081_v22 = vshrl.u32 %v18495_v1, 16  ;;  %v1088_v24 = vshll.u32 %v17513_v15, 16  ;;  %v18552_v2 = vld [vmem:[%s18462_s19 + $0xa8] sm:$0xff]  }
  0x2d   : > { %v1067_v21 = vsel %vm456_vm2, %v1062_v9, %v1066_v10  ;;  %v1085_v23 = vrot.slane %v1083_v16, 1  ;;  %v1249_v27 = vsel %vm681_vm3, %v1247_v5, %v1248_v6  ;;  %v1102_v29 = vrot.slane %v1100_v14, 1  ;;  %v17523_v11 = vld [vmem:[%s18462_s19 + $0xb0] ss:$0 sps:$4 sm:$0xff]  }
  0x2e   : > { %v1098_v28 = vor.u32 %v1097_v18, %v1093_v13  ;;  %v1119_v30 = vshll.u32 %v18509_v17, 16  ;;  %v1253_v31 = vrot.slane %v18491_v60, 1  ;;  %v1254_v32 = vrot.slane %v17511_v7, 1  ;;  %v18558_v7 = vld [vmem:[%s18462_s19 + $0x9c] sm:$0xff]  }
  0x2f   : > { %v1246_v33 = vsel %vm681_vm3, %v1244_v19, %v1245_v20  ;;  %v1086_v34 = vor.u32 %v1085_v23, %v1081_v22  ;;  %v1090_v35 = vrot.slane %v1088_v24, 1  ;;  %v1107_v37 = vshll.u32 %v18517_v26, 16 }
  0x30   : > { %1284 = vrot.lane.b32.xlu0 %v1240_v8, %s18357_s20  ;;  %1210 = vrot.lane.b32.xlu1 %v1079_v12, %s18358_s21  ;;  %v1103_v38 = vsel %vm456_vm2, %v1098_v28, %v1102_v29  ;;  %v1117_v39 = vshrl.u32 %v18509_v17, 16  ;;  %v1121_v40 = vrot.slane %v1119_v30, 1  ;;  %v1124_v41 = vshll.u32 %v17515_v25, 16 }
  0x31   : > { %v1250_v43 = vrot.slane %v18495_v1, 1  ;;  %v1251_v44 = vrot.slane %v17513_v15, 1  ;;  %v1091_v45 = vsel %vm456_vm2, %v1086_v34, %v1090_v35  ;;  %v1105_v46 = vshrl.u32 %v18517_v26, 16  ;;  %v18582_v34 = vld [vmem:[%s18462_s19 + $0xb4] sm:$0xff]  }
  0x32   : > { %v1109_v47 = vrot.slane %v1107_v37, 1  ;;  %v1112_v48 = vshll.u32 %v17517_v36, 16  ;;  %v1255_v51 = vsel %vm681_vm3, %v1253_v31, %v1254_v32  ;;  %v1122_v52 = vor.u32 %v1121_v40, %v1117_v39 }
  0x33   : > { %v1126_v53 = vrot.slane %v1124_v41, 1  ;;  %v1143_v54 = vshll.u32 %v18530_v42, 16  ;;  %v1259_v55 = vrot.slane %v18509_v17, 1  ;;  %v1260_v56 = vrot.slane %v17515_v25, 1 }
  0x34   : > { %1208 = vrot.lane.b32.xlu0 %v1067_v21, %s18358_s21  ;;  %1290 = vrot.lane.b32.xlu1 %v1249_v27, %s18357_s20  ;;  %v1252_v58 = vsel %vm681_vm3, %v1250_v43, %v1251_v44  ;;  %v1110_v59 = vor.u32 %v1109_v47, %v1105_v46  ;;  %v1114_v60 = vrot.slane %v1112_v48, 1  ;;  %v1131_v61 = vshll.u32 %v18539_v50, 16  ;;  %v17525_v21 = vld [vmem:[%s18462_s19 + $0xa4] ss:$0 sps:$4 sm:$0xff]  }
  0x35   : > { %v1127_v62 = vsel %vm456_vm2, %v1122_v52, %v1126_v53  ;;  %v1141_v63 = vshrl.u32 %v18530_v42, 16  ;;  %v1145_v0 = vrot.slane %v1143_v54, 1  ;;  %v1148_v1 = vshll.u32 %v17519_v49, 16  ;;  %v18574_v27 = vld [vmem:[%s18462_s19 + $0xc0] sm:$0xff]  }
  0x36   : > { %v1256_v4 = vrot.slane %v18517_v26, 1  ;;  %v1257_v5 = vrot.slane %v17517_v36, 1  ;;  %v1129_v6 = vshrl.u32 %v18539_v50, 16  ;;  %v1115_v8 = vsel %vm456_vm2, %v1110_v59, %v1114_v60  ;;  %v17531_v59 = vld [vmem:[%s18462_s19 + $0x14] ss:$0 sps:$4 sm:$0xff]  }
  0x37   : > { %v1133_v9 = vrot.slane %v1131_v61, 1  ;;  %v1136_v10 = vshll.u32 %v17521_v57, 16  ;;  %v1261_v12 = vsel %vm681_vm3, %v1259_v55, %v1260_v56  ;;  %v1146_v13 = vor.u32 %v1145_v0, %v1141_v63  ;;  %v18602_v55 = vld [vmem:[%s18462_s19] sm:$0xff]  }
  0x38   : > { %1288 = vrot.lane.b32.xlu0 %v1246_v33, %s18357_s20  ;;  %1214 = vrot.lane.b32.xlu1 %v1103_v38, %s18358_s21  ;;  %v1150_v14 = vrot.slane %v1148_v1, 1  ;;  %v1167_v15 = vshll.u32 %v18552_v2, 16  ;;  %v1265_v16 = vrot.slane %v18530_v42, 1  ;;  %v1266_v17 = vrot.slane %v17519_v49, 1  ;;  %v17527_v38 = vld [vmem:[%s18462_s19 + $0xc8] ss:$0 sps:$4 sm:$0xff]  }
  0x39   : > { %v1258_v18 = vsel %vm681_vm3, %v1256_v4, %v1257_v5  ;;  %v1134_v19 = vor.u32 %v1133_v9, %v1129_v6  ;;  %v1138_v20 = vrot.slane %v1136_v10, 1  ;;  %v1155_v22 = vshll.u32 %v18558_v7, 16  ;;  %v17529_v42 = vld [vmem:[%s18462_s19 + $0xbc] ss:$0 sps:$4 sm:$0xff]   ;;  %v17533_v6 = vld [vmem:[%s18462_s19 + $0x8] ss:$0 sps:$4 sm:$0xff]  }
  0x3a   : > { %v1151_v23 = vsel %vm456_vm2, %v1146_v13, %v1150_v14  ;;  %v1165_v24 = vshrl.u32 %v18552_v2, 16  ;;  %v1169_v25 = vrot.slane %v1167_v15, 1  ;;  %v1172_v26 = vshll.u32 %v17523_v11, 16  ;;  %v18621_v13 = vld [vmem:[%s18462_s19 + $0x18] sm:$0xff]  }
  0x3b   : > { %v1262_v28 = vrot.slane %v18539_v50, 1  ;;  %v1263_v29 = vrot.slane %v17521_v57, 1  ;;  %v1139_v30 = vsel %vm456_vm2, %v1134_v19, %v1138_v20  ;;  %v1153_v31 = vshrl.u32 %v18558_v7, 16 }
  0x3c   : > { %1212 = vrot.lane.b32.xlu0 %v1091_v45, %s18358_s21  ;;  %1294 = vrot.lane.b32.xlu1 %v1255_v51, %s18357_s20  ;;  %v1157_v32 = vrot.slane %v1155_v22, 1  ;;  %v1160_v33 = vshll.u32 %v17525_v21, 16  ;;  %v1267_v35 = vsel %vm681_vm3, %v1265_v16, %v1266_v17  ;;  %v1170_v36 = vor.u32 %v1169_v25, %v1165_v24  ;;  %v18596_v51 = vld [vmem:[%s18462_s19 + $0xc] sm:$0xff]  }
  0x3d   : > { %v1174_v37 = vrot.slane %v1172_v26, 1  ;;  %v1191_v39 = vshll.u32 %v18574_v27, 16  ;;  %v1271_v40 = vrot.slane %v18552_v2, 1  ;;  %v1272_v41 = vrot.slane %v17523_v11, 1  ;;  %v18634_v26 = vld [vmem:[%s18462_s19 + $0x20] ss:$0 sps:$4 sm:$0xff]  }
  0x3e   : > { %v1264_v43 = vsel %vm681_vm3, %v1262_v28, %v1263_v29  ;;  %v1158_v44 = vor.u32 %v1157_v32, %v1153_v31  ;;  %v1162_v45 = vrot.slane %v1160_v33, 1  ;;  %v1179_v46 = vshll.u32 %v18582_v34, 16 }
  0x3f   : > { %v1175_v47 = vsel %vm456_vm2, %v1170_v36, %v1174_v37  ;;  %v1189_v48 = vshrl.u32 %v18574_v27, 16  ;;  %v1193_v49 = vrot.slane %v1191_v39, 1  ;;  %v1196_v50 = vshll.u32 %v17527_v38, 16  ;;  %v18642_v36 = vld [vmem:[%s18462_s19 + $0x3c] sm:$0xff]  }
  0x40   : > { %1292 = vrot.lane.b32.xlu0 %v1252_v58, %s18357_s20  ;;  %1218 = vrot.lane.b32.xlu1 %v1127_v62, %s18358_s21  ;;  %v1268_v52 = vrot.slane %v18558_v7, 1  ;;  %v1269_v53 = vrot.slane %v17525_v21, 1  ;;  %v1177_v54 = vshrl.u32 %v18582_v34, 16  ;;  %v1163_v56 = vsel %vm456_vm2, %v1158_v44, %v1162_v45  ;;  %v18652_v44 = vld [vmem:[%s18462_s19 + $0x30] sm:$0xff]  }
  0x41   : > { %v1181_v57 = vrot.slane %v1179_v46, 1  ;;  %v1184_v58 = vshll.u32 %v17529_v42, 16  ;;  %v1273_v60 = vsel %vm681_vm3, %v1271_v40, %v1272_v41  ;;  %v1194_v61 = vor.u32 %v1193_v49, %v1189_v48  ;;  %v18657_v49 = vld [vmem:[%s18462_s19 + $0x38] ss:$0 sps:$4 sm:$0xff]  }
  0x42   : > { %v1198_v62 = vrot.slane %v1196_v50, 1  ;;  %v472_v63 = vshll.u32 %v18596_v51, 16  ;;  %v1277_v0 = vrot.slane %v18574_v27, 1  ;;  %v1278_v1 = vrot.slane %v17527_v38, 1 }
  0x43   : > { %v1270_v2 = vsel %vm681_vm3, %v1268_v52, %v1269_v53  ;;  %v1182_v4 = vor.u32 %v1181_v57, %v1177_v54  ;;  %v1186_v5 = vrot.slane %v1184_v58, 1  ;;  %v460_v7 = vshll.u32 %v18602_v55, 16 }
  0x44   : > { %1216 = vrot.lane.b32.xlu0 %v1115_v8, %s18358_s21  ;;  %1298 = vrot.lane.b32.xlu1 %v1261_v12, %s18357_s20  ;;  %v1199_v8 = vsel %vm456_vm2, %v1194_v61, %v1198_v62  ;;  %v470_v9 = vshrl.u32 %v18596_v51, 16  ;;  %v474_v10 = vrot.slane %v472_v63, 1  ;;  %v477_v11 = vshll.u32 %v17531_v59, 16  ;;  %v18618_v12 = vld [vmem:[%s18462_s19 + $0x24] sm:$0xff]   ;;  %v18672_v63 = vld [vmem:[%s18462_s19 + $0x5c] ss:$0 sps:$4 sm:$0xff]  }
  0x45   : > { %v1274_v14 = vrot.slane %v18582_v34, 1  ;;  %v1275_v15 = vrot.slane %v17529_v42, 1  ;;  %v1187_v16 = vsel %vm456_vm2, %v1182_v4, %v1186_v5  ;;  %v458_v17 = vshrl.u32 %v18602_v55, 16  ;;  %v18679_v5 = vld [vmem:[%s18462_s19 + $0x48] sm:$0xff]  }
  0x46   : > { %v465_v19 = vshll.u32 %v17533_v6, 16  ;;  %v1279_v20 = vsel %vm681_vm3, %v1277_v0, %v1278_v1  ;;  %v475_v21 = vor.u32 %v474_v10, %v470_v9  ;;  %v479_v22 = vrot.slane %v477_v11, 1  ;;  %v18688_v9 = vld [vmem:[%s18462_s19 + $0x6c] sm:$0xff]  }
  0x47   : > { %v496_v24 = vshll.u32 %v18618_v12, 16  ;;  %v685_v25 = vrot.slane %v18596_v51, 1  ;;  %v484_v27 = vshll.u32 %v18621_v13, 16  ;;  %v1276_v28 = vsel %vm681_vm3, %v1274_v14, %v1275_v15  ;;  %v18661_v51 = vld [vmem:[%s18462_s19 + $0x54] sm:$0xff]  }
  0x48   : > { %1296 = vrot.lane.b32.xlu0 %v1258_v18, %s18357_s20  ;;  %1222 = vrot.lane.b32.xlu1 %v1151_v23, %s18358_s21  ;;  %v462_v18 = vrot.slane %v460_v7, 1  ;;  %v17535_v23 = vld [vmem:[%s18462_s19 + $0x2c] ss:$0 sps:$4 sm:$0xff]   ;;  %v686_v31 = vrot.slane %v17531_v59, 1  ;;  %v480_v32 = vsel %vm456_vm2, %v475_v21, %v479_v22  ;;  %v494_v33 = vshrl.u32 %v18618_v12, 16 }
  0x49   : > { %v498_v34 = vrot.slane %v496_v24, 1  ;;  %v682_v37 = vrot.slane %v18602_v55, 1  ;;  %v683_v38 = vrot.slane %v17533_v6, 1  ;;  %v482_v39 = vshrl.u32 %v18621_v13, 16 }
  0x4a   : > { %v463_v29 = vor.u32 %v462_v18, %v458_v17  ;;  %v486_v40 = vrot.slane %v484_v27, 1  ;;  %v489_v41 = vshll.u32 %v18634_v26, 16  ;;  %v687_v45 = vsel %vm681_vm3, %v685_v25, %v686_v31  ;;  %v18695_v18 = vld [vmem:[%s18462_s19 + $0x60] sm:$0xff]   ;;  %v18704_v25 = vld [vmem:[%s18462_s19 + $0x74] ss:$0 sps:$4 sm:$0xff]  }
  0x4b   : > { %v499_v46 = vor.u32 %v498_v34, %v494_v33  ;;  %v520_v48 = vshll.u32 %v18642_v36, 16  ;;  %v684_v50 = vsel %vm681_vm3, %v682_v37, %v683_v38  ;;  %v691_v54 = vrot.slane %v18618_v12, 1 }
  0x4c   : > { %1220 = vrot.lane.b32.xlu0 %v1139_v30, %s18358_s21  ;;  %1302 = vrot.lane.b32.xlu1 %v1267_v35, %s18357_s20  ;;  %v467_v30 = vrot.slane %v465_v19, 1  ;;  %v501_v35 = vshll.u32 %v17535_v23, 16  ;;  %v487_v52 = vor.u32 %v486_v40, %v482_v39  ;;  %v491_v53 = vrot.slane %v489_v41, 1 }
  0x4d   : > { %v692_v55 = vrot.slane %v17535_v23, 1  ;;  %v518_v57 = vshrl.u32 %v18642_v36, 16  ;;  %v508_v59 = vshll.u32 %v18652_v44, 16  ;;  %v522_v61 = vrot.slane %v520_v48, 1  ;;  %v18737_v48 = vld [vmem:[%s18462_s19 + $0x8c] ss:$0 sps:$4 sm:$0xff]  }
  0x4e   : > { %v468_v42 = vsel %vm456_vm2, %v463_v29, %v467_v30  ;;  %v513_v62 = vshll.u32 %v18657_v49, 16  ;;  %v689_v0 = vrot.slane %v18634_v26, 1  ;;  %v506_v1 = vshrl.u32 %v18652_v44, 16  ;;  %v18707_v26 = vld [vmem:[%s18462_s19 + $0x84] sm:$0xff]  }
  0x4f   : > { %v544_v4 = vshll.u32 %v18661_v51, 16  ;;  %v492_v6 = vsel %vm456_vm2, %v487_v52, %v491_v53  ;;  %v693_v7 = vsel %vm681_vm3, %v691_v54, %v692_v55  ;;  %v510_v11 = vrot.slane %v508_v59, 1  ;;  %v18712_v29 = vld [vmem:[%s18462_s19 + $0x68] ss:$0 sps:$4 sm:$0xff]   ;;  %v17561_v30 = vld [vmem:[%s24304_s1] sm:$0x1f]  }
  0x50   : > { %1300 = vrot.lane.b32.xlu0 %v1264_v43, %s18357_s20  ;;  %1226 = vrot.lane.b32.xlu1 %v1175_v47, %s18358_s21  ;;  %v17539_v43 = vld [vmem:[%s18462_s19 + $0x44] ss:$0 sps:$4 sm:$0xff]   ;;  %v503_v47 = vrot.slane %v501_v35, 1  ;;  %v523_v14 = vor.u32 %v522_v61, %v518_v57  ;;  %v515_v15 = vrot.slane %v513_v62, 1  ;;  %v549_v17 = vshll.u32 %v18672_v63, 16  ;;  %v18754_v61 = vld [vmem:[%s18462_s19 + $0x90] sm:$0xff]  }
  0x51   : > { %v525_v58 = vshll.u32 %v17539_v43, 16  ;;  %v698_v12 = vrot.slane %v17539_v43, 1  ;;  %v542_v19 = vshrl.u32 %v18661_v51, 16  ;;  %v530_v21 = vshrl.u32 %v18679_v5, 16  ;;  %v18731_v43 = vld [vmem:[%s18462_s19 + $0x78] sm:$0xff]  }
  0x52   : > { %v532_v22 = vshll.u32 %v18679_v5, 16  ;;  %v703_v24 = vrot.slane %v18661_v51, 1  ;;  %v551_v33 = vrot.slane %v549_v17, 1  ;;  %v568_v34 = vshll.u32 %v18688_v9, 16  ;;  %v18776_v17 = vld [vmem:[%s18462_s19 + $0x98] ss:$0 sps:$4 sm:$0xff]  }
  0x53   : > { %v527_v10 = vrot.slane %v525_v58, 1  ;;  %v700_v37 = vrot.slane %v18679_v5, 1  ;;  %v18723_v38 = vand.u32 %v17561_v30, %v18456_v3  ;;  %v566_v40 = vshrl.u32 %v18688_v9, 16 }
  0x54   : > { %1224 = vrot.lane.b32.xlu0 %v1163_v56, %s18358_s21  ;;  %1306 = vrot.lane.b32.xlu1 %v1273_v60, %s18357_s20  ;;  %v688_v56 = vrot.slane %v18621_v13, 1  ;;  %v504_v60 = vsel %vm456_vm2, %v499_v46, %v503_v47  ;;  %v694_v13 = vrot.slane %v18652_v44, 1  ;;  %v534_v35 = vrot.slane %v532_v22, 1 }
  0x55   : > { %v528_v31 = vsel %vm456_vm2, %v523_v14, %v527_v10  ;;  %v573_v41 = vshll.u32 %v18704_v25, 16  ;;  %v561_v47 = vshll.u32 %v18712_v29, 16  ;;  %17288 = vmatprep.subr.bf16.mxu0 %v18723_v38  ;;  %v554_v51 = vshrl.u32 %v18695_v18, 16  ;;  %v18770_v14 = vld [vmem:[%s18462_s19 + $0xb4] sm:$0xff]  }
  0x56   : > { %v690_v27 = vsel %vm681_vm3, %v688_v56, %v689_v0  ;;  %v709_v52 = vrot.slane %v18688_v9, 1  ;;  %v592_v53 = vshll.u32 %v18707_v26, 16  ;;  %v535_v55 = vor.u32 %v534_v35, %v530_v21  ;;  %v18748_v56 = vld [vmem:[%s18462_s19 + $0x80] ss:$0 sps:$4 sm:$0xff]  }
  0x57   : > { %v575_v57 = vrot.slane %v573_v41, 1  ;;  %v710_v59 = vrot.slane %v18704_v25, 1  ;;  %v563_v62 = vrot.slane %v561_v47, 1  ;;  %v590_v0 = vshrl.u32 %v18707_v26, 16 }
  0x58   : > { %1304 = vrot.lane.b32.xlu0 %v1270_v2, %s18357_s20  ;;  %1230 = vrot.lane.b32.xlu1 %v1199_v8, %s18358_s21  ;;  %v697_v2 = vrot.slane %v18642_v36, 1  ;;  %v18685_v8 = vld [vmem:[%s18462_s19 + $0x50] ss:$0 sps:$4 sm:$0xff]   ;;  %v704_v36 = vrot.slane %v18672_v63, 1  ;;  %v707_v63 = vrot.slane %v18712_v29, 1  ;;  %v578_v10 = vshrl.u32 %v18731_v43, 16 }
  0x59   : > { %v537_v23 = vshll.u32 %v18685_v8, 16  ;;  %v701_v39 = vrot.slane %v18685_v8, 1  ;;  %v716_v22 = vrot.slane %v18737_v48, 1  ;;  %v712_v30 = vrot.slane %v18731_v43, 1 }
  0x5a   : > { %v602_v35 = vshrl.u32 %v18754_v61, 16  ;;  %v609_v41 = vshll.u32 %v18776_v17, 16  ;;  %v719_v8 = vrot.slane %v18776_v17, 1  ;;  %v638_v5 = vshrl.u32 %v18770_v14, 16 }
  0x5b   : > { %v539_v46 = vrot.slane %v537_v23, 1  ;;  %v18781_v23 = vld [vmem:[%s18462_s19 + $0xbc] ss:$0 sps:$4 sm:$0xff]  }
  0x5c   : > { %1228 = vrot.lane.b32.xlu0 %v1187_v16, %s18358_s21  ;;  %1310 = vrot.lane.b32.xlu1 %v1279_v20, %s18357_s20  ;;  %v695_v16 = vrot.slane %v18657_v49, 1  ;;  %v546_v20 = vrot.slane %v544_v4, 1  ;;  %v18740_v49 = vld [vmem:[%s18462_s19 + $0x9c] sm:$0xff]   ;;  %v594_v4 = vrot.slane %v592_v53, 1  ;;  %v645_v47 = vshll.u32 %v18781_v23, 16 }
  0x5e   : > { %v696_v54 = vsel %vm681_vm3, %v694_v13, %v695_v16  ;;  %v616_v13 = vshll.u32 %v18740_v49, 16  ;;  %v705_v16 = vsel %vm681_vm3, %v703_v24, %v704_v36  ;;  %v604_v24 = vshll.u32 %v18754_v61, 16  ;;  %v18795_v36 = vld [vmem:[%s18462_s19 + $0x24] sm:$0xff]  }
  0x5f   : > { %v1976_v29 = vshrl.u32 %v18795_v36, 16 }
  0x60   : > { %1308 = vrot.lane.b32.xlu0 %v1276_v28, %s18357_s20  ;;  %651 = vrot.lane.b32.xlu1 %v480_v32, %s18358_s21  ;;  %v511_v28 = vor.u32 %v510_v11, %v506_v1  ;;  %v699_v32 = vsel %vm681_vm3, %v697_v2, %v698_v12  ;;  %v597_v1 = vshll.u32 %v18737_v48, 16  ;;  %v585_v11 = vshll.u32 %v18748_v56, 16 }
  0x61   : > { %v715_v12 = vrot.slane %v18707_v26, 1  ;;  %v18918_v26 = vld [vmem:[%s18462_s19 + $0x48] sm:$0xff]  }
  0x62   : > { %v516_v44 = vsel %vm456_vm2, %v511_v28, %v515_v15  ;;  %v540_v15 = vsel %vm456_vm2, %v535_v55, %v539_v46  ;;  %v599_v21 = vrot.slane %v597_v1, 1  ;;  %v640_v46 = vshll.u32 %v18770_v14, 16  ;;  %v18827_v1 = vld [vmem:[%s18462_s19 + $0x2c] ss:$0 sps:$4 sm:$0xff]  }
  0x63   : > { %v718_v55 = vrot.slane %v18754_v61, 1 }
  0x64   : > { %649 = vrot.lane.b32.xlu0 %v468_v42, %s18358_s21  ;;  %732 = vrot.lane.b32.xlu1 %v687_v45, %s18357_s20  ;;  %v556_v42 = vshll.u32 %v18695_v18, 16  ;;  %v547_v45 = vor.u32 %v546_v20, %v542_v19 }
  0x66   : > { %v558_v58 = vrot.slane %v556_v42, 1  ;;  %v552_v2 = vsel %vm456_vm2, %v547_v45, %v551_v33  ;;  %v713_v33 = vrot.slane %v18748_v56, 1  ;;  %v721_v42 = vrot.slane %v18740_v49, 1  ;;  %v18954_v56 = vld [vmem:[%s18462_s19 + $0x74] ss:$0 sps:$4 sm:$0xff]  }
  0x67   : > { %v702_v45 = vsel %vm681_vm3, %v700_v37, %v701_v39 }
  0x68   : > { %730 = vrot.lane.b32.xlu0 %v684_v50, %s18357_s20  ;;  %655 = vrot.lane.b32.xlu1 %v504_v60, %s18358_s21  ;;  %v570_v50 = vrot.slane %v568_v34, 1  ;;  %v706_v60 = vrot.slane %v18695_v18, 1  ;;  %v559_v20 = vor.u32 %v558_v58, %v554_v51  ;;  %v614_v34 = vshrl.u32 %v18740_v49, 16  ;;  %v18875_v18 = vld [vmem:[%s18462_s19 + $0x30] sm:$0xff]  }
  0x69   : > { %v18823_v58 = vrot.slane %v609_v41, 1 }
  0x6a   : > { %v571_v19 = vor.u32 %v570_v50, %v566_v40  ;;  %v18798_v40 = vrot.slane %v616_v13, 1  ;;  %v18812_v50 = vld [vmem:[%s18462_s19 + $0xb0] ss:$0 sps:$4 sm:$0xff]   ;;  %v564_v39 = vsel %vm456_vm2, %v559_v20, %v563_v62  ;;  %v711_v62 = vsel %vm681_vm3, %v709_v52, %v710_v59  ;;  %v18864_v59 = vld [vmem:[%s18462_s19 + $0x44] ss:$0 sps:$4 sm:$0xff]  }
  0x6b   : > { %v633_v13 = vshll.u32 %v18812_v50, 16  ;;  %v728_v20 = vrot.slane %v18781_v23, 1  ;;  %v708_v9 = vsel %vm681_vm3, %v706_v60, %v707_v63  ;;  %v725_v25 = vrot.slane %v18812_v50, 1  ;;  %v18909_v63 = vld [vmem:[%s18462_s19 + $0x5c] ss:$0 sps:$4 sm:$0xff]  }
  0x6c   : > { %653 = vrot.lane.b32.xlu0 %v492_v6, %s18358_s21  ;;  %736 = vrot.lane.b32.xlu1 %v693_v7, %s18357_s20  ;;  %v580_v6 = vshll.u32 %v18731_v43, 16  ;;  %v18763_v7 = vld [vmem:[%s18462_s19 + $0xa4] ss:$0 sps:$4 sm:$0xff]   ;;  %v576_v51 = vsel %vm456_vm2, %v571_v19, %v575_v57  ;;  %v727_v19 = vrot.slane %v18770_v14, 1  ;;  %v1983_v52 = vshll.u32 %v18827_v1, 16 }
  0x6e   : > { %v582_v28 = vrot.slane %v580_v6, 1  ;;  %v18833_v6 = vrot.slane %v640_v46, 1 }
  0x70   : > { %734 = vrot.lane.b32.xlu0 %v690_v27, %s18357_s20  ;;  %659 = vrot.lane.b32.xlu1 %v528_v31, %s18358_s21  ;;  %v18784_v27 = vld [vmem:[%s18462_s19 + $0xa8] sm:$0xff]   ;;  %v621_v31 = vshll.u32 %v18763_v7, 16  ;;  %v643_v49 = vor.u32 %v18833_v6, %v638_v5 }
  0x71   : > { %v628_v37 = vshll.u32 %v18784_v27, 16  ;;  %v626_v57 = vshrl.u32 %v18784_v27, 16 }
  0x72   : > { %v18815_v53 = vrot.slane %v621_v31, 1  ;;  %v18847_v31 = vld [vmem:[%s18462_s19 + $0x20] ss:$0 sps:$4 sm:$0xff]  }
  0x73   : > { %v18852_v41 = vrot.slane %v628_v37, 1  ;;  %v18882_v37 = vld [vmem:[%s18462_s19 + $0x54] sm:$0xff]  }
  0x74   : > { %657 = vrot.lane.b32.xlu0 %v516_v44, %s18358_s21  ;;  %740 = vrot.lane.b32.xlu1 %v699_v32, %s18357_s20  ;;  %v18789_v32 = vrot.slane %v585_v11, 1  ;;  %v722_v44 = vrot.slane %v18763_v7, 1  ;;  %v18835_v11 = vrot.slane %v645_v47, 1  ;;  %v19021_v7 = vld [vmem:[%s18462_s19 + $0x8c] ss:$0 sps:$4 sm:$0xff]  }
  0x76   : > { %v723_v43 = vsel %vm681_vm3, %v721_v42, %v722_v44  ;;  %v2014_v44 = vshll.u32 %v18918_v26, 16  ;;  %v648_v6 = vsel %vm456_vm2, %v643_v49, %v18835_v11  ;;  %v19036_v49 = vld [vmem:[%s18462_s19 + $0x9c] sm:$0xff]  }
  0x78   : > { %738 = vrot.lane.b32.xlu0 %v696_v54, %s18357_s20  ;;  %663 = vrot.lane.b32.xlu1 %v552_v2, %s18358_s21  ;;  %v606_v54 = vrot.slane %v604_v24, 1  ;;  %v18830_v2 = vld [vmem:[%s18462_s19 + $0x18] sm:$0xff]  }
  0x79   : > { %v18850_v24 = vld [vmem:[%s18462_s19 + $0x3c] sm:$0xff]   ;;  %v1966_v47 = vshll.u32 %v18830_v2, 16 }
  0x7a   : > { %v2000_v48 = vshrl.u32 %v18850_v24, 16 }
  0x7c   : > { %661 = vrot.lane.b32.xlu0 %v540_v15, %s18358_s21  ;;  %744 = vrot.lane.b32.xlu1 %v705_v16, %s18357_s20  ;;  %v1978_v15 = vshll.u32 %v18795_v36, 16  ;;  %v595_v16 = vor.u32 %v594_v4, %v590_v0  ;;  %v583_v0 = vor.u32 %v582_v28, %v578_v10  ;;  %v18869_v4 = vrot.slane %v633_v13, 1 }
  0x7d   : > { %v2191_v28 = vrot.slane %v18827_v1, 1  ;;  %v18890_v13 = vrot.slane %v1983_v52, 1  ;;  %v619_v52 = vor.u32 %v18798_v40, %v614_v34  ;;  %v18911_v10 = vrot.slane %v1966_v47, 1 }
  0x7e   : > { %v18872_v46 = vrot.slane %v1978_v15, 1  ;;  %v600_v60 = vsel %vm456_vm2, %v595_v16, %v599_v21  ;;  %v2002_v15 = vshll.u32 %v18850_v24, 16  ;;  %v588_v16 = vsel %vm456_vm2, %v583_v0, %v18789_v32 }
  0x7f   : > { %v607_v21 = vor.u32 %v606_v54, %v602_v35  ;;  %v2188_v32 = vrot.slane %v18847_v31, 1  ;;  %v18924_v35 = vld [vmem:[%s18462_s19 + $0x6c] sm:$0xff]   ;;  %v2026_v0 = vshll.u32 %v18882_v37, 16  ;;  %v714_v47 = vsel %vm681_vm3, %v712_v30, %v713_v33  ;;  %v18957_v30 = vld [vmem:[%s18462_s19 + $0x60] sm:$0xff]  }
  0x80   : > { %742 = vrot.lane.b32.xlu0 %v702_v45, %s18357_s20  ;;  %667 = vrot.lane.b32.xlu1 %v576_v51, %s18358_s21  ;;  %v724_v45 = vrot.slane %v18784_v27, 1  ;;  %v1971_v51 = vshll.u32 %v18847_v31, 16  ;;  %v18927_v40 = vrot.slane %v2002_v15, 1  ;;  %v2031_v15 = vshll.u32 %v18909_v63, 16 }
  0x81   : > { %v624_v54 = vsel %vm456_vm2, %v619_v52, %v18815_v53  ;;  %v18970_v42 = vrot.slane %v2026_v0, 1  ;;  %v2055_v53 = vshll.u32 %v18954_v56, 16  ;;  %v18984_v52 = vld [vmem:[%s18462_s19 + $0x84] sm:$0xff]   ;;  %v18998_v0 = vrot.slane %v2014_v44, 1 }
  0x82   : > { %v18978_v5 = vrot.slane %v2031_v15, 1  ;;  %v18995_v15 = vld [vmem:[%s18462_s19 + $0x68] ss:$0 sps:$4 sm:$0xff]   ;;  %v2038_v61 = vshll.u32 %v18957_v30, 16  ;;  %v726_v14 = vsel %vm681_vm3, %v724_v45, %v725_v25  ;;  %v24433_v45 = vrot.slane %v18795_v36, 1 }
  0x83   : > { %v19017_v17 = vrot.slane %v2055_v53, 1  ;;  %v19033_v53 = vld [vmem:[%s18462_s19 + $0x80] ss:$0 sps:$4 sm:$0xff]   ;;  %v19075_v36 = vld [vmem:[%s18462_s19 + $0xa4] ss:$0 sps:$4 sm:$0xff]  }
  0x84   : > { %665 = vrot.lane.b32.xlu0 %v564_v39, %s18358_s21  ;;  %748 = vrot.lane.b32.xlu1 %v711_v62, %s18357_s20  ;;  %v18887_v39 = vld [vmem:[%s18462_s19 + $0x38] ss:$0 sps:$4 sm:$0xff]   ;;  %v2007_v62 = vshll.u32 %v18864_v59, 16  ;;  %24432 = vst [vmem:[#allocation7_spill] sm:$0xff] %v19033_v53  ;;  %v19045_v23 = vrot.slane %v2038_v61, 1  ;;  %v19062_v25 = vsel %vm681_vm3, %v24433_v45, %v2191_v28 }
  0x85   : > { %v1995_v34 = vshll.u32 %v18887_v39, 16  ;;  %v18202_v28 = vld [vmem:[%s18462_s19 + $0x18] sm:$0xff]  }
  0x88   : > { %746 = vrot.lane.b32.xlu0 %v708_v9, %s18357_s20  ;;  %671 = vrot.lane.b32.xlu1 %v600_v60, %s18358_s21  ;;  %v717_v9 = vsel %vm681_vm3, %v715_v12, %v716_v22  ;;  %v18913_v60 = vrot.slane %v1971_v51, 1  ;;  %v1990_v22 = vshll.u32 %v18875_v18, 16  ;;  %v18937_v51 = vrot.slane %v2007_v62, 1  ;;  %v18942_v12 = vld [vmem:[%s18462_s19 + $0x50] ss:$0 sps:$4 sm:$0xff]  }
  0x89   : > { %v18961_v62 = vrot.slane %v1995_v34, 1  ;;  %v2050_v34 = vshll.u32 %v18924_v35, 16 }
  0x8a   : > { %v18959_v33 = vrot.slane %v1990_v22, 1  ;;  %v631_v22 = vor.u32 %v18852_v41, %v626_v57 }
  0x8b   : > { %v19012_v57 = vrot.slane %v2050_v34, 1 }
  0x8c   : > { %669 = vrot.lane.b32.xlu0 %v588_v16, %s18358_s21  ;;  %752 = vrot.lane.b32.xlu1 %v717_v9, %s18357_s20  ;;  %v612_v9 = vsel %vm456_vm2, %v607_v21, %v18823_v58  ;;  %v2019_v21 = vshll.u32 %v18942_v12, 16  ;;  %v19004_v58 = vld [vmem:[%s18462_s19 + $0x78] sm:$0xff]   ;;  %v18201_v16 = vld [vmem:[%s18462_s19 + $0xc] sm:$0xff]   ;;  %v636_v50 = vsel %vm456_vm2, %v631_v22, %v18869_v4 }
  0x8d   : > { %v2062_v1 = vshll.u32 %v19004_v58, 16 }
  0x90   : > { %750 = vrot.lane.b32.xlu0 %v714_v47, %s18357_s20  ;;  %675 = vrot.lane.b32.xlu1 %v624_v54, %s18358_s21  ;;  %v720_v54 = vsel %vm681_vm3, %v718_v55, %v719_v8  ;;  %v1981_v55 = vor.u32 %v18872_v46, %v1976_v29  ;;  %v19010_v8 = vrot.slane %v2019_v21, 1  ;;  %v729_v46 = vsel %vm681_vm3, %v727_v19, %v728_v20  ;;  %v17594_v20 = vld [vmem:[%s24304_s1 + $0x10] sm:$0x1f]  }
  0x91   : > { %v2043_v21 = vshll.u32 %v18995_v15, 16  ;;  %v2074_v19 = vshll.u32 %v18984_v52, 16 }
  0x92   : > { %v1281_v47 = vpop.permute.xlu1 %1280  ;;  %v1986_v27 = vsel %vm456_vm2, %v1981_v55, %v18890_v13  ;;  %v2079_v13 = vshll.u32 %v19021_v7, 16 }
  0x94   : > { %673 = vrot.lane.b32.xlu0 %v612_v9, %s18358_s21  ;;  %756 = vrot.lane.b32.xlu1 %v723_v43, %s18357_s20 }
  0x96   : > { %v1201_v9 = vpop.permute.xlu0 %1200  ;;  %v1283_v44 = vpop.permute.xlu1 %1282 }
  0x97   : > { %v1313_v29 = vsel %vm762_vm4, %v18201_v16, %v1201_v9  ;;  %v19091_v16 = vrot.slane %v2074_v19, 1  ;;  %v2098_v19 = vshll.u32 %v19036_v49, 16 }
  0x98   : > { %754 = vrot.lane.b32.xlu0 %v720_v54, %s18357_s20  ;;  %v1345_v34 = vsel %vm795_vm5, %v1313_v29, %v1281_v47  ;;  %679 = vrot.lane.b32.xlu1 %v648_v6, %s18358_s21  ;;  %v19066_v47 = vld [vmem:[%s18462_s19 + $0x90] sm:$0xff]   ;;  %v24434_v6 = vshrl.u32 %v18830_v2, 16  ;;  %v2067_v29 = vshll.u32 %v19033_v53, 16  ;;  %v19169_v53 = vld [vmem:[%s18462_s19 + $0xc8] ss:$0 sps:$4 sm:$0xff]  }
  0x99   : > { %17256 = vmatprep.mubr.msk.bf16.mxu0 %vm1381_vm6, %v1345_v34  ;;  %v19082_v34 = vld [vmem:[%s18462_s19 + $0x98] ss:$0 sps:$4 sm:$0xff]   ;;  %v19147_v9 = vrot.slane %v2098_v19, 1 }
  0x9a   : > { %v1203_v54 = vpop.permute.xlu0 %1202  ;;  %v1969_v4 = vor.u32 %v18911_v10, %v24434_v6  ;;  %v1207_v55 = vpop.permute.xlu1 %1206  ;;  %v19085_v10 = vand.u32 %v17594_v20, %v18456_v3  ;;  %v19089_v6 = vrot.slane %v2043_v21, 1  ;;  %v24436_v3 = vrot.slane %v18830_v2, 1  ;;  %v19142_v21 = vld [vmem:[%s18462_s19 + $0xcc] sm:$0xff]  }
  0x9b   : > { %v1315_v61 = vsel %vm762_vm4, %v18202_v28, %v1203_v54  ;;  %v19095_v28 = vld [vmem:[%s18462_s19 + $0xb4] sm:$0xff]   ;;  %v19117_v2 = vrot.slane %v2062_v1, 1 }
  0x9c   : > { %24435 = vst [vmem:[#allocation8_spill] sm:$0xff] %v19085_v10  ;;  %677 = vrot.lane.b32.xlu0 %v636_v50, %s18358_s21  ;;  %v1347_v45 = vsel %vm795_vm5, %v1315_v61, %v1283_v44  ;;  %760 = vrot.lane.b32.xlu1 %v729_v46, %s18357_s20  ;;  %v19104_v20 = vsel %vm681_vm3, %v24436_v3, %v2188_v32  ;;  %v19110_v50 = vld [vmem:[%s18462_s19 + $0xbc] ss:$0 sps:$4 sm:$0xff]   ;;  %v19115_v46 = vrot.slane %v2079_v13, 1  ;;  %v2103_v32 = vshll.u32 %v19075_v36, 16  ;;  %v18203_v54 = vld [vmem:[%s18462_s19 + $0x30] sm:$0xff]  }
  0x9d   : > { %17257 = vmatmul.mubr.msk.bf16.vlgmr.msra.gmra.mrb[0].mxu0 %vm1381_vm6, %v1347_v45  ;;  %v1974_v31 = vsel %vm456_vm2, %v1969_v4, %v18913_v60  ;;  %v19121_v45 = vld [vmem:[%s18462_s19 + $0xa8] sm:$0xff]   ;;  %v2005_v44 = vor.u32 %v18927_v40, %v2000_v48  ;;  %v2086_v60 = vshll.u32 %v19066_v47, 16  ;;  %v19131_v4 = vld [vmem:[%s18462_s19 + $0xb0] ss:$0 sps:$4 sm:$0xff]   ;;  %v24438_v13 = vshrl.u32 %v18875_v18, 16  ;;  %v19155_v48 = vld [vmem:[%s18462_s19 + $0xc0] sm:$0xff]  }
  0x9e   : > { %17289 = vmatpush3.bf16.msra.mxu0 %v18723_v38  ;;  %v1205_v61 = vpop.permute.xlu0 %1204  ;;  %v1287_v3 = vpop.permute.xlu1 %1286  ;;  %v19126_v38 = vrot.slane %v2067_v29, 1  ;;  %24437 = vst [vmem:[#allocation9_spill] sm:$0xff] %v19131_v4  ;;  %v1319_v22 = vsel %vm762_vm4, %v18203_v54, %v1207_v55  ;;  %v18204_v40 = vld [vmem:[%s18462_s19 + $0x24] sm:$0xff]   ;;  %v19159_v11 = vrot.slane %v2103_v32, 1  ;;  %v2232_v55 = vrot.slane %v19142_v21, 1 }
  0x9f   : > { %17322 = vmatprep.subr.bf16.mxu0 %v19085_v10  ;;  %v1993_v1 = vor.u32 %v18959_v33, %v24438_v13  ;;  %v19152_v13 = vld [vmem:[%s18462_s19 + $0xd4] ss:$0 sps:$4 sm:$0xff]   ;;  %v1317_v29 = vsel %vm762_vm4, %v18204_v40, %v1205_v61  ;;  %v19164_v41 = vrot.slane %v2086_v60, 1  ;;  %v2127_v10 = vshll.u32 %v19110_v50, 16 }
  0xa0   : > { %758 = vrot.lane.b32.xlu0 %v726_v14, %s18357_s20  ;;  %2157 = vrot.lane.b32.xlu1 %v1986_v27, %s18358_s21  ;;  %v2091_v14 = vshll.u32 %v19082_v34, 16  ;;  %v2122_v27 = vshll.u32 %v19095_v28, 16  ;;  %v1351_v61 = vsel %vm795_vm5, %v1319_v22, %v1287_v3  ;;  %v24439_v60 = vrot.slane %v18864_v59, 1 }
  0xa1   : > { %v2146_v59 = vshll.u32 %v19142_v21, 16  ;;  %v2132_v40 = vshrl.u32 %v19155_v48, 16 }
  0xa2   : > { %v1285_v43 = vpop.permute.xlu0 %1284  ;;  %v1211_v19 = vpop.permute.xlu1 %1210  ;;  %v19185_v3 = vrot.slane %v2091_v14, 1  ;;  %v19191_v32 = vrot.slane %v2122_v27, 1  ;;  %v1998_v14 = vsel %vm456_vm2, %v1993_v1, %v18961_v62  ;;  %v18205_v62 = vld [vmem:[%s18462_s19 + $0x48] sm:$0xff]  }
  0xa3   : > { %v1349_v54 = vsel %vm795_vm5, %v1317_v29, %v1285_v43  ;;  %v2110_v43 = vshll.u32 %v19121_v45, 16  ;;  %v24440_v29 = vrot.slane %v18850_v24, 1 }
  0xa4   : > { %17260 = vmatprep.mubr.msk.bf16.mxu0 %vm1381_vm6, %v1349_v54  ;;  %2155 = vrot.lane.b32.xlu0 %v1974_v31, %s18358_s21  ;;  %v2115_v54 = vshll.u32 %v19131_v4, 16  ;;  %v2134_v31 = vshll.u32 %v19155_v48, 16 }
  0xa5   : > { %17261 = vmatmul.mubr.msk.bf16.gmra.mrb[4].mxu0 %vm1381_vm6, %v1351_v61  ;;  %2237 = vrot.lane.b32.xlu1 %v19062_v25, %s18357_s20  ;;  %v2198_v22 = vsel %vm681_vm3, %v24440_v29, %v24439_v60  ;;  %v2010_v61 = vsel %vm456_vm2, %v2005_v44, %v18937_v51  ;;  %v19197_v60 = vrot.slane %v2127_v10, 1  ;;  %v2151_v29 = vshll.u32 %v19152_v13, 16 }
  0xa6   : > { %v1209_v33 = vpop.permute.xlu0 %1208  ;;  %v1291_v24 = vpop.permute.xlu1 %1290  ;;  %v24442_v51 = vshrl.u32 %v18882_v37, 16  ;;  %v19206_v27 = vrot.slane %v2110_v43, 1  ;;  %v1323_v10 = vsel %vm762_vm4, %v18205_v62, %v1211_v19  ;;  %v19213_v1 = vrot.slane %v2115_v54, 1 }
  0xa7   : > { %24441 = vst [vmem:[#allocation10_spill] sm:$0xff] %v19197_v60  ;;  %v18206_v60 = vld [vmem:[%s18462_s19 + $0x3c] sm:$0xff]   ;;  %v19220_v25 = vrot.slane %v2146_v59, 1  ;;  %v19226_v54 = vrot.slane %v2134_v31, 1  ;;  %v1355_v4 = vsel %vm795_vm5, %v1323_v10, %v1291_v24  ;;  %v24443_v31 = vrot.slane %v18887_v39, 1 }
  0xa8   : > { %2235 = vrot.lane.b32.xlu0 %v19104_v20, %s18357_s20  ;;  %v2029_v44 = vor.u32 %v18970_v42, %v24442_v51  ;;  %v2139_v20 = vshll.u32 %v19169_v53, 16  ;;  %v1321_v42 = vsel %vm762_vm4, %v18206_v60, %v1209_v33  ;;  %v2144_v51 = vshrl.u32 %v19142_v21, 16 }
  0xa9   : > { %2161 = vrot.lane.b32.xlu1 %v2010_v61, %s18358_s21  ;;  %v19224_v61 = vrot.slane %v2151_v29, 1  ;;  %v2233_v33 = vrot.slane %v19152_v13, 1  ;;  %v2230_v60 = vrot.slane %v19169_v53, 1  ;;  %v24444_v29 = vrot.slane %v18875_v18, 1 }
  0xaa   : > { %v1289_v43 = vpop.permute.xlu0 %1288  ;;  %v1215_v62 = vpop.permute.xlu1 %1214  ;;  %v24445_v10 = vshrl.u32 %v18918_v26, 16  ;;  %v24477_v21 = vrot.slane %v19155_v48, 1 }
  0xab   : > { %v1353_v19 = vsel %vm795_vm5, %v1321_v42, %v1289_v43  ;;  %v2195_v24 = vsel %vm681_vm3, %v24444_v29, %v24443_v31  ;;  %v19245_v42 = vrot.slane %v2139_v20, 1  ;;  %v24446_v31 = vrot.slane %v18909_v63, 1 }
  0xac   : > { %17264 = vmatprep.mubr.msk.bf16.mxu0 %vm1381_vm6, %v1353_v19  ;;  %2159 = vrot.lane.b32.xlu0 %v1998_v14, %s18358_s21  ;;  %v2017_v14 = vor.u32 %v18998_v0, %v24445_v10  ;;  %v2034_v19 = vsel %vm456_vm2, %v2029_v44, %v18978_v5  ;;  %v24447_v29 = vrot.slane %v18882_v37, 1  ;;  %v24448_v44 = vshrl.u32 %v18924_v35, 16 }
  0xad   : > { %17265 = vmatmul.mubr.msk.bf16.gmra.mrb[8].mxu0 %vm1381_vm6, %v1355_v4  ;;  %2241 = vrot.lane.b32.xlu1 %v2198_v22, %s18357_s20  ;;  %v18207_v4 = vld [vmem:[%s18462_s19 + $0x60] sm:$0xff]   ;;  %v18208_v22 = vld [vmem:[%s18462_s19 + $0x54] sm:$0xff]   ;;  %v24449_v63 = vrot.slane %v18942_v12, 1  ;;  %v24450_v37 = vrot.slane %v18918_v26, 1  ;;  %v18210_v12 = vld [vmem:[%s18462_s19 + $0x6c] sm:$0xff]   ;;  %v2231_v13 = vsel %vm681_vm3, %v24477_v21, %v2230_v60 }
  0xae   : > { %v1213_v43 = vpop.permute.xlu0 %1212  ;;  %v1295_v59 = vpop.permute.xlu1 %1294  ;;  %v1327_v39 = vsel %vm762_vm4, %v18207_v4, %v1215_v62  ;;  %v2022_v18 = vsel %vm456_vm2, %v2017_v14, %v19010_v8  ;;  %v2204_v5 = vsel %vm681_vm3, %v24447_v29, %v24446_v31  ;;  %v2053_v62 = vor.u32 %v19012_v57, %v24448_v44 }
  0xaf   : > { %v1325_v0 = vsel %vm762_vm4, %v18208_v22, %v1213_v43  ;;  %v1359_v8 = vsel %vm795_vm5, %v1327_v39, %v1295_v59  ;;  %v2201_v57 = vsel %vm681_vm3, %v24450_v37, %v24449_v63  ;;  %v24451_v14 = vshrl.u32 %v18957_v30, 16  ;;  %v18209_v39 = vld [vmem:[%s18462_s19 + $0x78] sm:$0xff]   ;;  %v18211_v37 = vld [vmem:[%s18462_s19 + $0x90] sm:$0xff]  }
  0xb0   : > { %2239 = vrot.lane.b32.xlu0 %v2195_v24, %s18357_s20  ;;  %v2058_v59 = vsel %vm456_vm2, %v2053_v62, %v19017_v17  ;;  %v24454_v31 = vshrl.u32 %v18984_v52, 16  ;;  %v24457_v62 = vshrl.u32 %v19004_v58, 16 }
  0xb1   : > { %2165 = vrot.lane.b32.xlu1 %v2034_v19, %s18358_s21  ;;  %v2041_v43 = vor.u32 %v19045_v23, %v24451_v14  ;;  %v24452_v23 = vrot.slane %v18954_v56, 1  ;;  %v24456_v56 = vrot.slane %v18957_v30, 1 }
  0xb2   : > { %v1293_v20 = vpop.permute.xlu0 %1292  ;;  %v1219_v10 = vpop.permute.xlu1 %1218  ;;  %v2077_v29 = vor.u32 %v19091_v16, %v24454_v31 }
  0xb3   : > { %v1357_v24 = vsel %vm795_vm5, %v1325_v0, %v1293_v20  ;;  %v2046_v26 = vsel %vm456_vm2, %v2041_v43, %v19089_v6  ;;  %v24453_v20 = vrot.slane %v18924_v35, 1  ;;  %v24455_v35 = vrot.slane %v18995_v15, 1  ;;  %v18212_v15 = vld [vmem:[%s18462_s19 + $0x84] sm:$0xff]  }
  0xb4   : > { %17268 = vmatprep.mubr.msk.bf16.mxu0 %vm1381_vm6, %v1357_v24  ;;  %2163 = vrot.lane.b32.xlu0 %v2022_v18, %s18358_s21  ;;  %v1331_v18 = vsel %vm762_vm4, %v18209_v39, %v1219_v10  ;;  %v2065_v24 = vor.u32 %v19117_v2, %v24457_v62  ;;  %v24458_v2 = vrot.slane %v19021_v7, 1 }
  0xb5   : > { %17269 = vmatmul.mubr.msk.bf16.gmra.mrb[12].mxu0 %vm1381_vm6, %v1359_v8  ;;  %2245 = vrot.lane.b32.xlu1 %v2204_v5, %s18357_s20  ;;  %v2210_v17 = vsel %vm681_vm3, %v24453_v20, %v24452_v23  ;;  %v2207_v16 = vsel %vm681_vm3, %v24456_v56, %v24455_v35  ;;  %v2082_v8 = vsel %vm456_vm2, %v2077_v29, %v19115_v46  ;;  %v18214_v29 = vld [vmem:[%s18462_s19 + $0x9c] sm:$0xff]   ;;  %v24467_v35 = vshrl.u32 %v19095_v28, 16 }
  0xb6   : > { %v1217_v19 = vpop.permute.xlu0 %1216  ;;  %v1299_v4 = vpop.permute.xlu1 %1298  ;;  %v2070_v30 = vsel %vm456_vm2, %v2065_v24, %v19126_v38  ;;  %v24470_v24 = vshrl.u32 %v19121_v45, 16 }
  0xb7   : > { %v1329_v22 = vsel %vm762_vm4, %v18210_v12, %v1217_v19  ;;  %v1363_v6 = vsel %vm795_vm5, %v1331_v18, %v1299_v4  ;;  %v24459_v19 = vrot.slane %v18984_v52, 1  ;;  %v24461_v52 = vld [vmem:[#allocation7_spill] sm:$0xff]  ;;  %v24464_v12 = vshrl.u32 %v19066_v47, 16 }
  0xb8   : > { %2243 = vrot.lane.b32.xlu0 %v2201_v57, %s18357_s20  ;;  %v24462_v7 = vrot.slane %v24461_v52, 1  ;;  %v2125_v56 = vor.u32 %v19191_v32, %v24467_v35 }
  0xb9   : > { %2169 = vrot.lane.b32.xlu1 %v2058_v59, %s18358_s21  ;;  %v2216_v46 = vsel %vm681_vm3, %v24459_v19, %v24458_v2  ;;  %v24460_v59 = vshrl.u32 %v19036_v49, 16  ;;  %v24473_v2 = vrot.slane %v19095_v28, 1  ;;  %v24474_v28 = vld [vmem:[#allocation9_spill] sm:$0xff] }
  0xba   : > { %v1297_v0 = vpop.permute.xlu0 %1296  ;;  %v1223_v44 = vpop.permute.xlu1 %1222 }
  0xbb   : > { %v1361_v5 = vsel %vm795_vm5, %v1329_v22, %v1297_v0  ;;  %v1335_v57 = vsel %vm762_vm4, %v18211_v37, %v1223_v44  ;;  %v2101_v4 = vor.u32 %v19147_v9, %v24460_v59  ;;  %v2089_v22 = vor.u32 %v19164_v41, %v24464_v12 }
  0xbc   : > { %17272 = vmatprep.mubr.msk.bf16.mxu0 %vm1381_vm6, %v1361_v5  ;;  %2167 = vrot.lane.b32.xlu0 %v2046_v26, %s18358_s21  ;;  %v24463_v26 = vrot.slane %v19004_v58, 1  ;;  %v24465_v41 = vrot.slane %v19075_v36, 1  ;;  %v24469_v36 = vrot.slane %v19066_v47, 1 }
  0xbd   : > { %17273 = vmatmul.mubr.msk.bf16.gmra.mrb[16].mxu0 %vm1381_vm6, %v1363_v6  ;;  %2249 = vrot.lane.b32.xlu1 %v2210_v17, %s18357_s20  ;;  %v2106_v23 = vsel %vm456_vm2, %v2101_v4, %v19159_v11  ;;  %v18213_v17 = vld [vmem:[%s18462_s19 + $0xa8] sm:$0xff]   ;;  %v2094_v58 = vsel %vm456_vm2, %v2089_v22, %v19185_v3  ;;  %v24466_v6 = vrot.slane %v19036_v49, 1  ;;  %v24468_v49 = vrot.slane %v19082_v34, 1  ;;  %v18216_v34 = vld [vmem:[%s18462_s19 + $0xb4] sm:$0xff]  }
  0xbe   : > { %v1221_v10 = vpop.permute.xlu0 %1220  ;;  %v1303_v63 = vpop.permute.xlu1 %1302  ;;  %v2213_v9 = vsel %vm681_vm3, %v24463_v26, %v24462_v7  ;;  %v18217_v7 = vld [vmem:[%s18462_s19 + $0xc] sm:$0xff]  }
  0xbf   : > { %v1333_v14 = vsel %vm762_vm4, %v18212_v15, %v1221_v10  ;;  %v1367_v38 = vsel %vm795_vm5, %v1335_v57, %v1303_v63  ;;  %v2222_v11 = vsel %vm681_vm3, %v24466_v6, %v24465_v41  ;;  %v2219_v32 = vsel %vm681_vm3, %v24469_v36, %v24468_v49  ;;  %v24471_v63 = vld [vmem:[#allocation10_spill] sm:$0xff]  ;;  %v18222_v6 = vld [vmem:[%s18462_s19 + $0x30] sm:$0xff]  }
  0xc0   : > { %2247 = vrot.lane.b32.xlu0 %v2207_v16, %s18357_s20  ;;  %v2113_v10 = vor.u32 %v19206_v27, %v24470_v24  ;;  %v2130_v37 = vsel %vm456_vm2, %v2125_v56, %v24471_v63  ;;  %v24472_v27 = vrot.slane %v19110_v50, 1  ;;  %v24475_v50 = vrot.slane %v24474_v28, 1  ;;  %v18223_v36 = vld [vmem:[%s18462_s19 + $0x54] sm:$0xff]   ;;  %v18224_v24 = vld [vmem:[%s18462_s19 + $0x48] sm:$0xff]  }
  0xc1   : > { %2173 = vrot.lane.b32.xlu1 %v2082_v8, %s18358_s21 }
  0xc2   : > { %v1301_v43 = vpop.permute.xlu0 %1300  ;;  %v1227_v18 = vpop.permute.xlu1 %1226  ;;  %v2118_v47 = vsel %vm456_vm2, %v2113_v10, %v19213_v1  ;;  %v2228_v19 = vsel %vm681_vm3, %v24473_v2, %v24472_v27 }
  0xc3   : > { %v1365_v39 = vsel %vm795_vm5, %v1333_v14, %v1301_v43  ;;  %v1339_v31 = vsel %vm762_vm4, %v18213_v17, %v1227_v18  ;;  %v18220_v17 = vld [vmem:[%s18462_s19 + $0x18] sm:$0xff]  }
  0xc4   : > { %17276 = vmatprep.mubr.msk.bf16.mxu0 %vm1381_vm6, %v1365_v39  ;;  %2171 = vrot.lane.b32.xlu0 %v2070_v30, %s18358_s21  ;;  %v18215_v30 = vld [vmem:[%s18462_s19 + $0xc0] sm:$0xff]   ;;  %v24476_v39 = vrot.slane %v19121_v45, 1 }
  0xc5   : > { %17277 = vmatmul.mubr.msk.bf16.gmra.mrb[20].mxu0 %vm1381_vm6, %v1367_v38  ;;  %2253 = vrot.lane.b32.xlu1 %v2216_v46, %s18357_s20  ;;  %v2149_v46 = vor.u32 %v19220_v25, %v2144_v51  ;;  %v2137_v51 = vor.u32 %v19226_v54, %v2132_v40 }
  0xc6   : > { %v1225_v0 = vpop.permute.xlu0 %1224  ;;  %v1307_v20 = vpop.permute.xlu1 %1306  ;;  %v2225_v25 = vsel %vm681_vm3, %v24476_v39, %v24475_v50  ;;  %v18228_v50 = vld [vmem:[%s18462_s19 + $0x78] sm:$0xff]  }
  0xc7   : > { %v1337_v5 = vsel %vm762_vm4, %v18214_v29, %v1225_v0  ;;  %v1371_v3 = vsel %vm795_vm5, %v1339_v31, %v1307_v20  ;;  %v2154_v38 = vsel %vm456_vm2, %v2149_v46, %v19224_v61  ;;  %v2142_v45 = vsel %vm456_vm2, %v2137_v51, %v19245_v42  ;;  %vm19604_vm2 = vmand %vm2767_vm8, %vm2768_vm11 }
  0xc8   : > { %2251 = vrot.lane.b32.xlu0 %v2213_v9, %s18357_s20  ;;  %v18218_v9 = vld [vmem:[%s18462_s19] sm:$0xff]   ;;  %v2234_v61 = vsel %vm681_vm3, %v2232_v55, %v2233_v33  ;;  %v24478_v55 = vld [vmem:[#allocation8_spill] sm:$0xff]  ;;  %vm19611_vm3 = vmand %vm2887_vm13, %vm2888_vm14  ;;  %vm2994_vm8 = vsmask.f32 7946  ;;  %vm3087_vm11 = vsmask.f32 7950 }
  0xc9   : > { %2177 = vrot.lane.b32.xlu1 %v2106_v23, %s18358_s21  ;;  %v18219_v23 = vld [vmem:[%s18462_s19 + $0x24] sm:$0xff]   ;;  %vm19667_vm14 = vmand %vm2794_vm9, %vm2837_vm12 }
  0xca   : > { %v1305_v44 = vpop.permute.xlu0 %1304  ;;  %v1231_v62 = vpop.permute.xlu1 %1230  ;;  %vm19683_vm9 = vmand %vm2887_vm13, %vm2994_vm8  ;;  %vm4992_vm13 = vcmask 1046532  }
  0xcb   : > { %v1369_v16 = vsel %vm795_vm5, %v1337_v5, %v1305_v44  ;;  %v1343_v15 = vsel %vm762_vm4, %v18215_v30, %v1231_v62  ;;  %v18221_v44 = vld [vmem:[%s18462_s19 + $0x3c] sm:$0xff]   ;;  %vm19701_vm12 = vmand %vm3044_vm0, %vm3087_vm11 }
  0xcc   : > { %17280 = vmatprep.mubr.msk.bf16.mxu0 %vm1381_vm6, %v1369_v16  ;;  %2175 = vrot.lane.b32.xlu0 %v2094_v58, %s18358_s21 }
  0xcd   : > { %17281 = vmatmul.mubr.msk.bf16.gmra.mrb[24].mxu0 %vm1381_vm6, %v1371_v3  ;;  %2257 = vrot.lane.b32.xlu1 %v2222_v11, %s18357_s20 }
  0xce   : > { %v1229_v8 = vpop.permute.xlu0 %1228  ;;  %v1311_v57 = vpop.permute.xlu1 %1310 }
  0xcf   : > { %v1341_v14 = vsel %vm762_vm4, %v18216_v34, %v1229_v8  ;;  %v1375_v1 = vsel %vm795_vm5, %v1343_v15, %v1311_v57 }
  0xd0   : > { %2255 = vrot.lane.b32.xlu0 %v2219_v32, %s18357_s20 }
  0xd1   : > { %2181 = vrot.lane.b32.xlu1 %v2130_v37, %s18358_s21 }
  0xd2   : > { %v1309_v43 = vpop.permute.xlu0 %1308  ;;  %v652_v4 = vpop.permute.xlu1 %651 }
  0xd3   : > { %v1373_v59 = vsel %vm795_vm5, %v1341_v14, %v1309_v43  ;;  %v766_v26 = vsel %vm762_vm4, %v18217_v7, %v652_v4  ;;  %v18226_v14 = vld [vmem:[%s18462_s19 + $0x60] sm:$0xff]  }
  0xd4   : > { %17284 = vmatprep.mubr.msk.bf16.mxu0 %vm1381_vm6, %v1373_v59  ;;  %2179 = vrot.lane.b32.xlu0 %v2118_v47, %s18358_s21  ;;  %v18225_v47 = vld [vmem:[%s18462_s19 + $0x6c] sm:$0xff]  }
  0xd5   : > { %17285 = vmatmul.mubr.msk.bf16.gmra.mrb[28].mxu0 %vm1381_vm6, %v1375_v1  ;;  %2261 = vrot.lane.b32.xlu1 %v2228_v19, %s18357_s20  ;;  %v18227_v1 = vld [vmem:[%s18462_s19 + $0x84] sm:$0xff]  }
  0xd6   : > { %v650_v18 = vpop.permute.xlu0 %649  ;;  %v733_v52 = vpop.permute.xlu1 %732 }
  0xd7   : > { %v764_v12 = vsel %vm762_vm4, %v18218_v9, %v650_v18  ;;  %v799_v0 = vsel %vm795_vm5, %v766_v26, %v733_v52  ;;  %v18229_v26 = vld [vmem:[%s18462_s19 + $0x9c] sm:$0xff]   ;;  %v18230_v9 = vld [vmem:[%s18462_s19 + $0x90] sm:$0xff]  }
  0xd8   : > { %2259 = vrot.lane.b32.xlu0 %v2225_v25, %s18357_s20 }
  0xd9   : > { %2185 = vrot.lane.b32.xlu1 %v2154_v38, %s18358_s21 }
  0xda   : > { %v731_v40 = vpop.permute.xlu0 %730  ;;  %v656_v22 = vpop.permute.xlu1 %655 }
  0xdb   : > { %v797_v54 = vsel %vm795_vm5, %v764_v12, %v731_v40  ;;  %v770_v20 = vsel %vm762_vm4, %v18219_v23, %v656_v22 }
  0xdc   : > { %2183 = vrot.lane.b32.xlu0 %v2142_v45, %s18358_s21  ;;  %17290 = vmatprep.mubr.msk.bf16.mxu0 %vm1381_vm6, %v797_v54 }
  0xdd   : > { %17291 = vmatmul.mubr.msk.bf16.vlgmr.msra.gmra.mrb[0].mxu0 %vm1381_vm6, %v799_v0  ;;  %2265 = vrot.lane.b32.xlu1 %v2234_v61, %s18357_s20 }
  0xde   : > { %17323 = vmatpush3.bf16.msra.mxu0 %v24478_v55  ;;  %v654_v33 = vpop.permute.xlu0 %653  ;;  %v737_v42 = vpop.permute.xlu1 %736 }
  0xdf   : > { %v768_v31 = vsel %vm762_vm4, %v18220_v17, %v654_v33  ;;  %v803_v60 = vsel %vm795_vm5, %v770_v20, %v737_v42  ;;  %v18232_v33 = vld [vmem:[%s18462_s19 + $0xa8] sm:$0xff]  }
  0xe0   : > { %2263 = vrot.lane.b32.xlu0 %v2231_v13, %s18357_s20  ;;  %v18231_v13 = vld [vmem:[%s18462_s19 + $0xb4] sm:$0xff]  }
  0xe2   : > { %v735_v58 = vpop.permute.xlu0 %734  ;;  %v660_v48 = vpop.permute.xlu1 %659 }
  0xe3   : > { %v801_v53 = vsel %vm795_vm5, %v768_v31, %v735_v58  ;;  %v774_v41 = vsel %vm762_vm4, %v18221_v44, %v660_v48  ;;  %v18233_v48 = vld [vmem:[%s18462_s19 + $0x24] sm:$0xff]  }
  0xe4   : > { %17294 = vmatprep.mubr.msk.bf16.mxu0 %vm1381_vm6, %v801_v53 }
  0xe5   : > { %17295 = vmatmul.mubr.msk.bf16.gmra.mrb[4].mxu0 %vm1381_vm6, %v803_v60 }
  0xe6   : > { %v658_v29 = vpop.permute.xlu0 %657  ;;  %v741_v5 = vpop.permute.xlu1 %740 }
  0xe7   : > { %v772_v11 = vsel %vm762_vm4, %v18222_v6, %v658_v29  ;;  %v807_v62 = vsel %vm795_vm5, %v774_v41, %v741_v5  ;;  %v18234_v29 = vld [vmem:[%s18462_s19 + $0x18] sm:$0xff]  }
  0xea   : > { %v739_v35 = vpop.permute.xlu0 %738  ;;  %v664_v16 = vpop.permute.xlu1 %663 }
  0xeb   : > { %v805_v56 = vsel %vm795_vm5, %v772_v11, %v739_v35  ;;  %v778_v32 = vsel %vm762_vm4, %v18223_v36, %v664_v16  ;;  %v18235_v16 = vld [vmem:[%s18462_s19 + $0x3c] sm:$0xff]  }
  0xec   : > { %17298 = vmatprep.mubr.msk.bf16.mxu0 %vm1381_vm6, %v805_v56 }
  0xed   : > { %17299 = vmatmul.mubr.msk.bf16.gmra.mrb[8].mxu0 %vm1381_vm6, %v807_v62 }
  0xee   : > { %v662_v3 = vpop.permute.xlu0 %661  ;;  %v745_v49 = vpop.permute.xlu1 %744 }
  0xef   : > { %v776_v10 = vsel %vm762_vm4, %v18224_v24, %v662_v3  ;;  %v811_v57 = vsel %vm795_vm5, %v778_v32, %v745_v49  ;;  %v18236_v3 = vld [vmem:[%s18462_s19 + $0x30] sm:$0xff]  }
  0xf2   : > { %v743_v8 = vpop.permute.xlu0 %742  ;;  %v668_v37 = vpop.permute.xlu1 %667 }
  0xf3   : > { %v809_v63 = vsel %vm795_vm5, %v776_v10, %v743_v8  ;;  %v782_v34 = vsel %vm762_vm4, %v18225_v47, %v668_v37  ;;  %v18237_v37 = vld [vmem:[%s18462_s19 + $0x54] sm:$0xff]  }
  0xf4   : > { %17302 = vmatprep.mubr.msk.bf16.mxu0 %vm1381_vm6, %v809_v63 }
  0xf5   : > { %17303 = vmatmul.mubr.msk.bf16.gmra.mrb[12].mxu0 %vm1381_vm6, %v811_v57 }
  0xf6   : > { %v666_v30 = vpop.permute.xlu0 %665  ;;  %v749_v15 = vpop.permute.xlu1 %748 }
  0xf7   : > { %v780_v43 = vsel %vm762_vm4, %v18226_v14, %v666_v30  ;;  %v815_v46 = vsel %vm795_vm5, %v782_v34, %v749_v15  ;;  %v18238_v30 = vld [vmem:[%s18462_s19 + $0x48] sm:$0xff]  }
  0xfa   : > { %v747_v27 = vpop.permute.xlu0 %746  ;;  %v672_v19 = vpop.permute.xlu1 %671 }
  0xfb   : > { %v813_v2 = vsel %vm795_vm5, %v780_v43, %v747_v27  ;;  %v786_v28 = vsel %vm762_vm4, %v18227_v1, %v672_v19  ;;  %v18239_v19 = vld [vmem:[%s18462_s19 + $0x6c] sm:$0xff]  }
  0xfc   : > { %17306 = vmatprep.mubr.msk.bf16.mxu0 %vm1381_vm6, %v813_v2 }
  0xfd   : > { %17307 = vmatmul.mubr.msk.bf16.gmra.mrb[16].mxu0 %vm1381_vm6, %v815_v46 }
  0xfe   : > { %v670_v59 = vpop.permute.xlu0 %669  ;;  %v753_v4 = vpop.permute.xlu1 %752 }
  0xff   : > { %v784_v39 = vsel %vm762_vm4, %v18228_v50, %v670_v59  ;;  %v819_v38 = vsel %vm795_vm5, %v786_v28, %v753_v4  ;;  %v18240_v59 = vld [vmem:[%s18462_s19 + $0x60] sm:$0xff]  }
 0x102   : > { %v751_v25 = vpop.permute.xlu0 %750  ;;  %v676_v18 = vpop.permute.xlu1 %675 }
 0x103   : > { %v817_v51 = vsel %vm795_vm5, %v784_v39, %v751_v25  ;;  %v790_v45 = vsel %vm762_vm4, %v18229_v26, %v676_v18  ;;  %v18241_v18 = vld [vmem:[%s18462_s19 + $0x84] sm:$0xff]  }
 0x104   : > { %17310 = vmatprep.mubr.msk.bf16.mxu0 %vm1381_vm6, %v817_v51 }
 0x105   : > { %17311 = vmatmul.mubr.msk.bf16.gmra.mrb[20].mxu0 %vm1381_vm6, %v819_v38 }
 0x106   : > { %v674_v52 = vpop.permute.xlu0 %673  ;;  %v757_v7 = vpop.permute.xlu1 %756 }
 0x107   : > { %v788_v12 = vsel %vm762_vm4, %v18230_v9, %v674_v52  ;;  %v823_v22 = vsel %vm795_vm5, %v790_v45, %v757_v7  ;;  %v18242_v52 = vld [vmem:[%s18462_s19 + $0x78] sm:$0xff]  }
 0x10a   : > { %v755_v40 = vpop.permute.xlu0 %754  ;;  %v680_v54 = vpop.permute.xlu1 %679 }
 0x10b   : > { %v821_v61 = vsel %vm795_vm5, %v788_v12, %v755_v40  ;;  %v794_v55 = vsel %vm762_vm4, %v18231_v13, %v680_v54  ;;  %v18243_v54 = vld [vmem:[%s18462_s19 + $0x9c] sm:$0xff]  }
 0x10c   : > { %17314 = vmatprep.mubr.msk.bf16.mxu0 %vm1381_vm6, %v821_v61 }
 0x10d   : > { %17315 = vmatmul.mubr.msk.bf16.gmra.mrb[24].mxu0 %vm1381_vm6, %v823_v22 }
 0x10e   : > { %v678_v0 = vpop.permute.xlu0 %677  ;;  %v761_v21 = vpop.permute.xlu1 %760 }
 0x10f   : > { %v792_v42 = vsel %vm762_vm4, %v18232_v33, %v678_v0  ;;  %v827_v31 = vsel %vm795_vm5, %v794_v55, %v761_v21  ;;  %v18244_v0 = vld [vmem:[%s18462_s19 + $0x90] sm:$0xff]  }
 0x112   : > { %v759_v23 = vpop.permute.xlu0 %758  ;;  %v2158_v17 = vpop.permute.xlu1 %2157 }
 0x113   : > { %v825_v20 = vsel %vm795_vm5, %v792_v42, %v759_v23  ;;  %v2270_v60 = vsel %vm762_vm4, %v18233_v48, %v2158_v17  ;;  %v18245_v17 = vld [vmem:[%s18462_s19 + $0xb4] sm:$0xff]  }
 0x114   : > { %17318 = vmatprep.mubr.msk.bf16.mxu0 %vm1381_vm6, %v825_v20 }
 0x115   : > { %17319 = vmatmul.mubr.msk.bf16.gmra.mrb[28].mxu0 %vm1381_vm6, %v827_v31 }
 0x116   : > { %v2156_v58 = vpop.permute.xlu0 %2155 }
 0x117   : > { %v2238_v53 = vpop.permute.xlu1 %2237  ;;  %v2268_v5 = vsel %vm762_vm4, %v18234_v29, %v2156_v58  ;;  %v18246_v58 = vld [vmem:[%s18462_s19 + $0xa8] sm:$0xff]  }
 0x118   : > { %v2302_v11 = vsel %vm795_vm5, %v2270_v60, %v2238_v53 }
 0x11a   : > { %v2236_v44 = vpop.permute.xlu0 %2235 }
 0x11b   : > { %v2300_v41 = vsel %vm795_vm5, %v2268_v5, %v2236_v44  ;;  %v2162_v6 = vpop.permute.xlu1 %2161 }
 0x11c   : > { %17324 = vmatprep.mubr.msk.bf16.mxu0 %vm1381_vm6, %v2300_v41  ;;  %v2274_v62 = vsel %vm762_vm4, %v18235_v16, %v2162_v6  ;;  %v18247_v41 = vld [vmem:[%s18462_s19 + $0xcc] sm:$0xff]  }
 0x11d   : > { %17325 = vmatmul.mubr.msk.bf16.vlgmr.msra.gmra.mrb[0].mxu0 %vm1381_vm6, %v2302_v11 }
 0x11e   : > { %v2160_v35 = vpop.permute.xlu0 %2159 }
 0x11f   : > { %v2242_v56 = vpop.permute.xlu1 %2241  ;;  %v2272_v49 = vsel %vm762_vm4, %v18236_v3, %v2160_v35  ;;  %v18248_v35 = vld [vmem:[%s18462_s19 + $0xc0] sm:$0xff]   ;;  %s18361_s19 = smov [#allocation4]  }
 0x120   : > { %v2306_v10 = vsel %vm795_vm5, %v2274_v62, %v2242_v56  ;;  %s18296_s20 = sshll.u32 %s18361_s19, 4  ;;  %s18297_s20 = int_to_ptr.vmem [resolvable:$false] %s18296_s20 }
 0x121   : > { %s18298_s21 = scalar_lea.vmem %s18297_s20, 512  ;;  %p18299_p0 = scmp.lt.s32.totalorder %s24252_s13, %s18297_s20 }
 0x122   : > { %v2240_v36 = vpop.permute.xlu0 %2239  ;;  %p18300_p1 = scmp.lt.s32.totalorder %s18298_s21, %s18292_s28 }
 0x123   : > { %v2304_v32 = vsel %vm795_vm5, %v2272_v49, %v2240_v36  ;;  %v2166_v24 = vpop.permute.xlu1 %2165  ;;  %v18359_v49 = vmov 0   ;;  %v19568_v36 = vld [vmem:[%s24305_s2] ss:$0 sm:$0xff] }
 0x124   : > { %17328 = vmatprep.mubr.msk.bf16.mxu0 %vm1381_vm6, %v2304_v32  ;;  %v2278_v57 = vsel %vm762_vm4, %v18237_v37, %v2166_v24  ;;  %2637 = vst.msk [vmem:[#allocation2 + $0x8] sm:$0xff] %vm2635_vm7, %v18359_v49  ;;  %2636 = vst.msk [vmem:[#allocation2] sm:$0xff] %vm2635_vm7, %v18359_v49  ;;  %p18301_p2 = por %p18300_p1, %p18299_p0 }
 0x125   : > { %17329 = vmatmul.mubr.msk.bf16.gmra.mrb[4].mxu0 %vm1381_vm6, %v2306_v10  ;;  %2638 = vst.msk [vmem:[#allocation2 + $0x10] sm:$0xff] %vm2635_vm7, %v18359_v49  ;;  %2639 = vst.msk [vmem:[#allocation2 + $0x18] sm:$0xff] %vm2635_vm7, %v18359_v49 }
 0x126   : > { %v2164_v8 = vpop.permute.xlu0 %2163  ;;  %2640 = vst.msk [vmem:[#allocation2 + $0x20] sm:$0xff] %vm2635_vm7, %v18359_v49  ;;  %2641 = vst.msk [vmem:[#allocation2 + $0x28] sm:$0xff] %vm2635_vm7, %v18359_v49  ;;  %p18302_p3 = pnand %p18301_p2, %p18295_p13 }
 0x127   : > { %v2246_v63 = vpop.permute.xlu1 %2245  ;;  %v2276_v15 = vsel %vm762_vm4, %v18238_v30, %v2164_v8  ;;  %2642 = vst.msk [vmem:[#allocation2 + $0x30] sm:$0xff] %vm2635_vm7, %v18359_v49  ;;  %2643 = vst.msk [vmem:[#allocation2 + $0x38] sm:$0xff] %vm2635_vm7, %v18359_v49 }
 0x128   : > { %v2310_v43 = vsel %vm795_vm5, %v2278_v57, %v2246_v63  ;;  %2644 = vst.msk [vmem:[#allocation2 + $0x40] sm:$0xff] %vm2635_vm7, %v18359_v49  ;;  %2645 = vst.msk [vmem:[#allocation2 + $0x48] sm:$0xff] %vm2635_vm7, %v18359_v49 }
 0x129   : > { %4350 = vst [vmem:[#allocation3] sm:$0xff] %v18359_v49  ;;  %4356 = vst [vmem:[#allocation3 + $0x30] sm:$0xff] %v18359_v49 }
 0x12a   : > { %v2244_v47 = vpop.permute.xlu0 %2243  ;;  %4357 = vst [vmem:[#allocation3 + $0x38] sm:$0xff] %v18359_v49  ;;  %4358 = vst [vmem:[#allocation3 + $0x40] sm:$0xff] %v18359_v49 }
 0x12b   : > { %v2308_v34 = vsel %vm795_vm5, %v2276_v15, %v2244_v47  ;;  %v2170_v14 = vpop.permute.xlu1 %2169  ;;  %4359 = vst [vmem:[#allocation3 + $0x48] sm:$0xff] %v18359_v49  ;;  %4360 = vst [vmem:[#allocation3 + $0x50] sm:$0xff] %v18359_v49 }
 0x12c   : > { %17332 = vmatprep.mubr.msk.bf16.mxu0 %vm1381_vm6, %v2308_v34  ;;  %v2282_v46 = vsel %vm762_vm4, %v18239_v19, %v2170_v14  ;;  %4361 = vst [vmem:[#allocation3 + $0x58] sm:$0xff] %v18359_v49  ;;  %4362 = vst [vmem:[#allocation3 + $0x60] sm:$0xff] %v18359_v49 }
 0x12d   : > { %17333 = vmatmul.mubr.msk.bf16.gmra.mrb[8].mxu0 %vm1381_vm6, %v2310_v43  ;;  %4363 = vst [vmem:[#allocation3 + $0x68] sm:$0xff] %v18359_v49  ;;  %4364 = vst [vmem:[#allocation3 + $0x70] sm:$0xff] %v18359_v49 }
 0x12e   : > { %v2168_v27 = vpop.permute.xlu0 %2167  ;;  %4365 = vst [vmem:[#allocation3 + $0x78] sm:$0xff] %v18359_v49  ;;  %4366 = vst [vmem:[#allocation3 + $0x80] sm:$0xff] %v18359_v49 }
 0x12f   : > { %v2250_v2 = vpop.permute.xlu1 %2249  ;;  %v2280_v4 = vsel %vm762_vm4, %v18240_v59, %v2168_v27  ;;  %4367 = vst [vmem:[#allocation3 + $0x88] sm:$0xff] %v18359_v49  ;;  %4368 = vst [vmem:[#allocation3 + $0x90] sm:$0xff] %v18359_v49  ;;  %v17599_v59 = vld [vmem:[%s24306_s3 + $0xc0] ss:$8 sps:$4 sm:$0xff]  }
 0x130   : > { %v2314_v39 = vsel %vm795_vm5, %v2282_v46, %v2250_v2  ;;  %4369 = vst [vmem:[#allocation3 + $0x98] sm:$0xff] %v18359_v49  ;;  %4370 = vst [vmem:[#allocation3 + $0xa0] sm:$0xff] %v18359_v49  ;;  %v17597_v46 = vld [vmem:[%s24306_s3 + $0xc4] ss:$8 sps:$4 sm:$0xff]  }
 0x131   : > { %4371 = vst [vmem:[#allocation3 + $0xa8] sm:$0xff] %v18359_v49  ;;  %3621 = vmatprep.subr.bf16.mxu1 %v17597_v46  ;;  %v17608_v46 = vld [vmem:[%s24306_s3 + $0xf0] ss:$8 sps:$4 sm:$0xff]  }
 0x132   : > { %v2248_v1 = vpop.permute.xlu0 %2247  ;;  %3622 = vmatpush1.bf16.msra.mxu1 %v17599_v59  ;;  %v17609_v59 = vld [vmem:[%s24306_s3 + $0x104] ss:$8 sps:$4 sm:$0xff]  }
 0x133   : > { %v2312_v28 = vsel %vm795_vm5, %v2280_v4, %v2248_v1  ;;  %v2174_v50 = vpop.permute.xlu1 %2173 }
 0x134   : > { %17336 = vmatprep.mubr.msk.bf16.mxu0 %vm1381_vm6, %v2312_v28  ;;  %v2286_v38 = vsel %vm762_vm4, %v18241_v18, %v2174_v50 }
 0x135   : > { %17337 = vmatmul.mubr.msk.bf16.gmra.mrb[12].mxu0 %vm1381_vm6, %v2314_v39 }
 0x136   : > { %v2172_v25 = vpop.permute.xlu0 %2171 }
 0x137   : > { %v2254_v51 = vpop.permute.xlu1 %2253  ;;  %v2284_v7 = vsel %vm762_vm4, %v18242_v52, %v2172_v25 }
 0x138   : > { %v2318_v12 = vsel %vm795_vm5, %v2286_v38, %v2254_v51  ;;  %v2797_v51 = vld [vmem:[#allocation2 + $0x8] sm:$0x2] }
 0x13a   : > { %v2252_v26 = vpop.permute.xlu0 %2251 }
 0x13b   : > { %v2316_v45 = vsel %vm795_vm5, %v2284_v7, %v2252_v26  ;;  %v2178_v9 = vpop.permute.xlu1 %2177 }
 0x13c   : > { %17340 = vmatprep.mubr.msk.bf16.mxu0 %vm1381_vm6, %v2316_v45  ;;  %v2290_v22 = vsel %vm762_vm4, %v18243_v54, %v2178_v9 }
 0x13d   : > { %17341 = vmatmul.mubr.msk.bf16.gmra.mrb[16].mxu0 %vm1381_vm6, %v2318_v12  ;;  %v17600_v12 = vld [vmem:[%s24306_s3 + $0xd4] ss:$8 sps:$4 sm:$0xff]  }
 0x13e   : > { %v2176_v40 = vpop.permute.xlu0 %2175  ;;  %3623 = vmatprep.subr.bf16.mxu1 %v17600_v12 }
 0x13f   : > { %v2258_v61 = vpop.permute.xlu1 %2257  ;;  %v2288_v21 = vsel %vm762_vm4, %v18244_v0, %v2176_v40 }
 0x140   : > { %v2322_v42 = vsel %vm795_vm5, %v2290_v22, %v2258_v61  ;;  %v17602_v22 = vld [vmem:[%s24306_s3 + $0xd0] ss:$8 sps:$4 sm:$0xff]  }
 0x141   : > { %3624 = vmatpush1.bf16.msra.mxu1 %v17602_v22 }
 0x142   : > { %v2256_v13 = vpop.permute.xlu0 %2255 }
 0x143   : > { %v2320_v55 = vsel %vm795_vm5, %v2288_v21, %v2256_v13  ;;  %v2182_v33 = vpop.permute.xlu1 %2181  ;;  %v2770_v13 = vld [vmem:[#allocation2 + $0x8] sm:$0x1] }
 0x144   : > { %17344 = vmatprep.mubr.msk.bf16.mxu0 %vm1381_vm6, %v2320_v55  ;;  %v2294_v31 = vsel %vm762_vm4, %v18245_v17, %v2182_v33  ;;  %v2890_v55 = vld [vmem:[#allocation2 + $0x8] sm:$0x4] }
 0x145   : > { %17345 = vmatmul.mubr.msk.bf16.gmra.mrb[20].mxu0 %vm1381_vm6, %v2322_v42 }
 0x146   : > { %v2180_v23 = vpop.permute.xlu0 %2179 }
 0x147   : > { %v2262_v20 = vpop.permute.xlu1 %2261  ;;  %v2292_v53 = vsel %vm762_vm4, %v18246_v58, %v2180_v23 }
 0x148   : > { %v2326_v5 = vsel %vm795_vm5, %v2294_v31, %v2262_v20 }
 0x14a   : > { %v2260_v48 = vpop.permute.xlu0 %2259 }
 0x14b   : > { %v2324_v60 = vsel %vm795_vm5, %v2292_v53, %v2260_v48  ;;  %v2186_v29 = vpop.permute.xlu1 %2185 }
 0x14c   : > { %17348 = vmatprep.mubr.msk.bf16.mxu0 %vm1381_vm6, %v2324_v60  ;;  %v2298_v6 = vsel %vm762_vm4, %v18247_v41, %v2186_v29  ;;  %v17603_v29 = vld [vmem:[%s24306_s3 + $0xe4] ss:$8 sps:$4 sm:$0xff]   ;;  %v3047_v41 = vld [vmem:[#allocation2 + $0x8] sm:$0x8] }
 0x14d   : > { %17349 = vmatmul.mubr.msk.bf16.gmra.mrb[24].mxu0 %vm1381_vm6, %v2326_v5  ;;  %v17605_v5 = vld [vmem:[%s24306_s3 + $0xe0] ss:$8 sps:$4 sm:$0xff]   ;;  %3625 = vmatprep.subr.bf16.mxu1 %v17603_v29 }
 0x14e   : > { %v2184_v44 = vpop.permute.xlu0 %2183  ;;  %3626 = vmatpush1.bf16.msra.mxu1 %v17605_v5 }
 0x14f   : > { %v2266_v11 = vpop.permute.xlu1 %2265  ;;  %v2296_v56 = vsel %vm762_vm4, %v18248_v35, %v2184_v44  ;;  %vm3129_vm4 = vcmask 520196  }
 0x150   : > { %v2330_v3 = vsel %vm795_vm5, %v2298_v6, %v2266_v11 }
 0x152   : > { %v2264_v16 = vpop.permute.xlu0 %2263 }
 0x153   : > { %v2328_v62 = vsel %vm795_vm5, %v2296_v56, %v2264_v16  ;;  %vm3130_vm5 = vsmask.f32 4352 }
 0x154   : > { %17352 = vmatprep.mubr.msk.bf16.mxu0 %vm1381_vm6, %v2328_v62  ;;  %vm19644_vm10 = vmand %vm3129_vm4, %vm3130_vm5  ;;  %vm8136_vm4 = vsmask.f32 7440 }
 0x155   : > { %17353 = vmatmul.mubr.msk.bf16.gmra.mrb[28].mxu0 %vm1381_vm6, %v2330_v3  ;;  %vm19631_vm6 = vmand %vm3044_vm0, %vm3045_vm1  ;;  %vm4539_vm0 = vcmask 1045505  }
 0x156   : > { %vm21618_vm5 = vmor %vm3045_vm1, %vm8136_vm4 }
 0x1f0   : > { %v17326_v32 = vpop.f32.mrb[0].mxu0 }
 0x1f1   : > { %v2573_v24 = vadd.f32 %v17326_v32, %v19568_v36  ;;  %v2405_v10 = vpop.f32.mrb[1].mxu0  ;;  %v3132_v32 = vld [vmem:[#allocation2 + $0x8] sm:$0x10] }
 0x1f2   : > { %v2571_v8 = vadd.f32 %v19568_v36, %v2405_v10  ;;  %v17327_v63 = vpop.f32.mrb[2].mxu0 }
 0x1f3   : > { %v2605_v37 = vmax.f32 %v2573_v24, 0.0  ;;  %v2574_v57 = vadd.f32 %v17327_v63, %v19568_v36  ;;  %v2408_v30 = vpop.f32.mrb[3].mxu0 }
 0x1f4   : > { %v2603_v15 = vmax.f32 %v2571_v8, 0.0  ;;  %v2572_v47 = vadd.f32 %v19568_v36, %v2408_v30  ;;  %v2800_v30 = vld [vmem:[#allocation2 + $0x10] sm:$0x2] }
 0x1f5   : > { %v2647_v34 = vsel %vm2635_vm7, %v2605_v37, -inf  ;;  %v2606_v14 = vmax.f32 %v2574_v57, 0.0 }
 0x1f6   : > { %v2646_v43 = vsel %vm2635_vm7, %v2603_v15, -inf  ;;  %v2604_v27 = vmax.f32 %v2572_v47, 0.0 }
 0x1f7   : > { %v2648_v2 = vmax.f32 %v2646_v43, %v2647_v34  ;;  %v2650_v19 = vsel %vm2635_vm7, %v2606_v14, -inf  ;;  %v17606_v14 = vld [vmem:[%s24306_s3 + $0xf4] ss:$8 sps:$4 sm:$0xff]  }
 0x1f8   : > { %v2649_v4 = vsel %vm2635_vm7, %v2604_v27, -inf  ;;  %v17330_v1 = vpop.f32.mrb[4].mxu0  ;;  %3627 = vmatprep.subr.bf16.mxu1 %v17606_v14 }
 0x1f9   : > { %v2702_v28 = vrot.slane %v2648_v2, 1  ;;  %v2651_v50 = vmax.f32 %v2649_v4, %v2650_v19  ;;  %v2577_v39 = vadd.f32 %v17330_v1, %v19568_v36  ;;  %v2421_v25 = vpop.f32.mrb[5].mxu0  ;;  %v2773_v1 = vld [vmem:[#allocation2 + $0x10] sm:$0x1]  ;;  %3628 = vmatpush1.bf16.msra.mxu1 %v17608_v46 }
 0x1fa   : > { %v2575_v18 = vadd.f32 %v19568_v36, %v2421_v25  ;;  %v17331_v38 = vpop.f32.mrb[6].mxu0  ;;  %3629 = vmatprep.subr.bf16.mxu1 %v17609_v59 }
 0x1fb   : > { %v2718_v52 = vmax.f32 %v2648_v2, %v2702_v28  ;;  %v2922_v7 = vrot.slane %v2651_v50, 1  ;;  %v2609_v26 = vmax.f32 %v2577_v39, 0.0  ;;  %v2578_v45 = vadd.f32 %v17331_v38, %v19568_v36  ;;  %v2424_v9 = vpop.f32.mrb[7].mxu0  ;;  %v2893_v28 = vld [vmem:[#allocation2 + $0x10] sm:$0x4] }
 0x1fc   : > { %v2607_v61 = vmax.f32 %v2575_v18, 0.0  ;;  %v2576_v54 = vadd.f32 %v19568_v36, %v2424_v9 }
 0x1fd   : > { %v19600_v0 = vpack.c.bf16 %v2718_v52, %v2718_v52  ;;  %v2938_v33 = vmax.f32 %v2651_v50, %v2922_v7  ;;  %v2653_v42 = vsel %vm2635_vm7, %v2609_v26, -inf  ;;  %v2610_v23 = vmax.f32 %v2578_v45, 0.0  ;;  %v17611_v26 = vld [vmem:[%s24306_s3 + $0x100] ss:$8 sps:$4 sm:$0xff]   ;;  %v17612_v45 = vld [vmem:[%s24306_s3 + $0x114] ss:$8 sps:$4 sm:$0xff]  }
 0x1fe   : > { %v2652_v17 = vsel %vm2635_vm7, %v2607_v61, -inf  ;;  %v2608_v31 = vmax.f32 %v2576_v54, 0.0  ;;  %3630 = vmatpush1.bf16.msra.mxu1 %v17611_v26 }
 0x1ff   : > { %v2735_v58 = vshll.u32 %v19600_v0, 16  ;;  %v2798_v53 = vsel %vm19592_vm15, %v19600_v0, %v2797_v51  ;;  %v2871_v48 = vrot.slane %v19600_v0, 1  ;;  %v19621_v60 = vpack.c.bf16 %v2938_v33, %v2938_v33  ;;  %3631 = vmatprep.subr.bf16.mxu1 %v17612_v45 }
 0x200   : > { %2799 = vst [vmem:[#allocation2 + $0x8] sm:$0x2] %v2798_v53  ;;  %v2654_v6 = vmax.f32 %v2652_v17, %v2653_v42  ;;  %v2656_v11 = vsel %vm2635_vm7, %v2610_v23, -inf  ;;  %v2655_v35 = vsel %vm2635_vm7, %v2608_v31, -inf  ;;  %v17334_v56 = vpop.f32.mrb[8].mxu0 }
 0x201   : > { %v2771_v16 = vsel %vm19604_vm2, %v2735_v58, %v2770_v13  ;;  %v2891_v62 = vsel %vm19611_vm3, %v2871_v48, %v2890_v55  ;;  %v2955_v3 = vshll.u32 %v19621_v60, 16  ;;  %v2437_v24 = vpop.f32.mrb[9].mxu0  ;;  %v3028_v10 = vrot.slane %v19621_v60, 6  ;;  %v3050_v23 = vld [vmem:[#allocation2 + $0x10] sm:$0x8] }
 0x202   : > { %2772 = vst [vmem:[#allocation2 + $0x8] sm:$0x1] %v2771_v16  ;;  %2892 = vst [vmem:[#allocation2 + $0x8] sm:$0x4] %v2891_v62  ;;  %v3113_v8 = vrot.slane %v19621_v60, 7  ;;  %v2703_v63 = vrot.slane %v2654_v6, 1  ;;  %v2657_v37 = vmax.f32 %v2655_v35, %v2656_v11  ;;  %v2581_v15 = vadd.f32 %v17334_v56, %v19568_v36 }
 0x203   : > { %v17335_v57 = vpop.f32.mrb[10].mxu0  ;;  %v2579_v47 = vadd.f32 %v19568_v36, %v2437_v24  ;;  %v3048_v43 = vsel %vm19631_vm6, %v3028_v10, %v3047_v41  ;;  %v2821_v18 = vrot.slane %v2735_v58, 1  ;;  %v2957_v38 = vrot.slane %v2955_v3, 6  ;;  %v3135_v53 = vld [vmem:[#allocation2 + $0x10] sm:$0x10] }
 0x204   : > { %v2440_v34 = vpop.f32.mrb[11].mxu0  ;;  %v3133_v27 = vsel %vm19644_vm10, %v3113_v8, %v3132_v32  ;;  %v2719_v2 = vmax.f32 %v2654_v6, %v2703_v63  ;;  %v2923_v19 = vrot.slane %v2657_v37, 1  ;;  %3049 = vst [vmem:[#allocation2 + $0x8] sm:$0x8] %v3048_v43  ;;  %v2613_v50 = vmax.f32 %v2581_v15, 0.0 }
 0x205   : > { %3134 = vst [vmem:[#allocation2 + $0x8] sm:$0x10] %v3133_v27  ;;  %v2611_v39 = vmax.f32 %v2579_v47, 0.0  ;;  %v2582_v25 = vadd.f32 %v17335_v57, %v19568_v36  ;;  %v2580_v51 = vadd.f32 %v19568_v36, %v2440_v34  ;;  %v3071_v11 = vrot.slane %v2955_v3, 7  ;;  %v17614_v32 = vld [vmem:[%s24306_s3 + $0x110] ss:$8 sps:$4 sm:$0xff]  }
 0x206   : > { %v2727_v52 = vpack.c.bf16 %v2719_v2, %v2719_v2  ;;  %v2939_v7 = vmax.f32 %v2657_v37, %v2923_v19  ;;  %v2659_v61 = vsel %vm2635_vm7, %v2613_v50, -inf  ;;  %v17615_v60 = vld [vmem:[%s24306_s3 + $0x124] ss:$8 sps:$4 sm:$0xff]   ;;  %v2803_v19 = vld [vmem:[#allocation2 + $0x18] sm:$0x2]  ;;  %3632 = vmatpush1.bf16.msra.mxu1 %v17614_v32 }
 0x207   : > { %v2839_v9 = vld [vmem:[#allocation2 + $0x8] sm:$0x2]  ;;  %v2658_v54 = vsel %vm2635_vm7, %v2611_v39, -inf  ;;  %v2614_v22 = vmax.f32 %v2582_v25, 0.0  ;;  %v2612_v0 = vmax.f32 %v2580_v51, 0.0  ;;  %3633 = vmatprep.subr.bf16.mxu1 %v17615_v60 }
 0x208   : > { %v2840_v13 = vsel %vm19667_vm14, %v2821_v18, %v2839_v9  ;;  %v2738_v55 = vshll.u32 %v2727_v52, 16  ;;  %v2801_v33 = vsel %vm19592_vm15, %v2727_v52, %v2800_v30  ;;  %v2872_v42 = vrot.slane %v2727_v52, 1  ;;  %v17338_v17 = vpop.f32.mrb[12].mxu0  ;;  %v2776_v50 = vld [vmem:[#allocation2 + $0x18] sm:$0x1] }
 0x209   : > { %2841 = vst [vmem:[#allocation2 + $0x8] sm:$0x2] %v2840_v13  ;;  %v2996_v31 = vld [vmem:[#allocation2 + $0x8] sm:$0x4]  ;;  %2802 = vst [vmem:[#allocation2 + $0x10] sm:$0x2] %v2801_v33  ;;  %v2947_v58 = vpack.c.bf16 %v2939_v7, %v2939_v7  ;;  %v2660_v48 = vmax.f32 %v2658_v54, %v2659_v61  ;;  %v2585_v30 = vadd.f32 %v17338_v17, %v19568_v36 }
 0x20a   : > { %v2662_v29 = vsel %vm2635_vm7, %v2614_v22, -inf  ;;  %v2661_v5 = vsel %vm2635_vm7, %v2612_v0, -inf  ;;  %v2453_v41 = vpop.f32.mrb[13].mxu0  ;;  %v2997_v6 = vsel %vm19683_vm9, %v2957_v38, %v2996_v31  ;;  %v2774_v56 = vsel %vm19604_vm2, %v2738_v55, %v2773_v1  ;;  %v17617_v1 = vld [vmem:[%s24306_s3 + $0x120] ss:$8 sps:$4 sm:$0xff]  }
 0x20b   : > { %v2894_v16 = vsel %vm19611_vm3, %v2872_v42, %v2893_v28  ;;  %v17339_v62 = vpop.f32.mrb[14].mxu0  ;;  %2998 = vst [vmem:[#allocation2 + $0x8] sm:$0x4] %v2997_v6  ;;  %2775 = vst [vmem:[#allocation2 + $0x10] sm:$0x1] %v2774_v56  ;;  %v2959_v3 = vshll.u32 %v2947_v58, 16  ;;  %v2663_v57 = vmax.f32 %v2661_v5, %v2662_v29  ;;  %v2583_v15 = vadd.f32 %v19568_v36, %v2453_v41 }
 0x20c   : > { %2895 = vst [vmem:[#allocation2 + $0x10] sm:$0x4] %v2894_v16  ;;  %v3029_v24 = vrot.slane %v2947_v58, 6  ;;  %v3114_v10 = vrot.slane %v2947_v58, 7  ;;  %v2704_v8 = vrot.slane %v2660_v48, 1  ;;  %v2456_v63 = vpop.f32.mrb[15].mxu0  ;;  %v2586_v47 = vadd.f32 %v17339_v62, %v19568_v36  ;;  %3634 = vmatpush1.bf16.msra.mxu1 %v17617_v1 }
 0x20d   : > { %v3089_v37 = vld [vmem:[#allocation2 + $0x8] sm:$0x8]  ;;  %v2822_v14 = vrot.slane %v2738_v55, 1  ;;  %v2924_v46 = vrot.slane %v2663_v57, 1  ;;  %v2617_v59 = vmax.f32 %v2585_v30, 0.0  ;;  %v2961_v28 = vrot.slane %v2959_v3, 6 }
 0x20e   : > { %v3090_v34 = vsel %vm19701_vm12, %v3071_v11, %v3089_v37  ;;  %v3051_v43 = vsel %vm19631_vm6, %v3029_v24, %v3050_v23  ;;  %v3136_v27 = vsel %vm19644_vm10, %v3114_v10, %v3135_v53  ;;  %v2720_v2 = vmax.f32 %v2660_v48, %v2704_v8  ;;  %v2896_v39 = vld [vmem:[#allocation2 + $0x18] sm:$0x4]  ;;  %v17618_v38 = vld [vmem:[%s24306_s3 + $0x134] ss:$8 sps:$4 sm:$0xff]   ;;  %v17621_v11 = vld [vmem:[%s24306_s3 + $0x144] ss:$8 sps:$4 sm:$0xff]  }
 0x20f   : > { %3091 = vst [vmem:[#allocation2 + $0x8] sm:$0x8] %v3090_v34  ;;  %3052 = vst [vmem:[#allocation2 + $0x10] sm:$0x8] %v3051_v43  ;;  %v2615_v25 = vmax.f32 %v2583_v15, 0.0  ;;  %v2618_v51 = vmax.f32 %v2586_v47, 0.0  ;;  %v2584_v18 = vadd.f32 %v19568_v36, %v2456_v63  ;;  %v2940_v45 = vmax.f32 %v2663_v57, %v2924_v46  ;;  %3635 = vmatprep.subr.bf16.mxu1 %v17618_v38 }
 0x210   : > { %3137 = vst [vmem:[#allocation2 + $0x10] sm:$0x10] %v3136_v27  ;;  %v2842_v52 = vld [vmem:[#allocation2 + $0x10] sm:$0x2]  ;;  %v3072_v7 = vrot.slane %v2959_v3, 7  ;;  %v2728_v26 = vpack.c.bf16 %v2720_v2, %v2720_v2  ;;  %v2665_v9 = vsel %vm2635_vm7, %v2617_v59, -inf }
 0x211   : > { %v17342_v61 = vpop.f32.mrb[16].mxu0  ;;  %v2843_v54 = vsel %vm19667_vm14, %v2822_v14, %v2842_v52  ;;  %v2664_v22 = vsel %vm2635_vm7, %v2615_v25, -inf  ;;  %v2668_v0 = vsel %vm2635_vm7, %v2618_v51, -inf  ;;  %v2616_v13 = vmax.f32 %v2584_v18, 0.0  ;;  %v17620_v33 = vld [vmem:[%s24306_s3 + $0x130] ss:$8 sps:$4 sm:$0xff]  }
 0x212   : > { %v2469_v55 = vpop.f32.mrb[17].mxu0  ;;  %2844 = vst [vmem:[#allocation2 + $0x10] sm:$0x2] %v2843_v54  ;;  %v2741_v23 = vshll.u32 %v2728_v26, 16  ;;  %v2804_v17 = vsel %vm19592_vm15, %v2728_v26, %v2803_v19  ;;  %v2873_v31 = vrot.slane %v2728_v26, 1  ;;  %v2948_v58 = vpack.c.bf16 %v2940_v45, %v2940_v45  ;;  %3636 = vmatpush1.bf16.msra.mxu1 %v17620_v33 }
 0x213   : > { %v2999_v42 = vld [vmem:[#allocation2 + $0x10] sm:$0x4]  ;;  %v17343_v53 = vpop.f32.mrb[18].mxu0  ;;  %2805 = vst [vmem:[#allocation2 + $0x18] sm:$0x2] %v2804_v17  ;;  %v2666_v29 = vmax.f32 %v2664_v22, %v2665_v9  ;;  %v2667_v5 = vsel %vm2635_vm7, %v2616_v13, -inf  ;;  %v2589_v41 = vadd.f32 %v17342_v61, %v19568_v36  ;;  %3637 = vmatprep.subr.bf16.mxu1 %v17621_v11 }
 0x214   : > { %v3000_v48 = vsel %vm19683_vm9, %v2961_v28, %v2999_v42  ;;  %v2472_v6 = vpop.f32.mrb[19].mxu0  ;;  %v2777_v56 = vsel %vm19604_vm2, %v2741_v23, %v2776_v50  ;;  %v2823_v16 = vrot.slane %v2741_v23, 1  ;;  %v2897_v62 = vsel %vm19611_vm3, %v2873_v31, %v2896_v39  ;;  %v3053_v60 = vld [vmem:[#allocation2 + $0x18] sm:$0x8]  ;;  %v3138_v3 = vld [vmem:[#allocation2 + $0x18] sm:$0x10] }
 0x215   : > { %3001 = vst [vmem:[#allocation2 + $0x10] sm:$0x4] %v3000_v48  ;;  %v2963_v32 = vshll.u32 %v2948_v58, 16  ;;  %2778 = vst [vmem:[#allocation2 + $0x18] sm:$0x1] %v2777_v56  ;;  %v3030_v10 = vrot.slane %v2948_v58, 6  ;;  %v2669_v37 = vmax.f32 %v2667_v5, %v2668_v0  ;;  %v2587_v28 = vadd.f32 %v19568_v36, %v2469_v55 }
 0x216   : > { %v3092_v24 = vld [vmem:[#allocation2 + $0x10] sm:$0x8]  ;;  %2898 = vst [vmem:[#allocation2 + $0x18] sm:$0x4] %v2897_v62  ;;  %v3115_v8 = vrot.slane %v2948_v58, 7  ;;  %v2705_v63 = vrot.slane %v2666_v29, 1  ;;  %v2590_v50 = vadd.f32 %v17343_v53, %v19568_v36  ;;  %v2588_v39 = vadd.f32 %v19568_v36, %v2472_v6 }
 0x217   : > { %v3093_v57 = vsel %vm19701_vm12, %v3072_v7, %v3092_v24  ;;  %v2965_v30 = vrot.slane %v2963_v32, 6  ;;  %v19754_v15 = vrot.slane %v2963_v32, 7  ;;  %v2621_v47 = vmax.f32 %v2589_v41, 0.0  ;;  %v19756_v34 = vld [vmem:[#allocation2 + $0x8] sm:$0xff]  ;;  %v17624_v46 = vld [vmem:[%s24306_s3 + $0x154] ss:$8 sps:$4 sm:$0xff]  }
 0x218   : > { %v17623_v14 = vld [vmem:[%s24306_s3 + $0x140] ss:$8 sps:$4 sm:$0xff]   ;;  %3094 = vst [vmem:[#allocation2 + $0x10] sm:$0x8] %v3093_v57  ;;  %v3054_v43 = vsel %vm19631_vm6, %v3030_v10, %v3053_v60  ;;  %v3139_v27 = vsel %vm19644_vm10, %v3115_v8, %v3138_v3  ;;  %v2721_v2 = vmax.f32 %v2666_v29, %v2705_v63  ;;  %v2925_v19 = vrot.slane %v2669_v37, 1  ;;  %v17346_v25 = vpop.f32.mrb[20].mxu0 }
 0x219   : > { %3055 = vst [vmem:[#allocation2 + $0x18] sm:$0x8] %v3054_v43  ;;  %3140 = vst [vmem:[#allocation2 + $0x18] sm:$0x10] %v3139_v27  ;;  %v2806_v59 = vld [vmem:[#allocation2 + $0x20] sm:$0x2]  ;;  %v2593_v7 = vadd.f32 %v17346_v25, %v19568_v36  ;;  %3638 = vmatpush1.bf16.msra.mxu1 %v17623_v14 }
 0x21a   : > { %v2671_v1 = vsel %vm2635_vm7, %v2621_v47, -inf  ;;  %v2729_v51 = vpack.c.bf16 %v2721_v2, %v2721_v2  ;;  %v2779_v18 = vld [vmem:[#allocation2 + $0x20] sm:$0x1]  ;;  %v2899_v38 = vld [vmem:[#allocation2 + $0x20] sm:$0x4]  ;;  %v2941_v52 = vmax.f32 %v2669_v37, %v2925_v19  ;;  %v2485_v26 = vpop.f32.mrb[21].mxu0  ;;  %3639 = vmatprep.subr.bf16.mxu1 %v17624_v46 }
 0x21b   : > { %v3350_v45 = vshrl.u32 %v19756_v34, 16  ;;  %v2845_v9 = vld [vmem:[#allocation2 + $0x18] sm:$0x2]  ;;  %v2619_v61 = vmax.f32 %v2587_v28, 0.0  ;;  %v2622_v54 = vmax.f32 %v2590_v50, 0.0  ;;  %v2620_v22 = vmax.f32 %v2588_v39, 0.0 }
 0x21c   : > { %v2591_v0 = vadd.f32 %v19568_v36, %v2485_v26  ;;  %v17347_v13 = vpop.f32.mrb[22].mxu0  ;;  %v2846_v55 = vsel %vm19667_vm14, %v2823_v16, %v2845_v9  ;;  %v2744_v33 = vshll.u32 %v2729_v51, 16  ;;  %v2807_v42 = vsel %vm19592_vm15, %v2729_v51, %v2806_v59  ;;  %v3056_v17 = vld [vmem:[#allocation2 + $0x20] sm:$0x8]  ;;  %v17626_v58 = vld [vmem:[%s24306_s3 + $0x150] ss:$8 sps:$4 sm:$0xff]  }
 0x21d   : > { %v2874_v23 = vrot.slane %v2729_v51, 1  ;;  %v2488_v31 = vpop.f32.mrb[23].mxu0  ;;  %2847 = vst [vmem:[#allocation2 + $0x18] sm:$0x2] %v2846_v55  ;;  %v3002_v53 = vld [vmem:[#allocation2 + $0x18] sm:$0x4]  ;;  %v2949_v48 = vpack.c.bf16 %v2941_v52, %v2941_v52  ;;  %3640 = vmatpush1.bf16.msra.mxu1 %v17626_v58  ;;  %v2594_v47 = vadd.f32 %v17347_v13, %v19568_v36 }
 0x21e   : > { %2808 = vst [vmem:[#allocation2 + $0x20] sm:$0x2] %v2807_v42  ;;  %v2670_v29 = vsel %vm2635_vm7, %v2619_v61, -inf  ;;  %v2674_v5 = vsel %vm2635_vm7, %v2622_v54, -inf  ;;  %v2673_v41 = vsel %vm2635_vm7, %v2620_v22, -inf  ;;  %v3003_v6 = vsel %vm19683_vm9, %v2965_v30, %v3002_v53 }
 0x21f   : > { %v2780_v11 = vsel %vm19604_vm2, %v2744_v33, %v2779_v18  ;;  %v2824_v56 = vrot.slane %v2744_v33, 1  ;;  %v2900_v16 = vsel %vm19611_vm3, %v2874_v23, %v2899_v38  ;;  %v3141_v62 = vld [vmem:[#allocation2 + $0x20] sm:$0x10]  ;;  %3004 = vst [vmem:[#allocation2 + $0x18] sm:$0x4] %v3003_v6  ;;  %v2967_v60 = vshll.u32 %v2949_v48, 16 }
 0x220   : > { %v17627_v32 = vld [vmem:[%s24306_s3 + $0x164] ss:$8 sps:$4 sm:$0xff]   ;;  %2781 = vst [vmem:[#allocation2 + $0x20] sm:$0x1] %v2780_v11  ;;  %2901 = vst [vmem:[#allocation2 + $0x20] sm:$0x4] %v2900_v16  ;;  %v2672_v10 = vmax.f32 %v2670_v29, %v2671_v1  ;;  %v2675_v37 = vmax.f32 %v2673_v41, %v2674_v5  ;;  %v2592_v18 = vadd.f32 %v19568_v36, %v2488_v31 }
 0x221   : > { %v3031_v3 = vrot.slane %v2949_v48, 6  ;;  %v3116_v24 = vrot.slane %v2949_v48, 7  ;;  %v17629_v8 = vld [vmem:[%s24306_s3 + $0x160] ss:$8 sps:$4 sm:$0xff]   ;;  %v3095_v63 = vld [vmem:[#allocation2 + $0x18] sm:$0x8]  ;;  %3641 = vmatprep.subr.bf16.mxu1 %v17627_v32 }
 0x222   : > { %v2625_v57 = vmax.f32 %v2593_v7, 0.0  ;;  %v2623_v30 = vmax.f32 %v2591_v0, 0.0  ;;  %v17630_v14 = vld [vmem:[%s24306_s3 + $0x174] ss:$8 sps:$4 sm:$0xff]   ;;  %v3096_v43 = vsel %vm19701_vm12, %v19754_v15, %v3095_v63  ;;  %v2969_v27 = vrot.slane %v2967_v60, 6  ;;  %v17350_v46 = vpop.f32.mrb[24].mxu0  ;;  %3642 = vmatpush1.bf16.msra.mxu1 %v17629_v8 }
 0x223   : > { %v3057_v2 = vsel %vm19631_vm6, %v3031_v3, %v3056_v17  ;;  %v3074_v19 = vrot.slane %v2967_v60, 7  ;;  %3097 = vst [vmem:[#allocation2 + $0x18] sm:$0x8] %v3096_v43  ;;  %v3142_v59 = vsel %vm19644_vm10, %v3116_v24, %v3141_v62  ;;  %v2706_v1 = vrot.slane %v2672_v10, 1  ;;  %v2501_v39 = vpop.f32.mrb[25].mxu0  ;;  %3643 = vmatprep.subr.bf16.mxu1 %v17630_v14 }
 0x224   : > { %3058 = vst [vmem:[#allocation2 + $0x20] sm:$0x8] %v3057_v2  ;;  %v2926_v28 = vrot.slane %v2675_v37, 1  ;;  %v2677_v50 = vsel %vm2635_vm7, %v2625_v57, -inf  ;;  %3143 = vst [vmem:[#allocation2 + $0x20] sm:$0x10] %v3142_v59  ;;  %v2597_v61 = vadd.f32 %v17350_v46, %v19568_v36  ;;  %v2595_v11 = vadd.f32 %v19568_v36, %v2501_v39 }
 0x225   : > { %v2676_v25 = vsel %vm2635_vm7, %v2623_v30, -inf  ;;  %v2626_v15 = vmax.f32 %v2594_v47, 0.0  ;;  %v3352_v51 = vshll.u32 %v19756_v34, 16  ;;  %v19812_v38 = vpop.f32.mrb[26].mxu0  ;;  %v2848_v52 = vld [vmem:[#allocation2 + $0x20] sm:$0x2]  ;;  %v2722_v7 = vmax.f32 %v2672_v10, %v2706_v1 }
 0x226   : > { %v2942_v26 = vmax.f32 %v2675_v37, %v2926_v28  ;;  %v2678_v9 = vmax.f32 %v2676_v25, %v2677_v50  ;;  %v19815_v54 = vpop.f32.mrb[27].mxu0  ;;  %v2849_v22 = vsel %vm19667_vm14, %v2824_v56, %v2848_v52  ;;  %v2809_v0 = vld [vmem:[#allocation2 + $0x28] sm:$0x2]  ;;  %v2624_v33 = vmax.f32 %v2592_v18, 0.0  ;;  %v2782_v17 = vld [vmem:[#allocation2 + $0x28] sm:$0x1] }
 0x227   : > { %v2680_v13 = vsel %vm2635_vm7, %v2626_v15, -inf  ;;  %v3354_v55 = vrot.slane %v3352_v51, 1  ;;  %2850 = vst [vmem:[#allocation2 + $0x20] sm:$0x2] %v2849_v22  ;;  %v3005_v42 = vld [vmem:[#allocation2 + $0x20] sm:$0x4]  ;;  %v2730_v23 = vpack.c.bf16 %v2722_v7, %v2722_v7 }
 0x228   : > { %v2950_v31 = vpack.c.bf16 %v2942_v26, %v2942_v26  ;;  %v2707_v58 = vrot.slane %v2678_v9, 1  ;;  %v2629_v53 = vmax.f32 %v2597_v61, 0.0  ;;  %v3006_v48 = vsel %vm19683_vm9, %v2969_v27, %v3005_v42  ;;  %v2902_v29 = vld [vmem:[#allocation2 + $0x28] sm:$0x4]  ;;  %v3059_v5 = vld [vmem:[#allocation2 + $0x28] sm:$0x8] }
 0x229   : > { %v19824_v41 = vor.u32 %v3354_v55, %v3350_v45  ;;  %v2679_v6 = vsel %vm2635_vm7, %v2624_v33, -inf  ;;  %3007 = vst [vmem:[#allocation2 + $0x20] sm:$0x4] %v3006_v48  ;;  %v2747_v56 = vshll.u32 %v2730_v23, 16  ;;  %v2810_v16 = vsel %vm19592_vm15, %v2730_v23, %v2809_v0  ;;  %v3144_v60 = vld [vmem:[#allocation2 + $0x28] sm:$0x10] }
 0x22a   : > { %v2875_v62 = vrot.slane %v2730_v23, 1  ;;  %v2971_v32 = vshll.u32 %v2950_v31, 16  ;;  %2811 = vst [vmem:[#allocation2 + $0x28] sm:$0x2] %v2810_v16  ;;  %v3032_v24 = vrot.slane %v2950_v31, 6  ;;  %v3117_v10 = vrot.slane %v2950_v31, 7 }
 0x22b   : > { %v3098_v3 = vld [vmem:[#allocation2 + $0x20] sm:$0x8]  ;;  %v2723_v8 = vmax.f32 %v2678_v9, %v2707_v58  ;;  %3405 = vrot.lane.b32.xlu0 %v19824_v41, %s18360_s18  ;;  %v2681_v45 = vmax.f32 %v2679_v6, %v2680_v13  ;;  %v19832_v63 = vpop.f32.mrb[28].mxu0  ;;  %v2783_v57 = vsel %vm19604_vm2, %v2747_v56, %v2782_v17  ;;  %v19840_v47 = vld [vmem:[#allocation2 + $0x10] sm:$0xff]  ;;  %v2825_v27 = vrot.slane %v2747_v56, 1 }
 0x22c   : > { %v3099_v37 = vsel %vm19701_vm12, %v3074_v19, %v3098_v3  ;;  %v2903_v30 = vsel %vm19611_vm3, %v2875_v62, %v2902_v29  ;;  %v19842_v14 = vpop.f32.mrb[29].mxu0  ;;  %v17632_v43 = vld [vmem:[%s24306_s3 + $0x170] ss:$8 sps:$4 sm:$0xff]   ;;  %2784 = vst [vmem:[#allocation2 + $0x28] sm:$0x1] %v2783_v57  ;;  %v2973_v2 = vrot.slane %v2971_v32, 6  ;;  %v3060_v19 = vsel %vm19631_vm6, %v3032_v24, %v3059_v5 }
 0x22d   : > { %3100 = vst [vmem:[#allocation2 + $0x20] sm:$0x8] %v3099_v37  ;;  %2904 = vst [vmem:[#allocation2 + $0x28] sm:$0x4] %v2903_v30  ;;  %v3145_v46 = vsel %vm19644_vm10, %v3117_v10, %v3144_v60  ;;  %v2812_v59 = vld [vmem:[#allocation2 + $0x30] sm:$0x2]  ;;  %v2731_v50 = vpack.c.bf16 %v2723_v8, %v2723_v8  ;;  %3644 = vmatpush1.bf16.msra.mxu1 %v17632_v43  ;;  %v2598_v9 = vadd.f32 %v19812_v38, %v19568_v36 }
 0x22e   : > { %v19851_v1 = vpop.f32.mrb[30].mxu0  ;;  %3061 = vst [vmem:[#allocation2 + $0x28] sm:$0x8] %v3060_v19  ;;  %v3075_v28 = vrot.slane %v2971_v32, 7  ;;  %3146 = vst [vmem:[#allocation2 + $0x28] sm:$0x10] %v3145_v46  ;;  %v2596_v24 = vadd.f32 %v19568_v36, %v19815_v54  ;;  %v2601_v57 = vadd.f32 %v19832_v63, %v19568_v36 }
 0x22f   : > { %v2785_v39 = vld [vmem:[#allocation2 + $0x30] sm:$0x1]  ;;  %v2927_v25 = vrot.slane %v2681_v45, 1  ;;  %v2627_v15 = vmax.f32 %v2595_v11, 0.0  ;;  %v19853_v51 = vpop.f32.mrb[31].mxu0  ;;  %v2683_v52 = vsel %vm2635_vm7, %v2629_v53, -inf  ;;  %v2813_v22 = vsel %vm19592_vm15, %v2731_v50, %v2812_v59 }
 0x230   : > { %v2905_v18 = vld [vmem:[#allocation2 + $0x30] sm:$0x4]  ;;  %v3429_v7 = vrot.slane %v19756_v34, 1  ;;  %v3430_v26 = vrot.slane %v19840_v47, 1  ;;  %v2750_v61 = vshll.u32 %v2731_v50, 16  ;;  %v2876_v0 = vrot.slane %v2731_v50, 1 }
 0x231   : > { %v2943_v13 = vmax.f32 %v2681_v45, %v2927_v25  ;;  %2814 = vst [vmem:[#allocation2 + $0x30] sm:$0x2] %v2813_v22  ;;  %v2682_v55 = vsel %vm2635_vm7, %v2627_v15, -inf  ;;  %v3357_v42 = vshrl.u32 %v19840_v47, 16  ;;  %v3359_v23 = vshll.u32 %v19840_v47, 16  ;;  %v19892_v30 = vld [vmem:[#allocation2 + $0x18] sm:$0xff] }
 0x232   : > { %v14241_v33 = vcombine.low %v3429_v7, %v3430_v26  ;;  %v2851_v17 = vld [vmem:[#allocation2 + $0x28] sm:$0x2]  ;;  %v2786_v38 = vsel %vm19604_vm2, %v2750_v61, %v2785_v39  ;;  %v2906_v31 = vsel %vm19611_vm3, %v2876_v0, %v2905_v18  ;;  %v2630_v53 = vmax.f32 %v2598_v9, 0.0  ;;  %v17635_v48 = vld [vmem:[%s24306_s3 + $0x4] ss:$8 sps:$4 sm:$0xff]  }
 0x233   : > { %v19873_v58 = vpack.c.bf16 %v2943_v13, %v2943_v13  ;;  %v2852_v29 = vsel %vm19667_vm14, %v2825_v27, %v2851_v17  ;;  %2787 = vst [vmem:[#allocation2 + $0x30] sm:$0x1] %v2786_v38  ;;  %v2826_v5 = vrot.slane %v2750_v61, 1  ;;  %2907 = vst [vmem:[#allocation2 + $0x30] sm:$0x4] %v2906_v31  ;;  %v2684_v56 = vmax.f32 %v2682_v55, %v2683_v52 }
 0x234   : > { %v3062_v6 = vld [vmem:[#allocation2 + $0x30] sm:$0x8]  ;;  %v3147_v11 = vld [vmem:[#allocation2 + $0x30] sm:$0x10]  ;;  %14272 = vmatprep.mubr.msk.bf16.mxu1 %vm2635_vm7, %v14241_v33  ;;  %v3361_v16 = vrot.slane %v3359_v23, 1  ;;  %3838 = vmatprep.subr.bf16.mxu1 %v17635_v48  ;;  %v2686_v19 = vsel %vm2635_vm7, %v2630_v53, -inf  ;;  %v2599_v39 = vadd.f32 %v19568_v36, %v19842_v14  ;;  %v2602_v25 = vadd.f32 %v19851_v1, %v19568_v36 }
 0x235   : > { %2853 = vst [vmem:[#allocation2 + $0x28] sm:$0x2] %v2852_v29  ;;  %v3008_v62 = vld [vmem:[#allocation2 + $0x28] sm:$0x4]  ;;  %v2975_v32 = vshll.u32 %v19873_v58, 16  ;;  %v3033_v60 = vrot.slane %v19873_v58, 6 }
 0x236   : > { %v3118_v3 = vrot.slane %v19873_v58, 7  ;;  %v3009_v10 = vsel %vm19683_vm9, %v2973_v2, %v3008_v62  ;;  %v3101_v8 = vld [vmem:[#allocation2 + $0x28] sm:$0x8]  ;;  %v2708_v45 = vrot.slane %v2684_v56, 1  ;;  %v19888_v37 = vor.u32 %v3361_v16, %v3357_v42  ;;  %v2788_v61 = vld [vmem:[#allocation2 + $0x38] sm:$0x1] }
 0x237   : > { %3010 = vst [vmem:[#allocation2 + $0x28] sm:$0x4] %v3009_v10  ;;  %v3102_v43 = vsel %vm19701_vm12, %v3075_v28, %v3101_v8  ;;  %v2977_v27 = vrot.slane %v2975_v32, 6  ;;  %v3063_v54 = vsel %vm19631_vm6, %v3033_v60, %v3062_v6  ;;  %v2628_v63 = vmax.f32 %v2596_v24, 0.0  ;;  %v2815_v28 = vld [vmem:[#allocation2 + $0x38] sm:$0x2] }
 0x238   : > { %3103 = vst [vmem:[#allocation2 + $0x28] sm:$0x8] %v3102_v43  ;;  %3064 = vst [vmem:[#allocation2 + $0x30] sm:$0x8] %v3063_v54  ;;  %v3148_v2 = vsel %vm19644_vm10, %v3118_v3, %v3147_v11  ;;  %v2724_v46 = vmax.f32 %v2684_v56, %v2708_v45  ;;  %3407 = vrot.lane.b32.xlu1 %v19888_v37, %s18360_s18  ;;  %v2633_v59 = vmax.f32 %v2601_v57, 0.0  ;;  %v3364_v15 = vshrl.u32 %v19892_v30, 16 }
 0x239   : > { %v2854_v50 = vld [vmem:[#allocation2 + $0x30] sm:$0x2]  ;;  %3149 = vst [vmem:[#allocation2 + $0x30] sm:$0x10] %v3148_v2  ;;  %v3366_v18 = vshll.u32 %v19892_v30, 16  ;;  %v2685_v0 = vsel %vm2635_vm7, %v2628_v63, -inf  ;;  %v2600_v60 = vadd.f32 %v19568_v36, %v19853_v51 }
 0x23a   : > { %v2855_v52 = vsel %vm19667_vm14, %v2826_v5, %v2854_v50  ;;  %v2732_v9 = vpack.c.bf16 %v2724_v46, %v2724_v46  ;;  %v2908_v22 = vld [vmem:[#allocation2 + $0x38] sm:$0x4]  ;;  %v2689_v13 = vsel %vm2635_vm7, %v2633_v59, -inf  ;;  %v3011_v55 = vld [vmem:[#allocation2 + $0x30] sm:$0x4]  ;;  %v2687_v14 = vmax.f32 %v2685_v0, %v2686_v19  ;;  %v19917_v58 = vld [vmem:[#allocation2 + $0x20] sm:$0xff] }
 0x23b   : > { %2856 = vst [vmem:[#allocation2 + $0x30] sm:$0x2] %v2855_v52  ;;  %v2631_v33 = vmax.f32 %v2599_v39, 0.0  ;;  %v2634_v42 = vmax.f32 %v2602_v25, 0.0  ;;  %v3368_v1 = vrot.slane %v3366_v18, 1  ;;  %v3012_v23 = vsel %vm19683_vm9, %v2977_v27, %v3011_v55 }
 0x23c   : > { %v2753_v17 = vshll.u32 %v2732_v9, 16  ;;  %v2816_v38 = vsel %vm19592_vm15, %v2732_v9, %v2815_v28  ;;  %v2877_v31 = vrot.slane %v2732_v9, 1  ;;  %3013 = vst [vmem:[#allocation2 + $0x30] sm:$0x4] %v3012_v23  ;;  %v2928_v53 = vrot.slane %v2687_v14, 1 }
 0x23d   : > { %2817 = vst [vmem:[#allocation2 + $0x38] sm:$0x2] %v2816_v38  ;;  %v2688_v48 = vsel %vm2635_vm7, %v2631_v33, -inf  ;;  %v19920_v29 = vor.u32 %v3368_v1, %v3364_v15  ;;  %v3076_v5 = vrot.slane %v2975_v32, 7  ;;  %v3373_v3 = vshll.u32 %v19917_v58, 16 }
 0x23e   : > { %v2789_v6 = vsel %vm19604_vm2, %v2753_v17, %v2788_v61  ;;  %v2909_v11 = vsel %vm19611_vm3, %v2877_v31, %v2908_v22  ;;  %v2690_v56 = vmax.f32 %v2688_v48, %v2689_v13  ;;  %v2944_v62 = vmax.f32 %v2687_v14, %v2928_v53  ;;  %v3065_v27 = vld [vmem:[#allocation2 + $0x38] sm:$0x8]  ;;  %v3150_v2 = vld [vmem:[#allocation2 + $0x38] sm:$0x10]  ;;  %v2818_v39 = vld [vmem:[#allocation2 + $0x40] sm:$0x2] }
 0x23f   : > { %v3104_v16 = vld [vmem:[#allocation2 + $0x30] sm:$0x8]  ;;  %2790 = vst [vmem:[#allocation2 + $0x38] sm:$0x1] %v2789_v6  ;;  %2910 = vst [vmem:[#allocation2 + $0x38] sm:$0x4] %v2909_v11  ;;  %3409 = vrot.lane.b32.xlu0 %v19920_v29, %s18360_s18 }
 0x240   : > { %v19931_v32 = vld [vmem:[#allocation2 + $0x28] sm:$0xff]  ;;  %v3105_v24 = vsel %vm19701_vm12, %v3076_v5, %v3104_v16  ;;  %v2709_v10 = vrot.slane %v2690_v56, 1  ;;  %v2692_v8 = vsel %vm2635_vm7, %v2634_v42, -inf  ;;  %v2827_v57 = vrot.slane %v2753_v17, 1  ;;  %v2791_v55 = vld [vmem:[#allocation2 + $0x40] sm:$0x1] }
 0x241   : > { %v3380_v45 = vshll.u32 %v19931_v32, 16  ;;  %3106 = vst [vmem:[#allocation2 + $0x30] sm:$0x8] %v3105_v24  ;;  %v2952_v43 = vpack.c.bf16 %v2944_v62, %v2944_v62  ;;  %v2632_v54 = vmax.f32 %v2600_v60, 0.0  ;;  %v3375_v19 = vrot.slane %v3373_v3, 1 }
 0x242   : > { %v2725_v36 = vmax.f32 %v2690_v56, %v2709_v10  ;;  %v3371_v51 = vshrl.u32 %v19917_v58, 16  ;;  %v3378_v46 = vshrl.u32 %v19931_v32, 16  ;;  %v2911_v14 = vld [vmem:[#allocation2 + $0x40] sm:$0x4]  ;;  %v3431_v33 = vrot.slane %v19892_v30, 1 }
 0x243   : > { %v3382_v63 = vrot.slane %v3380_v45, 1  ;;  %v2979_v59 = vshll.u32 %v2952_v43, 16  ;;  %v3034_v50 = vrot.slane %v2952_v43, 6  ;;  %v3119_v28 = vrot.slane %v2952_v43, 7  ;;  %v3153_v45 = vld [vmem:[#allocation2 + $0x40] sm:$0x10] }
 0x244   : > { %v2691_v25 = vsel %vm2635_vm7, %v2632_v54, -inf  ;;  %v2857_v15 = vld [vmem:[#allocation2 + $0x38] sm:$0x2]  ;;  %v2733_v18 = vpack.c.bf16 %v2725_v36, %v2725_v36  ;;  %v19940_v9 = vor.u32 %v3375_v19, %v3371_v51  ;;  %v3433_v48 = vrot.slane %v19931_v32, 1 }
 0x245   : > { %v2693_v52 = vmax.f32 %v2691_v25, %v2692_v8  ;;  %v19942_v61 = vor.u32 %v3382_v63, %v3378_v46  ;;  %v2858_v22 = vsel %vm19667_vm14, %v2827_v57, %v2857_v15  ;;  %v2981_v0 = vrot.slane %v2979_v59, 6  ;;  %v3068_v8 = vld [vmem:[#allocation2 + $0x40] sm:$0x8] }
 0x246   : > { %v3066_v13 = vsel %vm19631_vm6, %v3034_v50, %v3065_v27  ;;  %2859 = vst [vmem:[#allocation2 + $0x38] sm:$0x2] %v2858_v22  ;;  %v3014_v42 = vld [vmem:[#allocation2 + $0x38] sm:$0x4]  ;;  %v3151_v1 = vsel %vm19644_vm10, %v3119_v28, %v3150_v2  ;;  %v2756_v23 = vshll.u32 %v2733_v18, 16  ;;  %v2819_v17 = vsel %vm19592_vm15, %v2733_v18, %v2818_v39  ;;  %3411 = vrot.lane.b32.xlu1 %v19940_v9, %s18360_s18  ;;  %v19992_v28 = vld [vmem:[#allocation2] sm:$0xff] }
 0x247   : > { %3067 = vst [vmem:[#allocation2 + $0x38] sm:$0x8] %v3066_v13  ;;  %v2878_v38 = vrot.slane %v2733_v18, 1  ;;  %3413 = vrot.lane.b32.xlu0 %v19942_v61, %s18360_s18  ;;  %v3015_v31 = vsel %vm19683_vm9, %v2981_v0, %v3014_v42  ;;  %3152 = vst [vmem:[#allocation2 + $0x38] sm:$0x10] %v3151_v1  ;;  %v2929_v53 = vrot.slane %v2693_v52, 1  ;;  %v19972_v62 = vcombine.low %v3430_v26, %v3431_v33 }
 0x248   : > { %2820 = vst [vmem:[#allocation2 + $0x40] sm:$0x2] %v2819_v17  ;;  %3016 = vst [vmem:[#allocation2 + $0x38] sm:$0x4] %v3015_v31  ;;  %v2792_v40 = vsel %vm19604_vm2, %v2756_v23, %v2791_v55  ;;  %v19964_v6 = vld [vmem:[#allocation2 + $0x30] sm:$0xff]  ;;  %v3432_v11 = vrot.slane %v19917_v58, 1 }
 0x249   : > { %v2912_v5 = vsel %vm19611_vm3, %v2878_v38, %v2911_v14  ;;  %2793 = vst [vmem:[#allocation2 + $0x40] sm:$0x1] %v2792_v40  ;;  %v2945_v56 = vmax.f32 %v2693_v52, %v2929_v53  ;;  %v3387_v16 = vshll.u32 %v19964_v6, 16  ;;  %v3385_v60 = vshrl.u32 %v19964_v6, 16  ;;  %v20034_v31 = vld [vmem:[#allocation2 + $0x48] sm:$0xff] }
 0x24a   : > { %2913 = vst [vmem:[#allocation2 + $0x40] sm:$0x4] %v2912_v5  ;;  %v19978_v21 = vcombine.low %v3432_v11, %v3433_v48  ;;  %v3077_v24 = vrot.slane %v2979_v59, 7  ;;  %v2828_v10 = vrot.slane %v2756_v23, 1  ;;  %v3191_v4 = vshll.u32 %v19992_v28, 16 }
 0x24b   : > { %v2953_v20 = vpack.c.bf16 %v2945_v56, %v2945_v56  ;;  %v3389_v3 = vrot.slane %v3387_v16, 1  ;;  %v3434_v18 = vrot.slane %v19964_v6, 1  ;;  %v3189_v52 = vshrl.u32 %v19992_v28, 16 }
 0x24c   : > { %v3193_v13 = vrot.slane %v3191_v4, 1  ;;  %vm4540_vm2 = vsmask.f32 5382 }
 0x24d   : > { %v2983_v43 = vshll.u32 %v2953_v20, 16  ;;  %v3035_v27 = vrot.slane %v2953_v20, 6  ;;  %v3120_v54 = vrot.slane %v2953_v20, 7  ;;  %v3390_v26 = vor.u32 %v3389_v3, %v3385_v60  ;;  %v17638_v20 = vld [vmem:[%s24306_s3 + $0x14] ss:$8 sps:$4 sm:$0xff]   ;;  %v17705_v3 = vld [vmem:[%s24308_s5 + $0x240] sm:$0xff]   ;;  %vm20393_vm3 = vmand %vm4539_vm0, %vm4540_vm2 }
 0x24e   : > { %v3107_v57 = vld [vmem:[#allocation2 + $0x38] sm:$0x8]  ;;  %v3194_v42 = vor.u32 %v3193_v13, %v3189_v52  ;;  %v14243_v60 = vcombine.low %v3431_v33, %v3432_v11  ;;  %v17641_v33 = vld [vmem:[%s24306_s3 + $0x24] ss:$8 sps:$4 sm:$0xff]   ;;  %16214 = vmatprep.subr.bf16.mxu0 %v17705_v3  ;;  %v17639_v11 = vld [vmem:[%s24306_s3 + $0x20] ss:$8 sps:$4 sm:$0xff]  }
 0x24f   : > { %v3108_v19 = vsel %vm19701_vm12, %v3077_v24, %v3107_v57  ;;  %v2860_v2 = vld [vmem:[#allocation2 + $0x40] sm:$0x2]  ;;  %v2985_v51 = vrot.slane %v2983_v43, 6  ;;  %v3069_v46 = vsel %vm19631_vm6, %v3035_v27, %v3068_v8  ;;  %3415 = vrot.lane.b32.xlu1 %v3390_v26, %s18360_s18  ;;  %v3154_v59 = vsel %vm19644_vm10, %v3120_v54, %v3153_v45  ;;  %v17644_v8 = vld [vmem:[%s24306_s3 + $0x34] ss:$8 sps:$4 sm:$0xff]  }
 0x250   : > { %3109 = vst [vmem:[#allocation2 + $0x38] sm:$0x8] %v3108_v19  ;;  %v2861_v36 = vsel %vm19667_vm14, %v2828_v10, %v2860_v2  ;;  %3070 = vst [vmem:[#allocation2 + $0x40] sm:$0x8] %v3069_v46  ;;  %v3078_v39 = vrot.slane %v2983_v43, 7  ;;  %v17706_v24 = vld [vmem:[%s24308_s5 + $0x200] sm:$0xff]   ;;  %v14245_v2 = vcombine.low %v3433_v48, %v3434_v18 }
 0x251   : > { %2862 = vst [vmem:[#allocation2 + $0x40] sm:$0x2] %v2861_v36  ;;  %v3017_v63 = vld [vmem:[#allocation2 + $0x40] sm:$0x4]  ;;  %3155 = vst [vmem:[#allocation2 + $0x40] sm:$0x10] %v3154_v59  ;;  %16215 = vmatpush3.bf16.msra.mxu0 %v17706_v24 }
 0x252   : > { %v3018_v50 = vsel %vm19683_vm9, %v2985_v51, %v3017_v63  ;;  %v17636_v10 = vld [vmem:[%s24306_s3 + $0x10] ss:$8 sps:$4 sm:$0xff]   ;;  %v17647_v27 = vld [vmem:[%s24306_s3 + $0x44] ss:$8 sps:$4 sm:$0xff]   ;;  %v17645_v36 = vld [vmem:[%s24306_s3 + $0x40] ss:$8 sps:$4 sm:$0xff]  }
 0x253   : > { %3019 = vst [vmem:[#allocation2 + $0x40] sm:$0x4] %v3018_v50  ;;  %v17642_v57 = vld [vmem:[%s24306_s3 + $0x30] ss:$8 sps:$4 sm:$0xff]   ;;  %v17650_v51 = vld [vmem:[%s24306_s3 + $0x54] ss:$8 sps:$4 sm:$0xff]  }
 0x254   : > { %v17648_v63 = vld [vmem:[%s24306_s3 + $0x50] ss:$8 sps:$4 sm:$0xff]   ;;  %v17653_v48 = vld [vmem:[%s24306_s3 + $0x64] ss:$8 sps:$4 sm:$0xff]  }
 0x255   : > { %v17654_v52 = vld [vmem:[%s24306_s3 + $0x70] ss:$8 sps:$4 sm:$0xff]   ;;  %v17677_v24 = vld [vmem:[%s24306_s3 + $0x1a4] ss:$8 sps:$4 sm:$0xff]  }
 0x256   : > { %v17660_v13 = vld [vmem:[%s24306_s3 + $0x90] ss:$8 sps:$4 sm:$0xff]  }
 0x257   : > { %v19995_v44 = vld [vmem:[#allocation2 + $0x38] sm:$0xff]  ;;  %v3110_v25 = vld [vmem:[#allocation2 + $0x40] sm:$0x8] }
 0x258   : > { %v3394_v15 = vshll.u32 %v19995_v44, 16  ;;  %v3435_v49 = vrot.slane %v19995_v44, 1  ;;  %v3111_v12 = vsel %vm19701_vm12, %v3078_v39, %v3110_v25  ;;  %v3392_v22 = vshrl.u32 %v19995_v44, 16 }
 0x259   : > { %3112 = vst [vmem:[#allocation2 + $0x40] sm:$0x8] %v3111_v12  ;;  %v17656_v12 = vld [vmem:[%s24306_s3 + $0x74] ss:$8 sps:$4 sm:$0xff]  }
 0x25a   : > { %v3396_v0 = vrot.slane %v3394_v15, 1  ;;  %v20008_v55 = vcombine.low %v3434_v18, %v3435_v49  ;;  %v17651_v15 = vld [vmem:[%s24306_s3 + $0x60] ss:$8 sps:$4 sm:$0xff]  }
 0x25c   : > { %v3397_v14 = vor.u32 %v3396_v0, %v3392_v22  ;;  %v17659_v22 = vld [vmem:[%s24306_s3 + $0x84] ss:$8 sps:$4 sm:$0xff]   ;;  %v17662_v0 = vld [vmem:[%s24306_s3 + $0x94] ss:$8 sps:$4 sm:$0xff]  }
 0x25e   : > { %3417 = vrot.lane.b32.xlu0 %v3397_v14, %s18360_s18 }
 0x260   : > { %v20011_v1 = vld [vmem:[#allocation2 + $0x40] sm:$0xff] }
 0x261   : > { %v3401_v35 = vshll.u32 %v20011_v1, 16  ;;  %v3399_v23 = vshrl.u32 %v20011_v1, 16  ;;  %v3436_v59 = vrot.slane %v20011_v1, 1 }
 0x262   : > { %3244 = vrot.lane.b32.xlu0 %v3194_v42, %s18360_s18  ;;  %v17663_v42 = vld [vmem:[%s24306_s3 + $0xa0] ss:$8 sps:$4 sm:$0xff]  }
 0x263   : > { %v3403_v17 = vrot.slane %v3401_v35, 1  ;;  %v14247_v18 = vcombine.low %v3435_v49, %v3436_v59  ;;  %v17657_v49 = vld [vmem:[%s24306_s3 + $0x80] ss:$8 sps:$4 sm:$0xff]   ;;  %v17668_v35 = vld [vmem:[%s24306_s3 + $0xb4] ss:$8 sps:$4 sm:$0xff]  }
 0x265   : > { %v3404_v38 = vor.u32 %v3403_v17, %v3399_v23  ;;  %v17666_v17 = vld [vmem:[%s24306_s3 + $0xb0] ss:$8 sps:$4 sm:$0xff]  }
 0x266   : > { %3248 = vrot.lane.b32.xlu0 %v19888_v37, %s18360_s18 }
 0x267   : > { %3419 = vrot.lane.b32.xlu1 %v3404_v38, %s18360_s18 }
 0x26a   : > { %3252 = vrot.lane.b32.xlu0 %v19940_v9, %s18360_s18 }
 0x26b   : > { %3246 = vrot.lane.b32.xlu1 %v19824_v41, %s18360_s18  ;;  %v3997_v41 = vshll.u32 %v20034_v31, 16 }
 0x26d   : > { %v3999_v53 = vrot.slane %v3997_v41, 1  ;;  %v17671_v41 = vld [vmem:[%s24306_s3 + $0x184] ss:$8 sps:$4 sm:$0xff]  }
 0x26e   : > { %3256 = vrot.lane.b32.xlu0 %v3390_v26, %s18360_s18 }
 0x26f   : > { %3250 = vrot.lane.b32.xlu1 %v19920_v29, %s18360_s18 }
 0x272   : > { %4001 = vrot.lane.b32.xlu0 %v19888_v37, %s18360_s18  ;;  %v3995_v37 = vshrl.u32 %v20034_v31, 16 }
 0x273   : > { %3254 = vrot.lane.b32.xlu1 %v19942_v61, %s18360_s18 }
 0x276   : > { %4005 = vrot.lane.b32.xlu0 %v19940_v9, %s18360_s18  ;;  %v4000_v9 = vor.u32 %v3999_v53, %v3995_v37 }
 0x277   : > { %3258 = vrot.lane.b32.xlu1 %v3397_v14, %s18360_s18 }
 0x27a   : > { %4009 = vrot.lane.b32.xlu0 %v3390_v26, %s18360_s18 }
 0x27b   : > { %4003 = vrot.lane.b32.xlu1 %v19920_v29, %s18360_s18 }
 0x27e   : > { %4013 = vrot.lane.b32.xlu0 %v3404_v38, %s18360_s18  ;;  %v3268_v38 = vrot.slane %v19992_v28, 1 }
 0x27f   : > { %4007 = vrot.lane.b32.xlu1 %v19942_v61, %s18360_s18  ;;  %v17633_v61 = vld [vmem:[%s24306_s3] ss:$8 sps:$4 sm:$0xff]  }
 0x283   : > { %4011 = vrot.lane.b32.xlu1 %v3397_v14, %s18360_s18  ;;  %v17665_v14 = vld [vmem:[%s24306_s3 + $0xa4] ss:$8 sps:$4 sm:$0xff]  }
 0x287   : > { %4015 = vrot.lane.b32.xlu1 %v4000_v9, %s18360_s18 }
 0x29d   : > { %v3406_v40 = vpop.permute.xlu0 %3405 }
 0x29e   : > { %v3438_v29 = vsel %vm2635_vm7, %v19756_v34, %v3406_v40 }
 0x2aa   : > { %v3408_v5 = vpop.permute.xlu1 %3407 }
 0x2ab   : > { %v3440_v56 = vsel %vm2635_vm7, %v19840_v47, %v3408_v5  ;;  %v14277_v5 = vcombine.low %v3268_v38, %v3429_v7  ;;  %v17674_v7 = vld [vmem:[%s24306_s3 + $0x194] ss:$8 sps:$4 sm:$0xff]  }
 0x2ac   : > { %v14240_v16 = vcombine.low %v3438_v29, %v3440_v56 }
 0x2ae   : > { %3654 = vmatmul.mubr.bf16.vlgmr.msra.gmra.mrb[0].mxu1 %v14240_v16 }
 0x2af   : > { %14273 = vmatprep.mubr.msk.bf16.mxu1 %vm2635_vm7, %v14243_v60  ;;  %3839 = vmatpush1.bf16.msra.mxu1 %v17633_v61 }
 0x2b0   : > { %3840 = vmatprep.subr.bf16.mxu1 %v17638_v20  ;;  %v17669_v20 = vld [vmem:[%s24306_s3 + $0x180] ss:$8 sps:$4 sm:$0xff]  }
 0x2b1   : > { %v3410_v45 = vpop.permute.xlu0 %3409 }
 0x2b2   : > { %v3442_v54 = vsel %vm2635_vm7, %v19892_v30, %v3410_v45  ;;  %v17680_v45 = vld [vmem:[%s24306_s3 + $0x1b4] ss:$8 sps:$4 sm:$0xff]  }
 0x2b3   : > { %3841 = vmatpush1.bf16.msra.mxu1 %v17636_v10 }
 0x2b4   : > { %3842 = vmatprep.subr.bf16.mxu1 %v17641_v33 }
 0x2b7   : > { %3843 = vmatpush1.bf16.msra.mxu1 %v17639_v11  ;;  %v17675_v11 = vld [vmem:[%s24306_s3 + $0x1a0] ss:$8 sps:$4 sm:$0xff]  }
 0x2b8   : > { %v3412_v43 = vpop.permute.xlu1 %3411  ;;  %3844 = vmatprep.subr.bf16.mxu1 %v17644_v8 }
 0x2b9   : > { %v3444_v26 = vsel %vm2635_vm7, %v19917_v58, %v3412_v43  ;;  %v3414_v46 = vpop.permute.xlu0 %3413  ;;  %v17678_v43 = vld [vmem:[%s24306_s3 + $0x1b0] ss:$8 sps:$4 sm:$0xff]  }
 0x2ba   : > { %v14242_v19 = vcombine.low %v3442_v54, %v3444_v26  ;;  %v3446_v4 = vsel %vm2635_vm7, %v19931_v32, %v3414_v46  ;;  %v17683_v54 = vld [vmem:[%s24306_s3 + $0x1c4] ss:$8 sps:$4 sm:$0xff]  }
 0x2bb   : > { %3845 = vmatpush1.bf16.msra.mxu1 %v17642_v57 }
 0x2bc   : > { %3664 = vmatmul.mubr.bf16.gmra.mrb[4].mxu1 %v14242_v19  ;;  %3846 = vmatprep.subr.bf16.mxu1 %v17647_v27 }
 0x2bd   : > { %14274 = vmatprep.mubr.msk.bf16.mxu1 %vm2635_vm7, %v14245_v2  ;;  %v17681_v2 = vld [vmem:[%s24306_s3 + $0x1c0] ss:$8 sps:$4 sm:$0xff]  }
 0x2bf   : > { %3847 = vmatpush1.bf16.msra.mxu1 %v17645_v36 }
 0x2c0   : > { %3848 = vmatprep.subr.bf16.mxu1 %v17650_v51  ;;  %v17686_v51 = vld [vmem:[%s24306_s3 + $0x1d4] ss:$8 sps:$4 sm:$0xff]  }
 0x2c1   : > { %v3416_v50 = vpop.permute.xlu1 %3415 }
 0x2c2   : > { %v3448_v39 = vsel %vm2635_vm7, %v19964_v6, %v3416_v50  ;;  %v17689_v50 = vld [vmem:[%s24306_s3 + $0x1e4] ss:$8 sps:$4 sm:$0xff]  }
 0x2c3   : > { %v14244_v25 = vcombine.low %v3446_v4, %v3448_v39  ;;  %3849 = vmatpush1.bf16.msra.mxu1 %v17648_v63  ;;  %v17684_v63 = vld [vmem:[%s24306_s3 + $0x1d0] ss:$8 sps:$4 sm:$0xff]  }
 0x2c4   : > { %3850 = vmatprep.subr.bf16.mxu1 %v17653_v48 }
 0x2c5   : > { %3674 = vmatmul.mubr.bf16.gmra.mrb[8].mxu1 %v14244_v25  ;;  %v17687_v25 = vld [vmem:[%s24306_s3 + $0x1e0] ss:$8 sps:$4 sm:$0xff]  }
 0x2c6   : > { %14275 = vmatprep.mubr.msk.bf16.mxu1 %vm2635_vm7, %v14247_v18  ;;  %v17692_v18 = vld [vmem:[%s24306_s3 + $0x1f4] ss:$8 sps:$4 sm:$0xff]  }
 0x2c7   : > { %3851 = vmatpush1.bf16.msra.mxu1 %v17651_v15 }
 0x2c8   : > { %3852 = vmatprep.subr.bf16.mxu1 %v17656_v12  ;;  %v17690_v12 = vld [vmem:[%s24306_s3 + $0x1f0] ss:$8 sps:$4 sm:$0xff]  }
 0x2cb   : > { %3853 = vmatpush1.bf16.msra.mxu1 %v17654_v52  ;;  %v17695_v52 = vld [vmem:[%s24306_s3 + $0x204] ss:$8 sps:$4 sm:$0xff]  }
 0x2cc   : > { %3854 = vmatprep.subr.bf16.mxu1 %v17659_v22  ;;  %v17693_v22 = vld [vmem:[%s24306_s3 + $0x200] ss:$8 sps:$4 sm:$0xff]  }
 0x2cf   : > { %3855 = vmatpush1.bf16.msra.mxu1 %v17657_v49  ;;  %v17698_v49 = vld [vmem:[%s24306_s3 + $0x214] ss:$8 sps:$4 sm:$0xff]  }
 0x2d0   : > { %3856 = vmatprep.subr.bf16.mxu1 %v17662_v0  ;;  %v3418_v23 = vpop.permute.xlu0 %3417  ;;  %v17701_v0 = vld [vmem:[%s24306_s3 + $0x224] ss:$8 sps:$4 sm:$0xff]  }
 0x2d1   : > { %v3450_v53 = vsel %vm2635_vm7, %v19995_v44, %v3418_v23 }
 0x2d3   : > { %3857 = vmatpush1.bf16.msra.mxu1 %v17660_v13  ;;  %v17699_v13 = vld [vmem:[%s24306_s3 + $0x220] ss:$8 sps:$4 sm:$0xff]  }
 0x2d4   : > { %3858 = vmatprep.subr.bf16.mxu1 %v17665_v14  ;;  %v3245_v56 = vpop.permute.xlu0 %3244  ;;  %v17704_v14 = vld [vmem:[%s24306_s3 + $0x234] ss:$8 sps:$4 sm:$0xff]  }
 0x2d5   : > { %v3277_v61 = vsel %vm2635_vm7, %v19992_v28, %v3245_v56  ;;  %v17672_v28 = vld [vmem:[%s24306_s3 + $0x190] ss:$8 sps:$4 sm:$0xff]   ;;  %v4032_v56 = vrot.slane %v20034_v31, 1 }
 0x2d7   : > { %3859 = vmatpush1.bf16.msra.mxu1 %v17663_v42 }
 0x2d8   : > { %3860 = vmatprep.subr.bf16.mxu1 %v17668_v35  ;;  %v17702_v35 = vld [vmem:[%s24306_s3 + $0x230] ss:$8 sps:$4 sm:$0xff]  }
 0x2d9   : > { %v3420_v37 = vpop.permute.xlu1 %3419 }
 0x2da   : > { %v3452_v9 = vsel %vm2635_vm7, %v20011_v1, %v3420_v37 }
 0x2db   : > { %v14246_v40 = vcombine.low %v3450_v53, %v3452_v9  ;;  %3861 = vmatpush1.bf16.msra.mxu1 %v17666_v17 }
 0x2dc   : > { %4217 = vmatprep.subr.bf16.mxu1 %v17671_v41 }
 0x2dd   : > { %v3247_v29 = vpop.permute.xlu1 %3246  ;;  %3684 = vmatmul.mubr.bf16.gmra.mrb[12].mxu1 %v14246_v40 }
 0x2de   : > { %14308 = vmatprep.mubr.msk.bf16.mxu1 %vm2635_vm7, %v14277_v5  ;;  %v3279_v16 = vsel %vm2635_vm7, %v19756_v34, %v3247_v29  ;;  %v3249_v34 = vpop.permute.xlu0 %3248 }
 0x2df   : > { %v14276_v60 = vcombine.low %v3277_v61, %v3279_v16  ;;  %v3281_v33 = vsel %vm2635_vm7, %v19840_v47, %v3249_v34  ;;  %v17715_v34 = vld [vmem:[%s24308_s5 + $0x1d8] sm:$0xff]  }
 0x2e1   : > { %v3251_v3 = vpop.permute.xlu1 %3250 }
 0x2e2   : > { %v3283_v10 = vsel %vm2635_vm7, %v19892_v30, %v3251_v3  ;;  %v3253_v27 = vpop.permute.xlu0 %3252  ;;  %v17713_v3 = vld [vmem:[%s24308_s5 + $0x1d0] sm:$0xff]  }
 0x2e3   : > { %v14278_v8 = vcombine.low %v3281_v33, %v3283_v10  ;;  %v3285_v19 = vsel %vm2635_vm7, %v19917_v58, %v3253_v27  ;;  %v17717_v10 = vld [vmem:[%s24308_s5 + $0x250] sm:$0xff]   ;;  %v17724_v27 = vld [vmem:[%s24308_s5 + $0x1a8] sm:$0xff]  }
 0x2e4   : > { %v17718_v33 = vld [vmem:[%s24308_s5 + $0x210] sm:$0xff]  }
 0x2e5   : > { %3871 = vmatmul.mubr.bf16.vlgmr.msra.gmra.mrb[0].mxu1 %v14276_v60  ;;  %v3255_v57 = vpop.permute.xlu1 %3254  ;;  %v17709_v60 = vld [vmem:[%s24308_s5 + $0x1c8] sm:$0xff]  }
 0x2e6   : > { %4218 = vmatpush1.bf16.msra.mxu1 %v17669_v20  ;;  %14309 = vmatprep.mubr.msk.bf16.mxu1 %vm2635_vm7, %v19972_v62  ;;  %v3287_v26 = vsel %vm2635_vm7, %v19931_v32, %v3255_v57  ;;  %v3257_v48 = vpop.permute.xlu0 %3256  ;;  %v17722_v57 = vld [vmem:[%s24308_s5 + $0x1e8] sm:$0xff]  }
 0x2e7   : > { %4219 = vmatprep.subr.bf16.mxu1 %v17674_v7  ;;  %v14280_v36 = vcombine.low %v3285_v19, %v3287_v26  ;;  %v3289_v39 = vsel %vm2635_vm7, %v19964_v6, %v3257_v48  ;;  %v17712_v7 = vld [vmem:[%s24308_s5 + $0x208] sm:$0xff]   ;;  %v17726_v26 = vld [vmem:[%s24308_s5 + $0x1f0] sm:$0xff]   ;;  %v17727_v19 = vld [vmem:[%s24308_s5 + $0x220] sm:$0xff]  }
 0x2e8   : > { %v17733_v48 = vld [vmem:[%s24308_s5 + $0x270] sm:$0xff]  }
 0x2e9   : > { %v3259_v46 = vpop.permute.xlu1 %3258 }
 0x2ea   : > { %4220 = vmatpush1.bf16.msra.mxu1 %v17672_v28  ;;  %v3291_v4 = vsel %vm2635_vm7, %v19995_v44, %v3259_v46  ;;  %v4002_v23 = vpop.permute.xlu0 %4001  ;;  %v17714_v28 = vld [vmem:[%s24308_s5 + $0x190] sm:$0xff]   ;;  %v17731_v46 = vld [vmem:[%s24308_s5 + $0x228] sm:$0xff]  }
 0x2eb   : > { %4221 = vmatprep.subr.bf16.mxu1 %v17677_v24  ;;  %v14282_v15 = vcombine.low %v3289_v39, %v3291_v4  ;;  %v4034_v38 = vsel %vm2635_vm7, %v19840_v47, %v4002_v23  ;;  %v17716_v24 = vld [vmem:[%s24308_s5 + $0x198] sm:$0xff]   ;;  %v17738_v4 = vld [vmem:[%s24308_s5 + $0x230] sm:$0xff]  }
 0x2ec   : > { %v17741_v39 = vld [vmem:[%s24308_s5 + $0x278] sm:$0xff]  }
 0x2ed   : > { %3881 = vmatmul.mubr.bf16.gmra.mrb[4].mxu1 %v14278_v8  ;;  %v4004_v42 = vpop.permute.xlu1 %4003  ;;  %v17720_v8 = vld [vmem:[%s24308_s5 + $0x1a0] sm:$0xff]  }
 0x2ee   : > { %4222 = vmatpush1.bf16.msra.mxu1 %v17675_v11  ;;  %14310 = vmatprep.mubr.msk.bf16.mxu1 %vm2635_vm7, %v19978_v21  ;;  %v4036_v17 = vsel %vm2635_vm7, %v19892_v30, %v4004_v42  ;;  %v4006_v53 = vpop.permute.xlu0 %4005  ;;  %v17719_v11 = vld [vmem:[%s24308_s5 + $0x1e0] sm:$0xff]  }
 0x2ef   : > { %4223 = vmatprep.subr.bf16.mxu1 %v17680_v45  ;;  %v14336_v41 = vcombine.low %v4034_v38, %v4036_v17  ;;  %v4038_v40 = vsel %vm2635_vm7, %v19917_v58, %v4006_v53  ;;  %v17721_v45 = vld [vmem:[%s24308_s5 + $0x258] sm:$0xff]  }
 0x2f1   : > { %v4008_v37 = vpop.permute.xlu1 %4007 }
 0x2f2   : > { %4224 = vmatpush1.bf16.msra.mxu1 %v17678_v43  ;;  %v4040_v9 = vsel %vm2635_vm7, %v19931_v32, %v4008_v37  ;;  %v4010_v47 = vpop.permute.xlu0 %4009  ;;  %v14343_v32 = vcombine.low %v3436_v59, %v4032_v56  ;;  %v17708_v59 = vld [vmem:[%s24308_s5 + $0x180] sm:$0xff]   ;;  %v17723_v43 = vld [vmem:[%s24308_s5 + $0x218] sm:$0xff]  }
 0x2f3   : > { %4225 = vmatprep.subr.bf16.mxu1 %v17683_v54  ;;  %v14338_v5 = vcombine.low %v4038_v40, %v4040_v9  ;;  %v17725_v54 = vld [vmem:[%s24308_s5 + $0x260] sm:$0xff]  }
 0x2f5   : > { %3891 = vmatmul.mubr.bf16.gmra.mrb[8].mxu1 %v14280_v36  ;;  %v4012_v29 = vpop.permute.xlu1 %4011  ;;  %v17729_v36 = vld [vmem:[%s24308_s5 + $0x268] sm:$0xff]  }
 0x2f6   : > { %4226 = vmatpush1.bf16.msra.mxu1 %v17681_v2  ;;  %14311 = vmatprep.mubr.msk.bf16.mxu1 %vm2635_vm7, %v20008_v55  ;;  %v4044_v30 = vsel %vm2635_vm7, %v19995_v44, %v4012_v29  ;;  %v4014_v16 = vpop.permute.xlu0 %4013  ;;  %v17728_v2 = vld [vmem:[%s24308_s5 + $0x1b0] sm:$0xff]  }
 0x2f7   : > { %4227 = vmatprep.subr.bf16.mxu1 %v17686_v51  ;;  %v4046_v44 = vsel %vm2635_vm7, %v20011_v1, %v4014_v16  ;;  %v17710_v1 = vld [vmem:[%s24308_s5 + $0x188] sm:$0xff]   ;;  %v17730_v51 = vld [vmem:[%s24308_s5 + $0x1f8] sm:$0xff]  }
 0x2f9   : > { %v4016_v58 = vpop.permute.xlu1 %4015 }
 0x2fa   : > { %4228 = vmatpush1.bf16.msra.mxu1 %v17684_v63  ;;  %v17732_v63 = vld [vmem:[%s24308_s5 + $0x1b8] sm:$0xff]  }
 0x2fb   : > { %4229 = vmatprep.subr.bf16.mxu1 %v17689_v50  ;;  %v17739_v50 = vld [vmem:[%s24308_s5 + $0x2c0] sm:$0xff]  }
 0x2fd   : > { %3901 = vmatmul.mubr.bf16.gmra.mrb[12].mxu1 %v14282_v15  ;;  %v17745_v15 = vld [vmem:[%s24308_s5 + $0x40] sm:$0xff]  }
 0x2fe   : > { %4230 = vmatpush1.bf16.msra.mxu1 %v17687_v25  ;;  %14368 = vmatprep.mubr.msk.bf16.mxu1 %vm2635_vm7, %v19972_v62  ;;  %v17696_v62 = vld [vmem:[%s24306_s3 + $0x210] ss:$8 sps:$4 sm:$0xff]  }
 0x2ff   : > { %4231 = vmatprep.subr.bf16.mxu1 %v17692_v18  ;;  %v17742_v25 = vld [vmem:[%s24308_s5 + $0x238] sm:$0xff]   ;;  %v4308_v18 = vlaneseq }
 0x302   : > { %4232 = vmatpush1.bf16.msra.mxu1 %v17690_v12  ;;  %v4309_v12 = vshrl.u32 %v4308_v18, 7 }
 0x303   : > { %4233 = vmatprep.subr.bf16.mxu1 %v17695_v52  ;;  %v18249_v52 = vld [vmem:[#allocation3] sm:$0xff] }
 0x304   : > { %v14375_v23 = vcombine.high %v18249_v52, %v18249_v52  ;;  %v4831_v38 = vrot.slane %v18249_v52, 1 }
 0x306   : > { %4234 = vmatpush1.bf16.msra.mxu1 %v17693_v22  ;;  %v4706_v22 = vshll.u32 %v18249_v52, 16  ;;  %v14374_v56 = vcombine.low %v4831_v38, %v4831_v38 }
 0x307   : > { %4235 = vmatprep.subr.bf16.mxu1 %v17698_v49  ;;  %v4310_v49 = vsub.s32 0, %v4309_v12 }
 0x30a   : > { %4236 = vmatpush1.bf16.msra.mxu1 %v17696_v62  ;;  %v4306_v62 = vld [vmem:[%s24307_s4] sm:$0x3] }
 0x30b   : > { %4237 = vmatprep.subr.bf16.mxu1 %v17701_v0  ;;  %v4314_v0 = vsub.s32 1, %v4309_v12  ;;  %v20375_v42 = vrot.slane %v4306_v62, %v4310_v49 }
 0x30d   : > { %v20377_v17 = vrot.slane %v4306_v62, %v4314_v0 }
 0x30e   : > { %4238 = vmatpush1.bf16.msra.mxu1 %v17699_v13  ;;  %v4704_v13 = vshrl.u32 %v18249_v52, 16 }
 0x30f   : > { %4239 = vmatprep.subr.bf16.mxu1 %v17704_v14  ;;  %v4708_v14 = vrot.slane %v4706_v22, 1  ;;  %v4548_v22 = vld [vmem:[#allocation3 + $0x40] sm:$0x3e] }
 0x312   : > { %4240 = vmatpush1.bf16.msra.mxu1 %v17702_v35  ;;  %v14372_v35 = vcombine.low %v18249_v52, %v18249_v52 }
 0x314   : > { %v14420_v40 = vrot.slane %v14372_v35, 9  ;;  %v4551_v35 = vld [vmem:[#allocation3 + $0x48] sm:$0x3e] }
 0x315   : > { %4250 = vmatmul.mubr.bf16.vlgmr.msra.gmra.mrb[0].mxu1 %v14336_v41  ;;  %v4709_v41 = vor.u32 %v4708_v14, %v4704_v13 }
 0x316   : > { %14369 = vmatprep.mubr.msk.bf16.mxu1 %vm2635_vm7, %v19978_v21  ;;  %v4042_v21 = vsel %vm2635_vm7, %v19964_v6, %v4010_v47  ;;  %v17707_v6 = vld [vmem:[%s24308_s5 + $0x1c0] sm:$0xff]  }
 0x317   : > { %v14340_v61 = vcombine.low %v4042_v21, %v4044_v30  ;;  %16174 = vmatprep.subr.bf16.mxu1 %v17707_v6  ;;  %v14377_v21 = vcombine.high %v4831_v38, %v4831_v38  ;;  %v14373_v16 = vcombine.low %v4709_v41, %v4709_v41  ;;  %v17922_v30 = vld [vmem:[%s24308_s5 + $0x570] sm:$0xff]  }
 0x318   : > { %16175 = vmatpush3.bf16.msra.mxu1 %v17708_v59 }
 0x319   : > { %16176 = vmatprep.subr.bf16.mxu1 %v17709_v60 }
 0x31c   : > { %16177 = vmatpush3.bf16.msra.mxu1 %v17710_v1 }
 0x31d   : > { %4260 = vmatmul.mubr.bf16.gmra.mrb[4].mxu1 %v14338_v5  ;;  %16178 = vmatprep.subr.bf16.mxu1 %v17713_v3  ;;  %v4996_v5 = vrot.slane %v14375_v23, 5  ;;  %v5004_v3 = vrot.slane %v14377_v21, 5 }
 0x31e   : > { %14370 = vmatprep.mubr.msk.bf16.mxu1 %vm2635_vm7, %v20008_v55  ;;  %v4048_v55 = vsel %vm2635_vm7, %v20034_v31, %v4016_v58  ;;  %v17711_v31 = vld [vmem:[%s24308_s5 + $0x248] sm:$0xff]  }
 0x31f   : > { %v14342_v20 = vcombine.low %v4046_v44, %v4048_v55  ;;  %16216 = vmatprep.subr.bf16.mxu0 %v17711_v31 }
 0x320   : > { %16217 = vmatpush3.bf16.msra.mxu0 %v17712_v7  ;;  %16179 = vmatpush3.bf16.msra.mxu1 %v17714_v28  ;;  %v14422_v7 = vrot.slane %v14374_v56, 9 }
 0x321   : > { %16180 = vmatprep.subr.bf16.mxu1 %v17715_v34  ;;  %16218 = vmatprep.subr.bf16.mxu0 %v17717_v10  ;;  %v14421_v10 = vrot.slane %v14373_v16, 9 }
 0x324   : > { %16219 = vmatpush3.bf16.msra.mxu0 %v17718_v33  ;;  %16181 = vmatpush3.bf16.msra.mxu1 %v17716_v24  ;;  %v4542_v33 = vld [vmem:[#allocation3 + $0x30] sm:$0x3e] }
 0x325   : > { %4270 = vmatmul.mubr.bf16.gmra.mrb[8].mxu1 %v14340_v61  ;;  %16182 = vmatprep.subr.bf16.mxu1 %v17719_v11 }
 0x326   : > { %14371 = vmatprep.mubr.msk.bf16.mxu1 %vm2635_vm7, %v14343_v32  ;;  %16220 = vmatprep.subr.bf16.mxu0 %v17721_v45  ;;  %vm4991_vm7 = vcmask 1042432  }
 0x327   : > { %vm20381_vm15 = vmor %vm4991_vm7, %vm4992_vm13 }
 0x328   : > { %16183 = vmatpush3.bf16.msra.mxu1 %v17720_v8  ;;  %16221 = vmatpush3.bf16.msra.mxu0 %v17723_v43  ;;  %v20389_v60 = vsel %vm20381_vm15, %v14420_v40, %v4996_v5 }
 0x329   : > { %16184 = vmatprep.subr.bf16.mxu1 %v17722_v57  ;;  %16222 = vmatprep.subr.bf16.mxu0 %v17725_v54 }
 0x32c   : > { %16185 = vmatpush3.bf16.msra.mxu1 %v17724_v27  ;;  %16223 = vmatpush3.bf16.msra.mxu0 %v17727_v19 }
 0x32d   : > { %4280 = vmatmul.mubr.bf16.gmra.mrb[12].mxu1 %v14342_v20  ;;  %16186 = vmatprep.subr.bf16.mxu1 %v17726_v26  ;;  %v14376_v20 = vcombine.high %v4709_v41, %v4709_v41 }
 0x32e   : > { %16224 = vmatprep.subr.bf16.mxu0 %v17729_v36 }
 0x32f   : > { %v5000_v43 = vrot.slane %v14376_v20, 5 }
 0x330   : > { %16187 = vmatpush3.bf16.msra.mxu1 %v17728_v2  ;;  %16225 = vmatpush3.bf16.msra.mxu0 %v17731_v46 }
 0x331   : > { %16188 = vmatprep.subr.bf16.mxu1 %v17730_v51  ;;  %16226 = vmatprep.subr.bf16.mxu0 %v17733_v48 }
 0x334   : > { %16189 = vmatpush3.bf16.msra.mxu1 %v17732_v63  ;;  %16227 = vmatpush3.bf16.msra.mxu0 %v17738_v4 }
 0x335   : > { %16254 = vmatprep.subr.bf16.mxu1 %v17739_v50  ;;  %16228 = vmatprep.subr.bf16.mxu0 %v17741_v39  ;;  %v4545_v39 = vld [vmem:[#allocation3 + $0x38] sm:$0x3e] }
 0x338   : > { %16229 = vmatpush3.bf16.msra.mxu0 %v17742_v25 }
 0x339   : > { %16294 = vmatprep.subr.bf16.mxu0 %v17745_v15 }
 0x3e8   : > { %v4251_v37 = vpop.f32.mrb[0].mxu1 }
 0x3e9   : > { %v4318_v53 = vadd.f32 %v20375_v42, %v4251_v37  ;;  %v4253_v9 = vpop.f32.mrb[1].mxu1 }
 0x3ea   : > { %v4319_v29 = vadd.f32 %v20377_v17, %v4253_v9  ;;  %v4255_v47 = vpop.f32.mrb[2].mxu1 }
 0x3eb   : > { %v4334_v61 = vmax.f32 %v4318_v53, 0.0  ;;  %v4320_v32 = vadd.f32 %v20375_v42, %v4255_v47  ;;  %v4257_v58 = vpop.f32.mrb[3].mxu1  ;;  %v20409_v47 = vsel %vm20381_vm15, %v14422_v7, %v5004_v3 }
 0x3ec   : > { %v4335_v55 = vmax.f32 %v4319_v29, 0.0  ;;  %v4321_v44 = vadd.f32 %v20377_v17, %v4257_v58  ;;  %v20415_v58 = vsel %vm20381_vm15, %v14421_v10, %v5000_v43  ;;  %v4554_v10 = vld [vmem:[#allocation3 + $0x50] sm:$0x3e] }
 0x3ed   : > { %v4378_v6 = vpack.c.bf16 %v4334_v61, %v4334_v61  ;;  %v4336_v59 = vmax.f32 %v4320_v32, 0.0 }
 0x3ee   : > { %v4379_v1 = vpack.c.bf16 %v4335_v55, %v4335_v55  ;;  %v4337_v31 = vmax.f32 %v4321_v44, 0.0 }
 0x3ef   : > { %v4395_v28 = vshrl.u32 %v4378_v6, 16  ;;  %v4398_v34 = vshll.u32 %v4378_v6, 16  ;;  %v4380_v24 = vpack.c.bf16 %v4336_v59, %v4336_v59 }
 0x3f0   : > { %v4403_v11 = vshrl.u32 %v4379_v1, 16  ;;  %v4406_v8 = vshll.u32 %v4379_v1, 16  ;;  %v4381_v45 = vpack.c.bf16 %v4337_v31, %v4337_v31  ;;  %v4261_v57 = vpop.f32.mrb[4].mxu1 }
 0x3f1   : > { %v4397_v27 = vrot.slane %v4395_v28, 6  ;;  %v4400_v54 = vrot.slane %v4398_v34, 7  ;;  %v4411_v26 = vshrl.u32 %v4380_v24, 16  ;;  %v4414_v19 = vshll.u32 %v4380_v24, 16  ;;  %v4263_v2 = vpop.f32.mrb[5].mxu1 }
 0x3f2   : > { %v4405_v51 = vrot.slane %v4403_v11, 6  ;;  %v4408_v46 = vrot.slane %v4406_v8, 7  ;;  %v4419_v63 = vshrl.u32 %v4381_v45, 16  ;;  %v4422_v48 = vshll.u32 %v4381_v45, 16  ;;  %v4265_v50 = vpop.f32.mrb[6].mxu1 }
 0x3f3   : > { %v4401_v4 = vor.u32 %v4400_v54, %v4397_v27  ;;  %v4413_v25 = vrot.slane %v4411_v26, 6  ;;  %v4416_v15 = vrot.slane %v4414_v19, 7  ;;  %v4322_v18 = vadd.f32 %v20375_v42, %v4261_v57  ;;  %v4267_v12 = vpop.f32.mrb[7].mxu1  ;;  %v4557_v54 = vld [vmem:[#allocation3 + $0x58] sm:$0x3e] }
 0x3f4   : > { %v4409_v52 = vor.u32 %v4408_v46, %v4405_v51  ;;  %v4421_v49 = vrot.slane %v4419_v63, 6  ;;  %v4424_v62 = vrot.slane %v4422_v48, 7  ;;  %v4323_v0 = vadd.f32 %v20377_v17, %v4263_v2  ;;  %v4560_v46 = vld [vmem:[#allocation3 + $0x60] sm:$0x3e] }
 0x3f5   : > { %v4543_v13 = vsel %vm20393_vm3, %v4401_v4, %v4542_v33  ;;  %v4417_v14 = vor.u32 %v4416_v15, %v4413_v25  ;;  %v4338_v23 = vmax.f32 %v4322_v18, 0.0  ;;  %v4324_v38 = vadd.f32 %v20375_v42, %v4265_v50  ;;  %v4563_v25 = vld [vmem:[#allocation3 + $0x68] sm:$0x3e] }
 0x3f6   : > { %4544 = vst [vmem:[#allocation3 + $0x30] sm:$0x3e] %v4543_v13  ;;  %v4546_v41 = vsel %vm20393_vm3, %v4409_v52, %v4545_v39  ;;  %v4425_v37 = vor.u32 %v4424_v62, %v4421_v49  ;;  %v4339_v53 = vmax.f32 %v4323_v0, 0.0  ;;  %v4325_v9 = vadd.f32 %v20377_v17, %v4267_v12 }
 0x3f7   : > { %4547 = vst [vmem:[#allocation3 + $0x38] sm:$0x3e] %v4546_v41  ;;  %v4549_v40 = vsel %vm20393_vm3, %v4417_v14, %v4548_v22  ;;  %v4382_v5 = vpack.c.bf16 %v4338_v23, %v4338_v23  ;;  %v4340_v29 = vmax.f32 %v4324_v38, 0.0 }
 0x3f8   : > { %4550 = vst [vmem:[#allocation3 + $0x40] sm:$0x3e] %v4549_v40  ;;  %v4552_v56 = vsel %vm20393_vm3, %v4425_v37, %v4551_v35  ;;  %v4383_v21 = vpack.c.bf16 %v4339_v53, %v4339_v53  ;;  %v4341_v61 = vmax.f32 %v4325_v9, 0.0  ;;  %v4271_v32 = vpop.f32.mrb[8].mxu1 }
 0x3f9   : > { %4553 = vst [vmem:[#allocation3 + $0x48] sm:$0x3e] %v4552_v56  ;;  %v4427_v16 = vshrl.u32 %v4382_v5, 16  ;;  %v4430_v55 = vshll.u32 %v4382_v5, 16  ;;  %v4384_v44 = vpack.c.bf16 %v4340_v29, %v4340_v29  ;;  %v4326_v20 = vadd.f32 %v20375_v42, %v4271_v32  ;;  %v4273_v6 = vpop.f32.mrb[9].mxu1 }
 0x3fa   : > { %v4435_v59 = vshrl.u32 %v4383_v21, 16  ;;  %v4438_v1 = vshll.u32 %v4383_v21, 16  ;;  %v4385_v31 = vpack.c.bf16 %v4341_v61, %v4341_v61  ;;  %v4327_v7 = vadd.f32 %v20377_v17, %v4273_v6  ;;  %v4275_v3 = vpop.f32.mrb[10].mxu1  ;;  %v4566_v61 = vld [vmem:[#allocation3 + $0x70] sm:$0x3e] }
 0x3fb   : > { %v4429_v28 = vrot.slane %v4427_v16, 6  ;;  %v4432_v34 = vrot.slane %v4430_v55, 7  ;;  %v4443_v24 = vshrl.u32 %v4384_v44, 16  ;;  %v4446_v33 = vshll.u32 %v4384_v44, 16  ;;  %v4277_v11 = vpop.f32.mrb[11].mxu1 }
 0x3fc   : > { %v4437_v8 = vrot.slane %v4435_v59, 6  ;;  %v4440_v45 = vrot.slane %v4438_v1, 7  ;;  %v4451_v57 = vshrl.u32 %v4385_v31, 16  ;;  %v4454_v43 = vshll.u32 %v4385_v31, 16  ;;  %v4569_v6 = vld [vmem:[#allocation3 + $0x78] sm:$0x3e] }
 0x3fd   : > { %v4433_v27 = vor.u32 %v4432_v34, %v4429_v28  ;;  %v4445_v26 = vrot.slane %v4443_v24, 6  ;;  %v4448_v19 = vrot.slane %v4446_v33, 7  ;;  %v4342_v2 = vmax.f32 %v4326_v20, 0.0 }
 0x3fe   : > { %v4441_v51 = vor.u32 %v4440_v45, %v4437_v8  ;;  %v4453_v63 = vrot.slane %v4451_v57, 6  ;;  %v4456_v48 = vrot.slane %v4454_v43, 7  ;;  %v4343_v50 = vmax.f32 %v4327_v7, 0.0  ;;  %v4572_v45 = vld [vmem:[#allocation3 + $0x80] sm:$0x3e] }
 0x3ff   : > { %v4555_v4 = vsel %vm20393_vm3, %v4433_v27, %v4554_v10  ;;  %v4449_v39 = vor.u32 %v4448_v19, %v4445_v26  ;;  %v4386_v15 = vpack.c.bf16 %v4342_v2, %v4342_v2  ;;  %v4328_v18 = vadd.f32 %v20375_v42, %v4275_v3  ;;  %v4575_v26 = vld [vmem:[#allocation3 + $0x88] sm:$0x3e] }
 0x400   : > { %4556 = vst [vmem:[#allocation3 + $0x50] sm:$0x3e] %v4555_v4  ;;  %v4558_v12 = vsel %vm20393_vm3, %v4441_v51, %v4557_v54  ;;  %v4457_v52 = vor.u32 %v4456_v48, %v4453_v63  ;;  %v4387_v22 = vpack.c.bf16 %v4343_v50, %v4343_v50  ;;  %v4329_v49 = vadd.f32 %v20377_v17, %v4277_v11  ;;  %v4281_v62 = vpop.f32.mrb[12].mxu1  ;;  %v20437_v4 = vld [vmem:[#allocation3 + $0x30] sm:$0xff] }
 0x401   : > { %4559 = vst [vmem:[#allocation3 + $0x58] sm:$0x3e] %v4558_v12  ;;  %v4561_v0 = vsel %vm20393_vm3, %v4449_v39, %v4560_v46  ;;  %v4459_v13 = vshrl.u32 %v4386_v15, 16  ;;  %v4462_v14 = vshll.u32 %v4386_v15, 16  ;;  %v4344_v35 = vmax.f32 %v4328_v18, 0.0  ;;  %v4283_v23 = vpop.f32.mrb[13].mxu1 }
 0x402   : > { %4562 = vst [vmem:[#allocation3 + $0x60] sm:$0x3e] %v4561_v0  ;;  %v4564_v38 = vsel %vm20393_vm3, %v4457_v52, %v4563_v25  ;;  %v4467_v41 = vshrl.u32 %v4387_v22, 16  ;;  %v4470_v37 = vshll.u32 %v4387_v22, 16  ;;  %v4345_v53 = vmax.f32 %v4329_v49, 0.0  ;;  %v4285_v9 = vpop.f32.mrb[14].mxu1 }
 0x403   : > { %4565 = vst [vmem:[#allocation3 + $0x68] sm:$0x3e] %v4564_v38  ;;  %v4461_v40 = vrot.slane %v4459_v13, 6  ;;  %v4464_v5 = vrot.slane %v4462_v14, 7  ;;  %v4388_v29 = vpack.c.bf16 %v4344_v35, %v4344_v35  ;;  %v4330_v56 = vadd.f32 %v20375_v42, %v4281_v62  ;;  %v4287_v21 = vpop.f32.mrb[15].mxu1  ;;  %24499 = vst [vmem:[#allocation7_spill] sm:$0xff] %v20437_v4 }
 0x404   : > { %v4469_v32 = vrot.slane %v4467_v41, 6  ;;  %v4472_v16 = vrot.slane %v4470_v37, 7  ;;  %v4389_v55 = vpack.c.bf16 %v4345_v53, %v4345_v53  ;;  %v4331_v44 = vadd.f32 %v20377_v17, %v4283_v23  ;;  %v20439_v39 = vld [vmem:[#allocation3 + $0x38] sm:$0xff]  ;;  %v20443_v52 = vld [vmem:[#allocation3 + $0x40] sm:$0xff]  ;;  %v20445_v22 = vld [vmem:[#allocation3 + $0x48] sm:$0xff] }
 0x405   : > { %v4465_v20 = vor.u32 %v4464_v5, %v4461_v40  ;;  %v4475_v59 = vshrl.u32 %v4388_v29, 16  ;;  %v4478_v1 = vshll.u32 %v4388_v29, 16  ;;  %v4346_v31 = vmax.f32 %v4330_v56, 0.0  ;;  %24500 = vst [vmem:[#allocation10_spill] sm:$0xff] %v20439_v39  ;;  %24501 = vst [vmem:[#allocation9_spill] sm:$0xff] %v20443_v52 }
 0x406   : > { %v4473_v7 = vor.u32 %v4472_v16, %v4469_v32  ;;  %v4483_v3 = vshrl.u32 %v4389_v55, 16  ;;  %v4486_v28 = vshll.u32 %v4389_v55, 16  ;;  %v4347_v34 = vmax.f32 %v4331_v44, 0.0  ;;  %24502 = vst [vmem:[#allocation8_spill] sm:$0xff] %v20445_v22  ;;  %v4578_v49 = vld [vmem:[#allocation3 + $0x90] sm:$0x3e] }
 0x407   : > { %v4567_v24 = vsel %vm20393_vm3, %v4465_v20, %v4566_v61  ;;  %v4477_v33 = vrot.slane %v4475_v59, 6  ;;  %v4480_v11 = vrot.slane %v4478_v1, 7  ;;  %v4390_v10 = vpack.c.bf16 %v4346_v31, %v4346_v31  ;;  %v4581_v14 = vld [vmem:[#allocation3 + $0x98] sm:$0x3e]  ;;  %v4584_v59 = vld [vmem:[#allocation3 + $0xa0] sm:$0x3e] }
 0x408   : > { %4568 = vst [vmem:[#allocation3 + $0x70] sm:$0x3e] %v4567_v24  ;;  %v4570_v8 = vsel %vm20393_vm3, %v4473_v7, %v4569_v6  ;;  %v4485_v57 = vrot.slane %v4483_v3, 6  ;;  %v4488_v43 = vrot.slane %v4486_v28, 7  ;;  %v4391_v27 = vpack.c.bf16 %v4347_v34, %v4347_v34  ;;  %v4587_v34 = vld [vmem:[#allocation3 + $0xa8] sm:$0x3e] }
 0x409   : > { %4571 = vst [vmem:[#allocation3 + $0x78] sm:$0x3e] %v4570_v8  ;;  %v4481_v54 = vor.u32 %v4480_v11, %v4477_v33  ;;  %v4491_v19 = vshrl.u32 %v4390_v10, 16  ;;  %v4494_v2 = vshll.u32 %v4390_v10, 16  ;;  %v4332_v51 = vadd.f32 %v20375_v42, %v4285_v9 }
 0x40a   : > { %v4489_v46 = vor.u32 %v4488_v43, %v4485_v57  ;;  %v4499_v63 = vshrl.u32 %v4391_v27, 16  ;;  %v4502_v48 = vshll.u32 %v4391_v27, 16  ;;  %v4333_v50 = vadd.f32 %v20377_v17, %v4287_v21  ;;  %v17740_v57 = vld [vmem:[%s24308_s5 + $0x280] sm:$0xff]  }
 0x40b   : > { %v4573_v25 = vsel %vm20393_vm3, %v4481_v54, %v4572_v45  ;;  %v4493_v15 = vrot.slane %v4491_v19, 6  ;;  %v4496_v18 = vrot.slane %v4494_v2, 7  ;;  %v4348_v12 = vmax.f32 %v4332_v51, 0.0  ;;  %v20492_v27 = vld [vmem:[#allocation3 + $0x50] sm:$0xff]  ;;  %v20494_v54 = vld [vmem:[#allocation3 + $0x58] sm:$0xff] }
 0x40c   : > { %4574 = vst [vmem:[#allocation3 + $0x80] sm:$0x3e] %v4573_v25  ;;  %v4576_v42 = vsel %vm20393_vm3, %v4489_v46, %v4575_v26  ;;  %v4501_v17 = vrot.slane %v4499_v63, 6  ;;  %v4504_v62 = vrot.slane %v4502_v48, 7  ;;  %v4349_v0 = vmax.f32 %v4333_v50, 0.0  ;;  %24503 = vst [vmem:[#allocation11_spill] sm:$0xff] %v20492_v27 }
 0x40d   : > { %4577 = vst [vmem:[#allocation3 + $0x88] sm:$0x3e] %v4576_v42  ;;  %v4497_v13 = vor.u32 %v4496_v18, %v4493_v15  ;;  %v4392_v35 = vpack.c.bf16 %v4348_v12, %v4348_v12  ;;  %v20451_v23 = vcombine.low %v20437_v4, %v20439_v39  ;;  %v20455_v38 = vcombine.high %v20437_v4, %v20439_v39  ;;  %v17743_v19 = vld [vmem:[%s24308_s5 + $0x2c8] sm:$0xff]   ;;  %v20505_v63 = vld [vmem:[#allocation3 + $0x60] sm:$0xff]  ;;  %v20507_v48 = vld [vmem:[#allocation3 + $0x68] sm:$0xff] }
 0x40e   : > { %v4505_v41 = vor.u32 %v4504_v62, %v4501_v17  ;;  %v4393_v37 = vpack.c.bf16 %v4349_v0, %v4349_v0  ;;  %v20459_v53 = vcombine.low %v20443_v52, %v20445_v22  ;;  %v20463_v9 = vcombine.high %v20443_v52, %v20445_v22  ;;  %24504 = vst [vmem:[#allocation12_spill] sm:$0xff] %v20494_v54  ;;  %v17744_v17 = vld [vmem:[%s24308_s5 + $0x288] sm:$0xff]  }
 0x40f   : > { %v4579_v40 = vsel %vm20393_vm3, %v4497_v13, %v4578_v49  ;;  %v4507_v5 = vshrl.u32 %v4392_v35, 16  ;;  %v4510_v29 = vshll.u32 %v4392_v35, 16  ;;  %v14588_v56 = vrot.slane %v20451_v23, 9  ;;  %24505 = vst [vmem:[#allocation13_spill] sm:$0xff] %v20505_v63  ;;  %24506 = vst [vmem:[#allocation14_spill] sm:$0xff] %v20507_v48 }
 0x410   : > { %4580 = vst [vmem:[#allocation3 + $0x90] sm:$0x3e] %v4579_v40  ;;  %v4582_v21 = vsel %vm20393_vm3, %v4505_v41, %v4581_v14  ;;  %v4515_v61 = vshrl.u32 %v4393_v37, 16  ;;  %v4518_v32 = vshll.u32 %v4393_v37, 16  ;;  %v5493_v16 = vrot.slane %v20455_v38, 5  ;;  %v17750_v40 = vld [vmem:[%s24308_s5 + $0x2d0] sm:$0xff]  }
 0x411   : > { %4583 = vst [vmem:[#allocation3 + $0x98] sm:$0x3e] %v4582_v21  ;;  %v4509_v55 = vrot.slane %v4507_v5, 6  ;;  %v4512_v44 = vrot.slane %v4510_v29, 7  ;;  %v14591_v20 = vrot.slane %v20459_v53, 9  ;;  %v5505_v6 = vrot.slane %v20463_v9, 5 }
 0x412   : > { %v4517_v1 = vrot.slane %v4515_v61, 6  ;;  %v4520_v31 = vrot.slane %v4518_v32, 7  ;;  %v20475_v7 = vsel %vm20381_vm15, %v14588_v56, %v5493_v16  ;;  %v24327_v3 = vshrl.u32 %v20437_v4, 16 }
 0x413   : > { %v4513_v28 = vor.u32 %v4512_v44, %v4509_v55  ;;  %v20480_v24 = vsel %vm20381_vm15, %v14591_v20, %v5505_v6  ;;  %v24326_v33 = vshll.u32 %v20437_v4, 16  ;;  %v24335_v11 = vshrl.u32 %v20439_v39, 16 }
 0x414   : > { %v4521_v10 = vor.u32 %v4520_v31, %v4517_v1  ;;  %v14612_v8 = vcombine.low %v20475_v7, %v20480_v24  ;;  %v14613_v45 = vcombine.high %v20475_v7, %v20480_v24  ;;  %v24334_v43 = vshll.u32 %v20439_v39, 16  ;;  %v17752_v31 = vld [vmem:[%s24308_s5 + $0x290] sm:$0xff]  }
 0x415   : > { %v4585_v26 = vsel %vm20393_vm3, %v4513_v28, %v4584_v59  ;;  %v5208_v2 = vrot.slane %v24326_v33, 1  ;;  %v24324_v51 = vshrl.u32 %v20443_v52, 16  ;;  %v24323_v46 = vshll.u32 %v20443_v52, 16 }
 0x416   : > { %4586 = vst [vmem:[#allocation3 + $0xa0] sm:$0x3e] %v4585_v26  ;;  %v4588_v50 = vsel %vm20393_vm3, %v4521_v10, %v4587_v34  ;;  %6003 = vmatprep.mubr.bf16.mxu1 %v14613_v45  ;;  %v5215_v25 = vrot.slane %v24334_v43, 1  ;;  %v24331_v15 = vshrl.u32 %v20445_v22, 16  ;;  %v24329_v18 = vshll.u32 %v20445_v22, 16  ;;  %v17754_v34 = vld [vmem:[%s24308_s5 + $0x2d8] sm:$0xff]  }
 0x417   : > { %4589 = vst [vmem:[#allocation3 + $0xa8] sm:$0x3e] %v4588_v50  ;;  %6004 = vmatmul.mubr.bf16.vlgmr.msra.gmra.mrb[16].mxu1 %v14612_v8  ;;  %v5209_v12 = vor.u32 %v5208_v2, %v24327_v3  ;;  %v5222_v42 = vrot.slane %v24323_v46, 1  ;;  %v20521_v36 = vcombine.low %v20492_v27, %v20494_v54  ;;  %v20525_v49 = vcombine.high %v20492_v27, %v20494_v54  ;;  %v20576_v26 = vld [vmem:[#allocation3 + $0x78] sm:$0xff] }
 0x418   : > { %16255 = vmatpush3.bf16.msra.mxu1 %v17740_v57  ;;  %v5216_v62 = vor.u32 %v5215_v25, %v24335_v11  ;;  %v5229_v0 = vrot.slane %v24329_v18, 1  ;;  %v20536_v13 = vcombine.low %v20505_v63, %v20507_v48  ;;  %v20540_v14 = vcombine.high %v20505_v63, %v20507_v48  ;;  %v20574_v57 = vld [vmem:[#allocation3 + $0x70] sm:$0xff]  ;;  %24512 = vst [vmem:[#allocation20_spill] sm:$0xff] %v20576_v26  ;;  %v17778_v11 = vld [vmem:[%s24308_s5 + $0x2f8] sm:$0xff]  }
 0x419   : > { %24507 = vst [vmem:[#allocation15_spill] sm:$0xff] %v20521_v36  ;;  %24508 = vst [vmem:[#allocation16_spill] sm:$0xff] %v20525_v49  ;;  %16256 = vmatprep.subr.bf16.mxu1 %v17743_v19  ;;  %v5223_v35 = vor.u32 %v5222_v42, %v24324_v51  ;;  %v14594_v41 = vrot.slane %v20521_v36, 9  ;;  %v5517_v37 = vrot.slane %v20525_v49, 5  ;;  %v24316_v5 = vshrl.u32 %v20492_v27, 16 }
 0x41a   : > { %24509 = vst [vmem:[#allocation17_spill] sm:$0xff] %v20536_v13  ;;  %24510 = vst [vmem:[#allocation18_spill] sm:$0xff] %v20540_v14  ;;  %v5230_v29 = vor.u32 %v5229_v0, %v24331_v15  ;;  %v14541_v56 = vcombine.low %v5209_v12, %v5216_v62  ;;  %v14544_v21 = vcombine.high %v5209_v12, %v5216_v62  ;;  %v14597_v61 = vrot.slane %v20536_v13, 9  ;;  %v20591_v0 = vld [vmem:[#allocation3 + $0x80] sm:$0xff] }
 0x41b   : > { %v20555_v32 = vsel %vm20381_vm15, %v14594_v41, %v5517_v37  ;;  %v5529_v16 = vrot.slane %v20540_v14, 5  ;;  %v24315_v55 = vshll.u32 %v20492_v27, 16  ;;  %v24319_v44 = vshrl.u32 %v20494_v54, 16  ;;  %24511 = vst [vmem:[#allocation19_spill] sm:$0xff] %v20574_v57  ;;  %24513 = vst [vmem:[#allocation21_spill] sm:$0xff] %v20591_v0  ;;  %v17756_v37 = vld [vmem:[%s24308_s5 + $0x298] sm:$0xff]  }
 0x41c   : > { %16257 = vmatpush3.bf16.msra.mxu1 %v17744_v17  ;;  %v14547_v20 = vcombine.low %v5223_v35, %v5230_v29  ;;  %v14550_v6 = vcombine.high %v5223_v35, %v5230_v29  ;;  %v14589_v59 = vrot.slane %v14541_v56, 9  ;;  %v5497_v1 = vrot.slane %v14544_v21, 5  ;;  %v20593_v35 = vld [vmem:[#allocation3 + $0x88] sm:$0xff]  ;;  %v17776_v15 = vld [vmem:[%s24308_s5 + $0x2b0] sm:$0xff]  }
 0x41d   : > { %v20565_v28 = vsel %vm20381_vm15, %v14597_v61, %v5529_v16  ;;  %16258 = vmatprep.subr.bf16.mxu1 %v17750_v40  ;;  %v5236_v10 = vrot.slane %v24315_v55, 1  ;;  %v24317_v8 = vshll.u32 %v20494_v54, 16  ;;  %v24318_v45 = vshrl.u32 %v20505_v63, 16  ;;  %24514 = vst [vmem:[#allocation22_spill] sm:$0xff] %v20593_v35  ;;  %v17751_v16 = vld [vmem:[%s24308_s5] sm:$0xff]   ;;  %v20696_v46 = vld [vmem:[#allocation3 + $0xa0] sm:$0xff] }
 0x41e   : > { %v20580_v19 = vsel %vm20381_vm15, %v14589_v59, %v5497_v1  ;;  %v14592_v2 = vrot.slane %v14547_v20, 9  ;;  %v5509_v50 = vrot.slane %v14550_v6, 5  ;;  %v14619_v25 = vcombine.high %v20555_v32, %v20565_v28  ;;  %v17762_v59 = vld [vmem:[%s24308_s5 + $0x2e0] sm:$0xff]   ;;  %v17753_v1 = vld [vmem:[%s24308_s5 + $0x48] sm:$0xff]   ;;  %24521 = vst [vmem:[#allocation29_spill] sm:$0xff] %v20696_v46  ;;  %v20698_v51 = vld [vmem:[#allocation3 + $0xa8] sm:$0xff] }
 0x41f   : > { %v14618_v12 = vcombine.low %v20555_v32, %v20565_v28  ;;  %v5237_v42 = vor.u32 %v5236_v10, %v24316_v5  ;;  %v5243_v17 = vrot.slane %v24317_v8, 1  ;;  %v24314_v62 = vshll.u32 %v20505_v63, 16  ;;  %24522 = vst [vmem:[#allocation30_spill] sm:$0xff] %v20698_v51 }
 0x420   : > { %v20597_v41 = vsel %vm20381_vm15, %v14592_v2, %v5509_v50  ;;  %6011 = vmatprep.mubr.bf16.mxu1 %v14619_v25  ;;  %16259 = vmatpush3.bf16.msra.mxu1 %v17752_v31  ;;  %v24322_v40 = vshrl.u32 %v20507_v48, 16  ;;  %v24320_v29 = vshll.u32 %v20507_v48, 16  ;;  %v20606_v56 = vcombine.low %v20574_v57, %v20576_v26 }
 0x421   : > { %v14614_v21 = vcombine.low %v20580_v19, %v20597_v41  ;;  %v14615_v61 = vcombine.high %v20580_v19, %v20597_v41  ;;  %6012 = vmatmul.mubr.bf16.gmra.mrb[20].mxu1 %v14618_v12  ;;  %16260 = vmatprep.subr.bf16.mxu1 %v17754_v34  ;;  %v5244_v20 = vor.u32 %v5243_v17, %v24319_v44  ;;  %v5250_v6 = vrot.slane %v24314_v62, 1  ;;  %v17757_v44 = vld [vmem:[%s24308_s5 + $0x50] sm:$0xff]  }
 0x422   : > { %24515 = vst [vmem:[#allocation23_spill] sm:$0xff] %v20606_v56  ;;  %v5257_v31 = vrot.slane %v24320_v29, 1  ;;  %v20629_v34 = vcombine.high %v20574_v57, %v20576_v26  ;;  %v20633_v10 = vcombine.low %v20591_v0, %v20593_v35  ;;  %v20637_v2 = vcombine.high %v20591_v0, %v20593_v35 }
 0x423   : > { %6068 = vmatprep.mubr.bf16.mxu0 %v14615_v61  ;;  %v5251_v50 = vor.u32 %v5250_v6, %v24318_v45  ;;  %v14553_v25 = vcombine.low %v5237_v42, %v5244_v20  ;;  %v14556_v12 = vcombine.high %v5237_v42, %v5244_v20  ;;  %v14600_v17 = vrot.slane %v20606_v56, 9  ;;  %v17764_v61 = vld [vmem:[%s24308_s5 + $0x2a0] sm:$0xff]   ;;  %v17755_v42 = vld [vmem:[%s24308_s5 + $0x8] sm:$0xff]  }
 0x424   : > { %24516 = vst [vmem:[#allocation24_spill] sm:$0xff] %v20629_v34  ;;  %24517 = vst [vmem:[#allocation25_spill] sm:$0xff] %v20633_v10  ;;  %6069 = vmatmul.mubr.bf16.vlgmr.msra.gmra.mrb[32].mxu0 %v14614_v21  ;;  %16261 = vmatpush3.bf16.msra.mxu1 %v17756_v37  ;;  %v5258_v62 = vor.u32 %v5257_v31, %v24322_v40  ;;  %v5541_v55 = vrot.slane %v20629_v34, 5  ;;  %v14603_v5 = vrot.slane %v20633_v10, 9  ;;  %v5553_v8 = vrot.slane %v20637_v2, 5  ;;  %v17786_v10 = vld [vmem:[%s24308_s5 + $0x38] sm:$0xff]  }
 0x425   : > { %24518 = vst [vmem:[#allocation26_spill] sm:$0xff] %v20637_v2  ;;  %16295 = vmatpush3.bf16.msra.mxu0 %v17751_v16  ;;  %v14595_v21 = vrot.slane %v14553_v25, 9  ;;  %v5521_v37 = vrot.slane %v14556_v12, 5  ;;  %16262 = vmatprep.subr.bf16.mxu1 %v17762_v59  ;;  %v24325_v20 = vshrl.u32 %v20574_v57, 16  ;;  %v24321_v6 = vshll.u32 %v20574_v57, 16  ;;  %v20679_v12 = vld [vmem:[#allocation3 + $0x90] sm:$0xff] }
 0x426   : > { %16296 = vmatprep.subr.bf16.mxu0 %v17753_v1  ;;  %v14559_v31 = vcombine.low %v5251_v50, %v5258_v62  ;;  %v14562_v45 = vcombine.high %v5251_v50, %v5258_v62  ;;  %v20660_v16 = vsel %vm20381_vm15, %v14600_v17, %v5541_v55  ;;  %v20664_v25 = vsel %vm20381_vm15, %v14603_v5, %v5553_v8  ;;  %v17766_v50 = vld [vmem:[%s24308_s5 + $0x2e8] sm:$0xff]  }
 0x427   : > { %v20668_v59 = vsel %vm20381_vm15, %v14595_v21, %v5521_v37  ;;  %v14625_v1 = vcombine.high %v20660_v16, %v20664_v25  ;;  %v14624_v62 = vcombine.low %v20660_v16, %v20664_v25  ;;  %v5264_v55 = vrot.slane %v24321_v6, 1  ;;  %24519 = vst [vmem:[#allocation27_spill] sm:$0xff] %v20679_v12  ;;  %v20681_v5 = vld [vmem:[#allocation3 + $0x98] sm:$0xff]  ;;  %v17763_v6 = vld [vmem:[%s24308_s5 + $0x10] sm:$0xff]  }
 0x428   : > { %24520 = vst [vmem:[#allocation28_spill] sm:$0xff] %v20681_v5  ;;  %v14598_v8 = vrot.slane %v14559_v31, 9  ;;  %v5533_v17 = vrot.slane %v14562_v45, 5  ;;  %16263 = vmatpush3.bf16.msra.mxu1 %v17764_v61  ;;  %v17768_v21 = vld [vmem:[%s24308_s5 + $0x2a8] sm:$0xff]   ;;  %v24332_v37 = vshrl.u32 %v20576_v26, 16  ;;  %v24328_v29 = vshll.u32 %v20576_v26, 16 }
 0x429   : > { %16297 = vmatpush3.bf16.msra.mxu0 %v17755_v42  ;;  %6019 = vmatprep.mubr.bf16.mxu1 %v14625_v1  ;;  %v5265_v40 = vor.u32 %v5264_v55, %v24325_v20  ;;  %v24337_v45 = vshrl.u32 %v20591_v0, 16  ;;  %v24330_v61 = vshll.u32 %v20591_v0, 16  ;;  %v24341_v31 = vshrl.u32 %v20593_v35, 16  ;;  %v17765_v1 = vld [vmem:[%s24308_s5 + $0x58] sm:$0xff]  }
 0x42a   : > { %v20702_v42 = vsel %vm20381_vm15, %v14598_v8, %v5533_v17  ;;  %16298 = vmatprep.subr.bf16.mxu0 %v17757_v44  ;;  %6020 = vmatmul.mubr.bf16.gmra.mrb[24].mxu1 %v14624_v62  ;;  %v5271_v55 = vrot.slane %v24328_v29, 1  ;;  %v24333_v20 = vshll.u32 %v20593_v35, 16  ;;  %v20712_v33 = vcombine.low %v20679_v12, %v20681_v5  ;;  %v17774_v17 = vld [vmem:[%s24308_s5 + $0x2f0] sm:$0xff]  }
 0x42b   : > { %v14621_v3 = vcombine.high %v20668_v59, %v20702_v42  ;;  %v14620_v44 = vcombine.low %v20668_v59, %v20702_v42  ;;  %16264 = vmatprep.subr.bf16.mxu1 %v17766_v50  ;;  %v5278_v62 = vrot.slane %v24330_v61, 1  ;;  %v20722_v8 = vcombine.high %v20679_v12, %v20681_v5 }
 0x42c   : > { %24523 = vst [vmem:[#allocation31_spill] sm:$0xff] %v20712_v33  ;;  %16265 = vmatpush3.bf16.msra.mxu1 %v17768_v21  ;;  %v5272_v29 = vor.u32 %v5271_v55, %v24332_v37  ;;  %v5285_v18 = vrot.slane %v24333_v20, 1  ;;  %v20733_v50 = vcombine.low %v20696_v46, %v20698_v51  ;;  %v20737_v61 = vcombine.high %v20696_v46, %v20698_v51  ;;  %v17767_v21 = vld [vmem:[%s24308_s5 + $0x18] sm:$0xff]  }
 0x42d   : > { %24524 = vst [vmem:[#allocation32_spill] sm:$0xff] %v20722_v8  ;;  %6076 = vmatprep.mubr.bf16.mxu0 %v14621_v3  ;;  %16299 = vmatpush3.bf16.msra.mxu0 %v17763_v6  ;;  %v5279_v55 = vor.u32 %v5278_v62, %v24337_v45  ;;  %v14606_v37 = vrot.slane %v20712_v33, 9  ;;  %v5565_v20 = vrot.slane %v20722_v8, 5  ;;  %v5331_v43 = vrot.slane %v20437_v4, 1  ;;  %v17769_v62 = vld [vmem:[%s24308_s5 + $0x60] sm:$0xff]  }
 0x42e   : > { %24525 = vst [vmem:[#allocation33_spill] sm:$0xff] %v20733_v50  ;;  %24526 = vst [vmem:[#allocation34_spill] sm:$0xff] %v20737_v61  ;;  %6077 = vmatmul.mubr.bf16.gmra.mrb[36].mxu0 %v14620_v44  ;;  %16300 = vmatprep.subr.bf16.mxu0 %v17765_v1  ;;  %v5286_v3 = vor.u32 %v5285_v18, %v24341_v31  ;;  %v14565_v6 = vcombine.low %v5265_v40, %v5272_v29  ;;  %v14609_v45 = vrot.slane %v20733_v50, 9  ;;  %v17780_v50 = vld [vmem:[%s24308_s5 + $0x2b8] sm:$0xff]  }
 0x42f   : > { %v14568_v2 = vcombine.high %v5265_v40, %v5272_v29  ;;  %v20761_v4 = vsel %vm20381_vm15, %v14606_v37, %v5565_v20  ;;  %v5577_v8 = vrot.slane %v20737_v61, 5  ;;  %16266 = vmatprep.subr.bf16.mxu1 %v17774_v17  ;;  %v5332_v1 = vrot.slane %v20439_v39, 1  ;;  %v17775_v37 = vld [vmem:[%s24308_s5 + $0x20] sm:$0xff]  }
 0x430   : > { %v5333_v44 = vrot.slane %v20443_v52, 1  ;;  %v14571_v18 = vcombine.low %v5279_v55, %v5286_v3  ;;  %v14574_v31 = vcombine.high %v5279_v55, %v5286_v3  ;;  %v14601_v40 = vrot.slane %v14565_v6, 9  ;;  %16267 = vmatpush3.bf16.msra.mxu1 %v17776_v15  ;;  %v17783_v3 = vld [vmem:[%s24308_s5 + $0xc0] sm:$0xff]  }
 0x431   : > { %v5545_v29 = vrot.slane %v14568_v2, 5  ;;  %16301 = vmatpush3.bf16.msra.mxu0 %v17767_v21  ;;  %v5578_v20 = vsel %vm20381_vm15, %v14609_v45, %v5577_v8  ;;  %v5334_v17 = vrot.slane %v20445_v22, 1  ;;  %v20775_v52 = vcombine.low %v5331_v43, %v5332_v1  ;;  %16268 = vmatprep.subr.bf16.mxu1 %v17778_v11  ;;  %v17777_v8 = vld [vmem:[%s24308_s5 + $0x68] sm:$0xff]  }
 0x432   : > { %v20777_v55 = vcombine.high %v5331_v43, %v5332_v1  ;;  %v14604_v2 = vrot.slane %v14571_v18, 9  ;;  %v5557_v21 = vrot.slane %v14574_v31, 5  ;;  %16302 = vmatprep.subr.bf16.mxu0 %v17769_v62  ;;  %v14631_v45 = vcombine.high %v20761_v4, %v5578_v20 }
 0x433   : > { %v20781_v15 = vsel %vm20381_vm15, %v14601_v40, %v5545_v29  ;;  %v14630_v43 = vcombine.low %v20761_v4, %v5578_v20  ;;  %v20791_v11 = vcombine.low %v5333_v44, %v5334_v17  ;;  %v20793_v6 = vcombine.high %v5333_v44, %v5334_v17 }
 0x434   : > { %v14590_v1 = vrot.slane %v20775_v52, 9  ;;  %v20798_v31 = vsel %vm20381_vm15, %v14604_v2, %v5557_v21  ;;  %6027 = vmatprep.mubr.bf16.mxu1 %v14631_v45  ;;  %v5501_v62 = vrot.slane %v20777_v55, 5  ;;  %16269 = vmatpush3.bf16.msra.mxu1 %v17780_v50  ;;  %v24346_v40 = vshll.u32 %v20679_v12, 16  ;;  %v17779_v50 = vld [vmem:[%s24308_s5 + $0x28] sm:$0xff]  }
 0x435   : > { %v14627_v29 = vcombine.high %v20781_v15, %v20798_v31  ;;  %v14626_v44 = vcombine.low %v20781_v15, %v20798_v31  ;;  %16303 = vmatpush3.bf16.msra.mxu0 %v17775_v37  ;;  %6028 = vmatmul.mubr.bf16.gmra.mrb[28].mxu1 %v14630_v43  ;;  %v14593_v20 = vrot.slane %v20791_v11, 9  ;;  %v5513_v17 = vrot.slane %v20793_v6, 5  ;;  %v17781_v43 = vld [vmem:[%s24308_s5 + $0x70] sm:$0xff]  }
 0x436   : > { %v20814_v2 = vsel %vm20381_vm15, %v14590_v1, %v5501_v62  ;;  %16304 = vmatprep.subr.bf16.mxu0 %v17777_v8  ;;  %v5292_v21 = vrot.slane %v24346_v40, 1  ;;  %v24350_v37 = vshll.u32 %v20681_v5, 16  ;;  %16334 = vmatprep.subr.bf16.mxu1 %v17783_v3  ;;  %v24349_v8 = vshll.u32 %v20696_v46, 16  ;;  %v17785_v62 = vld [vmem:[%s24308_s5 + $0x78] sm:$0xff]  }
 0x437   : > { %6084 = vmatprep.mubr.bf16.mxu0 %v14627_v29  ;;  %v20825_v18 = vsel %vm20381_vm15, %v14593_v20, %v5513_v17  ;;  %v24527_v3 = vshrl.u32 %v20679_v12, 16  ;;  %v5337_v1 = vrot.slane %v20505_v63, 1  ;;  %v5342_v34 = vrot.slane %v20593_v35, 1 }
 0x438   : > { %6085 = vmatmul.mubr.bf16.gmra.mrb[40].mxu0 %v14626_v44  ;;  %v14616_v40 = vcombine.low %v20814_v2, %v20825_v18  ;;  %v14617_v45 = vcombine.high %v20814_v2, %v20825_v18  ;;  %v5299_v20 = vrot.slane %v24350_v37, 1  ;;  %v5306_v17 = vrot.slane %v24349_v8, 1  ;;  %v17782_v44 = vld [vmem:[%s24308_s5 + $0x30] sm:$0xff]  }
 0x439   : > { %v5293_v29 = vor.u32 %v5292_v21, %v24527_v3  ;;  %16305 = vmatpush3.bf16.msra.mxu0 %v17779_v50  ;;  %v24528_v21 = vshrl.u32 %v20681_v5, 16  ;;  %v17784_v50 = vld [vmem:[%s24308_s5 + $0x80] sm:$0xff]   ;;  %v5335_v8 = vrot.slane %v20492_v27, 1  ;;  %v5336_v37 = vrot.slane %v20494_v54, 1  ;;  %v17787_v27 = vld [vmem:[%s24308_s5 + $0xc8] sm:$0xff]  }
 0x43a   : > { %6133 = vmatprep.mubr.bf16.mxu1 %v14617_v45  ;;  %16306 = vmatprep.subr.bf16.mxu0 %v17781_v43  ;;  %v24529_v45 = vshrl.u32 %v20696_v46, 16  ;;  %v5339_v54 = vrot.slane %v20574_v57, 1 }
 0x43b   : > { %v5300_v3 = vor.u32 %v5299_v20, %v24528_v21  ;;  %v24530_v20 = vshll.u32 %v20698_v51, 16  ;;  %v5338_v21 = vrot.slane %v20507_v48, 1  ;;  %v20869_v61 = vcombine.low %v5335_v8, %v5336_v37 }
 0x43c   : > { %v5307_v22 = vor.u32 %v5306_v17, %v24529_v45  ;;  %v20871_v33 = vcombine.high %v5335_v8, %v5336_v37  ;;  %v24533_v17 = vshrl.u32 %v20698_v51, 16 }
 0x43d   : > { %v5313_v43 = vrot.slane %v24530_v20, 1  ;;  %v14577_v63 = vcombine.low %v5293_v29, %v5300_v3  ;;  %v14580_v39 = vcombine.high %v5293_v29, %v5300_v3  ;;  %24531 = vst [vmem:[#allocation35_spill] sm:$0xff] %v20869_v61  ;;  %16307 = vmatpush3.bf16.msra.mxu0 %v17782_v44  ;;  %6134 = vmatmul.mubr.bf16.vlgmr.msra.gmra.mrb[32].mxu1 %v14616_v40  ;;  %v14596_v37 = vrot.slane %v20869_v61, 9  ;;  %v17788_v40 = vld [vmem:[%s24308_s5 + $0x88] sm:$0xff]  }
 0x43e   : > { %24532 = vst [vmem:[#allocation36_spill] sm:$0xff] %v20871_v33  ;;  %v20875_v20 = vcombine.low %v5337_v1, %v5338_v21  ;;  %v20877_v48 = vcombine.high %v5337_v1, %v5338_v21  ;;  %16335 = vmatpush3.bf16.msra.mxu1 %v17784_v50  ;;  %v5525_v8 = vrot.slane %v20871_v33, 5  ;;  %16308 = vmatprep.subr.bf16.mxu0 %v17785_v62  ;;  %v17789_v1 = vld [vmem:[%s24308_s5 + $0x140] sm:$0xff]  }
 0x43f   : > { %v5314_v45 = vor.u32 %v5313_v43, %v24533_v17  ;;  %v14607_v29 = vrot.slane %v14577_v63, 9  ;;  %v5569_v3 = vrot.slane %v14580_v39, 5  ;;  %16336 = vmatprep.subr.bf16.mxu1 %v17787_v27  ;;  %v17790_v63 = vld [vmem:[%s24308_s5 + $0xd0] sm:$0xff]   ;;  %v5340_v17 = vrot.slane %v20576_v26, 1  ;;  %v17804_v26 = vld [vmem:[%s24308_s5 + $0xa8] sm:$0xff]  }
 0x440   : > { %24534 = vst [vmem:[#allocation37_spill] sm:$0xff] %v20875_v20  ;;  %24535 = vst [vmem:[#allocation38_spill] sm:$0xff] %v20877_v48  ;;  %v14599_v21 = vrot.slane %v20875_v20, 9  ;;  %v5537_v39 = vrot.slane %v20877_v48, 5  ;;  %v20902_v50 = vsel %vm20381_vm15, %v14596_v37, %v5525_v8  ;;  %v17792_v37 = vld [vmem:[%s24308_s5 + $0x90] sm:$0xff]  }
 0x441   : > { %v14583_v44 = vcombine.low %v5307_v22, %v5314_v45  ;;  %v14586_v43 = vcombine.high %v5307_v22, %v5314_v45  ;;  %v20898_v62 = vsel %vm20381_vm15, %v14607_v29, %v5569_v3  ;;  %v5341_v22 = vrot.slane %v20591_v0, 1  ;;  %16309 = vmatpush3.bf16.msra.mxu0 %v17786_v10 }
 0x442   : > { %v20908_v27 = vsel %vm20381_vm15, %v14599_v21, %v5537_v39  ;;  %16337 = vmatpush3.bf16.msra.mxu1 %v17788_v40  ;;  %16374 = vmatprep.subr.bf16.mxu0 %v17789_v1  ;;  %v20918_v8 = vcombine.low %v5339_v54, %v5340_v17  ;;  %v17794_v1 = vld [vmem:[%s24308_s5 + $0xd8] sm:$0xff]  }
 0x443   : > { %v14610_v45 = vrot.slane %v14583_v44, 9  ;;  %v5581_v57 = vrot.slane %v14586_v43, 5  ;;  %v14623_v29 = vcombine.high %v20902_v50, %v20908_v27  ;;  %v14622_v3 = vcombine.low %v20902_v50, %v20908_v27  ;;  %16338 = vmatprep.subr.bf16.mxu1 %v17790_v63 }
 0x444   : > { %24536 = vst [vmem:[#allocation39_spill] sm:$0xff] %v20918_v8  ;;  %v5343_v44 = vrot.slane %v20679_v12, 1  ;;  %v20923_v43 = vcombine.high %v5339_v54, %v5340_v17  ;;  %v20925_v21 = vcombine.low %v5341_v22, %v5342_v34  ;;  %v20927_v40 = vcombine.high %v5341_v22, %v5342_v34  ;;  %v17796_v22 = vld [vmem:[%s24308_s5 + $0x98] sm:$0xff]  }
 0x445   : > { %v5582_v10 = vsel %vm20381_vm15, %v14610_v45, %v5581_v57  ;;  %6141 = vmatprep.mubr.bf16.mxu1 %v14623_v29  ;;  %v14602_v12 = vrot.slane %v20918_v8, 9  ;;  %v5344_v45 = vrot.slane %v20681_v5, 1  ;;  %v5345_v29 = vrot.slane %v20696_v46, 1  ;;  %v17793_v5 = vld [vmem:[%s24308_s5 + $0x148] sm:$0xff]  }
 0x446   : > { %24537 = vst [vmem:[#allocation40_spill] sm:$0xff] %v20923_v43  ;;  %24538 = vst [vmem:[#allocation41_spill] sm:$0xff] %v20925_v21  ;;  %v14633_v39 = vcombine.high %v20898_v62, %v5582_v10  ;;  %v14632_v0 = vcombine.low %v20898_v62, %v5582_v10  ;;  %6142 = vmatmul.mubr.bf16.gmra.mrb[36].mxu1 %v14622_v3  ;;  %v5549_v54 = vrot.slane %v20923_v43, 5  ;;  %v14605_v34 = vrot.slane %v20925_v21, 9  ;;  %v17825_v21 = vld [vmem:[%s24308_s5 + $0x3c8] sm:$0xff]  }
 0x447   : > { %24539 = vst [vmem:[#allocation42_spill] sm:$0xff] %v20927_v40  ;;  %v5561_v63 = vrot.slane %v20927_v40, 5  ;;  %16339 = vmatpush3.bf16.msra.mxu1 %v17792_v37  ;;  %v5346_v3 = vrot.slane %v20698_v51, 1  ;;  %v24540_v10 = vcombine.high %v20389_v60, %v20475_v7 }
 0x448   : > { %6092 = vmatprep.mubr.bf16.mxu0 %v14633_v39  ;;  %v20952_v57 = vsel %vm20381_vm15, %v14602_v12, %v5549_v54  ;;  %16340 = vmatprep.subr.bf16.mxu1 %v17794_v1  ;;  %v17798_v39 = vld [vmem:[%s24308_s5 + $0xe0] sm:$0xff]   ;;  %v20970_v54 = vcombine.low %v5343_v44, %v5344_v45  ;;  %v20972_v1 = vcombine.high %v5343_v44, %v5344_v45 }
 0x449   : > { %6093 = vmatmul.mubr.bf16.gmra.mrb[44].mxu0 %v14632_v0  ;;  %v20956_v37 = vsel %vm20381_vm15, %v14605_v34, %v5561_v63  ;;  %v20974_v34 = vcombine.low %v5345_v29, %v5346_v3  ;;  %v20976_v63 = vcombine.high %v5345_v29, %v5346_v3  ;;  %v17791_v3 = vld [vmem:[%s24308_s5 + $0x100] sm:$0xff]  }
 0x44a   : > { %6582 = vmatprep.mubr.bf16.mxu0 %v24540_v10  ;;  %v14629_v0 = vcombine.high %v20952_v57, %v20956_v37  ;;  %v14628_v12 = vcombine.low %v20952_v57, %v20956_v37  ;;  %24541 = vst [vmem:[#allocation43_spill] sm:$0xff] %v20970_v54  ;;  %24542 = vst [vmem:[#allocation44_spill] sm:$0xff] %v20972_v1  ;;  %v17800_v10 = vld [vmem:[%s24308_s5 + $0xa0] sm:$0xff]   ;;  %v14608_v17 = vrot.slane %v20970_v54, 9  ;;  %v5573_v46 = vrot.slane %v20972_v1, 5 }
 0x44b   : > { %24543 = vst [vmem:[#allocation45_spill] sm:$0xff] %v20974_v34  ;;  %24544 = vst [vmem:[#allocation46_spill] sm:$0xff] %v20976_v63  ;;  %16341 = vmatpush3.bf16.msra.mxu1 %v17796_v22  ;;  %v14611_v44 = vrot.slane %v20974_v34, 9  ;;  %v5585_v45 = vrot.slane %v20976_v63, 5  ;;  %v17802_v22 = vld [vmem:[%s24308_s5 + $0xe8] sm:$0xff]  }
 0x44c   : > { %6149 = vmatprep.mubr.bf16.mxu1 %v14629_v0  ;;  %16342 = vmatprep.subr.bf16.mxu1 %v17798_v39  ;;  %v20997_v0 = vsel %vm20381_vm15, %v14608_v17, %v5573_v46  ;;  %v14689_v39 = vcombine.high %v20409_v47, %v20814_v2  ;;  %v24545_v17 = vcombine.low %v20389_v60, %v20475_v7  ;;  %v17797_v60 = vld [vmem:[%s24308_s5 + $0x150] sm:$0xff]  }
 0x44d   : > { %v5586_v51 = vsel %vm20381_vm15, %v14611_v44, %v5585_v45  ;;  %v17795_v44 = vld [vmem:[%s24308_s5 + $0x108] sm:$0xff]   ;;  %v17799_v45 = vld [vmem:[%s24308_s5 + $0x110] sm:$0xff]  }
 0x44e   : > { %6150 = vmatmul.mubr.bf16.gmra.mrb[40].mxu1 %v14628_v12  ;;  %v14635_v29 = vcombine.high %v20997_v0, %v5586_v51  ;;  %v14634_v46 = vcombine.low %v20997_v0, %v5586_v51  ;;  %v17806_v12 = vld [vmem:[%s24308_s5 + $0xf0] sm:$0xff]  }
 0x44f   : > { %16343 = vmatpush3.bf16.msra.mxu1 %v17800_v10  ;;  %v24546_v10 = vcombine.high %v20480_v24, %v20555_v32  ;;  %v17808_v51 = vld [vmem:[%s24308_s5 + $0xb0] sm:$0xff]  }
 0x450   : > { %16344 = vmatprep.subr.bf16.mxu1 %v17802_v22  ;;  %6157 = vmatprep.mubr.bf16.mxu1 %v14635_v29  ;;  %v14686_v22 = vcombine.low %v20415_v58, %v20580_v19  ;;  %v17810_v29 = vld [vmem:[%s24308_s5 + $0xf8] sm:$0xff]  }
 0x451   : > { %6583 = vmatmul.mubr.bf16.vlgmr.msra.gmra.mrb[48].mxu0 %v24545_v17  ;;  %v24547_v17 = vcombine.low %v20480_v24, %v20555_v32  ;;  %v17805_v24 = vld [vmem:[%s24308_s5 + $0x160] sm:$0xff]  }
 0x452   : > { %6590 = vmatprep.mubr.bf16.mxu0 %v24546_v10  ;;  %16375 = vmatpush3.bf16.msra.mxu0 %v17791_v3  ;;  %v17812_v3 = vld [vmem:[%s24308_s5 + $0xb8] sm:$0xff]   ;;  %v17816_v32 = vld [vmem:[%s24308_s5 + $0x300] sm:$0xff]  }
 0x453   : > { %16376 = vmatprep.subr.bf16.mxu0 %v17793_v5  ;;  %16345 = vmatpush3.bf16.msra.mxu1 %v17804_v26  ;;  %v17801_v5 = vld [vmem:[%s24308_s5 + $0x158] sm:$0xff]   ;;  %v14687_v26 = vcombine.high %v20415_v58, %v20580_v19  ;;  %v24548_v58 = vcombine.high %v20565_v28, %v20660_v16 }
 0x454   : > { %16346 = vmatprep.subr.bf16.mxu1 %v17806_v12  ;;  %v17803_v19 = vld [vmem:[%s24308_s5 + $0x118] sm:$0xff]  }
 0x456   : > { %16377 = vmatpush3.bf16.msra.mxu0 %v17795_v44  ;;  %6158 = vmatmul.mubr.bf16.gmra.mrb[44].mxu1 %v14634_v46  ;;  %v17815_v46 = vld [vmem:[%s24308_s5 + $0x340] sm:$0xff]   ;;  %v14693_v44 = vcombine.high %v20597_v41, %v20668_v59 }
 0x457   : > { %16378 = vmatprep.subr.bf16.mxu0 %v17797_v60  ;;  %16347 = vmatpush3.bf16.msra.mxu1 %v17808_v51  ;;  %v17819_v60 = vld [vmem:[%s24308_s5 + $0x348] sm:$0xff]   ;;  %v14692_v51 = vcombine.low %v20597_v41, %v20668_v59  ;;  %v17822_v41 = vld [vmem:[%s24308_s5 + $0x350] sm:$0xff]  }
 0x458   : > { %6647 = vmatprep.mubr.bf16.mxu1 %v14687_v26  ;;  %16348 = vmatprep.subr.bf16.mxu1 %v17810_v29  ;;  %v17820_v26 = vld [vmem:[%s24308_s5 + $0x308] sm:$0xff]   ;;  %v21088_v59 = vld [vmem:[#allocation3 + $0x40] sm:$0xff]  ;;  %v24549_v29 = vcombine.low %v20565_v28, %v20660_v16  ;;  %v17828_v28 = vld [vmem:[%s24308_s5 + $0x318] sm:$0xff]  }
 0x459   : > { %6591 = vmatmul.mubr.bf16.gmra.mrb[52].mxu0 %v24547_v17  ;;  %v21097_v17 = vld [vmem:[#allocation3 + $0x58] sm:$0xff] }
 0x45a   : > { %6598 = vmatprep.mubr.bf16.mxu0 %v24548_v58  ;;  %16379 = vmatpush3.bf16.msra.mxu0 %v17799_v45  ;;  %v17807_v45 = vld [vmem:[%s24308_s5 + $0x120] sm:$0xff]   ;;  %v17811_v58 = vld [vmem:[%s24308_s5 + $0x128] sm:$0xff]  }
 0x45b   : > { %16380 = vmatprep.subr.bf16.mxu0 %v17801_v5  ;;  %16349 = vmatpush3.bf16.msra.mxu1 %v17812_v3  ;;  %v17809_v5 = vld [vmem:[%s24308_s5 + $0x168] sm:$0xff]   ;;  %v21093_v3 = vld [vmem:[#allocation3 + $0x48] sm:$0xff] }
 0x45c   : > { %16414 = vmatprep.subr.bf16.mxu1 %v17815_v46  ;;  %v24550_v46 = vcombine.high %v20664_v25, %v20761_v4  ;;  %v6869_v7 = vshll.u32 %v21093_v3, 16 }
 0x45e   : > { %16381 = vmatpush3.bf16.msra.mxu0 %v17803_v19  ;;  %6648 = vmatmul.mubr.bf16.vlgmr.msra.gmra.mrb[48].mxu1 %v14686_v22  ;;  %v21095_v22 = vld [vmem:[#allocation3 + $0x50] sm:$0xff]  ;;  %v17813_v19 = vld [vmem:[%s24308_s5 + $0x170] sm:$0xff]   ;;  %v6871_v1 = vrot.slane %v6869_v7, 1 }
 0x45f   : > { %16382 = vmatprep.subr.bf16.mxu0 %v17805_v24  ;;  %16415 = vmatpush3.bf16.msra.mxu1 %v17816_v32  ;;  %v17824_v24 = vld [vmem:[%s24308_s5 + $0x310] sm:$0xff]   ;;  %v21117_v32 = vcombine.low %v21088_v59, %v21093_v3  ;;  %v6876_v35 = vshll.u32 %v21095_v22, 16 }
 0x460   : > { %6655 = vmatprep.mubr.bf16.mxu1 %v14693_v44  ;;  %16416 = vmatprep.subr.bf16.mxu1 %v17819_v60  ;;  %v21121_v44 = vcombine.high %v21088_v59, %v21093_v3  ;;  %v14858_v60 = vcombine.low %v21095_v22, %v21097_v17 }
 0x461   : > { %6599 = vmatmul.mubr.bf16.gmra.mrb[56].mxu0 %v24549_v29  ;;  %v14699_v29 = vcombine.high %v20702_v42, %v20781_v15  ;;  %v14900_v16 = vrot.slane %v21117_v32, 9  ;;  %v6878_v54 = vrot.slane %v6876_v35, 1  ;;  %v17836_v35 = vld [vmem:[%s24308_s5 + $0x328] sm:$0xff]  }
 0x462   : > { %6606 = vmatprep.mubr.bf16.mxu0 %v24550_v46  ;;  %16383 = vmatpush3.bf16.msra.mxu0 %v17807_v45  ;;  %v17826_v45 = vld [vmem:[%s24308_s5 + $0x358] sm:$0xff]   ;;  %v14698_v46 = vcombine.low %v20702_v42, %v20781_v15  ;;  %v14903_v10 = vrot.slane %v14858_v60, 9  ;;  %v24551_v42 = vcombine.low %v20664_v25, %v20761_v4  ;;  %v17830_v15 = vld [vmem:[%s24308_s5 + $0x360] sm:$0xff]   ;;  %v6867_v60 = vshrl.u32 %v21093_v3, 16 }
 0x463   : > { %16384 = vmatprep.subr.bf16.mxu0 %v17809_v5  ;;  %16417 = vmatpush3.bf16.msra.mxu1 %v17820_v26  ;;  %v14861_v5 = vcombine.high %v21095_v22, %v21097_v17  ;;  %v17814_v26 = vld [vmem:[%s24308_s5 + $0x130] sm:$0xff]   ;;  %v17818_v4 = vld [vmem:[%s24308_s5 + $0x138] sm:$0xff]  }
 0x464   : > { %16418 = vmatprep.subr.bf16.mxu1 %v17822_v41  ;;  %v17817_v41 = vld [vmem:[%s24308_s5 + $0x178] sm:$0xff]   ;;  %v6872_v7 = vor.u32 %v6871_v1, %v6867_v60 }
 0x465   : > { %v7161_v12 = vrot.slane %v14861_v5, 5  ;;  %v21172_v5 = vld [vmem:[#allocation3 + $0x68] sm:$0xff] }
 0x466   : > { %16385 = vmatpush3.bf16.msra.mxu0 %v17811_v58  ;;  %6656 = vmatmul.mubr.bf16.gmra.mrb[52].mxu1 %v14692_v51  ;;  %v7149_v58 = vrot.slane %v21121_v44, 5  ;;  %v6897_v60 = vshll.u32 %v21172_v5, 16 }
 0x467   : > { %16386 = vmatprep.subr.bf16.mxu0 %v17813_v19  ;;  %16419 = vmatpush3.bf16.msra.mxu1 %v17824_v24  ;;  %v6860_v24 = vshrl.u32 %v21088_v59, 16  ;;  %v21166_v25 = vsel %vm20381_vm15, %v14903_v10, %v7161_v12  ;;  %v6874_v12 = vshrl.u32 %v21095_v22, 16  ;;  %v17834_v10 = vld [vmem:[%s24308_s5 + $0x368] sm:$0xff]  }
 0x468   : > { %6663 = vmatprep.mubr.bf16.mxu1 %v14699_v29  ;;  %16420 = vmatprep.subr.bf16.mxu1 %v17826_v45  ;;  %v21153_v51 = vsel %vm20381_vm15, %v14900_v16, %v7149_v58  ;;  %v6862_v16 = vshll.u32 %v21088_v59, 16  ;;  %v21170_v45 = vld [vmem:[#allocation3 + $0x60] sm:$0xff]  ;;  %v21185_v58 = vld [vmem:[#allocation3 + $0x70] sm:$0xff]  ;;  %v6881_v29 = vshrl.u32 %v21097_v17, 16 }
 0x469   : > { %6607 = vmatmul.mubr.bf16.gmra.mrb[60].mxu0 %v24551_v42  ;;  %v21187_v42 = vld [vmem:[#allocation3 + $0x78] sm:$0xff]  ;;  %v21202_v63 = vcombine.low %v21170_v45, %v21172_v5 }
 0x46a   : > { %16387 = vmatpush3.bf16.msra.mxu0 %v17814_v26  ;;  %6712 = vmatprep.mubr.bf16.mxu0 %v14689_v39  ;;  %v17821_v39 = vld [vmem:[%s24308_s5 + $0x3c0] sm:$0xff]   ;;  %v14705_v26 = vcombine.high %v20798_v31, %v20898_v62  ;;  %v6864_v19 = vrot.slane %v6862_v16, 1  ;;  %v21206_v16 = vcombine.high %v21170_v45, %v21172_v5  ;;  %v14870_v40 = vcombine.low %v21185_v58, %v21187_v42 }
 0x46b   : > { %16388 = vmatprep.subr.bf16.mxu0 %v17817_v41  ;;  %16421 = vmatpush3.bf16.msra.mxu1 %v17828_v28  ;;  %v17832_v41 = vld [vmem:[%s24308_s5 + $0x320] sm:$0xff]   ;;  %v6883_v28 = vshll.u32 %v21097_v17, 16  ;;  %v14906_v8 = vrot.slane %v21202_v63, 9 }
 0x46c   : > { %16422 = vmatprep.subr.bf16.mxu1 %v17830_v15  ;;  %v17823_v15 = vld [vmem:[%s24308_s5 + $0x380] sm:$0xff]   ;;  %v6865_v34 = vor.u32 %v6864_v19, %v6860_v24  ;;  %v7173_v56 = vrot.slane %v21206_v16, 5  ;;  %v6879_v19 = vor.u32 %v6878_v54, %v6874_v12  ;;  %v14909_v24 = vrot.slane %v14870_v40, 9 }
 0x46d   : > { %v6885_v43 = vrot.slane %v6883_v28, 1  ;;  %v17838_v28 = vld [vmem:[%s24308_s5 + $0x370] sm:$0xff]   ;;  %v6890_v54 = vshll.u32 %v21170_v45, 16  ;;  %v24553_v40 = vcombine.high %v20825_v18, %v20902_v50 }
 0x46e   : > { %16389 = vmatpush3.bf16.msra.mxu0 %v17818_v4  ;;  %6664 = vmatmul.mubr.bf16.gmra.mrb[56].mxu1 %v14698_v46  ;;  %v14873_v4 = vcombine.high %v21185_v58, %v21187_v42  ;;  %v24552_v46 = vcombine.low %v20409_v47, %v20814_v2  ;;  %v17827_v47 = vld [vmem:[%s24308_s5 + $0x388] sm:$0xff]   ;;  %v14853_v2 = vcombine.low %v6865_v34, %v6872_v7 }
 0x46f   : > { %16454 = vmatprep.subr.bf16.mxu0 %v17821_v39  ;;  %16423 = vmatpush3.bf16.msra.mxu1 %v17832_v41  ;;  %v6888_v39 = vshrl.u32 %v21170_v45, 16  ;;  %v6886_v41 = vor.u32 %v6885_v43, %v6881_v29  ;;  %v14856_v1 = vcombine.high %v6865_v34, %v6872_v7  ;;  %v6895_v43 = vshrl.u32 %v21172_v5, 16  ;;  %v17840_v34 = vld [vmem:[%s24308_s5 + $0x330] sm:$0xff]  }
 0x470   : > { %6671 = vmatprep.mubr.bf16.mxu1 %v14705_v26  ;;  %16424 = vmatprep.subr.bf16.mxu1 %v17834_v10  ;;  %v21232_v26 = vsel %vm20381_vm15, %v14906_v8, %v7173_v56  ;;  %v7185_v48 = vrot.slane %v14873_v4, 5  ;;  %v17829_v56 = vld [vmem:[%s24308_s5 + $0x3d0] sm:$0xff]   ;;  %v6892_v29 = vrot.slane %v6890_v54, 1  ;;  %v6899_v7 = vrot.slane %v6897_v60, 1 }
 0x471   : > { %6713 = vmatmul.mubr.bf16.vlgmr.msra.gmra.mrb[64].mxu0 %v24552_v46  ;;  %v14859_v8 = vcombine.low %v6879_v19, %v6886_v41  ;;  %v14862_v12 = vcombine.high %v6879_v19, %v6886_v41  ;;  %v7153_v4 = vrot.slane %v14856_v1, 5  ;;  %v21255_v46 = vld [vmem:[#allocation3 + $0x80] sm:$0xff]  ;;  %v6902_v41 = vshrl.u32 %v21185_v58, 16 }
 0x472   : > { %6720 = vmatprep.mubr.bf16.mxu0 %v24553_v40  ;;  %16455 = vmatpush3.bf16.msra.mxu0 %v17823_v15  ;;  %v21248_v10 = vsel %vm20381_vm15, %v14909_v24, %v7185_v48  ;;  %v14901_v15 = vrot.slane %v14853_v2, 9  ;;  %v21257_v40 = vld [vmem:[#allocation3 + $0x88] sm:$0xff]  ;;  %v6893_v24 = vor.u32 %v6892_v29, %v6888_v39  ;;  %v17831_v54 = vld [vmem:[%s24308_s5 + $0x390] sm:$0xff]   ;;  %v6900_v1 = vor.u32 %v6899_v7, %v6895_v43 }
 0x473   : > { %16456 = vmatprep.subr.bf16.mxu0 %v17825_v21  ;;  %16425 = vmatpush3.bf16.msra.mxu1 %v17836_v35  ;;  %v17846_v48 = vld [vmem:[%s24308_s5 + $0x378] sm:$0xff]   ;;  %v14904_v35 = vrot.slane %v14859_v8, 9  ;;  %v7165_v19 = vrot.slane %v14862_v12, 5  ;;  %v6909_v60 = vshrl.u32 %v21187_v42, 16  ;;  %v21272_v21 = vld [vmem:[#allocation3 + $0x90] sm:$0xff]  ;;  %v21274_v8 = vld [vmem:[#allocation3 + $0x98] sm:$0xff]  ;;  %v21311_v29 = vcombine.high %v21255_v46, %v21257_v40 }
 0x474   : > { %16426 = vmatprep.subr.bf16.mxu1 %v17838_v28  ;;  %v21268_v2 = vsel %vm20381_vm15, %v14901_v15, %v7153_v4  ;;  %v6904_v28 = vshll.u32 %v21185_v58, 16  ;;  %v17833_v39 = vld [vmem:[%s24308_s5 + $0x3d8] sm:$0xff]   ;;  %v6911_v12 = vshll.u32 %v21187_v42, 16  ;;  %v24555_v15 = vcombine.high %v21153_v51, %v21166_v25 }
 0x475   : > { %v21284_v43 = vsel %vm20381_vm15, %v14904_v35, %v7165_v19  ;;  %v14865_v35 = vcombine.low %v6893_v24, %v6900_v1  ;;  %v24556_v19 = vcombine.low %v20825_v18, %v20902_v50  ;;  %v17835_v18 = vld [vmem:[%s24308_s5 + $0x398] sm:$0xff]   ;;  %v6918_v20 = vshll.u32 %v21255_v46, 16 }
 0x476   : > { %16457 = vmatpush3.bf16.msra.mxu0 %v17827_v47  ;;  %v24554_v47 = vcombine.low %v20798_v31, %v20898_v62  ;;  %v17848_v31 = vld [vmem:[%s24308_s5 + $0x338] sm:$0xff]   ;;  %v6906_v7 = vrot.slane %v6904_v28, 1  ;;  %v14882_v62 = vcombine.low %v21272_v21, %v21274_v8  ;;  %v24557_v28 = vcombine.high %v20908_v27, %v20952_v57 }
 0x477   : > { %16458 = vmatprep.subr.bf16.mxu0 %v17829_v56  ;;  %v21291_v56 = vcombine.low %v21255_v46, %v21257_v40  ;;  %16427 = vmatpush3.bf16.msra.mxu1 %v17840_v34  ;;  %v17851_v34 = vld [vmem:[%s24308_s5 + $0x440] sm:$0xff]   ;;  %v6920_v33 = vrot.slane %v6918_v20, 1  ;;  %v24559_v61 = vcombine.high %v21232_v26, %v21248_v10 }
 0x478   : > { %6672 = vmatmul.mubr.bf16.gmra.mrb[60].mxu1 %v24554_v47  ;;  %16428 = vmatprep.subr.bf16.mxu1 %v17846_v48  ;;  %v6913_v47 = vrot.slane %v6911_v12, 1  ;;  %v6907_v50 = vor.u32 %v6906_v7, %v6902_v41  ;;  %v14907_v48 = vrot.slane %v14865_v35, 9  ;;  %v17837_v12 = vld [vmem:[%s24308_s5 + $0x3e0] sm:$0xff]   ;;  %v6916_v35 = vshrl.u32 %v21255_v46, 16 }
 0x479   : > { %7659 = vmatprep.mubr.bf16.mxu1 %v24555_v15  ;;  %6721 = vmatmul.mubr.bf16.gmra.mrb[68].mxu0 %v24556_v19  ;;  %v14868_v15 = vcombine.high %v6893_v24, %v6900_v1  ;;  %v14885_v24 = vcombine.high %v21272_v21, %v21274_v8  ;;  %v14912_v1 = vrot.slane %v21291_v56, 9  ;;  %v17852_v41 = vld [vmem:[%s24308_s5 + $0x400] sm:$0xff]  }
 0x47a   : > { %6728 = vmatprep.mubr.bf16.mxu0 %v24557_v28  ;;  %16459 = vmatpush3.bf16.msra.mxu0 %v17831_v54  ;;  %v6914_v19 = vor.u32 %v6913_v47, %v6909_v60  ;;  %v7197_v54 = vrot.slane %v21311_v29, 5  ;;  %v14915_v28 = vrot.slane %v14882_v62, 9  ;;  %v17859_v60 = vld [vmem:[%s24308_s5 + $0x448] sm:$0xff]   ;;  %v6921_v14 = vor.u32 %v6920_v33, %v6916_v35 }
 0x47b   : > { %16460 = vmatprep.subr.bf16.mxu0 %v17833_v39  ;;  %v7177_v4 = vrot.slane %v14868_v15, 5  ;;  %16429 = vmatpush3.bf16.msra.mxu1 %v17848_v31  ;;  %v7209_v7 = vrot.slane %v14885_v24, 5  ;;  %v6923_v39 = vshrl.u32 %v21257_v40, 16  ;;  %v17839_v24 = vld [vmem:[%s24308_s5 + $0x3a0] sm:$0xff]  }
 0x47c   : > { %16494 = vmatprep.subr.bf16.mxu1 %v17851_v34  ;;  %v14871_v47 = vcombine.low %v6907_v50, %v6914_v19  ;;  %v14874_v15 = vcombine.high %v6907_v50, %v6914_v19  ;;  %v21343_v62 = vsel %vm20381_vm15, %v14912_v1, %v7197_v54  ;;  %v6925_v50 = vshll.u32 %v21257_v40, 16 }
 0x47d   : > { %v21339_v31 = vsel %vm20381_vm15, %v14907_v48, %v7177_v4  ;;  %v21350_v34 = vsel %vm20381_vm15, %v14915_v28, %v7209_v7  ;;  %v6930_v19 = vshrl.u32 %v21272_v21, 16  ;;  %v21354_v4 = vld [vmem:[#allocation3 + $0xa0] sm:$0xff]  ;;  %v21356_v48 = vld [vmem:[#allocation3 + $0xa8] sm:$0xff]  ;;  %v24558_v1 = vcombine.low %v21153_v51, %v21166_v25 }
 0x47e   : > { %16461 = vmatpush3.bf16.msra.mxu0 %v17835_v18  ;;  %v17845_v18 = vld [vmem:[%s24308_s5 + $0x3e8] sm:$0xff]   ;;  %v14910_v54 = vrot.slane %v14871_v47, 9  ;;  %v7189_v28 = vrot.slane %v14874_v15, 5  ;;  %v14937_v20 = vcombine.high %v21343_v62, %v21350_v34  ;;  %v6932_v7 = vshll.u32 %v21272_v21, 16 }
 0x47f   : > { %16462 = vmatprep.subr.bf16.mxu0 %v17837_v12  ;;  %v17860_v12 = vld [vmem:[%s24308_s5 + $0x408] sm:$0xff]   ;;  %v6927_v13 = vrot.slane %v6925_v50, 1  ;;  %v6937_v51 = vshrl.u32 %v21274_v8, 16  ;;  %v6939_v25 = vshll.u32 %v21274_v8, 16  ;;  %v24560_v47 = vcombine.low %v20908_v27, %v20952_v57 }
 0x480   : > { %7660 = vmatmul.mubr.bf16.vlgmr.msra.gmra.mrb[64].mxu1 %v24558_v1  ;;  %v6934_v15 = vrot.slane %v6932_v7, 1  ;;  %v14888_v35 = vcombine.low %v21354_v4, %v21356_v48  ;;  %v24561_v27 = vcombine.high %v20956_v37, %v20997_v0  ;;  %v17847_v57 = vld [vmem:[%s24308_s5 + $0x3a8] sm:$0xff]  }
 0x481   : > { %16495 = vmatpush3.bf16.msra.mxu1 %v17852_v41  ;;  %7667 = vmatprep.mubr.bf16.mxu1 %v24559_v61  ;;  %v21380_v41 = vsel %vm20381_vm15, %v14910_v54, %v7189_v28  ;;  %v17862_v61 = vld [vmem:[%s24308_s5 + $0x450] sm:$0xff]   ;;  %v6928_v1 = vor.u32 %v6927_v13, %v6923_v39  ;;  %v6941_v54 = vrot.slane %v6939_v25, 1 }
 0x482   : > { %6729 = vmatmul.mubr.bf16.gmra.mrb[72].mxu0 %v24560_v47  ;;  %16496 = vmatprep.subr.bf16.mxu1 %v17859_v60  ;;  %v17849_v28 = vld [vmem:[%s24308_s5 + $0x3f0] sm:$0xff]   ;;  %v6935_v7 = vor.u32 %v6934_v15, %v6930_v19  ;;  %v14918_v25 = vrot.slane %v14888_v35, 9  ;;  %v17870_v15 = vld [vmem:[%s24308_s5 + $0x458] sm:$0xff]  }
 0x483   : > { %6736 = vmatprep.mubr.bf16.mxu0 %v24561_v27  ;;  %16463 = vmatpush3.bf16.msra.mxu0 %v17839_v24  ;;  %v14891_v24 = vcombine.high %v21354_v4, %v21356_v48  ;;  %v21404_v47 = vld [vmem:[#allocation3] sm:$0xff]  ;;  %v6942_v39 = vor.u32 %v6941_v54, %v6937_v51  ;;  %v14877_v19 = vcombine.low %v6921_v14, %v6928_v1 }
 0x484   : > { %16464 = vmatprep.subr.bf16.mxu0 %v17845_v18  ;;  %v21408_v27 = vcombine.low %v21404_v47, %v21404_v47  ;;  %v21412_v50 = vcombine.high %v21404_v47, %v21404_v47  ;;  %v17864_v13 = vld [vmem:[%s24308_s5 + $0x410] sm:$0xff]   ;;  %v14880_v18 = vcombine.high %v6921_v14, %v6928_v1  ;;  %v17857_v1 = vld [vmem:[%s24308_s5 + $0x3f8] sm:$0xff]  }
 0x485   : > { %16497 = vmatpush3.bf16.msra.mxu1 %v17860_v12  ;;  %v7221_v60 = vrot.slane %v14891_v24, 5  ;;  %v6944_v12 = vshrl.u32 %v21354_v4, 16  ;;  %v17850_v51 = vld [vmem:[%s24308_s5 + $0x3b0] sm:$0xff]   ;;  %v14883_v54 = vcombine.low %v6935_v7, %v6942_v39  ;;  %v14886_v14 = vcombine.high %v6935_v7, %v6942_v39  ;;  %v17872_v39 = vld [vmem:[%s24308_s5 + $0x418] sm:$0xff]  }
 0x486   : > { %16498 = vmatprep.subr.bf16.mxu1 %v17862_v61  ;;  %v14921_v33 = vrot.slane %v21408_v27, 9  ;;  %v7233_v49 = vrot.slane %v21412_v50, 5  ;;  %v14913_v35 = vrot.slane %v14877_v19, 9  ;;  %v7201_v61 = vrot.slane %v14880_v18, 5 }
 0x487   : > { %16465 = vmatpush3.bf16.msra.mxu0 %v17847_v57  ;;  %v24562_v24 = vcombine.low %v21232_v26, %v21248_v10  ;;  %v21434_v57 = vsel %vm20381_vm15, %v14918_v25, %v7221_v60  ;;  %v6946_v7 = vshll.u32 %v21354_v4, 16  ;;  %v14916_v10 = vrot.slane %v14883_v54, 9 }
 0x488   : > { %16466 = vmatprep.subr.bf16.mxu0 %v17849_v28  ;;  %v21438_v36 = vsel %vm20381_vm15, %v14921_v33, %v7233_v49  ;;  %v6951_v28 = vshrl.u32 %v21356_v48, 16  ;;  %v21447_v26 = vsel %vm20381_vm15, %v14913_v35, %v7201_v61  ;;  %v7213_v60 = vrot.slane %v14886_v14, 5 }
 0x489   : > { %7668 = vmatmul.mubr.bf16.gmra.mrb[68].mxu1 %v24562_v24  ;;  %v14943_v49 = vcombine.high %v21434_v57, %v21438_v36  ;;  %v24563_v33 = vcombine.low %v20956_v37, %v20997_v0  ;;  %v6953_v19 = vshll.u32 %v21356_v48, 16  ;;  %v6958_v18 = vshrl.u32 %v21404_v47, 16  ;;  %v17858_v37 = vld [vmem:[%s24308_s5 + $0x3b8] sm:$0xff]  }
 0x48a   : > { %16499 = vmatpush3.bf16.msra.mxu1 %v17864_v13  ;;  %7675 = vmatprep.mubr.bf16.mxu1 %v14937_v20  ;;  %v17874_v20 = vld [vmem:[%s24308_s5 + $0x460] sm:$0xff]   ;;  %v6948_v13 = vrot.slane %v6946_v7, 1  ;;  %v6960_v25 = vshll.u32 %v21404_v47, 16  ;;  %v24564_v54 = vcombine.high %v21268_v2, %v21284_v43  ;;  %v21468_v0 = vsel %vm20381_vm15, %v14916_v10, %v7213_v60 }
 0x48b   : > { %6737 = vmatmul.mubr.bf16.gmra.mrb[76].mxu0 %v24563_v33  ;;  %16500 = vmatprep.subr.bf16.mxu1 %v17870_v15  ;;  %v14942_v15 = vcombine.low %v21434_v57, %v21438_v36  ;;  %v6987_v14 = vrot.slane %v21088_v59, 1  ;;  %v6988_v35 = vrot.slane %v21093_v3, 1  ;;  %v14939_v61 = vcombine.high %v21447_v26, %v21468_v0  ;;  %v17876_v59 = vld [vmem:[%s24308_s5 + $0x420] sm:$0xff]  }
 0x48c   : > { %16467 = vmatpush3.bf16.msra.mxu0 %v17850_v51  ;;  %7724 = vmatprep.mubr.bf16.mxu0 %v24564_v54  ;;  %v17861_v51 = vld [vmem:[%s24308_s5 + $0x4c0] sm:$0xff]   ;;  %v6949_v7 = vor.u32 %v6948_v13, %v6944_v12  ;;  %v6955_v10 = vrot.slane %v6953_v19, 1  ;;  %v6962_v60 = vrot.slane %v6960_v25, 1  ;;  %v6989_v3 = vrot.slane %v21095_v22, 1  ;;  %v17880_v54 = vld [vmem:[%s24308_s5 + $0x468] sm:$0xff]  }
 0x48d   : > { %16468 = vmatprep.subr.bf16.mxu0 %v17857_v1  ;;  %v6990_v1 = vrot.slane %v21097_v17, 1  ;;  %v21486_v33 = vcombine.low %v6987_v14, %v6988_v35  ;;  %v21491_v12 = vcombine.high %v6987_v14, %v6988_v35  ;;  %v6992_v13 = vrot.slane %v21172_v5, 1  ;;  %v17863_v22 = vld [vmem:[%s24308_s5 + $0x480] sm:$0xff]  }
 0x48e   : > { %16501 = vmatpush3.bf16.msra.mxu1 %v17872_v39  ;;  %v6956_v24 = vor.u32 %v6955_v10, %v6951_v28  ;;  %v6991_v39 = vrot.slane %v21170_v45, 1  ;;  %v6963_v17 = vor.u32 %v6962_v60, %v6958_v18  ;;  %v17869_v28 = vld [vmem:[%s24308_s5 + $0x4c8] sm:$0xff]   ;;  %v24565_v45 = vcombine.low %v21343_v62, %v21350_v34  ;;  %v17893_v57 = vld [vmem:[%s24308_s5 + $0x540] sm:$0xff]  }
 0x48f   : > { %16502 = vmatprep.subr.bf16.mxu1 %v17874_v20  ;;  %v14860_v19 = vcombine.low %v6989_v3, %v6990_v1  ;;  %v14863_v25 = vcombine.high %v6989_v3, %v6990_v1  ;;  %v14902_v20 = vrot.slane %v21486_v33, 9  ;;  %v7157_v14 = vrot.slane %v21491_v12, 5  ;;  %v17882_v18 = vld [vmem:[%s24308_s5 + $0x428] sm:$0xff]  }
 0x490   : > { %16469 = vmatpush3.bf16.msra.mxu0 %v17858_v37  ;;  %v14889_v5 = vcombine.low %v6949_v7, %v6956_v24  ;;  %v14892_v37 = vcombine.high %v6949_v7, %v6956_v24  ;;  %v6993_v35 = vrot.slane %v21185_v58, 1  ;;  %v14898_v10 = vcombine.high %v6963_v17, %v6963_v17  ;;  %v17884_v58 = vld [vmem:[%s24308_s5 + $0x470] sm:$0xff]  }
 0x491   : > { %16534 = vmatprep.subr.bf16.mxu0 %v17861_v51  ;;  %7676 = vmatmul.mubr.bf16.gmra.mrb[72].mxu1 %v24565_v45  ;;  %v14895_v51 = vcombine.low %v6963_v17, %v6963_v17  ;;  %v14905_v60 = vrot.slane %v14860_v19, 9  ;;  %v7169_v3 = vrot.slane %v14863_v25, 5  ;;  %v24566_v62 = vcombine.low %v21268_v2, %v21284_v43  ;;  %v17871_v2 = vld [vmem:[%s24308_s5 + $0x488] sm:$0xff]   ;;  %v17886_v45 = vld [vmem:[%s24308_s5 + $0x430] sm:$0xff]  }
 0x492   : > { %16503 = vmatpush3.bf16.msra.mxu1 %v17876_v59  ;;  %7683 = vmatprep.mubr.bf16.mxu1 %v14943_v49  ;;  %v14919_v34 = vrot.slane %v14889_v5, 9  ;;  %v7225_v24 = vrot.slane %v14892_v37, 5  ;;  %v21518_v49 = vsel %vm20381_vm15, %v14902_v20, %v7157_v14  ;;  %v6994_v7 = vrot.slane %v21187_v42, 1  ;;  %v17873_v42 = vld [vmem:[%s24308_s5 + $0x4d0] sm:$0xff]  }
 0x493   : > { %7725 = vmatmul.mubr.bf16.vlgmr.msra.gmra.mrb[80].mxu0 %v24566_v62  ;;  %16504 = vmatprep.subr.bf16.mxu1 %v17880_v54  ;;  %v24567_v59 = vcombine.high %v21339_v31, %v21380_v41  ;;  %v14922_v43 = vrot.slane %v14895_v51, 9  ;;  %v7237_v1 = vrot.slane %v14898_v10, 5  ;;  %v21529_v54 = vsel %vm20381_vm15, %v14905_v60, %v7169_v3  ;;  %v21563_v60 = vld [vmem:[#allocation3 + $0x30] sm:$0xff] }
 0x494   : > { %16535 = vmatpush3.bf16.msra.mxu0 %v17863_v22  ;;  %v21531_v17 = vcombine.low %v6991_v39, %v6992_v13  ;;  %v21538_v22 = vsel %vm20381_vm15, %v14919_v34, %v7225_v24  ;;  %v14928_v19 = vcombine.low %v21518_v49, %v21529_v54  ;;  %v14929_v25 = vcombine.high %v21518_v49, %v21529_v54 }
 0x495   : > { %7732 = vmatprep.mubr.bf16.mxu0 %v24567_v59  ;;  %16536 = vmatprep.subr.bf16.mxu0 %v17869_v28  ;;  %v21544_v20 = vcombine.high %v6991_v39, %v6992_v13  ;;  %v21548_v28 = vsel %vm20381_vm15, %v14922_v43, %v7237_v1  ;;  %v14872_v5 = vcombine.low %v6993_v35, %v6994_v7  ;;  %v17888_v39 = vld [vmem:[%s24308_s5 + $0x478] sm:$0xff]   ;;  %v8139_v10 = vshrl.u32 %v21408_v27, 16 }
 0x496   : > { %16505 = vmatpush3.bf16.msra.mxu1 %v17882_v18  ;;  %v14875_v37 = vcombine.high %v6993_v35, %v6994_v7  ;;  %v14908_v14 = vrot.slane %v21531_v17, 9  ;;  %v14945_v51 = vcombine.high %v21538_v22, %v21548_v28  ;;  %v14944_v13 = vcombine.low %v21538_v22, %v21548_v28  ;;  %v17875_v35 = vld [vmem:[%s24308_s5 + $0x490] sm:$0xff]   ;;  %v17879_v7 = vld [vmem:[%s24308_s5 + $0x4d8] sm:$0xff]  }
 0x497   : > { %16506 = vmatprep.subr.bf16.mxu1 %v17884_v58  ;;  %v7181_v18 = vrot.slane %v21544_v20, 5  ;;  %v14911_v3 = vrot.slane %v14872_v5, 9  ;;  %v8142_v34 = vshll.u32 %v21408_v27, 16  ;;  %v8148_v24 = vshll.u32 %v21412_v50, 16  ;;  %v21570_v58 = vld [vmem:[#allocation3 + $0x38] sm:$0xff]  ;;  %v17890_v50 = vld [vmem:[%s24308_s5 + $0x438] sm:$0xff]  }
 0x498   : > { %16537 = vmatpush3.bf16.msra.mxu0 %v17871_v2  ;;  %v7193_v62 = vrot.slane %v14875_v37, 5  ;;  %v8141_v2 = vrot.slane %v8139_v10, 4  ;;  %v24568_v36 = vcombine.low %v21339_v31, %v21380_v41  ;;  %v17881_v31 = vld [vmem:[%s24308_s5 + $0x498] sm:$0xff]   ;;  %v17883_v5 = vld [vmem:[%s24308_s5 + $0x4e0] sm:$0xff]   ;;  %v6997_v49 = vrot.slane %v21272_v21, 1  ;;  %v17889_v21 = vld [vmem:[%s24308_s5 + $0x4a8] sm:$0xff]  }
 0x499   : > { %16538 = vmatprep.subr.bf16.mxu0 %v17873_v42  ;;  %7684 = vmatmul.mubr.bf16.gmra.mrb[76].mxu1 %v14942_v15  ;;  %v21580_v59 = vsel %vm20381_vm15, %v14908_v14, %v7181_v18  ;;  %v8144_v43 = vrot.slane %v8142_v34, 5  ;;  %v8150_v1 = vrot.slane %v8148_v24, 5  ;;  %v15104_v42 = vcombine.low %v21563_v60, %v21570_v58 }
 0x49a   : > { %16507 = vmatpush3.bf16.msra.mxu1 %v17886_v45  ;;  %7789 = vmatprep.mubr.bf16.mxu1 %v14929_v25  ;;  %v21587_v27 = vsel %vm20381_vm15, %v14911_v3, %v7193_v62  ;;  %v15107_v25 = vcombine.high %v21563_v60, %v21570_v58  ;;  %v8265_v45 = vshrl.u32 %v21117_v32, 16  ;;  %v8274_v3 = vshll.u32 %v21121_v44, 16 }
 0x49b   : > { %7733 = vmatmul.mubr.bf16.gmra.mrb[84].mxu0 %v24568_v36  ;;  %16508 = vmatprep.subr.bf16.mxu1 %v17888_v39  ;;  %v14935_v15 = vcombine.high %v21580_v59, %v21587_v27  ;;  %v8145_v41 = vor.u32 %v8144_v43, %v8141_v2  ;;  %v8223_v37 = vshrl.u32 %v15104_v42, 16  ;;  %v8226_v14 = vshll.u32 %v15104_v42, 16  ;;  %v17894_v39 = vld [vmem:[%s24308_s5 + $0x500] sm:$0xff]   ;;  %v21636_v42 = vld [vmem:[#allocation3 + $0x58] sm:$0xff] }
 0x49c   : > { %7740 = vmatprep.mubr.bf16.mxu0 %v14939_v61  ;;  %16539 = vmatpush3.bf16.msra.mxu0 %v17875_v35  ;;  %v8268_v61 = vshll.u32 %v21117_v32, 16  ;;  %v8232_v10 = vshll.u32 %v15107_v25, 16  ;;  %v8267_v35 = vrot.slane %v8265_v45, 4  ;;  %v17897_v32 = vld [vmem:[%s24308_s5 + $0x548] sm:$0xff]   ;;  %v17885_v2 = vld [vmem:[%s24308_s5 + $0x4a0] sm:$0xff]   ;;  %v8276_v43 = vrot.slane %v8274_v3, 5 }
 0x49d   : > { %16540 = vmatprep.subr.bf16.mxu0 %v17879_v7  ;;  %v8146_v18 = vrot.slane %v8145_v41, 4  ;;  %v8225_v34 = vrot.slane %v8223_v37, 4  ;;  %v8228_v24 = vrot.slane %v8226_v14, 5  ;;  %v14934_v36 = vcombine.low %v21580_v59, %v21587_v27  ;;  %v17898_v59 = vld [vmem:[%s24308_s5 + $0x508] sm:$0xff]   ;;  %v17904_v3 = vld [vmem:[%s24308_s5 + $0x510] sm:$0xff]  }
 0x49e   : > { %16509 = vmatpush3.bf16.msra.mxu1 %v17890_v50  ;;  %v8270_v7 = vrot.slane %v8268_v61, 5  ;;  %v8234_v50 = vrot.slane %v8232_v10, 5  ;;  %v6995_v25 = vrot.slane %v21255_v46, 1  ;;  %v24571_v54 = vcombine.low %v21447_v26, %v21468_v0  ;;  %v17891_v61 = vld [vmem:[%s24308_s5 + $0x4f0] sm:$0xff]  }
 0x49f   : > { %16574 = vmatprep.subr.bf16.mxu1 %v17893_v57  ;;  %v21630_v44 = vsel %vm21618_vm5, %v8146_v18, %v8150_v1  ;;  %v21634_v57 = vld [vmem:[#allocation3 + $0x50] sm:$0xff]  ;;  %v8229_v1 = vor.u32 %v8228_v24, %v8225_v34  ;;  %v6998_v37 = vrot.slane %v21274_v8, 1  ;;  %v8349_v8 = vshrl.u32 %v21202_v63, 16 }
 0x4a0   : > { %16541 = vmatpush3.bf16.msra.mxu0 %v17881_v31  ;;  %v17887_v31 = vld [vmem:[%s24308_s5 + $0x4e8] sm:$0xff]   ;;  %v8271_v41 = vor.u32 %v8270_v7, %v8267_v35  ;;  %v15140_v27 = vcombine.low %v21630_v44, %v21630_v44  ;;  %v15141_v45 = vcombine.high %v21630_v44, %v21630_v44  ;;  %v15116_v14 = vcombine.low %v21634_v57, %v21636_v42 }
 0x4a1   : > { %16542 = vmatprep.subr.bf16.mxu0 %v17883_v5  ;;  %7790 = vmatmul.mubr.bf16.vlgmr.msra.gmra.mrb[80].mxu1 %v14928_v19  ;;  %v6996_v5 = vrot.slane %v21257_v40, 1  ;;  %v8230_v46 = vrot.slane %v8229_v1, 4  ;;  %v15119_v0 = vcombine.high %v21634_v57, %v21636_v42  ;;  %v14884_v18 = vcombine.low %v6997_v49, %v6998_v37  ;;  %v17892_v1 = vld [vmem:[%s24308_s5 + $0x4b0] sm:$0xff]  }
 0x4a2   : > { %16575 = vmatpush3.bf16.msra.mxu1 %v17894_v39  ;;  %7797 = vmatprep.mubr.bf16.mxu1 %v14935_v15  ;;  %v8272_v19 = vrot.slane %v8271_v41, 4  ;;  %v17902_v15 = vld [vmem:[%s24308_s5 + $0x550] sm:$0xff]   ;;  %v14887_v10 = vcombine.high %v6997_v49, %v6998_v37  ;;  %v17895_v49 = vld [vmem:[%s24308_s5 + $0x4f8] sm:$0xff]   ;;  %v21711_v37 = vld [vmem:[#allocation3 + $0x70] sm:$0xff]  ;;  %v7001_v28 = vrot.slane %v21404_v47, 1 }
 0x4a3   : > { %7741 = vmatmul.mubr.bf16.gmra.mrb[88].mxu0 %v24571_v54  ;;  %16576 = vmatprep.subr.bf16.mxu1 %v17897_v32  ;;  %v21669_v40 = vcombine.low %v6995_v25, %v6996_v5  ;;  %v21671_v26 = vcombine.high %v6995_v25, %v6996_v5  ;;  %v14917_v7 = vrot.slane %v14884_v18, 9  ;;  %v8316_v25 = vshll.u32 %v15119_v0, 16  ;;  %v17912_v18 = vld [vmem:[%s24308_s5 + $0x560] sm:$0xff]  }
 0x4a4   : > { %7748 = vmatprep.mubr.bf16.mxu0 %v14945_v51  ;;  %16543 = vmatpush3.bf16.msra.mxu0 %v17885_v2  ;;  %v21681_v51 = vsel %vm21618_vm5, %v8230_v46, %v8234_v50  ;;  %v21685_v39 = vsel %vm21618_vm5, %v8272_v19, %v8276_v43  ;;  %v7217_v2 = vrot.slane %v14887_v10, 5  ;;  %v17906_v50 = vld [vmem:[%s24308_s5 + $0x558] sm:$0xff]   ;;  %v8307_v43 = vshrl.u32 %v15116_v14, 16 }
 0x4a5   : > { %16544 = vmatprep.subr.bf16.mxu0 %v17887_v31  ;;  %v15147_v35 = vcombine.high %v21681_v51, %v21685_v39  ;;  %v14914_v32 = vrot.slane %v21669_v40, 9  ;;  %v7205_v34 = vrot.slane %v21671_v26, 5  ;;  %v15146_v24 = vcombine.low %v21681_v51, %v21685_v39 }
 0x4a6   : > { %16577 = vmatpush3.bf16.msra.mxu1 %v17898_v59  ;;  %v8310_v31 = vshll.u32 %v15116_v14, 16  ;;  %v8351_v59 = vrot.slane %v8349_v8, 4  ;;  %v8352_v5 = vshll.u32 %v21202_v63, 16  ;;  %v7218_v54 = vsel %vm20381_vm15, %v14917_v7, %v7217_v2  ;;  %v21713_v14 = vld [vmem:[#allocation3 + $0x78] sm:$0xff]  ;;  %v17908_v63 = vld [vmem:[%s24308_s5 + $0x518] sm:$0xff]  }
 0x4a7   : > { %16578 = vmatprep.subr.bf16.mxu1 %v17902_v15  ;;  %v7206_v41 = vsel %vm20381_vm15, %v14914_v32, %v7205_v34  ;;  %v8309_v46 = vrot.slane %v8307_v43, 4  ;;  %v8358_v15 = vshll.u32 %v21206_v16, 16  ;;  %v8318_v0 = vrot.slane %v8316_v25, 5  ;;  %v17896_v32 = vld [vmem:[%s24308_s5 + $0x4b8] sm:$0xff]   ;;  %v17914_v43 = vld [vmem:[%s24308_s5 + $0x520] sm:$0xff]  }
 0x4a8   : > { %16545 = vmatpush3.bf16.msra.mxu0 %v17889_v21  ;;  %v8312_v19 = vrot.slane %v8310_v31, 5  ;;  %v14941_v21 = vcombine.high %v7206_v41, %v7218_v54  ;;  %v8354_v8 = vrot.slane %v8352_v5, 5  ;;  %v6999_v10 = vrot.slane %v21354_v4, 1 }
 0x4a9   : > { %16546 = vmatprep.subr.bf16.mxu0 %v17891_v61  ;;  %7798 = vmatmul.mubr.bf16.gmra.mrb[84].mxu1 %v14934_v36  ;;  %v14940_v36 = vcombine.low %v7206_v41, %v7218_v54  ;;  %v8360_v16 = vrot.slane %v8358_v15, 5  ;;  %v15131_v4 = vcombine.high %v21711_v37, %v21713_v14  ;;  %v14896_v31 = vcombine.low %v7001_v28, %v7001_v28 }
 0x4aa   : > { %16579 = vmatpush3.bf16.msra.mxu1 %v17904_v3  ;;  %v8313_v61 = vor.u32 %v8312_v19, %v8309_v46  ;;  %v7000_v3 = vrot.slane %v21356_v48, 1  ;;  %v8355_v22 = vor.u32 %v8354_v8, %v8351_v59  ;;  %v17899_v48 = vld [vmem:[%s24308_s5 + $0x5c0] sm:$0xff]   ;;  %7805 = vmatprep.mubr.bf16.mxu1 %v14941_v21 }
 0x4ab   : > { %7749 = vmatmul.mubr.bf16.gmra.mrb[92].mxu0 %v14944_v13  ;;  %16580 = vmatprep.subr.bf16.mxu1 %v17906_v50  ;;  %v15128_v13 = vcombine.low %v21711_v37, %v21713_v14  ;;  %v17903_v46 = vld [vmem:[%s24308_s5 + $0x580] sm:$0xff]   ;;  %v14923_v15 = vrot.slane %v14896_v31, 9 }
 0x4ac   : > { %16547 = vmatpush3.bf16.msra.mxu0 %v17892_v1  ;;  %8890 = vmatprep.mubr.bf16.mxu0 %v15141_v45  ;;  %v8314_v34 = vrot.slane %v8313_v61, 4  ;;  %v14890_v7 = vcombine.low %v6999_v10, %v7000_v3  ;;  %v14893_v2 = vcombine.high %v6999_v10, %v7000_v3  ;;  %v8433_v45 = vshrl.u32 %v21291_v56, 16  ;;  %v17918_v3 = vld [vmem:[%s24308_s5 + $0x528] sm:$0xff]  }
 0x4ad   : > { %16548 = vmatprep.subr.bf16.mxu0 %v17895_v49  ;;  %v8356_v50 = vrot.slane %v8355_v22, 4  ;;  %v14899_v1 = vcombine.high %v7001_v28, %v7001_v28  ;;  %v8391_v41 = vshrl.u32 %v15128_v13, 16  ;;  %v17916_v49 = vld [vmem:[%s24308_s5 + $0x568] sm:$0xff]   ;;  %v8394_v54 = vshll.u32 %v15128_v13, 16 }
 0x4ae   : > { %16581 = vmatpush3.bf16.msra.mxu1 %v17908_v63  ;;  %v21746_v25 = vsel %vm21618_vm5, %v8314_v34, %v8318_v0  ;;  %v14920_v59 = vrot.slane %v14890_v7, 9  ;;  %v7229_v5 = vrot.slane %v14893_v2, 5  ;;  %v17905_v0 = vld [vmem:[%s24308_s5 + $0x5c8] sm:$0xff]   ;;  %v8435_v22 = vrot.slane %v8433_v45, 4 }
 0x4af   : > { %16582 = vmatprep.subr.bf16.mxu1 %v17912_v18  ;;  %v21756_v19 = vsel %vm21618_vm5, %v8356_v50, %v8360_v16  ;;  %v7241_v21 = vrot.slane %v14899_v1, 5  ;;  %v8393_v63 = vrot.slane %v8391_v41, 4  ;;  %v8396_v16 = vrot.slane %v8394_v54, 5 }
 0x4b0   : > { %16549 = vmatpush3.bf16.msra.mxu0 %v17896_v32  ;;  %v15153_v8 = vcombine.high %v21746_v25, %v21756_v19  ;;  %v7230_v61 = vsel %vm20381_vm15, %v14920_v59, %v7229_v5  ;;  %v15152_v18 = vcombine.low %v21746_v25, %v21756_v19  ;;  %v8400_v32 = vshll.u32 %v15131_v4, 16  ;;  %v17926_v5 = vld [vmem:[%s24308_s5 + $0x578] sm:$0xff]   ;;  %v17929_v19 = vld [vmem:[%s24308_s5 + $0x5f0] sm:$0xff]  }
 0x4b1   : > { %16614 = vmatprep.subr.bf16.mxu0 %v17899_v48  ;;  %7806 = vmatmul.mubr.bf16.gmra.mrb[88].mxu1 %v14940_v36  ;;  %v7242_v10 = vsel %vm20381_vm15, %v14923_v15, %v7241_v21  ;;  %v8436_v28 = vshll.u32 %v21291_v56, 16  ;;  %v8397_v13 = vor.u32 %v8396_v16, %v8393_v63  ;;  %v8442_v48 = vshll.u32 %v21311_v29, 16  ;;  %v17907_v56 = vld [vmem:[%s24308_s5 + $0x588] sm:$0xff]   ;;  %v17909_v29 = vld [vmem:[%s24308_s5 + $0x5d0] sm:$0xff]   ;;  %v17915_v21 = vld [vmem:[%s24308_s5 + $0x5d8] sm:$0xff]  }
 0x4b2   : > { %16583 = vmatpush3.bf16.msra.mxu1 %v17914_v43  ;;  %v14947_v36 = vcombine.high %v7230_v61, %v7242_v10  ;;  %v14946_v34 = vcombine.low %v7230_v61, %v7242_v10  ;;  %v8402_v44 = vrot.slane %v8400_v32, 5  ;;  %v8153_v4 = vshrl.u32 %v14896_v31, 16  ;;  %v17924_v43 = vld [vmem:[%s24308_s5 + $0x530] sm:$0xff]   ;;  %v17928_v10 = vld [vmem:[%s24308_s5 + $0x538] sm:$0xff]  }
 0x4b3   : > { %8891 = vmatmul.mubr.bf16.vlgmr.msra.gmra.mrb[96].mxu0 %v15140_v27  ;;  %16584 = vmatprep.subr.bf16.mxu1 %v17916_v49  ;;  %v8438_v27 = vrot.slane %v8436_v28, 5  ;;  %v8156_v7 = vshll.u32 %v14896_v31, 16  ;;  %v8398_v2 = vrot.slane %v8397_v13, 4  ;;  %v8444_v45 = vrot.slane %v8442_v48, 5  ;;  %v17931_v28 = vld [vmem:[%s24308_s5 + $0x640] sm:$0xff]  }
 0x4b4   : > { %8898 = vmatprep.mubr.bf16.mxu0 %v15147_v35  ;;  %16615 = vmatpush3.bf16.msra.mxu0 %v17903_v46  ;;  %v8162_v50 = vshll.u32 %v14899_v1, 16  ;;  %v8155_v41 = vrot.slane %v8153_v4, 4  ;;  %v17913_v1 = vld [vmem:[%s24308_s5 + $0x590] sm:$0xff]   ;;  %v7964_v15 = vrot.slane %v21563_v60, 1  ;;  %v7965_v63 = vrot.slane %v21570_v58, 1  ;;  %v17919_v48 = vld [vmem:[%s24308_s5 + $0x5e0] sm:$0xff]  }
 0x4b5   : > { %16616 = vmatprep.subr.bf16.mxu0 %v17905_v0  ;;  %7813 = vmatprep.mubr.bf16.mxu1 %v14947_v36  ;;  %v8439_v35 = vor.u32 %v8438_v27, %v8435_v22  ;;  %v8158_v59 = vrot.slane %v8156_v7, 5  ;;  %v21794_v31 = vsel %vm21618_vm5, %v8398_v2, %v8402_v44  ;;  %v8279_v0 = vshrl.u32 %v21486_v33, 16  ;;  %v17932_v2 = vld [vmem:[%s24308_s5 + $0x600] sm:$0xff]  }
 0x4b6   : > { %16585 = vmatpush3.bf16.msra.mxu1 %v17918_v3  ;;  %v8164_v49 = vrot.slane %v8162_v50, 5  ;;  %v8282_v61 = vshll.u32 %v21486_v33, 16  ;;  %v8288_v32 = vshll.u32 %v21491_v12, 16  ;;  %v15105_v36 = vcombine.low %v7964_v15, %v7965_v63  ;;  %v17917_v12 = vld [vmem:[%s24308_s5 + $0x598] sm:$0xff]  }
 0x4b7   : > { %16586 = vmatprep.subr.bf16.mxu1 %v17922_v30  ;;  %v8440_v54 = vrot.slane %v8439_v35, 4  ;;  %v8159_v46 = vor.u32 %v8158_v59, %v8155_v41  ;;  %v8281_v13 = vrot.slane %v8279_v0, 4  ;;  %v15108_v39 = vcombine.high %v7964_v15, %v7965_v63  ;;  %v17923_v35 = vld [vmem:[%s24308_s5 + $0x5a0] sm:$0xff]   ;;  %v18252_v15 = vld [vmem:[#allocation3 + $0x48] sm:$0xff] }
 0x4b8   : > { %16617 = vmatpush3.bf16.msra.mxu0 %v17907_v56  ;;  %v8237_v30 = vshrl.u32 %v15105_v36, 16  ;;  %v8290_v56 = vrot.slane %v8288_v32, 5  ;;  %v7980_v4 = vrot.slane %v21563_v60, 2  ;;  %v17925_v60 = vld [vmem:[%s24308_s5 + $0x5e8] sm:$0xff]  }
 0x4b9   : > { %16618 = vmatprep.subr.bf16.mxu0 %v17909_v29  ;;  %7814 = vmatmul.mubr.bf16.gmra.mrb[92].mxu1 %v14946_v34  ;;  %v21811_v16 = vsel %vm21618_vm5, %v8440_v54, %v8444_v45  ;;  %v8160_v3 = vrot.slane %v8159_v46, 4  ;;  %v8240_v34 = vshll.u32 %v15105_v36, 16  ;;  %v8246_v44 = vshll.u32 %v15108_v39, 16  ;;  %v18251_v54 = vld [vmem:[#allocation3 + $0x40] sm:$0xff] }
 0x4ba   : > { %16587 = vmatpush3.bf16.msra.mxu1 %v17924_v43  ;;  %v15159_v22 = vcombine.high %v21794_v31, %v21811_v16  ;;  %v15158_v33 = vcombine.low %v21794_v31, %v21811_v16  ;;  %v8239_v45 = vrot.slane %v8237_v30, 4  ;;  %v7982_v46 = vrot.slane %v18251_v54, 2  ;;  %v17938_v30 = vld [vmem:[%s24308_s5 + $0x650] sm:$0xff]   ;;  %v17946_v31 = vld [vmem:[%s24308_s5 + $0x660] sm:$0xff]  }
 0x4bb   : > { %8899 = vmatmul.mubr.bf16.gmra.mrb[100].mxu0 %v15146_v24  ;;  %16588 = vmatprep.subr.bf16.mxu1 %v17926_v5  ;;  %v8165_v51 = vsel %vm21618_vm5, %v8160_v3, %v8164_v49  ;;  %v8284_v24 = vrot.slane %v8282_v61, 5  ;;  %v8242_v50 = vrot.slane %v8240_v34, 5  ;;  %v17935_v49 = vld [vmem:[%s24308_s5 + $0x648] sm:$0xff]   ;;  %v17937_v16 = vld [vmem:[%s24308_s5 + $0x6c0] sm:$0xff]  }
 0x4bc   : > { %8906 = vmatprep.mubr.bf16.mxu0 %v15153_v8  ;;  %16619 = vmatpush3.bf16.msra.mxu0 %v17913_v1  ;;  %v7976_v8 = vrot.slane %v21404_v47, 2  ;;  %v15142_v7 = vcombine.low %v8165_v51, %v8165_v51  ;;  %v15143_v29 = vcombine.high %v8165_v51, %v8165_v51  ;;  %v8248_v47 = vrot.slane %v8246_v44, 5 }
 0x4bd   : > { %16620 = vmatprep.subr.bf16.mxu0 %v17915_v21  ;;  %v8285_v27 = vor.u32 %v8284_v24, %v8281_v13  ;;  %v8243_v5 = vor.u32 %v8242_v50, %v8239_v45  ;;  %v7981_v1 = vrot.slane %v21570_v58, 2  ;;  %v7983_v21 = vrot.slane %v18252_v15, 2  ;;  %v17936_v58 = vld [vmem:[%s24308_s5 + $0x608] sm:$0xff]   ;;  %v17930_v45 = vld [vmem:[%s24308_s5 + $0x5b0] sm:$0xff]  }
 0x4be   : > { %16589 = vmatpush3.bf16.msra.mxu1 %v17928_v10  ;;  %v15094_v41 = vcombine.low %v7976_v8, %v7976_v8  ;;  %v15097_v59 = vcombine.high %v7976_v8, %v7976_v8  ;;  %8955 = vmatprep.mubr.bf16.mxu1 %v15143_v29  ;;  %v17927_v13 = vld [vmem:[%s24308_s5 + $0x5a8] sm:$0xff]   ;;  %v8363_v15 = vshrl.u32 %v21531_v17, 16 }
 0x4bf   : > { %16654 = vmatprep.subr.bf16.mxu1 %v17931_v28  ;;  %v8286_v43 = vrot.slane %v8285_v27, 4  ;;  %v8244_v3 = vrot.slane %v8243_v5, 4  ;;  %v15106_v32 = vcombine.low %v7980_v4, %v7981_v1  ;;  %v15109_v28 = vcombine.high %v7980_v4, %v7981_v1 }
 0x4c0   : > { %16621 = vmatpush3.bf16.msra.mxu0 %v17917_v12  ;;  %v8167_v0 = vshrl.u32 %v15094_v41, 16  ;;  %v8170_v61 = vshll.u32 %v15094_v41, 16  ;;  %v8176_v10 = vshll.u32 %v15097_v59, 16  ;;  %v15112_v36 = vcombine.low %v7982_v46, %v7983_v21  ;;  %v17942_v41 = vld [vmem:[%s24308_s5 + $0x658] sm:$0xff]  }
 0x4c1   : > { %16622 = vmatprep.subr.bf16.mxu0 %v17919_v48  ;;  %8956 = vmatmul.mubr.bf16.vlgmr.msra.gmra.mrb[96].mxu1 %v15142_v7  ;;  %v8291_v63 = vsel %vm21618_vm5, %v8286_v43, %v8290_v56  ;;  %v15115_v25 = vcombine.high %v7982_v46, %v7983_v21  ;;  %v8251_v24 = vshrl.u32 %v15106_v32, 16  ;;  %v8260_v48 = vshll.u32 %v15109_v28, 16  ;;  %v17933_v59 = vld [vmem:[%s24308_s5 + $0x5f8] sm:$0xff]  }
 0x4c2   : > { %16655 = vmatpush3.bf16.msra.mxu1 %v17932_v2  ;;  %v8169_v12 = vrot.slane %v8167_v0, 4  ;;  %v8172_v51 = vrot.slane %v8170_v61, 5  ;;  %v8178_v39 = vrot.slane %v8176_v10, 5  ;;  %v8293_v8 = vshrl.u32 %v15112_v36, 16  ;;  %v17940_v2 = vld [vmem:[%s24308_s5 + $0x610] sm:$0xff]  }
 0x4c3   : > { %8907 = vmatmul.mubr.bf16.gmra.mrb[104].mxu0 %v15152_v18  ;;  %v8249_v18 = vsel %vm21618_vm5, %v8244_v3, %v8248_v47  ;;  %16656 = vmatprep.subr.bf16.mxu1 %v17935_v49  ;;  %v8296_v44 = vshll.u32 %v15112_v36, 16  ;;  %v8253_v27 = vrot.slane %v8251_v24, 4  ;;  %v8262_v7 = vrot.slane %v8260_v48, 5  ;;  %v17944_v3 = vld [vmem:[%s24308_s5 + $0x618] sm:$0xff]  }
 0x4c4   : > { %8914 = vmatprep.mubr.bf16.mxu0 %v15159_v22  ;;  %16623 = vmatpush3.bf16.msra.mxu0 %v17923_v35  ;;  %v8254_v22 = vshll.u32 %v15106_v32, 16  ;;  %v15149_v34 = vcombine.high %v8249_v18, %v8291_v63  ;;  %v8173_v56 = vor.u32 %v8172_v51, %v8169_v12  ;;  %v8302_v29 = vshll.u32 %v15115_v25, 16 }
 0x4c5   : > { %16624 = vmatprep.subr.bf16.mxu0 %v17925_v60  ;;  %v8295_v35 = vrot.slane %v8293_v8, 4  ;;  %v8298_v47 = vrot.slane %v8296_v44, 5  ;;  %v15148_v43 = vcombine.low %v8249_v18, %v8291_v63  ;;  %v7968_v49 = vrot.slane %v21634_v57, 1 }
 0x4c6   : > { %16657 = vmatpush3.bf16.msra.mxu1 %v17936_v58  ;;  %v8256_v4 = vrot.slane %v8254_v22, 5  ;;  %8963 = vmatprep.mubr.bf16.mxu1 %v15149_v34  ;;  %v8174_v50 = vrot.slane %v8173_v56, 4  ;;  %v8304_v5 = vrot.slane %v8302_v29, 5  ;;  %v7969_v1 = vrot.slane %v21636_v42, 1  ;;  %v17934_v58 = vld [vmem:[%s24308_s5 + $0x5b8] sm:$0xff]   ;;  %v17948_v34 = vld [vmem:[%s24308_s5 + $0x620] sm:$0xff]  }
 0x4c7   : > { %16658 = vmatprep.subr.bf16.mxu1 %v17938_v30  ;;  %v8299_v46 = vor.u32 %v8298_v47, %v8295_v35  ;;  %v8366_v21 = vshll.u32 %v21531_v17, 16  ;;  %v8365_v28 = vrot.slane %v8363_v15, 4  ;;  %v8372_v51 = vshll.u32 %v21544_v20, 16  ;;  %v17939_v20 = vld [vmem:[%s24308_s5 + $0x680] sm:$0xff]   ;;  %v17950_v35 = vld [vmem:[%s24308_s5 + $0x668] sm:$0xff]  }
 0x4c8   : > { %16625 = vmatpush3.bf16.msra.mxu0 %v17927_v13  ;;  %v8257_v60 = vor.u32 %v8256_v4, %v8253_v27  ;;  %v8179_v54 = vsel %vm21618_vm5, %v8174_v50, %v8178_v39  ;;  %v15117_v10 = vcombine.low %v7968_v49, %v7969_v1  ;;  %v15120_v17 = vcombine.high %v7968_v49, %v7969_v1  ;;  %v17941_v4 = vld [vmem:[%s24308_s5 + $0x6c8] sm:$0xff]  }
 0x4c9   : > { %16626 = vmatprep.subr.bf16.mxu0 %v17929_v19  ;;  %8964 = vmatmul.mubr.bf16.gmra.mrb[100].mxu1 %v15148_v43  ;;  %v15144_v63 = vcombine.low %v8179_v54, %v8179_v54  ;;  %v15145_v0 = vcombine.high %v8179_v54, %v8179_v54  ;;  %v8300_v32 = vrot.slane %v8299_v46, 4  ;;  %v8368_v36 = vrot.slane %v8366_v21, 5  ;;  %v17952_v1 = vld [vmem:[%s24308_s5 + $0x628] sm:$0xff]  }
 0x4ca   : > { %v8258_v61 = vrot.slane %v8257_v60, 4  ;;  %16659 = vmatpush3.bf16.msra.mxu1 %v17940_v2  ;;  %v8321_v13 = vshrl.u32 %v15117_v10, 16  ;;  %v8324_v12 = vshll.u32 %v15117_v10, 16  ;;  %v8330_v25 = vshll.u32 %v15120_v17, 16  ;;  %v18254_v2 = vld [vmem:[#allocation3 + $0x68] sm:$0xff]  ;;  %v17943_v54 = vld [vmem:[%s24308_s5 + $0x688] sm:$0xff]  }
 0x4cb   : > { %8915 = vmatmul.mubr.bf16.gmra.mrb[108].mxu0 %v15158_v33  ;;  %16660 = vmatprep.subr.bf16.mxu1 %v17942_v41  ;;  %v21909_v39 = vsel %vm21618_vm5, %v8300_v32, %v8304_v5  ;;  %v8369_v19 = vor.u32 %v8368_v36, %v8365_v28  ;;  %v7984_v18 = vrot.slane %v21634_v57, 2  ;;  %v8374_v30 = vrot.slane %v8372_v51, 5 }
 0x4cc   : > { %16627 = vmatpush3.bf16.msra.mxu0 %v17930_v45  ;;  %9020 = vmatprep.mubr.bf16.mxu0 %v15145_v0  ;;  %v21904_v33 = vsel %vm21618_vm5, %v8258_v61, %v8262_v7  ;;  %v8323_v22 = vrot.slane %v8321_v13, 4  ;;  %v8326_v48 = vrot.slane %v8324_v12, 5  ;;  %v8332_v56 = vrot.slane %v8330_v25, 5  ;;  %v18253_v7 = vld [vmem:[#allocation3 + $0x60] sm:$0xff] }
 0x4cd   : > { %16628 = vmatprep.subr.bf16.mxu0 %v17933_v59  ;;  %v15151_v24 = vcombine.high %v21904_v33, %v21909_v39  ;;  %v8370_v8 = vrot.slane %v8369_v19, 4  ;;  %v15150_v57 = vcombine.low %v21904_v33, %v21909_v39  ;;  %v7985_v44 = vrot.slane %v21636_v42, 2  ;;  %v17945_v61 = vld [vmem:[%s24308_s5 + $0x6d0] sm:$0xff]   ;;  %v17951_v33 = vld [vmem:[%s24308_s5 + $0x698] sm:$0xff]  }
 0x4ce   : > { %16661 = vmatpush3.bf16.msra.mxu1 %v17944_v3  ;;  %v8327_v27 = vor.u32 %v8326_v48, %v8323_v22  ;;  %v7986_v29 = vrot.slane %v18253_v7, 2  ;;  %v7987_v45 = vrot.slane %v18254_v2, 2  ;;  %v7972_v50 = vrot.slane %v21711_v37, 1  ;;  %v17956_v25 = vld [vmem:[%s24308_s5 + $0x630] sm:$0xff]  }
 0x4cf   : > { %16662 = vmatprep.subr.bf16.mxu1 %v17946_v31  ;;  %v8375_v42 = vsel %vm21618_vm5, %v8370_v8, %v8374_v30  ;;  %v15118_v47 = vcombine.low %v7984_v18, %v7985_v44  ;;  %v15121_v43 = vcombine.high %v7984_v18, %v7985_v44  ;;  %v7973_v41 = vrot.slane %v21713_v14, 1  ;;  %v17954_v31 = vld [vmem:[%s24308_s5 + $0x670] sm:$0xff]   ;;  %v17958_v30 = vld [vmem:[%s24308_s5 + $0x678] sm:$0xff]  }
 0x4d0   : > { %16629 = vmatpush3.bf16.msra.mxu0 %v17934_v58  ;;  %v8328_v59 = vrot.slane %v8327_v27, 4  ;;  %v15124_v60 = vcombine.low %v7986_v29, %v7987_v45  ;;  %v15127_v5 = vcombine.high %v7986_v29, %v7987_v45  ;;  %v8447_v49 = vshrl.u32 %v21669_v40, 16  ;;  %v17947_v18 = vld [vmem:[%s24308_s5 + $0x690] sm:$0xff]   ;;  %v17949_v44 = vld [vmem:[%s24308_s5 + $0x6d8] sm:$0xff]  }
 0x4d1   : > { %16694 = vmatprep.subr.bf16.mxu0 %v17937_v16  ;;  %v8335_v46 = vshrl.u32 %v15118_v47, 16  ;;  %v8338_v15 = vshll.u32 %v15118_v47, 16  ;;  %v8344_v21 = vshll.u32 %v15121_v43, 16  ;;  %v8456_v8 = vshll.u32 %v21671_v26, 16  ;;  %v17960_v26 = vld [vmem:[%s24308_s5 + $0x638] sm:$0xff]   ;;  %v17953_v43 = vld [vmem:[%s24308_s5 + $0x6e0] sm:$0xff]  }
 0x4d2   : > { %16663 = vmatpush3.bf16.msra.mxu1 %v17948_v34  ;;  %v8333_v0 = vsel %vm21618_vm5, %v8328_v59, %v8332_v56  ;;  %v8377_v10 = vshrl.u32 %v15124_v60, 16  ;;  %v8380_v3 = vshll.u32 %v15124_v60, 16  ;;  %v8386_v58 = vshll.u32 %v15127_v5, 16  ;;  %v18256_v60 = vld [vmem:[#allocation3 + $0x88] sm:$0xff] }
 0x4d3   : > { %9021 = vmatmul.mubr.bf16.vlgmr.msra.gmra.mrb[112].mxu0 %v15144_v63  ;;  %v15129_v63 = vcombine.low %v7972_v50, %v7973_v41  ;;  %16664 = vmatprep.subr.bf16.mxu1 %v17950_v35  ;;  %v15155_v32 = vcombine.high %v8333_v0, %v8375_v42  ;;  %v8337_v17 = vrot.slane %v8335_v46, 4  ;;  %v8340_v28 = vrot.slane %v8338_v15, 5 }
 0x4d4   : > { %9028 = vmatprep.mubr.bf16.mxu0 %v15151_v24  ;;  %16695 = vmatpush3.bf16.msra.mxu0 %v17939_v20  ;;  %v8346_v36 = vrot.slane %v8344_v21, 5  ;;  %v8379_v16 = vrot.slane %v8377_v10, 4  ;;  %v8382_v13 = vrot.slane %v8380_v3, 5  ;;  %v8388_v12 = vrot.slane %v8386_v58, 5  ;;  %v17955_v58 = vld [vmem:[%s24308_s5 + $0x6a0] sm:$0xff]  }
 0x4d5   : > { %16696 = vmatprep.subr.bf16.mxu0 %v17941_v4  ;;  %v15154_v51 = vcombine.low %v8333_v0, %v8375_v42  ;;  %8971 = vmatprep.mubr.bf16.mxu1 %v15155_v32  ;;  %v8341_v19 = vor.u32 %v8340_v28, %v8337_v17  ;;  %v15132_v24 = vcombine.high %v7972_v50, %v7973_v41  ;;  %v8405_v22 = vshrl.u32 %v15129_v63, 16  ;;  %v18255_v41 = vld [vmem:[#allocation3 + $0x80] sm:$0xff] }
 0x4d6   : > { %16665 = vmatpush3.bf16.msra.mxu1 %v17952_v1  ;;  %v8408_v48 = vshll.u32 %v15129_v63, 16  ;;  %v8383_v34 = vor.u32 %v8382_v13, %v8379_v16  ;;  %v8449_v20 = vrot.slane %v8447_v49, 4  ;;  %v8450_v56 = vshll.u32 %v21669_v40, 16  ;;  %v17963_v49 = vld [vmem:[%s24308_s5 + $0x740] sm:$0xff]   ;;  %v17957_v16 = vld [vmem:[%s24308_s5 + $0x6e8] sm:$0xff]  }
 0x4d7   : > { %8972 = vmatmul.mubr.bf16.gmra.mrb[104].mxu1 %v15154_v51  ;;  %v8342_v27 = vrot.slane %v8341_v19, 4  ;;  %v8407_v4 = vrot.slane %v8405_v22, 4  ;;  %v8414_v29 = vshll.u32 %v15132_v24, 16  ;;  %16666 = vmatprep.subr.bf16.mxu1 %v17954_v31  ;;  %v8458_v50 = vrot.slane %v8456_v8, 5 }
 0x4d8   : > { %16697 = vmatpush3.bf16.msra.mxu0 %v17943_v54  ;;  %v8410_v7 = vrot.slane %v8408_v48, 5  ;;  %v8384_v2 = vrot.slane %v8383_v34, 4  ;;  %v8452_v45 = vrot.slane %v8450_v56, 5  ;;  %v7988_v40 = vrot.slane %v21711_v37, 2  ;;  %v17959_v56 = vld [vmem:[%s24308_s5 + $0x6a8] sm:$0xff]  }
 0x4d9   : > { %16698 = vmatprep.subr.bf16.mxu0 %v17945_v61  ;;  %v8347_v35 = vsel %vm21618_vm5, %v8342_v27, %v8346_v36  ;;  %v8416_v47 = vrot.slane %v8414_v29, 5  ;;  %v7989_v39 = vrot.slane %v21713_v14, 2  ;;  %v7990_v59 = vrot.slane %v18255_v41, 2 }
 0x4da   : > { %16667 = vmatpush3.bf16.msra.mxu1 %v17956_v25  ;;  %v8411_v42 = vor.u32 %v8410_v7, %v8407_v4  ;;  %v8389_v37 = vsel %vm21618_vm5, %v8384_v2, %v8388_v12  ;;  %v7991_v5 = vrot.slane %v18256_v60, 2  ;;  %v9223_v32 = vshrl.u32 %v20451_v23, 16  ;;  %v17961_v7 = vld [vmem:[%s24308_s5 + $0x6f0] sm:$0xff]  }
 0x4db   : > { %9029 = vmatmul.mubr.bf16.gmra.mrb[116].mxu0 %v15150_v57  ;;  %16668 = vmatprep.subr.bf16.mxu1 %v17958_v30  ;;  %v8453_v57 = vor.u32 %v8452_v45, %v8449_v20  ;;  %v15157_v1 = vcombine.high %v8347_v35, %v8389_v37  ;;  %v15156_v54 = vcombine.low %v8347_v35, %v8389_v37  ;;  %v9226_v20 = vshll.u32 %v20451_v23, 16 }
 0x4dc   : > { %16699 = vmatpush3.bf16.msra.mxu0 %v17947_v18  ;;  %v8412_v14 = vrot.slane %v8411_v42, 4  ;;  %v15130_v46 = vcombine.low %v7988_v40, %v7989_v39  ;;  %v15133_v21 = vcombine.high %v7988_v40, %v7989_v39  ;;  %v15136_v63 = vcombine.low %v7990_v59, %v7991_v5 }
 0x4dd   : > { %16700 = vmatprep.subr.bf16.mxu0 %v17949_v44  ;;  %v8454_v15 = vrot.slane %v8453_v57, 4  ;;  %v15139_v0 = vcombine.high %v7990_v59, %v7991_v5  ;;  %9036 = vmatprep.mubr.bf16.mxu0 %v15157_v1  ;;  %v9225_v34 = vrot.slane %v9223_v32, 4  ;;  %v9232_v44 = vshll.u32 %v20455_v38, 16 }
 0x4de   : > { %16669 = vmatpush3.bf16.msra.mxu1 %v17960_v26  ;;  %v8417_v61 = vsel %vm21618_vm5, %v8412_v14, %v8416_v47  ;;  %v8419_v10 = vshrl.u32 %v15130_v46, 16  ;;  %v8422_v3 = vshll.u32 %v15130_v46, 16  ;;  %v8428_v28 = vshll.u32 %v15133_v21, 16  ;;  %v17962_v47 = vld [vmem:[%s24308_s5 + $0x6b0] sm:$0xff]  }
 0x4df   : > { %v8459_v17 = vsel %vm21618_vm5, %v8454_v15, %v8458_v50  ;;  %v8461_v36 = vshrl.u32 %v15136_v63, 16  ;;  %v8464_v31 = vshll.u32 %v15136_v63, 16  ;;  %16734 = vmatprep.subr.bf16.mxu1 %v17963_v49  ;;  %v8470_v25 = vshll.u32 %v15139_v0, 16  ;;  %v24572_v15 = vld [vmem:[#allocation15_spill] sm:$0xff]  ;;  %v17966_v63 = vld [vmem:[%s24308_s5 + $0x6b8] sm:$0xff]  }
 0x4e0   : > { %16701 = vmatpush3.bf16.msra.mxu0 %v17951_v33  ;;  %v15161_v13 = vcombine.high %v8417_v61, %v8459_v17  ;;  %v8421_v12 = vrot.slane %v8419_v10, 4  ;;  %v8424_v51 = vrot.slane %v8422_v3, 5  ;;  %v8430_v19 = vrot.slane %v8428_v28, 5  ;;  %v17969_v3 = vld [vmem:[%s24308_s5 + $0x7c0] sm:$0xff]  }
 0x4e1   : > { %16702 = vmatprep.subr.bf16.mxu0 %v17953_v43  ;;  %v8463_v18 = vrot.slane %v8461_v36, 4  ;;  %v8466_v24 = vrot.slane %v8464_v31, 5  ;;  %v15160_v22 = vcombine.low %v8417_v61, %v8459_v17  ;;  %v8472_v30 = vrot.slane %v8470_v25, 5  ;;  %v17965_v43 = vld [vmem:[%s24308_s5 + $0x6f8] sm:$0xff]   ;;  %v17964_v17 = vld [vmem:[%s24308_s5 + $0x700] sm:$0xff]   ;;  %v17967_v25 = vld [vmem:[%s24308_s5 + $0x748] sm:$0xff]  }
 0x4e2   : > { %8979 = vmatprep.mubr.bf16.mxu1 %v15161_v13  ;;  %v8425_v48 = vor.u32 %v8424_v51, %v8421_v12  ;;  %v9265_v27 = vshrl.u32 %v20459_v53, 16  ;;  %v9268_v4 = vshll.u32 %v20459_v53, 16  ;;  %v9228_v2 = vrot.slane %v9226_v20, 5  ;;  %v24573_v12 = vld [vmem:[#allocation16_spill] sm:$0xff] }
 0x4e3   : > { %9037 = vmatmul.mubr.bf16.gmra.mrb[120].mxu0 %v15156_v54  ;;  %v8467_v8 = vor.u32 %v8466_v24, %v8463_v18  ;;  %8980 = vmatmul.mubr.bf16.gmra.mrb[108].mxu1 %v15160_v22  ;;  %v9274_v23 = vshll.u32 %v20463_v9, 16  ;;  %v9237_v45 = vshrl.u32 %v20775_v52, 16  ;;  %v9234_v40 = vrot.slane %v9232_v44, 5  ;;  %v24574_v18 = vld [vmem:[#allocation17_spill] sm:$0xff] }
 0x4e4   : > { %16703 = vmatpush3.bf16.msra.mxu0 %v17955_v58  ;;  %v8426_v29 = vrot.slane %v8425_v48, 4  ;;  %v9267_v26 = vrot.slane %v9265_v27, 4  ;;  %v9270_v35 = vrot.slane %v9268_v4, 5  ;;  %v9229_v42 = vor.u32 %v9228_v2, %v9225_v34  ;;  %v24575_v48 = vld [vmem:[#allocation18_spill] sm:$0xff]  ;;  %v24576_v34 = vld [vmem:[#allocation35_spill] sm:$0xff] }
 0x4e5   : > { %16704 = vmatprep.subr.bf16.mxu0 %v17957_v16  ;;  %v8468_v50 = vrot.slane %v8467_v8, 4  ;;  %v9276_v53 = vrot.slane %v9274_v23, 5  ;;  %v9239_v33 = vrot.slane %v9237_v45, 4  ;;  %v9240_v37 = vshll.u32 %v20775_v52, 16  ;;  %v17968_v45 = vld [vmem:[%s24308_s5 + $0x708] sm:$0xff]  }
 0x4e6   : > { %v8431_v38 = vsel %vm21618_vm5, %v8426_v29, %v8430_v19  ;;  %v9271_v39 = vor.u32 %v9270_v35, %v9267_v26  ;;  %v9246_v57 = vshll.u32 %v20777_v55, 16  ;;  %v9230_v59 = vrot.slane %v9229_v42, 4 }
 0x4e7   : > { %v8473_v9 = vsel %vm21618_vm5, %v8468_v50, %v8472_v30  ;;  %v9279_v5 = vshrl.u32 %v20791_v11, 16  ;;  %v9242_v1 = vrot.slane %v9240_v37, 5  ;;  %v9282_v54 = vshll.u32 %v20791_v11, 16 }
 0x4e8   : > { %16705 = vmatpush3.bf16.msra.mxu0 %v17959_v56  ;;  %v15163_v41 = vcombine.high %v8431_v38, %v8473_v9  ;;  %v15162_v60 = vcombine.low %v8431_v38, %v8473_v9  ;;  %v9272_v49 = vrot.slane %v9271_v39, 4  ;;  %v9248_v14 = vrot.slane %v9246_v57, 5  ;;  %v24577_v38 = vld [vmem:[#allocation36_spill] sm:$0xff]  ;;  %v24578_v39 = vld [vmem:[#allocation37_spill] sm:$0xff] }
 0x4e9   : > { %16706 = vmatprep.subr.bf16.mxu0 %v17961_v7  ;;  %v9235_v52 = vsel %vm21618_vm5, %v9230_v59, %v9234_v40  ;;  %v9281_v55 = vrot.slane %v9279_v5, 4  ;;  %v9288_v46 = vshll.u32 %v20793_v6, 16  ;;  %v9307_v21 = vshrl.u32 %v24572_v15, 16  ;;  %v17971_v57 = vld [vmem:[%s24308_s5 + $0x780] sm:$0xff]   ;;  %v17973_v5 = vld [vmem:[%s24308_s5 + $0x7c8] sm:$0xff]  }
 0x4ea   : > { %9044 = vmatprep.mubr.bf16.mxu0 %v15163_v41  ;;  %v9277_v0 = vsel %vm21618_vm5, %v9272_v49, %v9276_v53  ;;  %v9243_v61 = vor.u32 %v9242_v1, %v9239_v33  ;;  %v9284_v11 = vrot.slane %v9282_v54, 5  ;;  %v9310_v10 = vshll.u32 %v24572_v15, 16  ;;  %v22036_v36 = vpop.f32.mrb[16].mxu1  ;;  %v17970_v53 = vld [vmem:[%s24308_s5 + $0x750] sm:$0xff]  }
 0x4eb   : > { %9045 = vmatmul.mubr.bf16.gmra.mrb[124].mxu0 %v15162_v60  ;;  %v15324_v6 = vcombine.low %v9235_v52, %v9277_v0  ;;  %v15325_v58 = vcombine.high %v9235_v52, %v9277_v0  ;;  %v9290_v32 = vrot.slane %v9288_v46, 5  ;;  %v9309_v28 = vrot.slane %v9307_v21, 4  ;;  %v22042_v19 = vpop.f32.mrb[17].mxu1  ;;  %v17972_v52 = vld [vmem:[%s24308_s5 + $0x710] sm:$0xff]   ;;  %v24581_v0 = vld [vmem:[#allocation24_spill] sm:$0xff] }
 0x4ec   : > { %16707 = vmatpush3.bf16.msra.mxu0 %v17962_v47  ;;  %v9244_v31 = vrot.slane %v9243_v61, 4  ;;  %v9285_v16 = vor.u32 %v9284_v11, %v9281_v55  ;;  %v9312_v13 = vrot.slane %v9310_v10, 5  ;;  %v9316_v51 = vshll.u32 %v24573_v12, 16  ;;  %v22048_v56 = vpop.f32.mrb[18].mxu1  ;;  %v24580_v55 = vld [vmem:[#allocation23_spill] sm:$0xff]  ;;  %v17974_v11 = vld [vmem:[%s24308_s5 + $0x758] sm:$0xff]  }
 0x4ed   : > { %16708 = vmatprep.subr.bf16.mxu0 %v17965_v43  ;;  %9974 = vmatprep.mubr.bf16.mxu1 %v15325_v58  ;;  %v9349_v24 = vshrl.u32 %v24574_v18, 16  ;;  %v9352_v22 = vshll.u32 %v24574_v18, 16  ;;  %v9358_v30 = vshll.u32 %v24575_v48, 16  ;;  %v9321_v20 = vshrl.u32 %v24576_v34, 16  ;;  %v22052_v7 = vpop.f32.mrb[19].mxu1  ;;  %v24582_v58 = vld [vmem:[#allocation25_spill] sm:$0xff] }
 0x4ee   : > { %v9249_v8 = vsel %vm21618_vm5, %v9244_v31, %v9248_v14  ;;  %v9286_v44 = vrot.slane %v9285_v16, 4  ;;  %9975 = vmatmul.mubr.bf16.vlgmr.msra.gmra.mrb[112].mxu1 %v15324_v6  ;;  %v9313_v27 = vor.u32 %v9312_v13, %v9309_v28  ;;  %v9318_v4 = vrot.slane %v9316_v51, 5  ;;  %v24579_v14 = vld [vmem:[#allocation38_spill] sm:$0xff]  ;;  %v17977_v51 = vld [vmem:[%s24308_s5 + $0x7d0] sm:$0xff]  }
 0x4ef   : > { %16735 = vmatpush3.bf16.msra.mxu1 %v17964_v17  ;;  %v9351_v29 = vrot.slane %v9349_v24, 4  ;;  %v9354_v2 = vrot.slane %v9352_v22, 5  ;;  %v9360_v23 = vrot.slane %v9358_v30, 5  ;;  %v9323_v50 = vrot.slane %v9321_v20, 4  ;;  %v17975_v17 = vld [vmem:[%s24308_s5 + $0x788] sm:$0xff]   ;;  %v17976_v30 = vld [vmem:[%s24308_s5 + $0x718] sm:$0xff]  }
 0x4f0   : > { %16709 = vmatpush3.bf16.msra.mxu0 %v17966_v63  ;;  %v9291_v40 = vsel %vm21618_vm5, %v9286_v44, %v9290_v32  ;;  %v9314_v26 = vrot.slane %v9313_v27, 4  ;;  %16736 = vmatprep.subr.bf16.mxu1 %v17967_v25  ;;  %v9324_v35 = vshll.u32 %v24576_v34, 16  ;;  %v9330_v42 = vshll.u32 %v24577_v38, 16  ;;  %v24583_v44 = vld [vmem:[#allocation26_spill] sm:$0xff] }
 0x4f1   : > { %16774 = vmatprep.subr.bf16.mxu0 %v17969_v3  ;;  %v15326_v47 = vcombine.low %v9249_v8, %v9291_v40  ;;  %v15327_v33 = vcombine.high %v9249_v8, %v9291_v40  ;;  %v9355_v9 = vor.u32 %v9354_v2, %v9351_v29  ;;  %v9363_v37 = vshrl.u32 %v24578_v39, 16  ;;  %v17978_v2 = vld [vmem:[%s24308_s5 + $0x760] sm:$0xff]  }
 0x4f2   : > { %v9319_v43 = vsel %vm21618_vm5, %v9314_v26, %v9318_v4  ;;  %v9326_v41 = vrot.slane %v9324_v35, 5  ;;  %v9332_v59 = vrot.slane %v9330_v42, 5  ;;  %v9366_v60 = vshll.u32 %v24578_v39, 16  ;;  %v24584_v4 = vld [vmem:[#allocation39_spill] sm:$0xff]  ;;  %v24585_v35 = vld [vmem:[#allocation40_spill] sm:$0xff]  ;;  %v24586_v39 = vld [vmem:[#allocation41_spill] sm:$0xff] }
 0x4f3   : > { %10039 = vmatprep.mubr.bf16.mxu0 %v15327_v33  ;;  %v9356_v49 = vrot.slane %v9355_v9, 4  ;;  %16737 = vmatpush3.bf16.msra.mxu1 %v17968_v45  ;;  %v9365_v1 = vrot.slane %v9363_v37, 4  ;;  %v9372_v54 = vshll.u32 %v24579_v14, 16  ;;  %v9391_v46 = vshrl.u32 %v24580_v55, 16  ;;  %v17979_v42 = vld [vmem:[%s24308_s5 + $0x790] sm:$0xff]  }
 0x4f4   : > { %10040 = vmatmul.mubr.bf16.vlgmr.msra.gmra.mrb[128].mxu0 %v15326_v47  ;;  %v9327_v15 = vor.u32 %v9326_v41, %v9323_v50  ;;  %v9368_v21 = vrot.slane %v9366_v60, 5  ;;  %16738 = vmatprep.subr.bf16.mxu1 %v17970_v53  ;;  %v9394_v63 = vshll.u32 %v24580_v55, 16  ;;  %v9400_v61 = vshll.u32 %v24581_v0, 16  ;;  %v22090_v28 = vpop.f32.mrb[20].mxu1 }
 0x4f5   : > { %v9361_v10 = vsel %vm21618_vm5, %v9356_v49, %v9360_v23  ;;  %v9374_v3 = vrot.slane %v9372_v54, 5  ;;  %16775 = vmatpush3.bf16.msra.mxu0 %v17971_v57  ;;  %v9393_v6 = vrot.slane %v9391_v46, 4  ;;  %v9433_v32 = vshrl.u32 %v24582_v58, 16  ;;  %v22095_v25 = vpop.f32.mrb[21].mxu1  ;;  %v17981_v57 = vld [vmem:[%s24308_s5 + $0x7d8] sm:$0xff]   ;;  %v17980_v49 = vld [vmem:[%s24308_s5 + $0x720] sm:$0xff]  }
 0x4f6   : > { %v15331_v31 = vcombine.high %v9319_v43, %v9361_v10  ;;  %v9328_v16 = vrot.slane %v9327_v15, 4  ;;  %v9369_v13 = vor.u32 %v9368_v21, %v9365_v1  ;;  %v15330_v12 = vcombine.low %v9319_v43, %v9361_v10  ;;  %16776 = vmatprep.subr.bf16.mxu0 %v17973_v5  ;;  %v22101_v34 = vpop.f32.mrb[22].mxu1  ;;  %v17982_v46 = vld [vmem:[%s24308_s5 + $0x768] sm:$0xff]   ;;  %v17983_v10 = vld [vmem:[%s24308_s5 + $0x798] sm:$0xff]  }
 0x4f7   : > { %16739 = vmatpush3.bf16.msra.mxu1 %v17972_v52  ;;  %v9396_v18 = vrot.slane %v9394_v63, 5  ;;  %v9402_v24 = vrot.slane %v9400_v61, 5  ;;  %v9435_v22 = vrot.slane %v9433_v32, 4  ;;  %v9436_v48 = vshll.u32 %v24582_v58, 16  ;;  %v22110_v23 = vpop.f32.mrb[32].mxu0  ;;  %v22112_v45 = vpop.f32.mrb[23].mxu1 }
 0x4f8   : > { %9982 = vmatprep.mubr.bf16.mxu1 %v15331_v31  ;;  %v9333_v20 = vsel %vm21618_vm5, %v9328_v16, %v9332_v59  ;;  %v9370_v8 = vrot.slane %v9369_v13, 4  ;;  %v9442_v27 = vshll.u32 %v24583_v44, 16  ;;  %16740 = vmatprep.subr.bf16.mxu1 %v17974_v11  ;;  %v9405_v29 = vshrl.u32 %v24584_v4, 16  ;;  %v22119_v53 = vpop.f32.mrb[33].mxu0  ;;  %v24587_v63 = vld [vmem:[#allocation42_spill] sm:$0xff]  ;;  %v24588_v61 = vld [vmem:[#allocation31_spill] sm:$0xff] }
 0x4f9   : > { %9983 = vmatmul.mubr.bf16.gmra.mrb[116].mxu1 %v15330_v12  ;;  %v9397_v50 = vor.u32 %v9396_v18, %v9393_v6  ;;  %v9438_v40 = vrot.slane %v9436_v48, 5  ;;  %16777 = vmatpush3.bf16.msra.mxu0 %v17975_v17  ;;  %v9408_v26 = vshll.u32 %v24584_v4, 16  ;;  %v9414_v38 = vshll.u32 %v24585_v35, 16  ;;  %v22127_v43 = vpop.f32.mrb[34].mxu0  ;;  %v24589_v32 = vld [vmem:[#allocation32_spill] sm:$0xff]  ;;  %v17985_v31 = vld [vmem:[%s24308_s5 + $0x7e0] sm:$0xff]  }
 0x4fa   : > { %v9375_v47 = vsel %vm21618_vm5, %v9370_v8, %v9374_v3  ;;  %v9444_v33 = vrot.slane %v9442_v27, 5  ;;  %16778 = vmatprep.subr.bf16.mxu0 %v17977_v51  ;;  %v9407_v9 = vrot.slane %v9405_v29, 4  ;;  %v9447_v37 = vshrl.u32 %v24586_v39, 16  ;;  %v22132_v1 = vpop.f32.mrb[35].mxu0  ;;  %v24590_v18 = vld [vmem:[#allocation33_spill] sm:$0xff]  ;;  %v17984_v44 = vld [vmem:[%s24308_s5 + $0x728] sm:$0xff]  }
 0x4fb   : > { %v15333_v41 = vcombine.high %v9333_v20, %v9375_v47  ;;  %v9398_v59 = vrot.slane %v9397_v50, 4  ;;  %v9439_v60 = vor.u32 %v9438_v40, %v9435_v22  ;;  %16741 = vmatpush3.bf16.msra.mxu1 %v17976_v30  ;;  %v15332_v5 = vcombine.low %v9333_v20, %v9375_v47  ;;  %v17986_v27 = vld [vmem:[%s24308_s5 + $0x770] sm:$0xff]   ;;  %v24591_v47 = vld [vmem:[#allocation34_spill] sm:$0xff] }
 0x4fc   : > { %v9410_v14 = vrot.slane %v9408_v26, 5  ;;  %v9416_v54 = vrot.slane %v9414_v38, 5  ;;  %v9449_v52 = vrot.slane %v9447_v37, 4  ;;  %v9450_v55 = vshll.u32 %v24586_v39, 16  ;;  %16742 = vmatprep.subr.bf16.mxu1 %v17978_v2  ;;  %v17987_v26 = vld [vmem:[%s24308_s5 + $0x7a0] sm:$0xff]   ;;  %v17989_v39 = vld [vmem:[%s24308_s5 + $0x7e8] sm:$0xff]  }
 0x4fd   : > { %10047 = vmatprep.mubr.bf16.mxu0 %v15333_v41  ;;  %v9403_v15 = vsel %vm21618_vm5, %v9398_v59, %v9402_v24  ;;  %v9440_v21 = vrot.slane %v9439_v60, 4  ;;  %v9456_v0 = vshll.u32 %v24587_v63, 16  ;;  %16779 = vmatpush3.bf16.msra.mxu0 %v17979_v42  ;;  %v9475_v11 = vshrl.u32 %v24588_v61, 16  ;;  %v22150_v16 = vpop.f32.mrb[24].mxu1  ;;  %v24592_v60 = vld [vmem:[#allocation43_spill] sm:$0xff]  ;;  %v17990_v63 = vld [vmem:[%s24308_s5 + $0x778] sm:$0xff]  }
 0x4fe   : > { %10048 = vmatmul.mubr.bf16.gmra.mrb[132].mxu0 %v15332_v5  ;;  %v9411_v3 = vor.u32 %v9410_v14, %v9407_v9  ;;  %v9452_v6 = vrot.slane %v9450_v55, 5  ;;  %v9478_v58 = vshll.u32 %v24588_v61, 16  ;;  %v9484_v17 = vshll.u32 %v24589_v32, 16  ;;  %16780 = vmatprep.subr.bf16.mxu0 %v17981_v57  ;;  %v22155_v22 = vpop.f32.mrb[25].mxu1  ;;  %v17988_v55 = vld [vmem:[%s24308_s5 + $0x730] sm:$0xff]  }
 0x4ff   : > { %v9445_v13 = vsel %vm21618_vm5, %v9440_v21, %v9444_v33  ;;  %v9458_v12 = vrot.slane %v9456_v0, 5  ;;  %16743 = vmatpush3.bf16.msra.mxu1 %v17980_v49  ;;  %v9477_v51 = vrot.slane %v9475_v11, 4  ;;  %v9517_v24 = vshrl.u32 %v24590_v18, 16  ;;  %v22163_v4 = vpop.f32.mrb[26].mxu1  ;;  %v17991_v0 = vld [vmem:[%s24308_s5 + $0x7a8] sm:$0xff]   ;;  %v17993_v32 = vld [vmem:[%s24308_s5 + $0x7f0] sm:$0xff]  }
 0x500   : > { %v15337_v48 = vcombine.high %v9403_v15, %v9445_v13  ;;  %v9412_v30 = vrot.slane %v9411_v3, 4  ;;  %v9453_v20 = vor.u32 %v9452_v6, %v9449_v52  ;;  %v15336_v8 = vcombine.low %v9403_v15, %v9445_v13  ;;  %16744 = vmatprep.subr.bf16.mxu1 %v17982_v46  ;;  %v22169_v35 = vpop.f32.mrb[27].mxu1  ;;  %v24594_v6 = vld [vmem:[#allocation45_spill] sm:$0xff] }
 0x501   : > { %v9480_v29 = vrot.slane %v9478_v58, 5  ;;  %v9486_v2 = vrot.slane %v9484_v17, 5  ;;  %v9519_v50 = vrot.slane %v9517_v24, 4  ;;  %v9520_v40 = vshll.u32 %v24590_v18, 16  ;;  %16781 = vmatpush3.bf16.msra.mxu0 %v17983_v10  ;;  %v22181_v37 = vpop.f32.mrb[36].mxu0 }
 0x502   : > { %9990 = vmatprep.mubr.bf16.mxu1 %v15337_v48  ;;  %v9417_v38 = vsel %vm21618_vm5, %v9412_v30, %v9416_v54  ;;  %v9454_v42 = vrot.slane %v9453_v20, 4  ;;  %v9526_v33 = vshll.u32 %v24591_v47, 16  ;;  %v22176_v9 = vadd.f32 %v22042_v19, %v22036_v36  ;;  %16782 = vmatprep.subr.bf16.mxu0 %v17985_v31  ;;  %v22188_v49 = vpop.f32.mrb[37].mxu0  ;;  %v24593_v54 = vld [vmem:[#allocation44_spill] sm:$0xff]  ;;  %v18257_v48 = vld [vmem:[#allocation3 + $0x30] sm:$0xff]  ;;  %v18258_v20 = vld [vmem:[#allocation3 + $0x38] sm:$0xff] }
 0x503   : > { %9991 = vmatmul.mubr.bf16.gmra.mrb[120].mxu1 %v15336_v8  ;;  %v9481_v57 = vor.u32 %v9480_v29, %v9477_v51  ;;  %v9522_v41 = vrot.slane %v9520_v40, 5  ;;  %v22185_v59 = vadd.f32 %v22052_v7, %v22048_v56  ;;  %v9489_v5 = vshrl.u32 %v24592_v60, 16  ;;  %v22197_v46 = vpop.f32.mrb[38].mxu0  ;;  %v17994_v40 = vld [vmem:[%s24308_s5 + $0x7b0] sm:$0xff]  }
 0x504   : > { %v9459_v36 = vsel %vm21618_vm5, %v9454_v42, %v9458_v12  ;;  %v9528_v19 = vrot.slane %v9526_v33, 5  ;;  %16745 = vmatpush3.bf16.msra.mxu1 %v17984_v44  ;;  %v9492_v14 = vshll.u32 %v24592_v60, 16  ;;  %v9498_v52 = vshll.u32 %v24593_v54, 16  ;;  %v22205_v61 = vpop.f32.mrb[39].mxu0  ;;  %v24595_v12 = vld [vmem:[#allocation46_spill] sm:$0xff]  ;;  %v18260_v33 = vld [vmem:[#allocation3 + $0x48] sm:$0xff] }
 0x505   : > { %v15339_v56 = vcombine.high %v9417_v38, %v9459_v36  ;;  %v9482_v7 = vrot.slane %v9481_v57, 4  ;;  %v9523_v15 = vor.u32 %v9522_v41, %v9519_v50  ;;  %v15338_v21 = vcombine.low %v9417_v38, %v9459_v36  ;;  %16746 = vmatprep.subr.bf16.mxu1 %v17986_v27  ;;  %16783 = vmatpush3.bf16.msra.mxu0 %v17987_v26  ;;  %v18259_v50 = vld [vmem:[#allocation3 + $0x40] sm:$0xff]  ;;  %v17992_v57 = vld [vmem:[%s24308_s5 + $0x738] sm:$0xff]   ;;  %v17999_v54 = vld [vmem:[%s24308_s5 + $0x840] sm:$0xff]  }
 0x506   : > { %v9491_v11 = vrot.slane %v9489_v5, 4  ;;  %v9494_v10 = vrot.slane %v9492_v14, 5  ;;  %v9500_v3 = vrot.slane %v9498_v52, 5  ;;  %v9531_v58 = vshrl.u32 %v24594_v6, 16  ;;  %16784 = vmatprep.subr.bf16.mxu0 %v17989_v39  ;;  %v18001_v41 = vld [vmem:[%s24308_s5 + $0x7f8] sm:$0xff]  }
 0x507   : > { %10055 = vmatprep.mubr.bf16.mxu0 %v15339_v56  ;;  %v9487_v17 = vsel %vm21618_vm5, %v9482_v7, %v9486_v2  ;;  %v9524_v31 = vrot.slane %v9523_v15, 4  ;;  %v9534_v13 = vshll.u32 %v24594_v6, 16  ;;  %v9540_v51 = vshll.u32 %v24595_v12, 16 }
 0x508   : > { %10056 = vmatmul.mubr.bf16.gmra.mrb[136].mxu0 %v15338_v21  ;;  %v9495_v18 = vor.u32 %v9494_v10, %v9491_v11  ;;  %v9533_v24 = vrot.slane %v9531_v58, 4  ;;  %16747 = vmatpush3.bf16.msra.mxu1 %v17988_v55  ;;  %v9158_v30 = vrot.slane %v18257_v48, 2  ;;  %v9159_v8 = vrot.slane %v18258_v20, 2  ;;  %v22220_v26 = vpop.f32.mrb[28].mxu1  ;;  %v22247_v10 = vld [vmem:[#allocation3 + $0x50] sm:$0xff]  ;;  %v22265_v48 = vld [vmem:[#allocation3 + $0x68] sm:$0xff] }
 0x509   : > { %v9529_v44 = vsel %vm21618_vm5, %v9524_v31, %v9528_v19  ;;  %v9536_v27 = vrot.slane %v9534_v13, 5  ;;  %v9542_v29 = vrot.slane %v9540_v51, 5  ;;  %v9160_v2 = vrot.slane %v18259_v50, 2  ;;  %16748 = vmatprep.subr.bf16.mxu1 %v17990_v63  ;;  %16785 = vmatpush3.bf16.msra.mxu0 %v17991_v0  ;;  %v22228_v60 = vpop.f32.mrb[29].mxu1  ;;  %v22259_v31 = vld [vmem:[#allocation3 + $0x60] sm:$0xff] }
 0x50a   : > { %v15343_v38 = vcombine.high %v9487_v17, %v9529_v44  ;;  %v9496_v42 = vrot.slane %v9495_v18, 4  ;;  %v15342_v47 = vcombine.low %v9487_v17, %v9529_v44  ;;  %v9161_v39 = vrot.slane %v18260_v33, 2  ;;  %16786 = vmatprep.subr.bf16.mxu0 %v17993_v32  ;;  %v22235_v52 = vpop.f32.mrb[30].mxu1  ;;  %v22257_v17 = vld [vmem:[#allocation3 + $0x58] sm:$0xff] }
 0x50b   : > { %v9537_v5 = vor.u32 %v9536_v27, %v9533_v24  ;;  %v15308_v36 = vcombine.low %v9158_v30, %v9159_v8  ;;  %v15309_v19 = vcombine.high %v9158_v30, %v9159_v8  ;;  %v16232_v14 = vadd.f32 %v22119_v53, %v22110_v23  ;;  %v22243_v21 = vpop.f32.mrb[40].mxu0  ;;  %v22245_v63 = vpop.f32.mrb[31].mxu1 }
 0x50c   : > { %9998 = vmatprep.mubr.bf16.mxu1 %v15343_v38  ;;  %v9501_v55 = vsel %vm21618_vm5, %v9496_v42, %v9500_v3  ;;  %v15310_v56 = vcombine.low %v9160_v2, %v9161_v39  ;;  %v15311_v7 = vcombine.high %v9160_v2, %v9161_v39  ;;  %v22241_v15 = vadd.f32 %v22095_v25, %v22090_v28  ;;  %v18002_v3 = vld [vmem:[%s24308_s5 + $0x7b8] sm:$0xff]   ;;  %v22252_v6 = vpop.f32.mrb[41].mxu0 }
 0x50d   : > { %v9538_v23 = vrot.slane %v9537_v5, 4  ;;  %9999 = vmatmul.mubr.bf16.gmra.mrb[124].mxu1 %v15342_v47  ;;  %v9251_v53 = vshrl.u32 %v15308_v36, 16  ;;  %v9254_v0 = vshll.u32 %v15308_v36, 16  ;;  %v9260_v11 = vshll.u32 %v15309_v19, 16  ;;  %16787 = vmatpush3.bf16.msra.mxu0 %v17994_v40  ;;  %v22261_v13 = vpop.f32.mrb[42].mxu0 }
 0x50e   : > { %v9293_v28 = vshrl.u32 %v15310_v56, 16  ;;  %v9296_v25 = vshll.u32 %v15310_v56, 16  ;;  %v9302_v58 = vshll.u32 %v15311_v7, 16  ;;  %v22255_v32 = vadd.f32 %v16232_v14, %v22176_v9  ;;  %16749 = vmatpush3.bf16.msra.mxu1 %v17992_v57  ;;  %16788 = vmatprep.subr.bf16.mxu0 %v18001_v41  ;;  %v18005_v9 = vld [vmem:[%s24308_s5 + $0x8c0] sm:$0xff]   ;;  %v22270_v30 = vpop.f32.mrb[43].mxu0 }
 0x50f   : > { %v9543_v12 = vsel %vm21618_vm5, %v9538_v23, %v9542_v29  ;;  %v9253_v51 = vrot.slane %v9251_v53, 4  ;;  %v9256_v18 = vrot.slane %v9254_v0, 5  ;;  %v9262_v24 = vrot.slane %v9260_v11, 5  ;;  %16814 = vmatprep.subr.bf16.mxu1 %v17999_v54  ;;  %v18261_v57 = vld [vmem:[#allocation3 + $0x50] sm:$0xff] }
 0x510   : > { %v15345_v20 = vcombine.high %v9501_v55, %v9543_v12  ;;  %v9295_v8 = vrot.slane %v9293_v28, 4  ;;  %v9298_v44 = vrot.slane %v9296_v25, 5  ;;  %v9304_v27 = vrot.slane %v9302_v58, 5  ;;  %v22278_v38 = vpop.f32.mrb[32].mxu1 }
 0x511   : > { %v9257_v50 = vor.u32 %v9256_v18, %v9253_v51  ;;  %v16235_v29 = vadd.f32 %v22132_v1, %v22127_v43  ;;  %v22276_v2 = vadd.f32 %v22112_v45, %v22101_v34  ;;  %v15344_v40 = vcombine.low %v9501_v55, %v9543_v12  ;;  %16789 = vmatpush3.bf16.msra.mxu0 %v18002_v3  ;;  %v22286_v43 = vpop.f32.mrb[33].mxu1  ;;  %v18000_v51 = vld [vmem:[%s24308_s5 + $0x800] sm:$0xff]  }
 0x512   : > { %10063 = vmatprep.mubr.bf16.mxu0 %v15345_v20  ;;  %v9299_v42 = vor.u32 %v9298_v44, %v9295_v8  ;;  %v15492_v47 = vcombine.low %v22247_v10, %v22257_v17  ;;  %v15495_v33 = vcombine.high %v22247_v10, %v22257_v17  ;;  %v15498_v39 = vcombine.low %v22259_v31, %v22265_v48  ;;  %v22293_v5 = vpop.f32.mrb[34].mxu1  ;;  %v18263_v8 = vld [vmem:[#allocation3 + $0x60] sm:$0xff] }
 0x513   : > { %v9258_v1 = vrot.slane %v9257_v50, 4  ;;  %v22289_v34 = vadd.f32 %v16235_v29, %v22185_v59  ;;  %10064 = vmatmul.mubr.bf16.gmra.mrb[140].mxu0 %v15344_v40  ;;  %v15501_v45 = vcombine.high %v22259_v31, %v22265_v48  ;;  %v9162_v41 = vrot.slane %v18261_v57, 2  ;;  %16854 = vmatprep.subr.bf16.mxu0 %v18005_v9  ;;  %v22295_v55 = vpop.f32.mrb[35].mxu1  ;;  %v18264_v29 = vld [vmem:[#allocation3 + $0x68] sm:$0xff] }
 0x514   : > { %v9300_v36 = vrot.slane %v9299_v42, 4  ;;  %v10452_v19 = vshrl.u32 %v15492_v47, 16  ;;  %v10455_v14 = vshll.u32 %v15492_v47, 16  ;;  %v10461_v54 = vshll.u32 %v15495_v33, 16 }
 0x515   : > { %v9263_v56 = vsel %vm21618_vm5, %v9258_v1, %v9262_v24  ;;  %v10494_v59 = vshrl.u32 %v15498_v39, 16  ;;  %v10497_v7 = vshll.u32 %v15498_v39, 16  ;;  %v10503_v23 = vshll.u32 %v15501_v45, 16  ;;  %v18262_v24 = vld [vmem:[#allocation3 + $0x58] sm:$0xff] }
 0x516   : > { %v9305_v53 = vsel %vm21618_vm5, %v9300_v36, %v9304_v27  ;;  %v10454_v0 = vrot.slane %v10452_v19, 4  ;;  %v10457_v11 = vrot.slane %v10455_v14, 5  ;;  %v10463_v3 = vrot.slane %v10461_v54, 5  ;;  %v18003_v27 = vld [vmem:[%s24308_s5 + $0x848] sm:$0xff]  }
 0x517   : > { %v15328_v28 = vcombine.low %v9263_v56, %v9305_v53  ;;  %v15329_v25 = vcombine.high %v9263_v56, %v9305_v53  ;;  %v10496_v58 = vrot.slane %v10494_v59, 4  ;;  %v10499_v12 = vrot.slane %v10497_v7, 5  ;;  %v22331_v59 = vld [vmem:[#allocation3 + $0x70] sm:$0xff] }
 0x518   : > { %v10458_v18 = vor.u32 %v10457_v11, %v10454_v0  ;;  %v10505_v9 = vrot.slane %v10503_v23, 5  ;;  %v9163_v20 = vrot.slane %v18262_v24, 2  ;;  %v9164_v44 = vrot.slane %v18263_v8, 2  ;;  %v22345_v24 = vld [vmem:[#allocation3 + $0x88] sm:$0xff] }
 0x519   : > { %10104 = vmatprep.mubr.bf16.mxu1 %v15329_v25  ;;  %v10500_v50 = vor.u32 %v10499_v12, %v10496_v58  ;;  %v9165_v40 = vrot.slane %v18264_v29, 2  ;;  %v16238_v42 = vadd.f32 %v22188_v49, %v22181_v37  ;;  %v22311_v47 = vadd.f32 %v22155_v22, %v22150_v16  ;;  %v22313_v33 = vpop.f32.mrb[36].mxu1  ;;  %v18004_v16 = vld [vmem:[%s24308_s5 + $0x808] sm:$0xff]   ;;  %v22341_v25 = vld [vmem:[#allocation3 + $0x80] sm:$0xff]  ;;  %24596 = vst [vmem:[#allocation15_spill] sm:$0xff] %v22345_v24 }
 0x51a   : > { %v10459_v39 = vrot.slane %v10458_v18, 4  ;;  %10105 = vmatmul.mubr.bf16.vlgmr.msra.gmra.mrb[128].mxu1 %v15328_v28  ;;  %v15312_v1 = vcombine.low %v9162_v41, %v9163_v20  ;;  %v15313_v45 = vcombine.high %v9162_v41, %v9163_v20  ;;  %v16241_v57 = vadd.f32 %v22205_v61, %v22197_v46  ;;  %v22317_v36 = vpop.f32.mrb[37].mxu1  ;;  %v22339_v28 = vld [vmem:[#allocation3 + $0x78] sm:$0xff]  ;;  %v18010_v20 = vld [vmem:[%s24308_s5 + $0x850] sm:$0xff]  }
 0x51b   : > { %v10501_v19 = vrot.slane %v10500_v50, 4  ;;  %16815 = vmatpush3.bf16.msra.mxu1 %v18000_v51  ;;  %v15314_v14 = vcombine.low %v9164_v44, %v9165_v40  ;;  %v15315_v54 = vcombine.high %v9164_v44, %v9165_v40  ;;  %v22320_v37 = vadd.f32 %v16238_v42, %v22241_v15  ;;  %v22327_v49 = vpop.f32.mrb[38].mxu1  ;;  %v18012_v40 = vld [vmem:[%s24308_s5 + $0x810] sm:$0xff]   ;;  %v18013_v42 = vld [vmem:[%s24308_s5 + $0x8c8] sm:$0xff]  }
 0x51c   : > { %v22325_v22 = vpop.f32.mrb[44].mxu0  ;;  %v10464_v46 = vsel %vm21618_vm5, %v10459_v39, %v10463_v3  ;;  %v9335_v61 = vshrl.u32 %v15312_v1, 16  ;;  %v9338_v41 = vshll.u32 %v15312_v1, 16  ;;  %v9344_v56 = vshll.u32 %v15313_v45, 16  ;;  %16816 = vmatprep.subr.bf16.mxu1 %v18003_v27  ;;  %v22335_v15 = vpop.f32.mrb[39].mxu1 }
 0x51d   : > { %v22333_v7 = vpop.f32.mrb[45].mxu0  ;;  %v10506_v23 = vsel %vm21618_vm5, %v10501_v19, %v10505_v9  ;;  %v9377_v53 = vshrl.u32 %v15314_v14, 16  ;;  %v9380_v0 = vshll.u32 %v15314_v14, 16  ;;  %v9386_v11 = vshll.u32 %v15315_v54, 16  ;;  %v18011_v9 = vld [vmem:[%s24308_s5 + $0x880] sm:$0xff]   ;;  %v18014_v14 = vld [vmem:[%s24308_s5 + $0x858] sm:$0xff]  }
 0x51e   : > { %v22343_v3 = vpop.f32.mrb[46].mxu0  ;;  %v15540_v58 = vcombine.low %v10464_v46, %v10506_v23  ;;  %v15541_v12 = vcombine.high %v10464_v46, %v10506_v23  ;;  %v9337_v51 = vrot.slane %v9335_v61, 4  ;;  %v9340_v18 = vrot.slane %v9338_v41, 5  ;;  %v18265_v23 = vld [vmem:[#allocation3 + $0x70] sm:$0xff] }
 0x51f   : > { %v22353_v8 = vpop.f32.mrb[47].mxu0  ;;  %v9346_v44 = vrot.slane %v9344_v56, 5  ;;  %v9379_v27 = vrot.slane %v9377_v53, 4  ;;  %v9382_v50 = vrot.slane %v9380_v0, 5  ;;  %v9388_v29 = vrot.slane %v9386_v11, 5  ;;  %16817 = vmatpush3.bf16.msra.mxu1 %v18004_v16  ;;  %v18017_v0 = vld [vmem:[%s24308_s5 + $0x8d0] sm:$0xff]  }
 0x520   : > { %11203 = vmatprep.mubr.bf16.mxu0 %v15541_v12  ;;  %v9341_v39 = vor.u32 %v9340_v18, %v9337_v51  ;;  %v22362_v1 = vadd.f32 %v16241_v57, %v22276_v2  ;;  %v22366_v45 = vadd.f32 %v22169_v35, %v22163_v4  ;;  %v15504_v19 = vcombine.low %v22331_v59, %v22339_v28  ;;  %v18015_v4 = vld [vmem:[%s24308_s5 + $0x888] sm:$0xff]   ;;  %v18016_v35 = vld [vmem:[%s24308_s5 + $0x818] sm:$0xff]  }
 0x521   : > { %v9383_v54 = vor.u32 %v9382_v50, %v9379_v27  ;;  %11204 = vmatmul.mubr.bf16.vlgmr.msra.gmra.mrb[144].mxu0 %v15540_v58  ;;  %v15507_v16 = vcombine.high %v22331_v59, %v22339_v28  ;;  %v15510_v2 = vcombine.low %v22341_v25, %v22345_v24  ;;  %v15513_v57 = vcombine.high %v22341_v25, %v22345_v24  ;;  %v22385_v46 = vpop.f32.mrb[40].mxu1 }
 0x522   : > { %24597 = vst [vmem:[#allocation16_spill] sm:$0xff] %v22385_v46  ;;  %v9342_v61 = vrot.slane %v9341_v39, 4  ;;  %v10536_v41 = vshrl.u32 %v15504_v19, 16  ;;  %v10539_v56 = vshll.u32 %v15504_v19, 16  ;;  %16818 = vmatprep.subr.bf16.mxu1 %v18010_v20  ;;  %16855 = vmatpush3.bf16.msra.mxu0 %v18011_v9  ;;  %v9166_v53 = vrot.slane %v18265_v23, 2  ;;  %v22390_v11 = vpop.f32.mrb[41].mxu1 }
 0x523   : > { %24598 = vst [vmem:[#allocation17_spill] sm:$0xff] %v22390_v11  ;;  %v9384_v58 = vrot.slane %v9383_v54, 4  ;;  %v10545_v12 = vshll.u32 %v15507_v16, 16  ;;  %v10578_v51 = vshrl.u32 %v15510_v2, 16  ;;  %v10581_v18 = vshll.u32 %v15510_v2, 16  ;;  %16819 = vmatpush3.bf16.msra.mxu1 %v18012_v40  ;;  %16856 = vmatprep.subr.bf16.mxu0 %v18013_v42  ;;  %v22394_v50 = vpop.f32.mrb[42].mxu1 }
 0x524   : > { %v22392_v27 = vpop.f32.mrb[48].mxu0  ;;  %24599 = vst [vmem:[#allocation18_spill] sm:$0xff] %v22394_v50  ;;  %v9347_v20 = vsel %vm21618_vm5, %v9342_v61, %v9346_v44  ;;  %v10538_v9 = vrot.slane %v10536_v41, 4  ;;  %v10541_v39 = vrot.slane %v10539_v56, 5  ;;  %v10587_v19 = vshll.u32 %v15513_v57, 16  ;;  %16820 = vmatprep.subr.bf16.mxu1 %v18014_v14  ;;  %v18022_v54 = vld [vmem:[%s24308_s5 + $0x860] sm:$0xff]  }
 0x525   : > { %v22401_v16 = vpop.f32.mrb[49].mxu0  ;;  %v22403_v2 = vpop.f32.mrb[43].mxu1  ;;  %v9389_v40 = vsel %vm21618_vm5, %v9384_v58, %v9388_v29  ;;  %v10547_v42 = vrot.slane %v10545_v12, 5  ;;  %v10580_v23 = vrot.slane %v10578_v51, 4  ;;  %v10583_v50 = vrot.slane %v10581_v18, 5  ;;  %v18023_v41 = vld [vmem:[%s24308_s5 + $0x890] sm:$0xff]  }
 0x526   : > { %24600 = vst [vmem:[#allocation35_spill] sm:$0xff] %v22403_v2  ;;  %v22407_v11 = vpop.f32.mrb[50].mxu0  ;;  %v15335_v44 = vcombine.high %v9347_v20, %v9389_v40  ;;  %v10542_v61 = vor.u32 %v10541_v39, %v10538_v9  ;;  %v10589_v57 = vrot.slane %v10587_v19, 5  ;;  %v15334_v14 = vcombine.low %v9347_v20, %v9389_v40  ;;  %16857 = vmatpush3.bf16.msra.mxu0 %v18015_v4  ;;  %v18266_v46 = vld [vmem:[#allocation3 + $0x78] sm:$0xff]  ;;  %v18267_v29 = vld [vmem:[#allocation3 + $0x80] sm:$0xff]  ;;  %v18268_v12 = vld [vmem:[#allocation3 + $0x88] sm:$0xff] }
 0x527   : > { %v22412_v56 = vpop.f32.mrb[51].mxu0  ;;  %v10584_v2 = vor.u32 %v10583_v50, %v10580_v23  ;;  %v9167_v24 = vrot.slane %v18266_v46, 2  ;;  %v9168_v58 = vrot.slane %v18267_v29, 2  ;;  %v9169_v51 = vrot.slane %v18268_v12, 2  ;;  %16821 = vmatpush3.bf16.msra.mxu1 %v18016_v35  ;;  %16858 = vmatprep.subr.bf16.mxu0 %v18017_v0  ;;  %v18024_v18 = vld [vmem:[%s24308_s5 + $0x820] sm:$0xff]   ;;  %v18025_v4 = vld [vmem:[%s24308_s5 + $0x8d8] sm:$0xff]  }
 0x528   : > { %10112 = vmatprep.mubr.bf16.mxu1 %v15335_v44  ;;  %v10543_v20 = vrot.slane %v10542_v61, 4  ;;  %v16244_v50 = vadd.f32 %v22252_v6, %v22243_v21  ;;  %v22424_v46 = vadd.f32 %v22228_v60, %v22220_v26  ;;  %v16247_v35 = vadd.f32 %v22270_v30, %v22261_v13  ;;  %16822 = vmatprep.subr.bf16.mxu1 %v18022_v54  ;;  %v18026_v0 = vld [vmem:[%s24308_s5 + $0x868] sm:$0xff]   ;;  %v22441_v13 = vld [vmem:[#allocation3 + $0x90] sm:$0xff]  ;;  %v22445_v54 = vld [vmem:[#allocation3 + $0xa0] sm:$0xff] }
 0x529   : > { %v10585_v9 = vrot.slane %v10584_v2, 4  ;;  %10113 = vmatmul.mubr.bf16.gmra.mrb[132].mxu1 %v15334_v14  ;;  %v15316_v39 = vcombine.low %v9166_v53, %v9167_v24  ;;  %v15317_v19 = vcombine.high %v9166_v53, %v9167_v24  ;;  %v15318_v40 = vcombine.low %v9168_v58, %v9169_v51  ;;  %v22431_v23 = vpop.f32.mrb[44].mxu1  ;;  %24602 = vst [vmem:[#allocation37_spill] sm:$0xff] %v22441_v13  ;;  %v22443_v30 = vld [vmem:[#allocation3 + $0x98] sm:$0xff]  ;;  %v22447_v24 = vld [vmem:[#allocation3 + $0xa8] sm:$0xff] }
 0x52a   : > { %24601 = vst [vmem:[#allocation36_spill] sm:$0xff] %v22431_v23  ;;  %v10548_v21 = vsel %vm21618_vm5, %v10543_v20, %v10547_v42  ;;  %v15319_v26 = vcombine.high %v9168_v58, %v9169_v51  ;;  %v22436_v60 = vadd.f32 %v16244_v50, %v22311_v47  ;;  %v22439_v6 = vadd.f32 %v16247_v35, %v22366_v45  ;;  %v18027_v53 = vld [vmem:[%s24308_s5 + $0x898] sm:$0xff]   ;;  %v22452_v2 = vpop.f32.mrb[45].mxu1  ;;  %v18028_v61 = vld [vmem:[%s24308_s5 + $0x828] sm:$0xff]  }
 0x52b   : > { %24603 = vst [vmem:[#allocation38_spill] sm:$0xff] %v22443_v30  ;;  %24604 = vst [vmem:[#allocation23_spill] sm:$0xff] %v22447_v24  ;;  %16859 = vmatpush3.bf16.msra.mxu0 %v18023_v41  ;;  %v10590_v47 = vsel %vm21618_vm5, %v10585_v9, %v10589_v57  ;;  %v9419_v45 = vshrl.u32 %v15316_v39, 16  ;;  %v9422_v42 = vshll.u32 %v15316_v39, 16  ;;  %v9428_v44 = vshll.u32 %v15317_v19, 16  ;;  %16823 = vmatpush3.bf16.msra.mxu1 %v18024_v18  ;;  %v22461_v41 = vpop.f32.mrb[46].mxu1 }
 0x52c   : > { %24605 = vst [vmem:[#allocation24_spill] sm:$0xff] %v22452_v2  ;;  %16860 = vmatprep.subr.bf16.mxu0 %v18025_v4  ;;  %v22459_v14 = vpop.f32.mrb[52].mxu0  ;;  %24606 = vst [vmem:[#allocation25_spill] sm:$0xff] %v22461_v41  ;;  %v15547_v29 = vcombine.high %v10548_v21, %v10590_v47  ;;  %v9461_v58 = vshrl.u32 %v15318_v40, 16  ;;  %v9464_v12 = vshll.u32 %v15318_v40, 16  ;;  %v9470_v51 = vshll.u32 %v15319_v26, 16  ;;  %16824 = vmatprep.subr.bf16.mxu1 %v18026_v0 }
 0x52d   : > { %v18029_v57 = vld [vmem:[%s24308_s5 + $0x8e0] sm:$0xff]   ;;  %v22466_v20 = vpop.f32.mrb[53].mxu0  ;;  %v22468_v18 = vpop.f32.mrb[47].mxu1  ;;  %v9421_v4 = vrot.slane %v9419_v45, 4  ;;  %v9424_v50 = vrot.slane %v9422_v42, 5  ;;  %v9430_v35 = vrot.slane %v9428_v44, 5  ;;  %v22472_v9 = vadd.f32 %v22245_v63, %v22235_v52 }
 0x52e   : > { %24607 = vst [vmem:[#allocation26_spill] sm:$0xff] %v22468_v18  ;;  %v18030_v39 = vld [vmem:[%s24308_s5 + $0x870] sm:$0xff]   ;;  %v22477_v0 = vpop.f32.mrb[54].mxu0  ;;  %11211 = vmatprep.mubr.bf16.mxu0 %v15547_v29  ;;  %v9463_v19 = vrot.slane %v9461_v58, 4  ;;  %v9466_v40 = vrot.slane %v9464_v12, 5  ;;  %v9472_v26 = vrot.slane %v9470_v51, 5  ;;  %v15546_v41 = vcombine.low %v10548_v21, %v10590_v47 }
 0x52f   : > { %16861 = vmatpush3.bf16.msra.mxu0 %v18027_v53  ;;  %v18031_v45 = vld [vmem:[%s24308_s5 + $0x8a0] sm:$0xff]   ;;  %v22482_v42 = vpop.f32.mrb[55].mxu0  ;;  %v9425_v52 = vor.u32 %v9424_v50, %v9421_v4  ;;  %v15516_v63 = vcombine.low %v22441_v13, %v22443_v30  ;;  %v15519_v44 = vcombine.high %v22441_v13, %v22443_v30  ;;  %v15522_v29 = vcombine.low %v22445_v54, %v22447_v24  ;;  %v18032_v21 = vld [vmem:[%s24308_s5 + $0x830] sm:$0xff]   ;;  %v18033_v53 = vld [vmem:[%s24308_s5 + $0x8e8] sm:$0xff]  }
 0x530   : > { %16825 = vmatpush3.bf16.msra.mxu1 %v18028_v61  ;;  %v9467_v47 = vor.u32 %v9466_v40, %v9463_v19  ;;  %11212 = vmatmul.mubr.bf16.gmra.mrb[148].mxu0 %v15546_v41  ;;  %v15525_v58 = vcombine.high %v22445_v54, %v22447_v24  ;;  %v18269_v12 = vld [vmem:[#allocation3 + $0x90] sm:$0xff]  ;;  %v18270_v4 = vld [vmem:[#allocation3 + $0x98] sm:$0xff]  ;;  %v18034_v61 = vld [vmem:[%s24308_s5 + $0x878] sm:$0xff]  }
 0x531   : > { %v9170_v51 = vrot.slane %v18269_v12, 2  ;;  %v9171_v50 = vrot.slane %v18270_v4, 2  ;;  %16862 = vmatprep.subr.bf16.mxu0 %v18029_v57  ;;  %v9426_v18 = vrot.slane %v9425_v52, 4  ;;  %v10620_v2 = vshrl.u32 %v15516_v63, 16  ;;  %16826 = vmatprep.subr.bf16.mxu1 %v18030_v39  ;;  %v22501_v13 = vpop.f32.mrb[48].mxu1  ;;  %v18035_v57 = vld [vmem:[%s24308_s5 + $0x8a8] sm:$0xff]  }
 0x532   : > { %v10623_v23 = vshll.u32 %v15516_v63, 16  ;;  %v10629_v30 = vshll.u32 %v15519_v44, 16  ;;  %24608 = vst [vmem:[#allocation39_spill] sm:$0xff] %v22501_v13  ;;  %v9468_v41 = vrot.slane %v9467_v47, 4  ;;  %v10662_v19 = vshrl.u32 %v15522_v29, 16  ;;  %v22506_v12 = vpop.f32.mrb[49].mxu1 }
 0x533   : > { %v10665_v40 = vshll.u32 %v15522_v29, 16  ;;  %v10671_v24 = vshll.u32 %v15525_v58, 16  ;;  %16863 = vmatpush3.bf16.msra.mxu0 %v18031_v45  ;;  %24609 = vst [vmem:[#allocation40_spill] sm:$0xff] %v22506_v12  ;;  %v9431_v52 = vsel %vm21618_vm5, %v9426_v18, %v9430_v35  ;;  %v10622_v4 = vrot.slane %v10620_v2, 4  ;;  %v18036_v39 = vld [vmem:[%s24308_s5 + $0x838] sm:$0xff]   ;;  %v22515_v45 = vpop.f32.mrb[50].mxu1 }
 0x534   : > { %v10625_v63 = vrot.slane %v10623_v23, 5  ;;  %v10631_v44 = vrot.slane %v10629_v30, 5  ;;  %16827 = vmatpush3.bf16.msra.mxu1 %v18032_v21  ;;  %16864 = vmatprep.subr.bf16.mxu0 %v18033_v53  ;;  %v22513_v29 = vpop.f32.mrb[56].mxu0  ;;  %24611 = vst [vmem:[#allocation42_spill] sm:$0xff] %v22515_v45  ;;  %v9473_v47 = vsel %vm21618_vm5, %v9468_v41, %v9472_v26  ;;  %v10664_v58 = vrot.slane %v10662_v19, 4  ;;  %v18037_v23 = vld [vmem:[%s24308_s5 + $0x8f0] sm:$0xff]  }
 0x535   : > { %24610 = vst [vmem:[#allocation41_spill] sm:$0xff] %v22513_v29  ;;  %v10667_v12 = vrot.slane %v10665_v40, 5  ;;  %v10673_v13 = vrot.slane %v10671_v24, 5  ;;  %16828 = vmatprep.subr.bf16.mxu1 %v18034_v61  ;;  %v22522_v30 = vpop.f32.mrb[57].mxu0  ;;  %v22524_v2 = vpop.f32.mrb[51].mxu1  ;;  %v15341_v18 = vcombine.high %v9431_v52, %v9473_v47  ;;  %v15340_v21 = vcombine.low %v9431_v52, %v9473_v47  ;;  %v18271_v53 = vld [vmem:[#allocation3 + $0xa0] sm:$0xff] }
 0x536   : > { %24612 = vst [vmem:[#allocation31_spill] sm:$0xff] %v22524_v2  ;;  %v10626_v35 = vor.u32 %v10625_v63, %v10622_v4  ;;  %v9172_v45 = vrot.slane %v18271_v53, 2  ;;  %v18039_v26 = vld [vmem:[%s24308_s5 + $0x940] sm:$0xff]   ;;  %v22529_v41 = vpop.f32.mrb[58].mxu0  ;;  %v18272_v61 = vld [vmem:[#allocation3 + $0xa8] sm:$0xff]  ;;  %v15320_v40 = vcombine.low %v9170_v51, %v9171_v50  ;;  %v15321_v29 = vcombine.high %v9170_v51, %v9171_v50  ;;  %v18038_v2 = vld [vmem:[%s24308_s5 + $0x8b0] sm:$0xff]  }
 0x537   : > { %v10668_v24 = vor.u32 %v10667_v12, %v10664_v58  ;;  %v9173_v19 = vrot.slane %v18272_v61, 2  ;;  %16865 = vmatpush3.bf16.msra.mxu0 %v18035_v57  ;;  %v22534_v4 = vpop.f32.mrb[59].mxu0  ;;  %10120 = vmatprep.mubr.bf16.mxu1 %v15341_v18  ;;  %v16250_v63 = vadd.f32 %v22333_v7, %v22325_v22  ;;  %v16253_v47 = vadd.f32 %v22353_v8, %v22343_v3  ;;  %v18041_v51 = vld [vmem:[%s24308_s5 + $0x8f8] sm:$0xff]  }
 0x538   : > { %v10627_v52 = vrot.slane %v10626_v35, 4  ;;  %v16272_v12 = vadd.f32 %v22286_v43, %v22278_v38  ;;  %16829 = vmatpush3.bf16.msra.mxu1 %v18036_v39  ;;  %v9503_v18 = vshrl.u32 %v15320_v40, 16  ;;  %16866 = vmatprep.subr.bf16.mxu0 %v18037_v23  ;;  %v9506_v7 = vshll.u32 %v15320_v40, 16 }
 0x539   : > { %v10669_v50 = vrot.slane %v10668_v24, 4  ;;  %10121 = vmatmul.mubr.bf16.gmra.mrb[136].mxu1 %v15340_v21  ;;  %v15322_v57 = vcombine.low %v9172_v45, %v9173_v19  ;;  %v15323_v58 = vcombine.high %v9172_v45, %v9173_v19  ;;  %v9512_v35 = vshll.u32 %v15321_v29, 16  ;;  %16894 = vmatprep.subr.bf16.mxu1 %v18039_v26  ;;  %v22550_v38 = vpop.f32.mrb[52].mxu1  ;;  %v18042_v45 = vld [vmem:[%s24308_s5 + $0x8b8] sm:$0xff]   ;;  %v18045_v26 = vld [vmem:[%s24308_s5 + $0x9c0] sm:$0xff]  }
 0x53a   : > { %v10632_v22 = vsel %vm21618_vm5, %v10627_v52, %v10631_v44  ;;  %v22548_v3 = vadd.f32 %v16250_v63, %v22424_v46  ;;  %v9505_v8 = vrot.slane %v9503_v18, 4  ;;  %v22557_v44 = vpop.f32.mrb[53].mxu1  ;;  %v9508_v23 = vrot.slane %v9506_v7, 5 }
 0x53b   : > { %v10674_v43 = vsel %vm21618_vm5, %v10669_v50, %v10673_v13  ;;  %v9545_v39 = vshrl.u32 %v15322_v57, 16  ;;  %v9548_v21 = vshll.u32 %v15322_v57, 16  ;;  %16867 = vmatpush3.bf16.msra.mxu0 %v18038_v2  ;;  %v9514_v46 = vrot.slane %v9512_v35, 5  ;;  %v22564_v24 = vpop.f32.mrb[54].mxu1 }
 0x53c   : > { %v15553_v29 = vcombine.high %v10632_v22, %v10674_v43  ;;  %v9554_v53 = vshll.u32 %v15323_v58, 16  ;;  %16868 = vmatprep.subr.bf16.mxu0 %v18041_v51  ;;  %v22562_v13 = vpop.f32.mrb[60].mxu0  ;;  %v22567_v19 = vadd.f32 %v16253_v47, %v22472_v9  ;;  %v6136_v40 = vadd.f32 %v16272_v12, %v22255_v32  ;;  %v22572_v63 = vpop.f32.mrb[55].mxu1 }
 0x53d   : > { %v9547_v2 = vrot.slane %v9545_v39, 4  ;;  %v9550_v61 = vrot.slane %v9548_v21, 5  ;;  %v22570_v52 = vpop.f32.mrb[61].mxu0  ;;  %v9509_v51 = vor.u32 %v9508_v23, %v9505_v8  ;;  %v16275_v57 = vadd.f32 %v22295_v55, %v22293_v5 }
 0x53e   : > { %11219 = vmatprep.mubr.bf16.mxu0 %v15553_v29  ;;  %v9556_v50 = vrot.slane %v9554_v53, 5  ;;  %v15552_v58 = vcombine.low %v10632_v22, %v10674_v43  ;;  %v22576_v18 = vpop.f32.mrb[62].mxu0  ;;  %v10275_v35 = vrot.slane %v22247_v10, 1  ;;  %v10276_v9 = vrot.slane %v22257_v17, 1 }
 0x53f   : > { %v9551_v7 = vor.u32 %v9550_v61, %v9547_v2  ;;  %v10277_v32 = vrot.slane %v22259_v31, 1  ;;  %16869 = vmatpush3.bf16.msra.mxu0 %v18042_v45  ;;  %v22581_v47 = vpop.f32.mrb[63].mxu0  ;;  %v9510_v12 = vrot.slane %v9509_v51, 4  ;;  %v6139_v8 = vadd.f32 %v16275_v57, %v22289_v34 }
 0x540   : > { %11220 = vmatmul.mubr.bf16.gmra.mrb[152].mxu0 %v15552_v58  ;;  %v10278_v39 = vrot.slane %v22265_v48, 1  ;;  %v16312_v5 = vadd.f32 %v22401_v16, %v22392_v27  ;;  %16934 = vmatprep.subr.bf16.mxu0 %v18045_v26  ;;  %v15493_v22 = vcombine.low %v10275_v35, %v10276_v9  ;;  %v15496_v43 = vcombine.high %v10275_v35, %v10276_v9 }
 0x541   : > { %v9552_v55 = vrot.slane %v9551_v7, 4  ;;  %v16278_v21 = vadd.f32 %v22317_v36, %v22313_v33  ;;  %v9515_v45 = vsel %vm21618_vm5, %v9510_v12, %v9514_v46  ;;  %v22593_v34 = vpop.f32.mrb[56].mxu1 }
 0x542   : > { %v15499_v29 = vcombine.low %v10277_v32, %v10278_v39  ;;  %v15502_v23 = vcombine.high %v10277_v32, %v10278_v39  ;;  %v22591_v53 = vadd.f32 %v16312_v5, %v6136_v40  ;;  %v10466_v27 = vshrl.u32 %v15493_v22, 16  ;;  %v22597_v61 = vpop.f32.mrb[57].mxu1 }
 0x543   : > { %v9557_v2 = vsel %vm21618_vm5, %v9552_v55, %v9556_v50  ;;  %v10469_v16 = vshll.u32 %v15493_v22, 16  ;;  %v10475_v26 = vshll.u32 %v15496_v43, 16  ;;  %24613 = vst [vmem:[#allocation32_spill] sm:$0xff] %v22597_v61  ;;  %v22601_v46 = vpop.f32.mrb[58].mxu1  ;;  %v22608_v5 = vadd.f32 %v16278_v21, %v22320_v37 }
 0x544   : > { %v15347_v51 = vcombine.high %v9515_v45, %v9557_v2  ;;  %v15346_v57 = vcombine.low %v9515_v45, %v9557_v2  ;;  %v10508_v33 = vshrl.u32 %v15499_v29, 16  ;;  %v10511_v36 = vshll.u32 %v15499_v29, 16  ;;  %v22599_v58 = vpop.f32.mrb[64].mxu0  ;;  %24614 = vst [vmem:[#allocation33_spill] sm:$0xff] %v22601_v46  ;;  %v22605_v50 = vpop.f32.mrb[59].mxu1  ;;  %v22614_v29 = vld [vmem:[#allocation3] sm:$0xff] }
 0x545   : > { %v10468_v40 = vrot.slane %v10466_v27, 4  ;;  %v10471_v7 = vrot.slane %v10469_v16, 5  ;;  %v10477_v35 = vrot.slane %v10475_v26, 5  ;;  %v10517_v9 = vshll.u32 %v15502_v23, 16  ;;  %v22603_v32 = vpop.f32.mrb[65].mxu0  ;;  %24615 = vst [vmem:[#allocation34_spill] sm:$0xff] %v22605_v50 }
 0x546   : > { %10128 = vmatprep.mubr.bf16.mxu1 %v15347_v51  ;;  %v10510_v12 = vrot.slane %v10508_v33, 4  ;;  %v10513_v39 = vrot.slane %v10511_v36, 5  ;;  %v16315_v55 = vadd.f32 %v22412_v56, %v22407_v11  ;;  %v22612_v22 = vpop.f32.mrb[66].mxu0  ;;  %v22618_v23 = vcombine.low %v22614_v29, %v22614_v29 }
 0x547   : > { %10129 = vmatmul.mubr.bf16.gmra.mrb[140].mxu1 %v15346_v57  ;;  %v10472_v43 = vor.u32 %v10471_v7, %v10468_v40  ;;  %v10519_v45 = vrot.slane %v10517_v9, 5  ;;  %v15531_v2 = vcombine.high %v22614_v29, %v22614_v29  ;;  %v22622_v27 = vpop.f32.mrb[67].mxu0  ;;  %v16281_v11 = vadd.f32 %v22335_v15, %v22327_v49 }
 0x548   : > { %24616 = vst [vmem:[#allocation43_spill] sm:$0xff] %v22618_v23  ;;  %v10514_v37 = vor.u32 %v10513_v39, %v10510_v12  ;;  %v22624_v21 = vadd.f32 %v16315_v55, %v6139_v8  ;;  %v10291_v56 = vrot.slane %v22247_v10, 2  ;;  %v10704_v26 = vshrl.u32 %v22618_v23, 16 }
 0x549   : > { %v10473_v16 = vrot.slane %v10472_v43, 4  ;;  %v10707_v51 = vshll.u32 %v22618_v23, 16  ;;  %v10713_v57 = vshll.u32 %v15531_v2, 16  ;;  %v22632_v36 = vadd.f32 %v16281_v11, %v22362_v1 }
 0x54a   : > { %v10515_v33 = vrot.slane %v10514_v37, 4  ;;  %v10292_v40 = vrot.slane %v22257_v17, 2  ;;  %v10293_v8 = vrot.slane %v22259_v31, 2  ;;  %v10706_v10 = vrot.slane %v10704_v26, 4 }
 0x54b   : > { %v22636_v7 = vpop.f32.mrb[60].mxu1  ;;  %v10478_v49 = vsel %vm21618_vm5, %v10473_v16, %v10477_v35  ;;  %v10709_v15 = vrot.slane %v10707_v51, 5  ;;  %v10715_v9 = vrot.slane %v10713_v57, 5  ;;  %v10294_v1 = vrot.slane %v22265_v48, 2  ;;  %v18040_v35 = vld [vmem:[%s24308_s5 + $0x900] sm:$0xff]  }
 0x54c   : > { %24617 = vst [vmem:[#allocation44_spill] sm:$0xff] %v22636_v7  ;;  %v22640_v12 = vpop.f32.mrb[61].mxu1  ;;  %v10520_v39 = vsel %vm21618_vm5, %v10515_v33, %v10519_v45  ;;  %v15494_v55 = vcombine.low %v10291_v56, %v10292_v40  ;;  %v15497_v43 = vcombine.high %v10291_v56, %v10292_v40  ;;  %v22645_v17 = vpop.f32.mrb[68].mxu0  ;;  %v10279_v16 = vrot.slane %v22331_v59, 1  ;;  %v18043_v33 = vld [vmem:[%s24308_s5 + $0x948] sm:$0xff]  }
 0x54d   : > { %24618 = vst [vmem:[#allocation45_spill] sm:$0xff] %v22640_v12  ;;  %v22647_v31 = vpop.f32.mrb[62].mxu1  ;;  %v15542_v2 = vcombine.low %v10478_v49, %v10520_v39  ;;  %v15543_v37 = vcombine.high %v10478_v49, %v10520_v39  ;;  %v10710_v11 = vor.u32 %v10709_v15, %v10706_v10  ;;  %v22653_v26 = vpop.f32.mrb[69].mxu0  ;;  %v15500_v48 = vcombine.low %v10293_v8, %v10294_v1 }
 0x54e   : > { %24619 = vst [vmem:[#allocation46_spill] sm:$0xff] %v22647_v31  ;;  %v22655_v45 = vpop.f32.mrb[63].mxu1  ;;  %v15503_v51 = vcombine.high %v10293_v8, %v10294_v1  ;;  %v10480_v56 = vshrl.u32 %v15494_v55, 16  ;;  %v10483_v57 = vshll.u32 %v15494_v55, 16  ;;  %v22660_v40 = vpop.f32.mrb[70].mxu0  ;;  %v10489_v10 = vshll.u32 %v15497_v43, 16 }
 0x54f   : > { %24620 = vst [vmem:[#allocation47_spill] sm:$0xff] %v22655_v45  ;;  %24621 = vst [vmem:[#allocation48_spill] sm:$0xff] %v22660_v40  ;;  %11268 = vmatprep.mubr.bf16.mxu1 %v15543_v37  ;;  %v10711_v49 = vrot.slane %v10710_v11, 4  ;;  %v10280_v15 = vrot.slane %v22339_v28, 1  ;;  %v10281_v39 = vrot.slane %v22341_v25, 1  ;;  %v22664_v31 = vpop.f32.mrb[71].mxu0 }
 0x550   : > { %24622 = vst [vmem:[#allocation49_spill] sm:$0xff] %v22664_v31  ;;  %v10482_v45 = vrot.slane %v10480_v56, 4  ;;  %v10485_v23 = vrot.slane %v10483_v57, 5  ;;  %v10522_v8 = vshrl.u32 %v15500_v48, 16  ;;  %v10525_v1 = vshll.u32 %v15500_v48, 16  ;;  %11269 = vmatmul.mubr.bf16.vlgmr.msra.gmra.mrb[144].mxu1 %v15542_v2  ;;  %v24623_v37 = vld [vmem:[#allocation15_spill] sm:$0xff] }
 0x551   : > { %v10716_v55 = vsel %vm21618_vm5, %v10711_v49, %v10715_v9  ;;  %v10491_v12 = vrot.slane %v10489_v10, 5  ;;  %v10531_v7 = vshll.u32 %v15503_v51, 16  ;;  %16895 = vmatpush3.bf16.msra.mxu1 %v18040_v35  ;;  %v10282_v11 = vrot.slane %v24623_v37, 1  ;;  %v18044_v43 = vld [vmem:[%s24308_s5 + $0x908] sm:$0xff]   ;;  %v18046_v2 = vld [vmem:[%s24308_s5 + $0x950] sm:$0xff]  }
 0x552   : > { %v15559_v50 = vcombine.high %v10716_v55, %v10716_v55  ;;  %v15558_v46 = vcombine.low %v10716_v55, %v10716_v55  ;;  %v10486_v31 = vor.u32 %v10485_v23, %v10482_v45  ;;  %v10524_v56 = vrot.slane %v10522_v8, 4  ;;  %16896 = vmatprep.subr.bf16.mxu1 %v18043_v33 }
 0x553   : > { %v22675_v48 = vpop.f32.mrb[64].mxu1  ;;  %v10527_v9 = vrot.slane %v10525_v1, 5  ;;  %v10533_v51 = vrot.slane %v10531_v7, 5  ;;  %v15505_v35 = vcombine.low %v10279_v16, %v10280_v15  ;;  %v15508_v57 = vcombine.high %v10279_v16, %v10280_v15 }
 0x554   : > { %24624 = vst [vmem:[#allocation15_spill] sm:$0xff] %v22675_v48  ;;  %v22677_v49 = vpop.f32.mrb[65].mxu1  ;;  %11227 = vmatprep.mubr.bf16.mxu0 %v15559_v50  ;;  %v10487_v10 = vrot.slane %v10486_v31, 4  ;;  %v15511_v40 = vcombine.low %v10281_v39, %v10282_v11  ;;  %v15514_v61 = vcombine.high %v10281_v39, %v10282_v11  ;;  %v16318_v23 = vadd.f32 %v22466_v20, %v22459_v14  ;;  %v18048_v50 = vld [vmem:[%s24308_s5 + $0x910] sm:$0xff]  }
 0x555   : > { %24625 = vst [vmem:[#allocation50_spill] sm:$0xff] %v22677_v49  ;;  %v22681_v45 = vpop.f32.mrb[72].mxu0  ;;  %v22683_v33 = vpop.f32.mrb[66].mxu1  ;;  %11228 = vmatmul.mubr.bf16.gmra.mrb[156].mxu0 %v15558_v46  ;;  %v10528_v8 = vor.u32 %v10527_v9, %v10524_v56  ;;  %v10550_v55 = vshrl.u32 %v15505_v35, 16  ;;  %v10553_v1 = vshll.u32 %v15505_v35, 16  ;;  %v10559_v7 = vshll.u32 %v15508_v57, 16  ;;  %16897 = vmatpush3.bf16.msra.mxu1 %v18044_v43 }
 0x556   : > { %24626 = vst [vmem:[#allocation51_spill] sm:$0xff] %v22683_v33  ;;  %v22688_v31 = vpop.f32.mrb[73].mxu0  ;;  %v22690_v16 = vpop.f32.mrb[67].mxu1  ;;  %v10492_v14 = vsel %vm21618_vm5, %v10487_v10, %v10491_v12  ;;  %v10592_v20 = vshrl.u32 %v15511_v40, 16  ;;  %v10595_v15 = vshll.u32 %v15511_v40, 16  ;;  %v10601_v39 = vshll.u32 %v15514_v61, 16  ;;  %16898 = vmatprep.subr.bf16.mxu1 %v18046_v2 }
 0x557   : > { %24627 = vst [vmem:[#allocation52_spill] sm:$0xff] %v22690_v16  ;;  %v18050_v46 = vld [vmem:[%s24308_s5 + $0x958] sm:$0xff]   ;;  %v22697_v11 = vpop.f32.mrb[74].mxu0  ;;  %v10529_v43 = vrot.slane %v10528_v8, 4  ;;  %v10552_v56 = vrot.slane %v10550_v55, 4  ;;  %v10555_v9 = vrot.slane %v10553_v1, 5  ;;  %v22702_v12 = vadd.f32 %v16318_v23, %v22608_v5 }
 0x558   : > { %v10561_v35 = vrot.slane %v10559_v7, 5  ;;  %v22699_v57 = vpop.f32.mrb[75].mxu0  ;;  %v10594_v16 = vrot.slane %v10592_v20, 4  ;;  %v10597_v33 = vrot.slane %v10595_v15, 5  ;;  %v10603_v49 = vrot.slane %v10601_v39, 5  ;;  %v24628_v2 = vld [vmem:[#allocation16_spill] sm:$0xff] }
 0x559   : > { %v10534_v61 = vsel %vm21618_vm5, %v10529_v43, %v10533_v51  ;;  %v10556_v40 = vor.u32 %v10555_v9, %v10552_v56  ;;  %v24629_v10 = vld [vmem:[#allocation17_spill] sm:$0xff]  ;;  %v16321_v8 = vadd.f32 %v22482_v42, %v22477_v0  ;;  %16899 = vmatpush3.bf16.msra.mxu1 %v18048_v50  ;;  %v18052_v55 = vld [vmem:[%s24308_s5 + $0x918] sm:$0xff]   ;;  %v24630_v5 = vld [vmem:[#allocation18_spill] sm:$0xff]  ;;  %v10296_v9 = vrot.slane %v22339_v28, 2 }
 0x55a   : > { %v16284_v48 = vadd.f32 %v24629_v10, %v24628_v2  ;;  %v15544_v1 = vcombine.low %v10492_v14, %v10534_v61  ;;  %v15545_v7 = vcombine.high %v10492_v14, %v10534_v61  ;;  %v10598_v20 = vor.u32 %v10597_v33, %v10594_v16  ;;  %v24631_v23 = vld [vmem:[#allocation35_spill] sm:$0xff]  ;;  %v18047_v51 = vld [vmem:[%s24308_s5 + $0x980] sm:$0xff]   ;;  %16900 = vmatprep.subr.bf16.mxu1 %v18050_v46  ;;  %v18049_v14 = vld [vmem:[%s24308_s5 + $0x9c8] sm:$0xff]  }
 0x55b   : > { %v16287_v15 = vadd.f32 %v24631_v23, %v24630_v5  ;;  %v18054_v0 = vld [vmem:[%s24308_s5 + $0x960] sm:$0xff]   ;;  %v10557_v50 = vrot.slane %v10556_v40, 4  ;;  %v22727_v33 = vadd.f32 %v16321_v8, %v22632_v36  ;;  %v10295_v16 = vrot.slane %v22331_v59, 2  ;;  %v24637_v10 = vld [vmem:[#allocation38_spill] sm:$0xff] }
 0x55c   : > { %v22721_v42 = vpop.f32.mrb[68].mxu1  ;;  %v22724_v39 = vadd.f32 %v16284_v48, %v22436_v60  ;;  %11333 = vmatprep.mubr.bf16.mxu0 %v15545_v7  ;;  %v10599_v43 = vrot.slane %v10598_v20, 4  ;;  %v10297_v60 = vrot.slane %v22341_v25, 2  ;;  %v10298_v61 = vrot.slane %v24623_v37, 2  ;;  %v24636_v40 = vld [vmem:[#allocation37_spill] sm:$0xff] }
 0x55d   : > { %24632 = vst [vmem:[#allocation16_spill] sm:$0xff] %v22721_v42  ;;  %v22733_v46 = vpop.f32.mrb[69].mxu1  ;;  %v22736_v56 = vadd.f32 %v16287_v15, %v22439_v6  ;;  %v10562_v59 = vsel %vm21618_vm5, %v10557_v50, %v10561_v35  ;;  %11334 = vmatmul.mubr.bf16.vlgmr.msra.gmra.mrb[160].mxu0 %v15544_v1  ;;  %v10283_v2 = vrot.slane %v24636_v40, 1  ;;  %v10284_v8 = vrot.slane %v24637_v10, 1  ;;  %16901 = vmatpush3.bf16.msra.mxu1 %v18052_v55  ;;  %v18056_v28 = vld [vmem:[%s24308_s5 + $0x920] sm:$0xff]   ;;  %v18051_v55 = vld [vmem:[%s24308_s5 + $0x988] sm:$0xff]  }
 0x55e   : > { %24633 = vst [vmem:[#allocation17_spill] sm:$0xff] %v22733_v46  ;;  %v22740_v48 = vpop.f32.mrb[76].mxu0  ;;  %v22742_v36 = vpop.f32.mrb[70].mxu1  ;;  %v10604_v7 = vsel %vm21618_vm5, %v10599_v43, %v10603_v49  ;;  %v15506_v35 = vcombine.low %v10295_v16, %v10296_v9  ;;  %v15509_v1 = vcombine.high %v10295_v16, %v10296_v9  ;;  %16935 = vmatpush3.bf16.msra.mxu0 %v18047_v51  ;;  %v10285_v37 = vrot.slane %v22445_v54, 1  ;;  %v18053_v49 = vld [vmem:[%s24308_s5 + $0x9d0] sm:$0xff]   ;;  %v18058_v51 = vld [vmem:[%s24308_s5 + $0x968] sm:$0xff]  }
 0x55f   : > { %24634 = vst [vmem:[#allocation18_spill] sm:$0xff] %v22740_v48  ;;  %24635 = vst [vmem:[#allocation35_spill] sm:$0xff] %v22742_v36  ;;  %v22752_v25 = vpop.f32.mrb[77].mxu0  ;;  %v22754_v6 = vpop.f32.mrb[71].mxu1  ;;  %16902 = vmatprep.subr.bf16.mxu1 %v18054_v0  ;;  %v15549_v5 = vcombine.high %v10562_v59, %v10604_v7  ;;  %v15512_v23 = vcombine.low %v10297_v60, %v10298_v61  ;;  %v15515_v15 = vcombine.high %v10297_v60, %v10298_v61  ;;  %v18060_v61 = vld [vmem:[%s24308_s5 + $0x928] sm:$0xff]  }
 0x560   : > { %24638 = vst [vmem:[#allocation37_spill] sm:$0xff] %v22752_v25  ;;  %24639 = vst [vmem:[#allocation38_spill] sm:$0xff] %v22754_v6  ;;  %v22762_v20 = vpop.f32.mrb[78].mxu0  ;;  %v15548_v50 = vcombine.low %v10562_v59, %v10604_v7  ;;  %16936 = vmatprep.subr.bf16.mxu0 %v18049_v14  ;;  %v10564_v43 = vshrl.u32 %v15506_v35, 16  ;;  %v10567_v9 = vshll.u32 %v15506_v35, 16  ;;  %v10573_v0 = vshll.u32 %v15509_v1, 16 }
 0x561   : > { %24640 = vst [vmem:[#allocation53_spill] sm:$0xff] %v22762_v20  ;;  %v22770_v16 = vpop.f32.mrb[79].mxu0  ;;  %v24642_v6 = vld [vmem:[#allocation23_spill] sm:$0xff]  ;;  %11276 = vmatprep.mubr.bf16.mxu1 %v15549_v5  ;;  %v10606_v46 = vshrl.u32 %v15512_v23, 16  ;;  %v10609_v60 = vshll.u32 %v15512_v23, 16  ;;  %v10615_v59 = vshll.u32 %v15515_v15, 16  ;;  %v15517_v14 = vcombine.low %v10283_v2, %v10284_v8  ;;  %16903 = vmatpush3.bf16.msra.mxu1 %v18056_v28 }
 0x562   : > { %24641 = vst [vmem:[#allocation54_spill] sm:$0xff] %v22770_v16  ;;  %v10286_v36 = vrot.slane %v24642_v6, 1  ;;  %v10566_v7 = vrot.slane %v10564_v43, 4  ;;  %v10569_v42 = vrot.slane %v10567_v9, 5  ;;  %v10575_v20 = vrot.slane %v10573_v0, 5  ;;  %11277 = vmatmul.mubr.bf16.gmra.mrb[148].mxu1 %v15548_v50  ;;  %16937 = vmatpush3.bf16.msra.mxu0 %v18051_v55  ;;  %v18055_v35 = vld [vmem:[%s24308_s5 + $0x990] sm:$0xff]  }
 0x563   : > { %v15520_v16 = vcombine.high %v10283_v2, %v10284_v8  ;;  %v18062_v1 = vld [vmem:[%s24308_s5 + $0x970] sm:$0xff]   ;;  %v10608_v28 = vrot.slane %v10606_v46, 4  ;;  %v10611_v23 = vrot.slane %v10609_v60, 5  ;;  %v10617_v15 = vrot.slane %v10615_v59, 5  ;;  %16938 = vmatprep.subr.bf16.mxu0 %v18053_v49  ;;  %v18057_v2 = vld [vmem:[%s24308_s5 + $0x9d8] sm:$0xff]   ;;  %16904 = vmatprep.subr.bf16.mxu1 %v18058_v51 }
 0x564   : > { %v22782_v5 = vpop.f32.mrb[72].mxu1  ;;  %v15523_v25 = vcombine.low %v10285_v37, %v10286_v36  ;;  %v10570_v55 = vor.u32 %v10569_v42, %v10566_v7  ;;  %v15526_v50 = vcombine.high %v10285_v37, %v10286_v36  ;;  %v10634_v43 = vshrl.u32 %v15517_v14, 16  ;;  %v18059_v0 = vld [vmem:[%s24308_s5 + $0x998] sm:$0xff]   ;;  %v18064_v42 = vld [vmem:[%s24308_s5 + $0x930] sm:$0xff]  }
 0x565   : > { %24643 = vst [vmem:[#allocation23_spill] sm:$0xff] %v22782_v5  ;;  %v22787_v8 = vpop.f32.mrb[73].mxu1  ;;  %v10637_v9 = vshll.u32 %v15517_v14, 16  ;;  %v10612_v49 = vor.u32 %v10611_v23, %v10608_v28  ;;  %v10643_v59 = vshll.u32 %v15520_v16, 16  ;;  %16905 = vmatpush3.bf16.msra.mxu1 %v18060_v61  ;;  %v18066_v16 = vld [vmem:[%s24308_s5 + $0x978] sm:$0xff]  }
 0x566   : > { %24644 = vst [vmem:[#allocation55_spill] sm:$0xff] %v22787_v8  ;;  %v22792_v46 = vpop.f32.mrb[80].mxu0  ;;  %v22794_v60 = vpop.f32.mrb[74].mxu1  ;;  %v10676_v5 = vshrl.u32 %v15523_v25, 16  ;;  %v10679_v48 = vshll.u32 %v15523_v25, 16  ;;  %v10571_v51 = vrot.slane %v10570_v55, 4  ;;  %16939 = vmatpush3.bf16.msra.mxu0 %v18055_v35  ;;  %16906 = vmatprep.subr.bf16.mxu1 %v18062_v1 }
 0x567   : > { %24645 = vst [vmem:[#allocation56_spill] sm:$0xff] %v22794_v60  ;;  %v22799_v36 = vpop.f32.mrb[81].mxu0  ;;  %v22801_v37 = vpop.f32.mrb[75].mxu1  ;;  %v10636_v14 = vrot.slane %v10634_v43, 4  ;;  %v10639_v7 = vrot.slane %v10637_v9, 5  ;;  %v10685_v8 = vshll.u32 %v15526_v50, 16  ;;  %16940 = vmatprep.subr.bf16.mxu0 %v18057_v2 }
 0x568   : > { %24646 = vst [vmem:[#allocation57_spill] sm:$0xff] %v22801_v37  ;;  %v22806_v25 = vpop.f32.mrb[82].mxu0  ;;  %v10613_v61 = vrot.slane %v10612_v49, 4  ;;  %v10645_v28 = vrot.slane %v10643_v59, 5  ;;  %v10678_v23 = vrot.slane %v10676_v5, 4  ;;  %v10681_v60 = vrot.slane %v10679_v48, 5 }
 0x569   : > { %24647 = vst [vmem:[#allocation58_spill] sm:$0xff] %v22806_v25  ;;  %v18061_v55 = vld [vmem:[%s24308_s5 + $0x9e0] sm:$0xff]   ;;  %v22811_v43 = vpop.f32.mrb[83].mxu0  ;;  %v10576_v35 = vsel %vm21618_vm5, %v10571_v51, %v10575_v20  ;;  %v10640_v1 = vor.u32 %v10639_v7, %v10636_v14  ;;  %v10687_v50 = vrot.slane %v10685_v8, 5  ;;  %v24649_v48 = vld [vmem:[#allocation36_spill] sm:$0xff]  ;;  %v16327_v25 = vadd.f32 %v22534_v4, %v22529_v41  ;;  %16907 = vmatpush3.bf16.msra.mxu1 %v18064_v42  ;;  %v24652_v7 = vld [vmem:[#allocation26_spill] sm:$0xff] }
 0x56a   : > { %v24648_v9 = vld [vmem:[#allocation41_spill] sm:$0xff]  ;;  %v10618_v49 = vsel %vm21618_vm5, %v10613_v61, %v10617_v15  ;;  %v10682_v5 = vor.u32 %v10681_v60, %v10678_v23  ;;  %v24650_v2 = vld [vmem:[#allocation24_spill] sm:$0xff]  ;;  %16941 = vmatpush3.bf16.msra.mxu0 %v18059_v0  ;;  %16908 = vmatprep.subr.bf16.mxu1 %v18066_v16 }
 0x56b   : > { %v16324_v37 = vadd.f32 %v22522_v30, %v24648_v9  ;;  %v16290_v59 = vadd.f32 %v24650_v2, %v24649_v48  ;;  %v18068_v20 = vld [vmem:[%s24308_s5 + $0x938] sm:$0xff]   ;;  %v15551_v51 = vcombine.high %v10576_v35, %v10618_v49  ;;  %v10641_v8 = vrot.slane %v10640_v1, 4  ;;  %v24651_v30 = vld [vmem:[#allocation25_spill] sm:$0xff]  ;;  %16942 = vmatprep.subr.bf16.mxu0 %v18061_v55 }
 0x56c   : > { %v16293_v15 = vadd.f32 %v24652_v7, %v24651_v30  ;;  %v18063_v60 = vld [vmem:[%s24308_s5 + $0x9a0] sm:$0xff]   ;;  %v22834_v41 = vpop.f32.mrb[76].mxu1  ;;  %v10683_v4 = vrot.slane %v10682_v5, 4  ;;  %v22838_v61 = vadd.f32 %v16327_v25, %v22736_v56  ;;  %v15550_v23 = vcombine.low %v10576_v35, %v10618_v49 }
 0x56d   : > { %v22827_v14 = vadd.f32 %v16324_v37, %v22724_v39  ;;  %v6160_v42 = vadd.f32 %v16290_v59, %v22548_v3  ;;  %v18065_v39 = vld [vmem:[%s24308_s5 + $0x9e8] sm:$0xff]   ;;  %v22843_v0 = vpop.f32.mrb[77].mxu1  ;;  %11341 = vmatprep.mubr.bf16.mxu0 %v15551_v51  ;;  %v10646_v37 = vsel %vm21618_vm5, %v10641_v8, %v10645_v28  ;;  %v10299_v1 = vrot.slane %v24636_v40, 2  ;;  %v18071_v56 = vld [vmem:[%s24308_s5 + $0xa40] sm:$0xff]   ;;  %16909 = vmatpush3.bf16.msra.mxu1 %v18068_v20 }
 0x56e   : > { %v6163_v16 = vadd.f32 %v16293_v15, %v22567_v19  ;;  %v10300_v3 = vrot.slane %v24637_v10, 2  ;;  %v22853_v25 = vpop.f32.mrb[84].mxu0  ;;  %v22855_v55 = vpop.f32.mrb[78].mxu1  ;;  %v10688_v35 = vsel %vm21618_vm5, %v10683_v4, %v10687_v50  ;;  %11342 = vmatmul.mubr.bf16.gmra.mrb[164].mxu0 %v15550_v23  ;;  %v10301_v28 = vrot.slane %v22445_v54, 2  ;;  %v18067_v50 = vld [vmem:[%s24308_s5 + $0x9a8] sm:$0xff]   ;;  %v24653_v15 = vld [vmem:[#allocation39_spill] sm:$0xff]  ;;  %16974 = vmatprep.subr.bf16.mxu1 %v18071_v56 }
 0x56f   : > { %v10302_v19 = vrot.slane %v24642_v6, 2  ;;  %v16330_v40 = vadd.f32 %v22570_v52, %v22562_v13  ;;  %v22863_v10 = vpop.f32.mrb[85].mxu0  ;;  %v22865_v9 = vpop.f32.mrb[79].mxu1  ;;  %v15555_v49 = vcombine.high %v10646_v37, %v10688_v35  ;;  %v15554_v2 = vcombine.low %v10646_v37, %v10688_v35  ;;  %16943 = vmatpush3.bf16.msra.mxu0 %v18063_v60  ;;  %v18069_v52 = vld [vmem:[%s24308_s5 + $0x9f0] sm:$0xff]   ;;  %v24654_v60 = vld [vmem:[#allocation40_spill] sm:$0xff] }
 0x570   : > { %v15518_v5 = vcombine.low %v10299_v1, %v10300_v3  ;;  %v15521_v48 = vcombine.high %v10299_v1, %v10300_v3  ;;  %v22870_v54 = vpop.f32.mrb[86].mxu0  ;;  %v16333_v13 = vadd.f32 %v22581_v47, %v22576_v18  ;;  %16944 = vmatprep.subr.bf16.mxu0 %v18065_v39  ;;  %v16352_v4 = vadd.f32 %v24654_v60, %v24653_v15  ;;  %v18070_v35 = vld [vmem:[%s24308_s5 + $0x9b0] sm:$0xff]  }
 0x571   : > { %v15524_v6 = vcombine.low %v10301_v28, %v10302_v19  ;;  %v15527_v59 = vcombine.high %v10301_v28, %v10302_v19  ;;  %v22872_v51 = vadd.f32 %v16330_v40, %v6160_v42  ;;  %v22879_v20 = vpop.f32.mrb[87].mxu0  ;;  %11284 = vmatprep.mubr.bf16.mxu1 %v15555_v49  ;;  %v24655_v49 = vld [vmem:[#allocation42_spill] sm:$0xff]  ;;  %v10303_v15 = vrot.slane %v22614_v29, 2 }
 0x572   : > { %v10648_v8 = vshrl.u32 %v15518_v5, 16  ;;  %v10651_v30 = vshll.u32 %v15518_v5, 16  ;;  %v10657_v7 = vshll.u32 %v15521_v48, 16  ;;  %11285 = vmatmul.mubr.bf16.gmra.mrb[152].mxu1 %v15554_v2  ;;  %v22883_v18 = vadd.f32 %v16333_v13, %v6163_v16  ;;  %v24656_v5 = vld [vmem:[#allocation31_spill] sm:$0xff]  ;;  %v18073_v16 = vld [vmem:[%s24308_s5 + $0x9f8] sm:$0xff]  }
 0x573   : > { %v10690_v42 = vshrl.u32 %v15524_v6, 16  ;;  %v10693_v23 = vshll.u32 %v15524_v6, 16  ;;  %v10699_v37 = vshll.u32 %v15527_v59, 16  ;;  %v6650_v3 = vadd.f32 %v16352_v4, %v22591_v53  ;;  %16945 = vmatpush3.bf16.msra.mxu0 %v18067_v50 }
 0x574   : > { %v10650_v47 = vrot.slane %v10648_v8, 4  ;;  %v10653_v39 = vrot.slane %v10651_v30, 5  ;;  %v10659_v1 = vrot.slane %v10657_v7, 5  ;;  %v22889_v28 = vpop.f32.mrb[80].mxu1  ;;  %v16355_v48 = vadd.f32 %v24656_v5, %v24655_v49  ;;  %16946 = vmatprep.subr.bf16.mxu0 %v18069_v52 }
 0x575   : > { %v10692_v19 = vrot.slane %v10690_v42, 4  ;;  %v10695_v56 = vrot.slane %v10693_v23, 5  ;;  %v10701_v40 = vrot.slane %v10699_v37, 5  ;;  %v22896_v2 = vpop.f32.mrb[81].mxu1  ;;  %v10287_v50 = vrot.slane %v22614_v29, 1 }
 0x576   : > { %v10654_v53 = vor.u32 %v10653_v39, %v10650_v47  ;;  %v16392_v6 = vadd.f32 %v22603_v32, %v22599_v58  ;;  %v16358_v59 = vadd.f32 %v22557_v44, %v22550_v38  ;;  %v22903_v13 = vpop.f32.mrb[88].mxu0  ;;  %v22905_v8 = vpop.f32.mrb[82].mxu1  ;;  %v6653_v30 = vadd.f32 %v16355_v48, %v22624_v21  ;;  %v18074_v44 = vld [vmem:[%s24308_s5 + $0x9b8] sm:$0xff]   ;;  %v18077_v47 = vld [vmem:[%s24308_s5 + $0xac0] sm:$0xff]  }
 0x577   : > { %v10696_v52 = vor.u32 %v10695_v56, %v10692_v19  ;;  %v16395_v7 = vadd.f32 %v22622_v27, %v22612_v22  ;;  %v22911_v60 = vpop.f32.mrb[89].mxu0  ;;  %v22913_v4 = vpop.f32.mrb[83].mxu1  ;;  %v15529_v32 = vcombine.low %v10287_v50, %v10287_v50  ;;  %v15532_v42 = vcombine.high %v10287_v50, %v10287_v50  ;;  %16947 = vmatpush3.bf16.msra.mxu0 %v18070_v35 }
 0x578   : > { %v10655_v58 = vrot.slane %v10654_v53, 4  ;;  %v22915_v38 = vadd.f32 %v16392_v6, %v6650_v3  ;;  %v22920_v21 = vpop.f32.mrb[90].mxu0  ;;  %v6658_v22 = vadd.f32 %v16358_v59, %v22702_v12  ;;  %v15530_v37 = vcombine.low %v10303_v15, %v10303_v15  ;;  %16948 = vmatprep.subr.bf16.mxu0 %v18073_v16 }
 0x579   : > { %v10697_v23 = vrot.slane %v10696_v52, 4  ;;  %v22923_v27 = vadd.f32 %v16395_v7, %v6653_v30  ;;  %v22928_v39 = vpop.f32.mrb[91].mxu0  ;;  %v10718_v35 = vshrl.u32 %v15529_v32, 16  ;;  %v10721_v19 = vshll.u32 %v15529_v32, 16 }
 0x57a   : > { %v10660_v3 = vsel %vm21618_vm5, %v10655_v58, %v10659_v1  ;;  %v10727_v56 = vshll.u32 %v15532_v42, 16  ;;  %v15533_v12 = vcombine.high %v10303_v15, %v10303_v15  ;;  %v10732_v5 = vshrl.u32 %v15530_v37, 16 }
 0x57b   : > { %v10702_v49 = vsel %vm21618_vm5, %v10697_v23, %v10701_v40  ;;  %v10735_v48 = vshll.u32 %v15530_v37, 16  ;;  %v10720_v16 = vrot.slane %v10718_v35, 4  ;;  %v10723_v50 = vrot.slane %v10721_v19, 5  ;;  %16949 = vmatpush3.bf16.msra.mxu0 %v18074_v44  ;;  %v24659_v19 = vld [vmem:[#allocation48_spill] sm:$0xff] }
 0x57c   : > { %v15557_v53 = vcombine.high %v10660_v3, %v10702_v49  ;;  %v22934_v6 = vpop.f32.mrb[84].mxu1  ;;  %v15556_v59 = vcombine.low %v10660_v3, %v10702_v49  ;;  %v10734_v52 = vrot.slane %v10732_v5, 4  ;;  %v10741_v7 = vshll.u32 %v15533_v12, 16  ;;  %17014 = vmatprep.subr.bf16.mxu0 %v18077_v47  ;;  %v22946_v3 = vld [vmem:[#allocation3 + $0x38] sm:$0xff]  ;;  %v24658_v47 = vld [vmem:[#allocation32_spill] sm:$0xff] }
 0x57d   : > { %v10737_v30 = vrot.slane %v10735_v48, 5  ;;  %v22936_v1 = vpop.f32.mrb[85].mxu1  ;;  %v10724_v58 = vor.u32 %v10723_v50, %v10720_v16  ;;  %v10729_v32 = vrot.slane %v10727_v56, 5  ;;  %v16361_v40 = vadd.f32 %v22572_v63, %v22564_v24  ;;  %24657 = vst [vmem:[#allocation41_spill] sm:$0xff] %v22946_v3  ;;  %v24660_v56 = vld [vmem:[#allocation49_spill] sm:$0xff] }
 0x57e   : > { %11349 = vmatprep.mubr.bf16.mxu0 %v15557_v53  ;;  %v16398_v15 = vadd.f32 %v22653_v26, %v22645_v17  ;;  %v22942_v42 = vpop.f32.mrb[92].mxu0  ;;  %v22944_v44 = vpop.f32.mrb[86].mxu1  ;;  %v10743_v37 = vrot.slane %v10741_v7, 5  ;;  %v16364_v35 = vadd.f32 %v24658_v47, %v22593_v34  ;;  %v16401_v49 = vadd.f32 %v24660_v56, %v24659_v19  ;;  %v24663_v50 = vld [vmem:[#allocation33_spill] sm:$0xff] }
 0x57f   : > { %11350 = vmatmul.mubr.bf16.gmra.mrb[168].mxu0 %v15556_v59  ;;  %v10738_v23 = vor.u32 %v10737_v30, %v10734_v52  ;;  %v22952_v12 = vpop.f32.mrb[93].mxu0  ;;  %v22954_v24 = vpop.f32.mrb[87].mxu1  ;;  %v10725_v63 = vrot.slane %v10724_v58, 4  ;;  %v6661_v17 = vadd.f32 %v16361_v40, %v22727_v33  ;;  %v11496_v5 = vshrl.u32 %v22614_v29, 16  ;;  %v24664_v59 = vld [vmem:[#allocation34_spill] sm:$0xff]  ;;  %v22976_v56 = vld [vmem:[#allocation3 + $0x30] sm:$0xff] }
 0x580   : > { %24661 = vst [vmem:[#allocation36_spill] sm:$0xff] %v22954_v24  ;;  %v22957_v26 = vadd.f32 %v16398_v15, %v6658_v22  ;;  %v22960_v48 = vpop.f32.mrb[94].mxu0  ;;  %v6666_v16 = vadd.f32 %v16364_v35, %v22827_v14  ;;  %v11499_v34 = vshll.u32 %v22614_v29, 16  ;;  %v16367_v52 = vadd.f32 %v24664_v59, %v24663_v50  ;;  %24666 = vst [vmem:[#allocation26_spill] sm:$0xff] %v22976_v56 }
 0x581   : > { %v10739_v53 = vrot.slane %v10738_v23, 4  ;;  %v22966_v30 = vpop.f32.mrb[95].mxu0  ;;  %v10730_v7 = vsel %vm21618_vm5, %v10725_v63, %v10729_v32  ;;  %v22970_v33 = vadd.f32 %v16401_v49, %v6661_v17  ;;  %v11498_v22 = vrot.slane %v11496_v5, 1  ;;  %v24671_v5 = vld [vmem:[#allocation45_spill] sm:$0xff] }
 0x582   : > { %24662 = vst [vmem:[#allocation24_spill] sm:$0xff] %v22957_v26  ;;  %v11544_v58 = vshrl.u32 %v22946_v3, 16  ;;  %v15561_v40 = vcombine.high %v10730_v7, %v10730_v7  ;;  %v15560_v15 = vcombine.low %v10730_v7, %v10730_v7  ;;  %v11501_v23 = vrot.slane %v11499_v34, 2  ;;  %v24674_v7 = vld [vmem:[#allocation43_spill] sm:$0xff]  ;;  %v24688_v26 = vld [vmem:[#allocation54_spill] sm:$0xff] }
 0x583   : > { %24665 = vst [vmem:[#allocation25_spill] sm:$0xff] %v22970_v33  ;;  %v10744_v14 = vsel %vm21618_vm5, %v10739_v53, %v10743_v37  ;;  %v6669_v19 = vadd.f32 %v16367_v52, %v22838_v61  ;;  %v11547_v49 = vshll.u32 %v22946_v3, 16  ;;  %v22985_v37 = vld [vmem:[#allocation3 + $0x48] sm:$0xff]  ;;  %v16404_v17 = vadd.f32 %v22688_v31, %v22681_v45  ;;  %v24676_v45 = vld [vmem:[#allocation46_spill] sm:$0xff]  ;;  %v24677_v31 = vld [vmem:[#allocation47_spill] sm:$0xff] }
 0x584   : > { %v15563_v47 = vcombine.high %v10744_v14, %v10744_v14  ;;  %v15562_v35 = vcombine.low %v10744_v14, %v10744_v14  ;;  %v22978_v50 = vpop.f32.mrb[88].mxu1  ;;  %11292 = vmatprep.mubr.bf16.mxu1 %v15561_v40  ;;  %v22980_v32 = vor.u32 %v11501_v23, %v11498_v22  ;;  %v11546_v62 = vrot.slane %v11544_v58, 1  ;;  %24669 = vst [vmem:[#allocation42_spill] sm:$0xff] %v22985_v37  ;;  %v24670_v61 = vld [vmem:[#allocation44_spill] sm:$0xff]  ;;  %v23000_v40 = vld [vmem:[#allocation3 + $0x58] sm:$0xff]  ;;  %v24687_v33 = vld [vmem:[#allocation53_spill] sm:$0xff] }
 0x585   : > { %24667 = vst [vmem:[#allocation39_spill] sm:$0xff] %v22978_v50  ;;  %v22983_v63 = vpop.f32.mrb[89].mxu1  ;;  %11293 = vmatmul.mubr.bf16.gmra.mrb[156].mxu1 %v15560_v15  ;;  %v16370_v53 = vadd.f32 %v24671_v5, %v24670_v61  ;;  %v16407_v34 = vadd.f32 %v22699_v57, %v22697_v11  ;;  %v11549_v58 = vrot.slane %v11547_v49, 2  ;;  %24675 = vst [vmem:[#allocation48_spill] sm:$0xff] %v23000_v40  ;;  %v11536_v14 = vshrl.u32 %v22976_v56, 16  ;;  %v23045_v50 = vld [vmem:[#allocation3 + $0x50] sm:$0xff] }
 0x586   : > { %24668 = vst [vmem:[#allocation40_spill] sm:$0xff] %v22983_v63  ;;  %11357 = vmatprep.mubr.bf16.mxu0 %v15563_v47  ;;  %v22993_v59 = vpop.f32.mrb[96].mxu0  ;;  %v22995_v52 = vpop.f32.mrb[90].mxu1  ;;  %12063 = vmatprep.mubr.bf16.mxu1 %v24674_v7  ;;  %v15711_v22 = vcombine.low %v22980_v32, %v22980_v32  ;;  %v16373_v15 = vadd.f32 %v24677_v31, %v24676_v45  ;;  %v11539_v61 = vshll.u32 %v22976_v56, 16  ;;  %v11560_v45 = vshrl.u32 %v22985_v37, 16 }
 0x587   : > { %24672 = vst [vmem:[#allocation31_spill] sm:$0xff] %v22993_v59  ;;  %24673 = vst [vmem:[#allocation32_spill] sm:$0xff] %v22995_v52  ;;  %11358 = vmatmul.mubr.bf16.gmra.mrb[172].mxu0 %v15562_v35  ;;  %v23005_v23 = vpop.f32.mrb[97].mxu0  ;;  %v23007_v11 = vpop.f32.mrb[91].mxu1  ;;  %v23009_v57 = vadd.f32 %v16404_v17, %v6666_v16  ;;  %v6674_v47 = vadd.f32 %v16370_v53, %v22872_v51  ;;  %v23012_v35 = vadd.f32 %v16407_v34, %v6669_v19  ;;  %v18072_v51 = vld [vmem:[%s24308_s5 + $0xa00] sm:$0xff]  }
 0x588   : > { %24678 = vst [vmem:[#allocation49_spill] sm:$0xff] %v23005_v23  ;;  %24679 = vst [vmem:[#allocation33_spill] sm:$0xff] %v23007_v11  ;;  %v23015_v49 = vpop.f32.mrb[98].mxu0  ;;  %12128 = vmatprep.mubr.bf16.mxu0 %v15711_v22  ;;  %v6677_v5 = vadd.f32 %v16373_v15, %v22883_v18  ;;  %v11563_v52 = vshll.u32 %v22985_v37, 16  ;;  %v11576_v16 = vshrl.u32 %v23000_v40, 16  ;;  %v11579_v17 = vshll.u32 %v23000_v40, 16 }
 0x589   : > { %24680 = vst [vmem:[#allocation34_spill] sm:$0xff] %v23009_v57  ;;  %24681 = vst [vmem:[#allocation44_spill] sm:$0xff] %v23012_v35  ;;  %v23019_v31 = vpop.f32.mrb[99].mxu0  ;;  %v11550_v19 = vor.u32 %v11549_v58, %v11546_v62  ;;  %v15715_v53 = vcombine.low %v22614_v29, %v22946_v3  ;;  %v18075_v18 = vld [vmem:[%s24308_s5 + $0xa48] sm:$0xff]   ;;  %v23032_v34 = vrot.slane %v11536_v14, 1  ;;  %v23034_v15 = vrot.slane %v11539_v61, 2 }
 0x58a   : > { %24682 = vst [vmem:[#allocation45_spill] sm:$0xff] %v23015_v49  ;;  %24683 = vst [vmem:[#allocation43_spill] sm:$0xff] %v23019_v31  ;;  %v24684_v35 = vld [vmem:[#allocation18_spill] sm:$0xff]  ;;  %v24685_v57 = vld [vmem:[#allocation37_spill] sm:$0xff]  ;;  %v23043_v58 = vrot.slane %v11560_v45, 1  ;;  %v16413_v3 = vadd.f32 %v24688_v26, %v24687_v33  ;;  %v23059_v45 = vrot.slane %v11563_v52, 2 }
 0x58b   : > { %v16410_v11 = vadd.f32 %v24685_v57, %v24684_v35  ;;  %v18079_v62 = vld [vmem:[%s24308_s5 + $0xa80] sm:$0xff]   ;;  %v24689_v14 = vld [vmem:[#allocation15_spill] sm:$0xff]  ;;  %v24690_v31 = vld [vmem:[#allocation50_spill] sm:$0xff]  ;;  %v11581_v24 = vrot.slane %v11579_v17, 2 }
 0x58c   : > { %v23038_v63 = vpop.f32.mrb[92].mxu1  ;;  %v16432_v61 = vadd.f32 %v24690_v31, %v24689_v14  ;;  %v24691_v49 = vld [vmem:[#allocation51_spill] sm:$0xff]  ;;  %v24692_v23 = vld [vmem:[#allocation52_spill] sm:$0xff]  ;;  %v18082_v35 = vld [vmem:[%s24308_s5 + $0xac8] sm:$0xff]   ;;  %v23075_v52 = vadd.f32 %v16413_v3, %v6677_v5  ;;  %v15714_v3 = vcombine.low %v22614_v29, %v22976_v56  ;;  %v15721_v5 = vcombine.low %v22985_v37, %v23000_v40 }
 0x58d   : > { %24686 = vst [vmem:[#allocation46_spill] sm:$0xff] %v23038_v63  ;;  %v16435_v59 = vadd.f32 %v24692_v23, %v24691_v49  ;;  %v23053_v57 = vpop.f32.mrb[93].mxu1  ;;  %12064 = vmatmul.mubr.bf16.vlgmr.msra.gmra.mrb[160].mxu1 %v24674_v7  ;;  %v23061_v63 = vrot.slane %v11576_v16, 1  ;;  %v23063_v26 = vadd.f32 %v16410_v11, %v6674_v47  ;;  %v18076_v7 = vld [vmem:[%s24308_s5 + $0xa08] sm:$0xff]   ;;  %v15717_v23 = vcombine.low %v22980_v32, %v11550_v19  ;;  %v23073_v49 = vld [vmem:[#allocation3 + $0x40] sm:$0xff]  ;;  %v23095_v19 = vld [vmem:[#allocation3 + $0x68] sm:$0xff] }
 0x58e   : > { %24693 = vst [vmem:[#allocation47_spill] sm:$0xff] %v23053_v57  ;;  %v23065_v33 = vpop.f32.mrb[100].mxu0  ;;  %v23067_v31 = vpop.f32.mrb[94].mxu1  ;;  %16975 = vmatpush3.bf16.msra.mxu1 %v18072_v51  ;;  %12071 = vmatprep.mubr.bf16.mxu1 %v15715_v53  ;;  %24697 = vst [vmem:[#allocation54_spill] sm:$0xff] %v23075_v52  ;;  %v18078_v47 = vld [vmem:[%s24308_s5 + $0xa50] sm:$0xff]   ;;  %v23084_v17 = vld [vmem:[#allocation3 + $0x78] sm:$0xff] }
 0x58f   : > { %24694 = vst [vmem:[#allocation18_spill] sm:$0xff] %v23063_v26  ;;  %24695 = vst [vmem:[#allocation37_spill] sm:$0xff] %v23065_v33  ;;  %v23077_v16 = vpop.f32.mrb[101].mxu0  ;;  %v23079_v11 = vpop.f32.mrb[95].mxu1  ;;  %16976 = vmatprep.subr.bf16.mxu1 %v18075_v18  ;;  %12129 = vmatmul.mubr.bf16.vlgmr.msra.gmra.mrb[176].mxu0 %v15711_v22  ;;  %v18084_v22 = vld [vmem:[%s24308_s5 + $0xa88] sm:$0xff]   ;;  %v11568_v53 = vshrl.u32 %v23045_v50, 16  ;;  %v11582_v52 = vor.u32 %v11581_v24, %v23061_v63 }
 0x590   : > { %24696 = vst [vmem:[#allocation53_spill] sm:$0xff] %v23067_v31  ;;  %24698 = vst [vmem:[#allocation15_spill] sm:$0xff] %v23077_v16  ;;  %v23086_v51 = vpop.f32.mrb[102].mxu0  ;;  %12136 = vmatprep.mubr.bf16.mxu0 %v15717_v23  ;;  %17015 = vmatpush3.bf16.msra.mxu0 %v18079_v62  ;;  %v11571_v18 = vshll.u32 %v23045_v50, 16  ;;  %v11542_v62 = vor.u32 %v23034_v15, %v23032_v34  ;;  %v18086_v29 = vld [vmem:[%s24308_s5 + $0xad0] sm:$0xff]   ;;  %v11566_v23 = vor.u32 %v23059_v45, %v23043_v58  ;;  %v18083_v24 = vld [vmem:[%s24308_s5 + $0xa58] sm:$0xff]  }
 0x591   : > { %24699 = vst [vmem:[#allocation50_spill] sm:$0xff] %v23079_v11  ;;  %24700 = vst [vmem:[#allocation51_spill] sm:$0xff] %v23086_v51  ;;  %v23099_v14 = vpop.f32.mrb[103].mxu0  ;;  %17016 = vmatprep.subr.bf16.mxu0 %v18082_v35  ;;  %v11552_v26 = vshrl.u32 %v23073_v49, 16  ;;  %v18080_v11 = vld [vmem:[%s24308_s5 + $0xa10] sm:$0xff]   ;;  %v11555_v35 = vshll.u32 %v23073_v49, 16  ;;  %v16472_v31 = vadd.f32 %v22799_v36, %v22792_v46 }
 0x592   : > { %24701 = vst [vmem:[#allocation52_spill] sm:$0xff] %v23099_v14  ;;  %16977 = vmatpush3.bf16.msra.mxu1 %v18076_v7  ;;  %v11608_v34 = vshrl.u32 %v23084_v17, 16  ;;  %v11611_v15 = vshll.u32 %v23084_v17, 16  ;;  %v11592_v63 = vshrl.u32 %v23095_v19, 16  ;;  %v11595_v58 = vshll.u32 %v23095_v19, 16  ;;  %v24702_v45 = vld [vmem:[#allocation16_spill] sm:$0xff] }
 0x593   : > { %16978 = vmatprep.subr.bf16.mxu1 %v18078_v47  ;;  %v24703_v7 = vld [vmem:[#allocation17_spill] sm:$0xff]  ;;  %v24704_v37 = vld [vmem:[#allocation58_spill] sm:$0xff]  ;;  %v18088_v46 = vld [vmem:[%s24308_s5 + $0xa90] sm:$0xff]   ;;  %v23130_v36 = vrot.slane %v11568_v53, 1  ;;  %v23132_v47 = vrot.slane %v11571_v18, 2  ;;  %v23134_v56 = vadd.f32 %v16472_v31, %v16432_v61  ;;  %v15723_v31 = vcombine.low %v11566_v23, %v11582_v52 }
 0x594   : > { %v16438_v57 = vadd.f32 %v24703_v7, %v24702_v45  ;;  %v16475_v40 = vadd.f32 %v22811_v43, %v24704_v37  ;;  %17017 = vmatpush3.bf16.msra.mxu0 %v18084_v22  ;;  %v24705_v14 = vld [vmem:[#allocation35_spill] sm:$0xff]  ;;  %v24706_v51 = vld [vmem:[#allocation38_spill] sm:$0xff]  ;;  %v23138_v33 = vpop.f32.mrb[96].mxu1  ;;  %v15716_v45 = vcombine.low %v22980_v32, %v11542_v62  ;;  %v18092_v43 = vld [vmem:[%s24308_s5 + $0xad8] sm:$0xff]   ;;  %v11613_v32 = vrot.slane %v11611_v15, 2 }
 0x595   : > { %v16441_v16 = vadd.f32 %v24706_v51, %v24705_v14  ;;  %12072 = vmatmul.mubr.bf16.gmra.mrb[164].mxu1 %v15714_v3  ;;  %17018 = vmatprep.subr.bf16.mxu0 %v18086_v29  ;;  %v23148_v53 = vpop.f32.mrb[97].mxu1  ;;  %v18085_v61 = vld [vmem:[%s24308_s5 + $0xa18] sm:$0xff]   ;;  %v11610_v51 = vrot.slane %v11608_v34, 1  ;;  %v23153_v3 = vld [vmem:[#allocation3 + $0x70] sm:$0xff]  ;;  %v11574_v23 = vor.u32 %v23132_v47, %v23130_v36  ;;  %v11597_v34 = vrot.slane %v11595_v58, 2  ;;  %v23171_v15 = vld [vmem:[#allocation3 + $0x60] sm:$0xff] }
 0x596   : > { %v23144_v37 = vadd.f32 %v16475_v40, %v16435_v59  ;;  %v23146_v22 = vpop.f32.mrb[104].mxu0  ;;  %16979 = vmatpush3.bf16.msra.mxu1 %v18080_v11  ;;  %12079 = vmatprep.mubr.bf16.mxu1 %v15721_v5  ;;  %v23157_v14 = vpop.f32.mrb[98].mxu1  ;;  %v18087_v59 = vld [vmem:[%s24308_s5 + $0xa60] sm:$0xff]   ;;  %v11554_v40 = vrot.slane %v11552_v26, 1  ;;  %v11557_v11 = vrot.slane %v11555_v35, 2  ;;  %v11594_v5 = vrot.slane %v11592_v63, 1 }
 0x597   : > { %v23155_v18 = vpop.f32.mrb[105].mxu0  ;;  %24707 = vst [vmem:[#allocation16_spill] sm:$0xff] %v23157_v14  ;;  %16980 = vmatprep.subr.bf16.mxu1 %v18083_v24  ;;  %12137 = vmatmul.mubr.bf16.gmra.mrb[180].mxu0 %v15716_v45  ;;  %v23164_v52 = vpop.f32.mrb[99].mxu1  ;;  %v18094_v29 = vld [vmem:[%s24308_s5 + $0xa98] sm:$0xff]   ;;  %v16478_v26 = vadd.f32 %v22863_v10, %v22853_v25  ;;  %v24709_v35 = vld [vmem:[#allocation23_spill] sm:$0xff]  ;;  %v11600_v45 = vshrl.u32 %v23153_v3, 16  ;;  %v16481_v58 = vadd.f32 %v22879_v20, %v22870_v54 }
 0x598   : > { %v23162_v62 = vpop.f32.mrb[106].mxu0  ;;  %24708 = vst [vmem:[#allocation17_spill] sm:$0xff] %v23164_v52  ;;  %12144 = vmatprep.mubr.bf16.mxu0 %v15723_v31  ;;  %17019 = vmatpush3.bf16.msra.mxu0 %v18088_v46  ;;  %v24710_v24 = vld [vmem:[#allocation55_spill] sm:$0xff]  ;;  %v18096_v46 = vld [vmem:[%s24308_s5 + $0xae0] sm:$0xff]   ;;  %v11603_v36 = vshll.u32 %v23153_v3, 16  ;;  %v24711_v47 = vld [vmem:[#allocation56_spill] sm:$0xff]  ;;  %v15720_v10 = vcombine.low %v23073_v49, %v23045_v50  ;;  %v11558_v20 = vor.u32 %v11557_v11, %v11554_v40 }
 0x599   : > { %v16444_v63 = vadd.f32 %v24710_v24, %v24709_v35  ;;  %v23177_v7 = vpop.f32.mrb[107].mxu0  ;;  %17020 = vmatprep.subr.bf16.mxu0 %v18092_v43  ;;  %v24712_v31 = vld [vmem:[#allocation57_spill] sm:$0xff]  ;;  %v15727_v35 = vcombine.low %v23095_v19, %v23084_v17  ;;  %v11614_v24 = vor.u32 %v11613_v32, %v11610_v51  ;;  %v23195_v52 = vadd.f32 %v16478_v26, %v16438_v57  ;;  %v18093_v54 = vld [vmem:[%s24308_s5 + $0xa68] sm:$0xff]  }
 0x59a   : > { %v16447_v25 = vadd.f32 %v24712_v31, %v24711_v47  ;;  %16981 = vmatpush3.bf16.msra.mxu1 %v18085_v61  ;;  %v18090_v43 = vld [vmem:[%s24308_s5 + $0xa20] sm:$0xff]   ;;  %v11584_v61 = vshrl.u32 %v23171_v15, 16  ;;  %v11587_v47 = vshll.u32 %v23171_v15, 16  ;;  %v23202_v31 = vadd.f32 %v16481_v58, %v16441_v16  ;;  %v18101_v11 = vld [vmem:[%s24308_s5 + $0xae8] sm:$0xff]   ;;  %v23247_v58 = vld [vmem:[#allocation3] sm:$0xff] }
 0x59b   : > { %16982 = vmatprep.subr.bf16.mxu1 %v18087_v59  ;;  %v11598_v14 = vor.u32 %v11597_v34, %v11594_v5  ;;  %v18098_v51 = vld [vmem:[%s24308_s5 + $0xaa0] sm:$0xff]   ;;  %v16484_v57 = vadd.f32 %v22911_v60, %v22903_v13  ;;  %v16450_v32 = vadd.f32 %v22843_v0, %v22834_v41  ;;  %v16487_v59 = vadd.f32 %v22928_v39, %v22920_v21  ;;  %v18095_v0 = vld [vmem:[%s24308_s5 + $0xa28] sm:$0xff]  }
 0x59c   : > { %17021 = vmatpush3.bf16.msra.mxu0 %v18094_v29  ;;  %v23213_v40 = vpop.f32.mrb[100].mxu1  ;;  %v15722_v16 = vcombine.low %v11558_v20, %v11574_v23  ;;  %v11602_v5 = vrot.slane %v11600_v45, 1  ;;  %v11605_v29 = vrot.slane %v11603_v36, 2  ;;  %v16453_v13 = vadd.f32 %v22865_v9, %v22855_v55  ;;  %v18097_v55 = vld [vmem:[%s24308_s5 + $0xa70] sm:$0xff]   ;;  %v18103_v36 = vld [vmem:[%s24308_s5 + $0xaa8] sm:$0xff]   ;;  %24713 = vst [vmem:[#allocation58_spill] sm:$0xff] %v23247_v58 }
 0x59d   : > { %12080 = vmatmul.mubr.bf16.gmra.mrb[168].mxu1 %v15720_v10  ;;  %17022 = vmatprep.subr.bf16.mxu0 %v18096_v46  ;;  %v23222_v41 = vpop.f32.mrb[101].mxu1  ;;  %v15729_v21 = vcombine.low %v11598_v14, %v11614_v24  ;;  %v23227_v39 = vadd.f32 %v16484_v57, %v16444_v63  ;;  %v23229_v23 = vadd.f32 %v16487_v59, %v16447_v25  ;;  %v11586_v9 = vrot.slane %v11584_v61, 1  ;;  %v24714_v59 = vld [vmem:[#allocation36_spill] sm:$0xff] }
 0x59e   : > { %v23220_v60 = vpop.f32.mrb[108].mxu0  ;;  %16983 = vmatpush3.bf16.msra.mxu1 %v18090_v43  ;;  %12087 = vmatprep.mubr.bf16.mxu1 %v15727_v35  ;;  %v23233_v26 = vpop.f32.mrb[102].mxu1  ;;  %v11589_v46 = vrot.slane %v11587_v47, 2  ;;  %v16490_v45 = vadd.f32 %v22952_v12, %v22942_v42  ;;  %v23250_v25 = vrot.slane %v23247_v58, 3  ;;  %v16493_v10 = vadd.f32 %v22966_v30, %v22960_v48  ;;  %v18105_v35 = vld [vmem:[%s24308_s5 + $0xaf0] sm:$0xff]  }
 0x59f   : > { %v23231_v34 = vpop.f32.mrb[109].mxu0  ;;  %16984 = vmatprep.subr.bf16.mxu1 %v18093_v54  ;;  %12145 = vmatmul.mubr.bf16.gmra.mrb[184].mxu0 %v15722_v16  ;;  %v23242_v63 = vpop.f32.mrb[103].mxu1  ;;  %v16512_v42 = vadd.f32 %v22896_v2, %v22889_v28  ;;  %v11606_v43 = vor.u32 %v11605_v29, %v11602_v5  ;;  %v16515_v54 = vadd.f32 %v22913_v4, %v22905_v8  ;;  %v18100_v48 = vld [vmem:[%s24308_s5 + $0xa30] sm:$0xff]   ;;  %v18102_v8 = vld [vmem:[%s24308_s5 + $0xa78] sm:$0xff]  }
 0x5a0   : > { %v23240_v14 = vpop.f32.mrb[110].mxu0  ;;  %12152 = vmatprep.mubr.bf16.mxu0 %v15729_v21  ;;  %17023 = vmatpush3.bf16.msra.mxu0 %v18098_v51  ;;  %v23261_v24 = vadd.f32 %v16490_v45, %v16450_v32  ;;  %v15713_v28 = vcombine.low %v23250_v25, %v23250_v25  ;;  %v23270_v2 = vadd.f32 %v16493_v10, %v16453_v13  ;;  %v18106_v47 = vld [vmem:[%s24308_s5 + $0xab0] sm:$0xff]   ;;  %v18110_v32 = vld [vmem:[%s24308_s5 + $0xaf8] sm:$0xff]   ;;  %v24716_v13 = vld [vmem:[#allocation49_spill] sm:$0xff] }
 0x5a1   : > { %v23256_v12 = vpop.f32.mrb[111].mxu0  ;;  %17024 = vmatprep.subr.bf16.mxu0 %v18101_v11  ;;  %v7792_v30 = vadd.f32 %v16512_v42, %v23134_v56  ;;  %v15726_v20 = vcombine.low %v23171_v15, %v23153_v3  ;;  %v11590_v4 = vor.u32 %v11589_v46, %v11586_v9  ;;  %v7795_v61 = vadd.f32 %v16515_v54, %v23144_v37  ;;  %v24715_v29 = vld [vmem:[#allocation31_spill] sm:$0xff]  ;;  %v18108_v21 = vld [vmem:[%s24308_s5 + $0xb40] sm:$0xff]   ;;  %v18111_v42 = vld [vmem:[%s24308_s5 + $0xab8] sm:$0xff]  }
 0x5a2   : > { %16985 = vmatpush3.bf16.msra.mxu1 %v18095_v0  ;;  %v16518_v56 = vadd.f32 %v22936_v1, %v22934_v6  ;;  %v16521_v16 = vadd.f32 %v24714_v59, %v22944_v44  ;;  %v23300_v6 = vld [vmem:[#allocation3 + $0x38] sm:$0xff]  ;;  %v23302_v1 = vld [vmem:[#allocation3 + $0x48] sm:$0xff]  ;;  %v23309_v44 = vadd.f32 %v24716_v13, %v24715_v29  ;;  %v24717_v9 = vld [vmem:[#allocation45_spill] sm:$0xff] }
 0x5a3   : > { %16986 = vmatprep.subr.bf16.mxu1 %v18097_v55  ;;  %v23283_v51 = vadd.f32 %v7792_v30, %v22915_v38  ;;  %v15728_v57 = vcombine.low %v11590_v4, %v11606_v43  ;;  %v23291_v37 = vadd.f32 %v7795_v61, %v22923_v27  ;;  %v18104_v38 = vld [vmem:[%s24308_s5 + $0xa38] sm:$0xff]   ;;  %v15877_v5 = vcombine.low %v23300_v6, %v23302_v1  ;;  %v24718_v46 = vld [vmem:[#allocation43_spill] sm:$0xff]  ;;  %v24723_v4 = vld [vmem:[#allocation37_spill] sm:$0xff] }
 0x5a4   : > { %17025 = vmatpush3.bf16.msra.mxu0 %v18103_v36  ;;  %v7800_v27 = vadd.f32 %v16518_v56, %v23195_v52  ;;  %v7803_v55 = vadd.f32 %v16521_v16, %v23202_v31  ;;  %v23319_v45 = vadd.f32 %v24718_v46, %v24717_v9  ;;  %v24719_v52 = vld [vmem:[#allocation41_spill] sm:$0xff]  ;;  %v24720_v43 = vld [vmem:[#allocation24_spill] sm:$0xff]  ;;  %v24724_v61 = vld [vmem:[#allocation15_spill] sm:$0xff] }
 0x5a5   : > { %12088 = vmatmul.mubr.bf16.gmra.mrb[172].mxu1 %v15726_v20  ;;  %17026 = vmatprep.subr.bf16.mxu0 %v18105_v35  ;;  %v11638_v10 = vrot.slane %v24719_v52, 3  ;;  %v18115_v31 = vld [vmem:[%s24308_s5 + $0xbc0] sm:$0xff]   ;;  %v24725_v56 = vld [vmem:[#allocation39_spill] sm:$0xff]  ;;  %v24728_v16 = vld [vmem:[#allocation52_spill] sm:$0xff] }
 0x5a6   : > { %v23295_v11 = vpop.f32.mrb[112].mxu0  ;;  %16987 = vmatpush3.bf16.msra.mxu1 %v18100_v48  ;;  %12193 = vmatprep.mubr.bf16.mxu1 %v15713_v28  ;;  %v23328_v35 = vadd.f32 %v7800_v27, %v24720_v43  ;;  %v24721_v48 = vld [vmem:[#allocation25_spill] sm:$0xff]  ;;  %v24727_v59 = vld [vmem:[#allocation51_spill] sm:$0xff]  ;;  %v24729_v13 = vld [vmem:[#allocation32_spill] sm:$0xff] }
 0x5a7   : > { %v23311_v0 = vpop.f32.mrb[113].mxu0  ;;  %16988 = vmatprep.subr.bf16.mxu1 %v18102_v8  ;;  %12153 = vmatmul.mubr.bf16.gmra.mrb[188].mxu0 %v15728_v57  ;;  %v23336_v30 = vadd.f32 %v7803_v55, %v24721_v48  ;;  %v18109_v20 = vld [vmem:[%s24308_s5 + $0xb00] sm:$0xff]   ;;  %v18112_v8 = vld [vmem:[%s24308_s5 + $0xb48] sm:$0xff]   ;;  %v24726_v57 = vld [vmem:[#allocation40_spill] sm:$0xff]  ;;  %v15719_v27 = vcombine.low %v23250_v25, %v11638_v10 }
 0x5a8   : > { %v23321_v36 = vpop.f32.mrb[114].mxu0  ;;  %17027 = vmatpush3.bf16.msra.mxu0 %v18106_v47  ;;  %12795 = vmatprep.mubr.bf16.mxu0 %v15877_v5  ;;  %v23346_v47 = vadd.f32 %v24724_v61, %v24723_v4  ;;  %v23352_v5 = vadd.f32 %v24728_v16, %v24727_v59  ;;  %v18118_v29 = vld [vmem:[%s24308_s5 + $0xb80] sm:$0xff]   ;;  %v23366_v52 = vld [vmem:[#allocation3 + $0x40] sm:$0xff]  ;;  %v18120_v10 = vld [vmem:[%s24308_s5 + $0xbc8] sm:$0xff]  }
 0x5a9   : > { %v23330_v54 = vpop.f32.mrb[115].mxu0  ;;  %17028 = vmatprep.subr.bf16.mxu0 %v18110_v32  ;;  %24722 = vst [vmem:[#allocation35_spill] sm:$0xff] %v23336_v30  ;;  %v16524_v32 = vadd.f32 %v24726_v57, %v24725_v56  ;;  %v23364_v46 = vld [vmem:[#allocation3 + $0x30] sm:$0xff]  ;;  %v23381_v61 = vld [vmem:[#allocation3 + $0x58] sm:$0xff]  ;;  %v23383_v56 = vld [vmem:[#allocation3 + $0x68] sm:$0xff] }
 0x5aa   : > { %16989 = vmatpush3.bf16.msra.mxu1 %v18104_v38  ;;  %v23354_v38 = vpop.f32.mrb[104].mxu1  ;;  %24731 = vst [vmem:[#allocation38_spill] sm:$0xff] %v23364_v46  ;;  %v15876_v43 = vcombine.low %v23364_v46, %v23366_v52  ;;  %24732 = vst [vmem:[#allocation23_spill] sm:$0xff] %v23381_v61  ;;  %v24733_v59 = vld [vmem:[#allocation26_spill] sm:$0xff] }
 0x5ab   : > { %17054 = vmatprep.subr.bf16.mxu1 %v18108_v21  ;;  %v24730_v21 = vld [vmem:[#allocation33_spill] sm:$0xff]  ;;  %v23362_v9 = vpop.f32.mrb[105].mxu1  ;;  %v11637_v16 = vrot.slane %v24733_v59, 3 }
 0x5ac   : > { %17029 = vmatpush3.bf16.msra.mxu0 %v18111_v42  ;;  %v16527_v55 = vadd.f32 %v24730_v21, %v24729_v13  ;;  %v7808_v42 = vadd.f32 %v16524_v32, %v23227_v39  ;;  %v23376_v4 = vpop.f32.mrb[106].mxu1 }
 0x5ad   : > { %12194 = vmatmul.mubr.bf16.vlgmr.msra.gmra.mrb[176].mxu1 %v15713_v28  ;;  %17094 = vmatprep.subr.bf16.mxu0 %v18115_v31  ;;  %v18113_v28 = vld [vmem:[%s24308_s5 + $0xb08] sm:$0xff]   ;;  %v15883_v31 = vcombine.low %v23381_v61, %v23383_v56  ;;  %v23390_v32 = vpop.f32.mrb[107].mxu1 }
 0x5ae   : > { %v23374_v48 = vpop.f32.mrb[116].mxu0  ;;  %17055 = vmatpush3.bf16.msra.mxu1 %v18109_v20  ;;  %12201 = vmatprep.mubr.bf16.mxu1 %v15719_v27  ;;  %v7811_v57 = vadd.f32 %v16527_v55, %v23229_v23  ;;  %v18117_v20 = vld [vmem:[%s24308_s5 + $0xb50] sm:$0xff]   ;;  %v24734_v27 = vld [vmem:[#allocation34_spill] sm:$0xff]  ;;  %v24736_v23 = vld [vmem:[#allocation48_spill] sm:$0xff] }
 0x5af   : > { %v23388_v39 = vpop.f32.mrb[117].mxu0  ;;  %17056 = vmatprep.subr.bf16.mxu1 %v18112_v8  ;;  %12796 = vmatmul.mubr.bf16.vlgmr.msra.gmra.mrb[192].mxu0 %v15876_v43  ;;  %v23397_v13 = vadd.f32 %v7808_v42, %v24734_v27  ;;  %v11642_v55 = vrot.slane %v24736_v23, 3  ;;  %v18122_v8 = vld [vmem:[%s24308_s5 + $0xb88] sm:$0xff]   ;;  %v24737_v43 = vld [vmem:[#allocation44_spill] sm:$0xff]  ;;  %v18125_v42 = vld [vmem:[%s24308_s5 + $0xbd0] sm:$0xff]   ;;  %v23419_v27 = vadd.f32 %v23155_v18, %v23146_v22 }
 0x5b0   : > { %v23399_v21 = vpop.f32.mrb[118].mxu0  ;;  %12803 = vmatprep.mubr.bf16.mxu0 %v15883_v31  ;;  %17095 = vmatpush3.bf16.msra.mxu0 %v18118_v29  ;;  %v23406_v58 = vadd.f32 %v7811_v57, %v24737_v43  ;;  %v18119_v29 = vld [vmem:[%s24308_s5 + $0xb10] sm:$0xff]   ;;  %v24739_v31 = vld [vmem:[#allocation42_spill] sm:$0xff] }
 0x5b1   : > { %24735 = vst [vmem:[#allocation55_spill] sm:$0xff] %v23397_v13  ;;  %v23408_v30 = vpop.f32.mrb[119].mxu0  ;;  %17096 = vmatprep.subr.bf16.mxu0 %v18120_v10  ;;  %v11640_v59 = vrot.slane %v24739_v31, 3  ;;  %v24740_v57 = vld [vmem:[#allocation46_spill] sm:$0xff]  ;;  %v24741_v23 = vld [vmem:[#allocation47_spill] sm:$0xff]  ;;  %v23425_v10 = vadd.f32 %v23177_v7, %v23162_v62  ;;  %v24742_v13 = vld [vmem:[#allocation53_spill] sm:$0xff] }
 0x5b2   : > { %24738 = vst [vmem:[#allocation56_spill] sm:$0xff] %v23406_v58  ;;  %17057 = vmatpush3.bf16.msra.mxu1 %v18113_v28  ;;  %v16530_v43 = vadd.f32 %v24741_v23, %v24740_v57  ;;  %v15718_v28 = vcombine.low %v23250_v25, %v11637_v16  ;;  %v18121_v58 = vld [vmem:[%s24308_s5 + $0xb58] sm:$0xff]   ;;  %v24743_v31 = vld [vmem:[#allocation50_spill] sm:$0xff]  ;;  %v18128_v22 = vld [vmem:[%s24308_s5 + $0xb90] sm:$0xff]  }
 0x5b3   : > { %17058 = vmatprep.subr.bf16.mxu1 %v18117_v20  ;;  %v16533_v61 = vadd.f32 %v24743_v31, %v24742_v13  ;;  %v15725_v46 = vcombine.low %v11640_v59, %v11642_v55  ;;  %v23437_v62 = vld [vmem:[#allocation3 + $0x50] sm:$0xff]  ;;  %v23439_v7 = vld [vmem:[#allocation3 + $0x60] sm:$0xff]  ;;  %v18130_v20 = vld [vmem:[%s24308_s5 + $0xbd8] sm:$0xff]   ;;  %v11639_v31 = vrot.slane %v23073_v49, 3 }
 0x5b4   : > { %17097 = vmatpush3.bf16.msra.mxu0 %v18122_v8  ;;  %v7816_v18 = vadd.f32 %v16530_v43, %v23261_v24  ;;  %24744 = vst [vmem:[#allocation57_spill] sm:$0xff] %v23437_v62  ;;  %v15882_v25 = vcombine.low %v23437_v62, %v23439_v7  ;;  %v18123_v24 = vld [vmem:[%s24308_s5 + $0xb18] sm:$0xff]   ;;  %v23452_v55 = vld [vmem:[#allocation3 + $0x78] sm:$0xff] }
 0x5b5   : > { %12202 = vmatmul.mubr.bf16.gmra.mrb[180].mxu1 %v15718_v28  ;;  %17098 = vmatprep.subr.bf16.mxu0 %v18125_v42  ;;  %v7819_v16 = vadd.f32 %v16533_v61, %v23270_v2  ;;  %24745 = vst [vmem:[#allocation36_spill] sm:$0xff] %v23452_v55  ;;  %v23454_v8 = vld [vmem:[#allocation3 + $0x88] sm:$0xff]  ;;  %v24747_v59 = vld [vmem:[#allocation18_spill] sm:$0xff]  ;;  %v18127_v2 = vld [vmem:[%s24308_s5 + $0xb60] sm:$0xff]  }
 0x5b6   : > { %v23447_v13 = vpop.f32.mrb[120].mxu0  ;;  %17059 = vmatpush3.bf16.msra.mxu1 %v18119_v29  ;;  %12209 = vmatprep.mubr.bf16.mxu1 %v15725_v46  ;;  %24746 = vst [vmem:[#allocation31_spill] sm:$0xff] %v23454_v8  ;;  %v15889_v42 = vcombine.low %v23452_v55, %v23454_v8  ;;  %v23459_v57 = vadd.f32 %v7816_v18, %v24747_v59  ;;  %v11641_v46 = vrot.slane %v23045_v50, 3  ;;  %v24749_v61 = vld [vmem:[#allocation54_spill] sm:$0xff]  ;;  %v23470_v43 = vpop.f32.mrb[108].mxu1  ;;  %v11646_v18 = vrot.slane %v23084_v17, 3 }
 0x5b7   : > { %v23461_v23 = vpop.f32.mrb[121].mxu0  ;;  %17060 = vmatprep.subr.bf16.mxu1 %v18121_v58  ;;  %12804 = vmatmul.mubr.bf16.gmra.mrb[196].mxu0 %v15882_v25  ;;  %v23468_v29 = vadd.f32 %v7819_v16, %v24749_v61  ;;  %v11644_v58 = vrot.slane %v23095_v19, 3  ;;  %v18132_v25 = vld [vmem:[%s24308_s5 + $0xb98] sm:$0xff]   ;;  %v23480_v50 = vpop.f32.mrb[109].mxu1  ;;  %v23493_v17 = vadd.f32 %v23231_v34, %v23220_v60  ;;  %v23497_v19 = vadd.f32 %v23256_v12, %v23240_v14  ;;  %v18131_v8 = vld [vmem:[%s24308_s5 + $0xb68] sm:$0xff]  }
 0x5b8   : > { %24748 = vst [vmem:[#allocation49_spill] sm:$0xff] %v23459_v57  ;;  %v23472_v28 = vpop.f32.mrb[122].mxu0  ;;  %12811 = vmatprep.mubr.bf16.mxu0 %v15889_v42  ;;  %17099 = vmatpush3.bf16.msra.mxu0 %v18128_v22  ;;  %v18135_v42 = vld [vmem:[%s24308_s5 + $0xbe0] sm:$0xff]   ;;  %v24751_v22 = vld [vmem:[#allocation10_spill] sm:$0xff]  ;;  %v16592_v61 = vadd.f32 %v23148_v53, %v23138_v33  ;;  %v24755_v60 = vld [vmem:[#allocation8_spill] sm:$0xff] }
 0x5b9   : > { %24750 = vst [vmem:[#allocation45_spill] sm:$0xff] %v23468_v29  ;;  %v23482_v16 = vpop.f32.mrb[123].mxu0  ;;  %17100 = vmatprep.subr.bf16.mxu0 %v18130_v20  ;;  %v24752_v59 = vshrl.u32 %v24751_v22, 16  ;;  %24753 = vst [vmem:[#allocation43_spill] sm:$0xff] %v23497_v19  ;;  %v23501_v20 = vpop.f32.mrb[110].mxu1  ;;  %v18129_v29 = vld [vmem:[%s24308_s5 + $0xb20] sm:$0xff]  }
 0x5ba   : > { %17061 = vmatpush3.bf16.msra.mxu1 %v18123_v24  ;;  %v24756_v34 = vshrl.u32 %v24755_v60, 16  ;;  %v24757_v14 = vshll.u32 %v24755_v60, 16  ;;  %v24758_v62 = vld [vmem:[#allocation16_spill] sm:$0xff]  ;;  %v24759_v19 = vld [vmem:[#allocation17_spill] sm:$0xff]  ;;  %v23516_v53 = vpop.f32.mrb[111].mxu1  ;;  %v15724_v24 = vcombine.low %v11639_v31, %v11641_v46  ;;  %v23532_v46 = vld [vmem:[#allocation3 + $0x98] sm:$0xff] }
 0x5bb   : > { %v23489_v49 = vrot.slane %v24752_v59, 1  ;;  %v24754_v59 = vshll.u32 %v24751_v22, 16  ;;  %v16595_v33 = vadd.f32 %v24759_v19, %v24758_v62  ;;  %17062 = vmatprep.subr.bf16.mxu1 %v18127_v2  ;;  %v8958_v22 = vadd.f32 %v16592_v61, %v23309_v44  ;;  %v18138_v60 = vld [vmem:[%s24308_s5 + $0xba0] sm:$0xff]   ;;  %v23528_v19 = vld [vmem:[#allocation3 + $0x80] sm:$0xff]  ;;  %v23534_v44 = vld [vmem:[#allocation3 + $0xa8] sm:$0xff] }
 0x5bc   : > { %v12340_v55 = vrot.slane %v24756_v34, 1  ;;  %v12341_v12 = vrot.slane %v24757_v14, 2  ;;  %17101 = vmatpush3.bf16.msra.mxu0 %v18132_v25  ;;  %v23526_v62 = vld [vmem:[#allocation3 + $0x70] sm:$0xff]  ;;  %v15895_v31 = vcombine.low %v23532_v46, %v23534_v44  ;;  %v18133_v25 = vld [vmem:[%s24308_s5 + $0xb28] sm:$0xff]   ;;  %v12380_v14 = vrot.slane %v23300_v6, 3 }
 0x5bd   : > { %v23508_v57 = vrot.slane %v24754_v59, 2  ;;  %v15731_v59 = vcombine.low %v11644_v58, %v11646_v18  ;;  %v8961_v34 = vadd.f32 %v16595_v33, %v23319_v45  ;;  %12210 = vmatmul.mubr.bf16.gmra.mrb[184].mxu1 %v15724_v24  ;;  %v15888_v2 = vcombine.low %v23526_v62, %v23528_v19  ;;  %17102 = vmatprep.subr.bf16.mxu0 %v18135_v42  ;;  %v18140_v18 = vld [vmem:[%s24308_s5 + $0xbe8] sm:$0xff]   ;;  %v24760_v33 = vld [vmem:[#allocation7_spill] sm:$0xff] }
 0x5be   : > { %v11643_v58 = vrot.slane %v23171_v15, 3  ;;  %v11645_v45 = vrot.slane %v23153_v3, 3  ;;  %17063 = vmatpush3.bf16.msra.mxu1 %v18129_v29  ;;  %v12342_v61 = vor.u32 %v12341_v12, %v12340_v55  ;;  %v16632_v15 = vadd.f32 %v23311_v0, %v23295_v11  ;;  %v18137_v3 = vld [vmem:[%s24308_s5 + $0xb70] sm:$0xff]   ;;  %v23565_v11 = vpop.f32.mrb[124].mxu0  ;;  %v18142_v0 = vld [vmem:[%s24308_s5 + $0xba8] sm:$0xff]  }
 0x5bf   : > { %12217 = vmatprep.mubr.bf16.mxu1 %v15731_v59  ;;  %v12336_v42 = vor.u32 %v23508_v57, %v23489_v49  ;;  %17064 = vmatprep.subr.bf16.mxu1 %v18131_v8  ;;  %v12382_v29 = vrot.slane %v23302_v1, 3  ;;  %v24761_v24 = vshrl.u32 %v24760_v33, 16  ;;  %v24762_v57 = vshll.u32 %v24760_v33, 16  ;;  %v24763_v1 = vld [vmem:[#allocation9_spill] sm:$0xff] }
 0x5c0   : > { %12812 = vmatmul.mubr.bf16.gmra.mrb[200].mxu0 %v15888_v2  ;;  %v16598_v6 = vadd.f32 %v23222_v41, %v23213_v40  ;;  %v24764_v8 = vshrl.u32 %v24763_v1, 16  ;;  %v9023_v12 = vadd.f32 %v16632_v15, %v8958_v22  ;;  %v16635_v2 = vadd.f32 %v23330_v54, %v23321_v36  ;;  %v23578_v40 = vpop.f32.mrb[125].mxu0  ;;  %v18145_v41 = vld [vmem:[%s24308_s5 + $0xbf0] sm:$0xff]  }
 0x5c1   : > { %v23557_v59 = vrot.slane %v24761_v24, 1  ;;  %v23561_v55 = vrot.slane %v24762_v57, 2  ;;  %12819 = vmatprep.mubr.bf16.mxu0 %v15895_v31  ;;  %17103 = vmatpush3.bf16.msra.mxu0 %v18138_v60  ;;  %v16601_v33 = vadd.f32 %v23242_v63, %v23233_v26  ;;  %v24765_v60 = vshll.u32 %v24763_v1, 16  ;;  %v24766_v24 = vld [vmem:[#allocation14_spill] sm:$0xff]  ;;  %v23596_v63 = vpop.f32.mrb[126].mxu0  ;;  %v18139_v15 = vld [vmem:[%s24308_s5 + $0xb30] sm:$0xff]  }
 0x5c2   : > { %v23572_v49 = vrot.slane %v24764_v8, 1  ;;  %17104 = vmatprep.subr.bf16.mxu0 %v18140_v18  ;;  %v24767_v57 = vshrl.u32 %v24766_v24, 16  ;;  %v24768_v36 = vshll.u32 %v24766_v24, 16  ;;  %v8966_v26 = vadd.f32 %v16598_v6, %v23346_v47  ;;  %17065 = vmatpush3.bf16.msra.mxu1 %v18133_v25  ;;  %v18141_v47 = vld [vmem:[%s24308_s5 + $0xb78] sm:$0xff]   ;;  %v23610_v25 = vld [vmem:[#allocation3 + $0x90] sm:$0xff] }
 0x5c3   : > { %v23585_v31 = vrot.slane %v24765_v60, 2  ;;  %v15730_v18 = vcombine.low %v11643_v58, %v11645_v45  ;;  %v23602_v1 = vadd.f32 %v9023_v12, %v23283_v51  ;;  %v9026_v8 = vadd.f32 %v16635_v2, %v8961_v34  ;;  %17066 = vmatprep.subr.bf16.mxu1 %v18137_v3  ;;  %v23612_v58 = vld [vmem:[#allocation3 + $0xa0] sm:$0xff]  ;;  %v24769_v6 = vld [vmem:[#allocation12_spill] sm:$0xff] }
 0x5c4   : > { %v23589_v22 = vrot.slane %v24767_v57, 1  ;;  %v23593_v54 = vrot.slane %v24768_v36, 2  ;;  %v8969_v60 = vadd.f32 %v16601_v33, %v23352_v5  ;;  %v23605_v57 = vpop.f32.mrb[127].mxu0  ;;  %v15879_v24 = vcombine.low %v12336_v42, %v12342_v61  ;;  %v23618_v5 = vpop.f32.mrb[112].mxu1  ;;  %v18146_v42 = vld [vmem:[%s24308_s5 + $0xbb0] sm:$0xff]  }
 0x5c5   : > { %v15894_v45 = vcombine.low %v23610_v25, %v23612_v58  ;;  %v15881_v51 = vcombine.low %v12380_v14, %v12382_v29  ;;  %v24770_v34 = vshrl.u32 %v24769_v6, 16  ;;  %17105 = vmatpush3.bf16.msra.mxu0 %v18142_v0  ;;  %v12333_v61 = vor.u32 %v23561_v55, %v23557_v59  ;;  %v23632_v29 = vpop.f32.mrb[113].mxu1  ;;  %12218 = vmatmul.mubr.bf16.gmra.mrb[188].mxu1 %v15730_v18 }
 0x5c6   : > { %v23626_v3 = vadd.f32 %v9026_v8, %v23291_v37  ;;  %v16638_v2 = vadd.f32 %v23388_v39, %v23374_v48  ;;  %v16604_v14 = vadd.f32 %v23362_v9, %v23354_v38  ;;  %17106 = vmatprep.subr.bf16.mxu0 %v18145_v41  ;;  %v12339_v0 = vor.u32 %v23585_v31, %v23572_v49  ;;  %v18149_v48 = vld [vmem:[%s24308_s5 + $0xbf8] sm:$0xff]   ;;  %v23645_v9 = vpop.f32.mrb[114].mxu1 }
 0x5c7   : > { %v12346_v12 = vrot.slane %v24770_v34, 1  ;;  %v24771_v33 = vshll.u32 %v24769_v6, 16  ;;  %v12354_v37 = vor.u32 %v23593_v54, %v23589_v22  ;;  %v16641_v38 = vadd.f32 %v23408_v30, %v23399_v21  ;;  %17067 = vmatpush3.bf16.msra.mxu1 %v18139_v15  ;;  %12860 = vmatprep.mubr.bf16.mxu1 %v15879_v24  ;;  %v18143_v39 = vld [vmem:[%s24308_s5 + $0xb38] sm:$0xff]   ;;  %v23656_v31 = vpop.f32.mrb[115].mxu1  ;;  %v18147_v30 = vld [vmem:[%s24308_s5 + $0xc40] sm:$0xff]   ;;  %v24772_v22 = vld [vmem:[#allocation11_spill] sm:$0xff] }
 0x5c8   : > { %v12381_v59 = vrot.slane %v23366_v52, 3  ;;  %v9031_v55 = vadd.f32 %v16638_v2, %v8966_v26  ;;  %v23652_v49 = vadd.f32 %v16604_v14, %v23419_v27  ;;  %v16607_v41 = vadd.f32 %v23390_v32, %v23376_v4  ;;  %17068 = vmatprep.subr.bf16.mxu1 %v18141_v47  ;;  %12820 = vmatmul.mubr.bf16.gmra.mrb[204].mxu0 %v15894_v45  ;;  %v18150_v4 = vld [vmem:[%s24308_s5 + $0xbb8] sm:$0xff]   ;;  %v24775_v32 = vld [vmem:[#allocation13_spill] sm:$0xff]  ;;  %v24780_v14 = vld [vmem:[#allocation35_spill] sm:$0xff] }
 0x5c9   : > { %v12347_v36 = vrot.slane %v24771_v33, 2  ;;  %v12386_v21 = vrot.slane %v23383_v56, 3  ;;  %v24773_v54 = vshrl.u32 %v24772_v22, 16  ;;  %v24774_v27 = vshll.u32 %v24772_v22, 16  ;;  %17107 = vmatpush3.bf16.msra.mxu0 %v18146_v42  ;;  %12925 = vmatprep.mubr.bf16.mxu0 %v15881_v51  ;;  %v24778_v51 = vld [vmem:[#allocation38_spill] sm:$0xff]  ;;  %v18153_v34 = vld [vmem:[%s24308_s5 + $0xcc0] sm:$0xff]  }
 0x5ca   : > { %v9034_v18 = vadd.f32 %v16641_v38, %v8969_v60  ;;  %v24776_v15 = vshrl.u32 %v24775_v32, 16  ;;  %v24777_v56 = vshll.u32 %v24775_v32, 16  ;;  %v23682_v47 = vadd.f32 %v9031_v55, %v23328_v35  ;;  %17108 = vmatprep.subr.bf16.mxu0 %v18149_v48  ;;  %v24779_v42 = vld [vmem:[#allocation23_spill] sm:$0xff]  ;;  %v23693_v38 = vpop.f32.mrb[128].mxu0 }
 0x5cb   : > { %v23664_v52 = vrot.slane %v24773_v54, 1  ;;  %v23668_v26 = vrot.slane %v24774_v27, 2  ;;  %v8977_v45 = vadd.f32 %v16607_v41, %v23425_v10  ;;  %v12348_v60 = vor.u32 %v12347_v36, %v12346_v12  ;;  %17069 = vmatpush3.bf16.msra.mxu1 %v18143_v39  ;;  %v18148_v10 = vld [vmem:[%s24308_s5 + $0xc00] sm:$0xff]   ;;  %v24781_v12 = vld [vmem:[#allocation22_spill] sm:$0xff]  ;;  %v23706_v22 = vpop.f32.mrb[129].mxu0  ;;  %v24784_v27 = vld [vmem:[#allocation20_spill] sm:$0xff] }
 0x5cc   : > { %v23675_v8 = vrot.slane %v24776_v15, 1  ;;  %v23679_v24 = vrot.slane %v24777_v56, 2  ;;  %v12379_v6 = vrot.slane %v24778_v51, 3  ;;  %v12384_v2 = vrot.slane %v24779_v42, 3  ;;  %17134 = vmatprep.subr.bf16.mxu1 %v18147_v30  ;;  %v23713_v15 = vpop.f32.mrb[130].mxu0  ;;  %v18155_v56 = vld [vmem:[%s24308_s5 + $0xc80] sm:$0xff]  }
 0x5cd   : > { %v23691_v33 = vadd.f32 %v9034_v18, %v24780_v14  ;;  %v15878_v35 = vcombine.low %v12333_v61, %v12339_v0  ;;  %v24782_v36 = vshrl.u32 %v24781_v12, 16  ;;  %v24783_v55 = vshll.u32 %v24781_v12, 16  ;;  %v18151_v61 = vld [vmem:[%s24308_s5 + $0xc48] sm:$0xff]   ;;  %17109 = vmatpush3.bf16.msra.mxu0 %v18150_v4  ;;  %v23728_v42 = vpop.f32.mrb[131].mxu0 }
 0x5ce   : > { %v15885_v54 = vcombine.low %v12348_v60, %v12354_v37  ;;  %v15880_v0 = vcombine.low %v12379_v6, %v12381_v59  ;;  %v15887_v39 = vcombine.low %v12384_v2, %v12386_v21  ;;  %v24785_v18 = vshrl.u32 %v24784_v27, 16  ;;  %v24787_v21 = vld [vmem:[#allocation21_spill] sm:$0xff]  ;;  %17174 = vmatprep.subr.bf16.mxu0 %v18153_v34  ;;  %v18157_v4 = vld [vmem:[%s24308_s5 + $0xcc8] sm:$0xff]  }
 0x5cf   : > { %v23700_v48 = vrot.slane %v24782_v36, 1  ;;  %v23704_v41 = vrot.slane %v24783_v55, 2  ;;  %v12345_v30 = vor.u32 %v23668_v26, %v23664_v52  ;;  %v12351_v37 = vor.u32 %v23679_v24, %v23675_v8  ;;  %12861 = vmatmul.mubr.bf16.vlgmr.msra.gmra.mrb[192].mxu1 %v15878_v35  ;;  %v18152_v34 = vld [vmem:[%s24308_s5 + $0xc08] sm:$0xff]   ;;  %v24790_v35 = vld [vmem:[#allocation19_spill] sm:$0xff] }
 0x5d0   : > { %v12358_v32 = vrot.slane %v24785_v18, 1  ;;  %v24786_v60 = vshll.u32 %v24784_v27, 16  ;;  %v24788_v51 = vshrl.u32 %v24787_v21, 16  ;;  %v24789_v52 = vshll.u32 %v24787_v21, 16  ;;  %17135 = vmatpush3.bf16.msra.mxu1 %v18148_v10  ;;  %12868 = vmatprep.mubr.bf16.mxu1 %v15885_v54  ;;  %v24797_v21 = vld [vmem:[#allocation43_spill] sm:$0xff] }
 0x5d1   : > { %v16644_v8 = vadd.f32 %v23461_v23, %v23447_v13  ;;  %v16610_v24 = vadd.f32 %v23480_v50, %v23470_v43  ;;  %v16647_v2 = vadd.f32 %v23482_v16, %v23472_v28  ;;  %v12366_v14 = vor.u32 %v23704_v41, %v23700_v48  ;;  %v23752_v50 = vpop.f32.mrb[116].mxu1  ;;  %17136 = vmatprep.subr.bf16.mxu1 %v18151_v61  ;;  %v18154_v28 = vld [vmem:[%s24308_s5 + $0xc50] sm:$0xff]   ;;  %v24793_v16 = vld [vmem:[#allocation30_spill] sm:$0xff] }
 0x5d2   : > { %v12359_v59 = vrot.slane %v24786_v60, 2  ;;  %v23726_v6 = vrot.slane %v24788_v51, 1  ;;  %v12362_v26 = vrot.slane %v24789_v52, 2  ;;  %v24791_v12 = vshrl.u32 %v24790_v35, 16  ;;  %12926 = vmatmul.mubr.bf16.vlgmr.msra.gmra.mrb[208].mxu0 %v15880_v0  ;;  %v23763_v18 = vpop.f32.mrb[117].mxu1  ;;  %v24796_v61 = vld [vmem:[#allocation31_spill] sm:$0xff] }
 0x5d3   : > { %v24792_v13 = vshll.u32 %v24790_v35, 16  ;;  %v16613_v43 = vadd.f32 %v23516_v53, %v23501_v20  ;;  %v24794_v10 = vshrl.u32 %v24793_v16, 16  ;;  %v24795_v55 = vshll.u32 %v24793_v16, 16  ;;  %12933 = vmatprep.mubr.bf16.mxu0 %v15887_v39  ;;  %17175 = vmatpush3.bf16.msra.mxu0 %v18155_v56  ;;  %v18159_v20 = vld [vmem:[%s24308_s5 + $0xc88] sm:$0xff]   ;;  %v23771_v52 = vpop.f32.mrb[118].mxu1  ;;  %v24798_v39 = vld [vmem:[#allocation28_spill] sm:$0xff] }
 0x5d4   : > { %v12355_v36 = vrot.slane %v24791_v12, 1  ;;  %v9039_v54 = vadd.f32 %v16644_v8, %v23652_v49  ;;  %v8982_v27 = vadd.f32 %v16610_v24, %v23493_v17  ;;  %v12385_v53 = vrot.slane %v23439_v7, 3  ;;  %17176 = vmatprep.subr.bf16.mxu0 %v18157_v4  ;;  %v18161_v17 = vld [vmem:[%s24308_s5 + $0xcd0] sm:$0xff]   ;;  %17137 = vmatpush3.bf16.msra.mxu1 %v18152_v34  ;;  %v24804_v16 = vld [vmem:[#allocation56_spill] sm:$0xff] }
 0x5d5   : > { %v12356_v23 = vrot.slane %v24792_v13, 2  ;;  %v12376_v48 = vrot.slane %v24794_v10, 1  ;;  %v12377_v41 = vrot.slane %v24795_v55, 2  ;;  %v12390_v0 = vrot.slane %v24796_v61, 3  ;;  %v24801_v35 = vld [vmem:[#allocation55_spill] sm:$0xff]  ;;  %v24802_v13 = vld [vmem:[#allocation57_spill] sm:$0xff]  ;;  %17138 = vmatprep.subr.bf16.mxu1 %v18154_v28 }
 0x5d6   : > { %v9042_v60 = vadd.f32 %v16647_v2, %v8977_v45  ;;  %v8985_v51 = vadd.f32 %v16613_v43, %v24797_v21  ;;  %v12363_v49 = vor.u32 %v12362_v26, %v23726_v6  ;;  %v24799_v56 = vshrl.u32 %v24798_v39, 16  ;;  %v23784_v45 = vpop.f32.mrb[119].mxu1  ;;  %v18156_v4 = vld [vmem:[%s24308_s5 + $0xc10] sm:$0xff]   ;;  %v24803_v6 = vld [vmem:[#allocation36_spill] sm:$0xff] }
 0x5d7   : > { %v24800_v24 = vshll.u32 %v24798_v39, 16  ;;  %v23782_v12 = vadd.f32 %v9039_v54, %v24801_v35  ;;  %v12360_v2 = vor.u32 %v12359_v59, %v12358_v32  ;;  %v12383_v43 = vrot.slane %v24802_v13, 3  ;;  %v18158_v54 = vld [vmem:[%s24308_s5 + $0xc58] sm:$0xff]   ;;  %v23798_v39 = vpop.f32.mrb[132].mxu0  ;;  %17177 = vmatpush3.bf16.msra.mxu0 %v18159_v20  ;;  %v23820_v20 = vld [vmem:[#allocation3 + $0x78] sm:$0xff] }
 0x5d8   : > { %v12370_v8 = vrot.slane %v24799_v56, 1  ;;  %v12388_v26 = vrot.slane %v24803_v6, 3  ;;  %v23792_v10 = vadd.f32 %v9042_v60, %v24804_v16  ;;  %v15884_v55 = vcombine.low %v12345_v30, %v12351_v37  ;;  %v18163_v60 = vld [vmem:[%s24308_s5 + $0xc90] sm:$0xff]   ;;  %v23805_v37 = vpop.f32.mrb[133].mxu0  ;;  %17178 = vmatprep.subr.bf16.mxu0 %v18161_v17  ;;  %17139 = vmatpush3.bf16.msra.mxu1 %v18156_v4  ;;  %v23842_v4 = vld [vmem:[#allocation3 + $0x68] sm:$0xff]  ;;  %v18169_v6 = vld [vmem:[%s24308_s5 + $0xce0] sm:$0xff]  }
 0x5d9   : > { %v12371_v7 = vrot.slane %v24800_v24, 2  ;;  %v12357_v61 = vor.u32 %v12356_v23, %v12355_v36  ;;  %v12378_v34 = vor.u32 %v12377_v41, %v12376_v48  ;;  %v12389_v21 = vrot.slane %v23528_v19, 3  ;;  %v18165_v19 = vld [vmem:[%s24308_s5 + $0xcd8] sm:$0xff]   ;;  %v23813_v48 = vpop.f32.mrb[134].mxu0  ;;  %17140 = vmatprep.subr.bf16.mxu1 %v18158_v54  ;;  %v24808_v24 = vld [vmem:[#allocation29_spill] sm:$0xff] }
 0x5da   : > { %v15891_v32 = vcombine.low %v12360_v2, %v12366_v14  ;;  %v15886_v59 = vcombine.low %v12383_v43, %v12385_v53  ;;  %v15893_v56 = vcombine.low %v12388_v26, %v12390_v0  ;;  %v16650_v30 = vadd.f32 %v23578_v40, %v23565_v11  ;;  %12869 = vmatmul.mubr.bf16.gmra.mrb[196].mxu1 %v15884_v55  ;;  %v18160_v11 = vld [vmem:[%s24308_s5 + $0xc18] sm:$0xff]   ;;  %v16720_v0 = vpop.f32.mrb[135].mxu0  ;;  %v24810_v2 = vld [vmem:[#allocation49_spill] sm:$0xff]  ;;  %v16682_v43 = vpop.f32.mrb[120].mxu1 }
 0x5db   : > { %v15890_v36 = vcombine.low %v12357_v61, %v12363_v49  ;;  %v12372_v23 = vor.u32 %v12371_v7, %v12370_v8  ;;  %v12387_v14 = vrot.slane %v23526_v62, 3  ;;  %v16653_v28 = vadd.f32 %v23605_v57, %v23596_v63  ;;  %v18162_v63 = vld [vmem:[%s24308_s5 + $0xc60] sm:$0xff]   ;;  %v24805_v49 = vld [vmem:[#allocation27_spill] sm:$0xff]  ;;  %17179 = vmatpush3.bf16.msra.mxu0 %v18163_v60 }
 0x5dc   : > { %12876 = vmatprep.mubr.bf16.mxu1 %v15891_v32  ;;  %v12392_v40 = vrot.slane %v23532_v46, 3  ;;  %v12394_v41 = vrot.slane %v23534_v44, 3  ;;  %v9047_v53 = vadd.f32 %v16650_v30, %v8982_v27  ;;  %v16672_v62 = vadd.f32 %v23632_v29, %v23618_v5  ;;  %12934 = vmatmul.mubr.bf16.gmra.mrb[212].mxu0 %v15886_v59  ;;  %v18167_v5 = vld [vmem:[%s24308_s5 + $0xc98] sm:$0xff]   ;;  %v24812_v61 = vld [vmem:[#allocation45_spill] sm:$0xff] }
 0x5dd   : > { %v15897_v57 = vcombine.low %v12372_v23, %v12378_v34  ;;  %v15892_v17 = vcombine.low %v12387_v14, %v12389_v21  ;;  %v24806_v8 = vshrl.u32 %v24805_v49, 16  ;;  %v9050_v44 = vadd.f32 %v16653_v28, %v8985_v51  ;;  %12941 = vmatprep.mubr.bf16.mxu0 %v15893_v56  ;;  %17180 = vmatprep.subr.bf16.mxu0 %v18165_v19  ;;  %v16683_v21 = vpop.f32.mrb[121].mxu1  ;;  %v23864_v32 = vld [vmem:[#allocation3 + $0x70] sm:$0xff]  ;;  %v18166_v23 = vld [vmem:[%s24308_s5 + $0xc68] sm:$0xff]  }
 0x5de   : > { %v24807_v29 = vshll.u32 %v24805_v49, 16  ;;  %v24809_v7 = vshrl.u32 %v24808_v24, 16  ;;  %v23845_v13 = vadd.f32 %v9047_v53, %v24810_v2  ;;  %v16675_v51 = vadd.f32 %v23656_v31, %v23645_v9  ;;  %17141 = vmatpush3.bf16.msra.mxu1 %v18160_v11  ;;  %v18164_v9 = vld [vmem:[%s24308_s5 + $0xc20] sm:$0xff]   ;;  %v16685_v30 = vpop.f32.mrb[122].mxu1  ;;  %v23900_v53 = vld [vmem:[#allocation3 + $0x60] sm:$0xff]  ;;  %v23906_v49 = vld [vmem:[#allocation3 + $0x98] sm:$0xff] }
 0x5df   : > { %v23829_v46 = vrot.slane %v24806_v8, 1  ;;  %v24811_v26 = vshll.u32 %v24808_v24, 16  ;;  %v13105_v55 = vshrl.u32 %v23820_v20, 16  ;;  %v13108_v54 = vshll.u32 %v23820_v20, 16  ;;  %17142 = vmatprep.subr.bf16.mxu1 %v18162_v63  ;;  %17181 = vmatpush3.bf16.msra.mxu0 %v18167_v5  ;;  %v16722_v63 = vpop.f32.mrb[136].mxu0 }
 0x5e0   : > { %v23836_v27 = vrot.slane %v24807_v29, 2  ;;  %v23840_v35 = vrot.slane %v24809_v7, 1  ;;  %v23859_v34 = vadd.f32 %v9050_v44, %v24812_v61  ;;  %v15899_v31 = vcombine.low %v12392_v40, %v12394_v41  ;;  %17182 = vmatprep.subr.bf16.mxu0 %v18169_v6  ;;  %v16723_v29 = vpop.f32.mrb[137].mxu0  ;;  %v18172_v61 = vld [vmem:[%s24308_s5 + $0xc30] sm:$0xff]  }
 0x5e1   : > { %v23854_v16 = vrot.slane %v24811_v26, 2  ;;  %v16712_v59 = vadd.f32 %v23706_v22, %v23693_v38  ;;  %v16678_v56 = vadd.f32 %v23763_v18, %v23752_v50  ;;  %v16715_v60 = vadd.f32 %v23728_v42, %v23713_v15  ;;  %v16686_v22 = vpop.f32.mrb[123].mxu1  ;;  %v18171_v15 = vld [vmem:[%s24308_s5 + $0xca0] sm:$0xff]   ;;  %v16725_v2 = vpop.f32.mrb[138].mxu0 }
 0x5e2   : > { %v16045_v19 = vcombine.low %v23842_v4, %v23820_v20  ;;  %v13089_v14 = vshrl.u32 %v23842_v4, 16  ;;  %v13092_v28 = vshll.u32 %v23842_v4, 16  ;;  %v16681_v38 = vadd.f32 %v23784_v45, %v23771_v52  ;;  %12877 = vmatmul.mubr.bf16.gmra.mrb[200].mxu1 %v15890_v36  ;;  %v18174_v45 = vld [vmem:[%s24308_s5 + $0xce8] sm:$0xff]  }
 0x5e3   : > { %v12369_v42 = vor.u32 %v23836_v27, %v23829_v46  ;;  %v12391_v50 = vrot.slane %v23610_v25, 3  ;;  %v23887_v18 = vadd.f32 %v16712_v59, %v16672_v62  ;;  %v23889_v11 = vadd.f32 %v16715_v60, %v16675_v51  ;;  %17143 = vmatpush3.bf16.msra.mxu1 %v18164_v9  ;;  %12884 = vmatprep.mubr.bf16.mxu1 %v15897_v57  ;;  %v18168_v36 = vld [vmem:[%s24308_s5 + $0xc28] sm:$0xff]   ;;  %v18170_v57 = vld [vmem:[%s24308_s5 + $0xc70] sm:$0xff]   ;;  %v16688_v59 = vpop.f32.mrb[124].mxu1  ;;  %v18177_v25 = vld [vmem:[%s24308_s5 + $0xc38] sm:$0xff]  }
 0x5e4   : > { %v12375_v52 = vor.u32 %v23854_v16, %v23840_v35  ;;  %v23896_v40 = vrot.slane %v13105_v55, 1  ;;  %v23898_v41 = vrot.slane %v13108_v54, 2  ;;  %v13097_v62 = vshrl.u32 %v23864_v32, 16  ;;  %17144 = vmatprep.subr.bf16.mxu1 %v18166_v23  ;;  %12942 = vmatmul.mubr.bf16.gmra.mrb[216].mxu0 %v15892_v17 }
 0x5e5   : > { %v13100_v8 = vshll.u32 %v23864_v32, 16  ;;  %v16718_v46 = vadd.f32 %v23805_v37, %v23798_v39  ;;  %v16684_v44 = vadd.f32 %v16683_v21, %v16682_v43  ;;  %v16721_v5 = vadd.f32 %v16720_v0, %v23813_v48  ;;  %12949 = vmatprep.mubr.bf16.mxu0 %v15899_v31  ;;  %17183 = vmatpush3.bf16.msra.mxu0 %v18171_v15  ;;  %v18176_v39 = vld [vmem:[%s24308_s5 + $0xca8] sm:$0xff]   ;;  %v23919_v37 = vld [vmem:[#allocation3 + $0x88] sm:$0xff]  ;;  %v18178_v43 = vld [vmem:[%s24308_s5 + $0xcf0] sm:$0xff]  }
 0x5e6   : > { %v12393_v27 = vrot.slane %v23612_v58, 3  ;;  %v13091_v24 = vrot.slane %v13089_v14, 1  ;;  %v13094_v7 = vrot.slane %v13092_v28, 2  ;;  %v16687_v35 = vadd.f32 %v16686_v22, %v16685_v30  ;;  %v16726_v58 = vpop.f32.mrb[139].mxu0  ;;  %17184 = vmatprep.subr.bf16.mxu0 %v18174_v45  ;;  %v16689_v14 = vpop.f32.mrb[125].mxu1 }
 0x5e7   : > { %v13081_v48 = vshrl.u32 %v23900_v53, 16  ;;  %v13084_v0 = vshll.u32 %v23900_v53, 16  ;;  %v23923_v17 = vadd.f32 %v16718_v46, %v16678_v56  ;;  %v23925_v51 = vadd.f32 %v16721_v5, %v16681_v38  ;;  %17145 = vmatpush3.bf16.msra.mxu1 %v18168_v36  ;;  %v18175_v56 = vld [vmem:[%s24308_s5 + $0xc78] sm:$0xff]   ;;  %v18179_v38 = vld [vmem:[%s24308_s5 + $0xcb0] sm:$0xff]   ;;  %v16691_v45 = vpop.f32.mrb[126].mxu1  ;;  %v23956_v36 = vld [vmem:[#allocation3 + $0x90] sm:$0xff] }
 0x5e8   : > { %v13137_v6 = vshrl.u32 %v23906_v49, 16  ;;  %v13140_v26 = vshll.u32 %v23906_v49, 16  ;;  %v16724_v16 = vadd.f32 %v16723_v29, %v16722_v63  ;;  %v16727_v55 = vadd.f32 %v16726_v58, %v16725_v2  ;;  %17146 = vmatprep.subr.bf16.mxu1 %v18170_v57  ;;  %v23964_v46 = vld [vmem:[#allocation3 + $0x80] sm:$0xff]  ;;  %v18180_v29 = vld [vmem:[%s24308_s5 + $0xd40] sm:$0xff]  }
 0x5e9   : > { %v15896_v54 = vcombine.low %v12369_v42, %v12375_v52  ;;  %v13111_v21 = vor.u32 %v23898_v41, %v23896_v40  ;;  %v23937_v9 = vrot.slane %v13097_v62, 1  ;;  %v13102_v31 = vrot.slane %v13100_v8, 2  ;;  %17185 = vmatpush3.bf16.msra.mxu0 %v18176_v39  ;;  %v18184_v41 = vld [vmem:[%s24308_s5 + $0xcf8] sm:$0xff]   ;;  %v16692_v8 = vpop.f32.mrb[127].mxu1  ;;  %v16728_v39 = vpop.f32.mrb[140].mxu0 }
 0x5ea   : > { %v13121_v60 = vshrl.u32 %v23919_v37, 16  ;;  %v13124_v30 = vshll.u32 %v23919_v37, 16  ;;  %v23944_v23 = vadd.f32 %v16724_v16, %v16684_v44  ;;  %v23946_v28 = vadd.f32 %v16727_v55, %v16687_v35  ;;  %17186 = vmatprep.subr.bf16.mxu0 %v18178_v43  ;;  %v23966_v44 = vld [vmem:[#allocation3 + $0xa8] sm:$0xff]  ;;  %v24813_v55 = vld [vmem:[#allocation58_spill] sm:$0xff] }
 0x5eb   : > { %v13095_v22 = vor.u32 %v13094_v7, %v13091_v24  ;;  %v13083_v15 = vrot.slane %v13081_v48, 1  ;;  %v13086_v42 = vrot.slane %v13084_v0, 2  ;;  %v16690_v52 = vadd.f32 %v16689_v14, %v16688_v59  ;;  %12885 = vmatmul.mubr.bf16.gmra.mrb[204].mxu1 %v15896_v54  ;;  %v18185_v24 = vld [vmem:[%s24308_s5 + $0xcb8] sm:$0xff]  }
 0x5ec   : > { %v15898_v40 = vcombine.low %v12391_v50, %v12393_v27  ;;  %v13139_v62 = vrot.slane %v13137_v6, 1  ;;  %v13142_v63 = vrot.slane %v13140_v26, 2  ;;  %17147 = vmatpush3.bf16.msra.mxu1 %v18172_v61  ;;  %13656 = vmatprep.mubr.bf16.mxu1 %v16045_v19  ;;  %v16693_v5 = vadd.f32 %v16692_v8, %v16691_v45  ;;  %v16729_v6 = vpop.f32.mrb[141].mxu0  ;;  %v18182_v26 = vld [vmem:[%s24308_s5 + $0xd00] sm:$0xff]  }
 0x5ed   : > { %v16047_v50 = vcombine.low %v13095_v22, %v13111_v21  ;;  %17148 = vmatprep.subr.bf16.mxu1 %v18175_v56  ;;  %v13103_v57 = vor.u32 %v13102_v31, %v23937_v9  ;;  %v13123_v27 = vrot.slane %v13121_v60, 1  ;;  %v13126_v19 = vrot.slane %v13124_v30, 2  ;;  %17187 = vmatpush3.bf16.msra.mxu0 %v18179_v38  ;;  %v16731_v9 = vpop.f32.mrb[142].mxu0  ;;  %v18186_v56 = vld [vmem:[%s24308_s5 + $0xd48] sm:$0xff]  }
 0x5ee   : > { %12950 = vmatmul.mubr.bf16.gmra.mrb[220].mxu0 %v15898_v40  ;;  %v13087_v7 = vor.u32 %v13086_v42, %v13083_v15  ;;  %v13129_v35 = vshrl.u32 %v23956_v36, 16  ;;  %v13132_v2 = vshll.u32 %v23956_v36, 16  ;;  %17188 = vmatprep.subr.bf16.mxu0 %v18184_v41  ;;  %v13143_v48 = vor.u32 %v13142_v63, %v13139_v62  ;;  %v16732_v14 = vpop.f32.mrb[143].mxu0  ;;  %v18187_v63 = vld [vmem:[%s24308_s5 + $0xd08] sm:$0xff]  }
 0x5ef   : > { %13721 = vmatprep.mubr.bf16.mxu0 %v16047_v50  ;;  %v13113_v0 = vshrl.u32 %v23964_v46, 16  ;;  %v13116_v58 = vshll.u32 %v23964_v46, 16  ;;  %v13153_v43 = vshrl.u32 %v23966_v44, 16  ;;  %v13156_v16 = vshll.u32 %v23966_v44, 16 }
 0x5f0   : > { %17149 = vmatpush3.bf16.msra.mxu1 %v18177_v25  ;;  %v13169_v54 = vshrl.u32 %v24813_v55, 16  ;;  %v13172_v61 = vshll.u32 %v24813_v55, 16  ;;  %v16730_v21 = vadd.f32 %v16729_v6, %v16728_v39  ;;  %v16044_v31 = vcombine.low %v23900_v53, %v23864_v32 }
 0x5f1   : > { %17214 = vmatprep.subr.bf16.mxu1 %v18180_v29  ;;  %v16051_v59 = vcombine.low %v23919_v37, %v23906_v49  ;;  %v16046_v60 = vcombine.low %v13087_v7, %v13103_v57  ;;  %v13127_v30 = vor.u32 %v13126_v19, %v13123_v27  ;;  %17189 = vmatpush3.bf16.msra.mxu0 %v18185_v24  ;;  %v13131_v38 = vrot.slane %v13129_v35, 1  ;;  %v23998_v29 = vld [vmem:[#allocation3 + $0xa0] sm:$0xff]  ;;  %v16750_v27 = vpop.f32.mrb[128].mxu1 }
 0x5f2   : > { %v13134_v22 = vrot.slane %v13132_v2, 2  ;;  %v23993_v15 = vadd.f32 %v16730_v21, %v16690_v52  ;;  %v16733_v42 = vadd.f32 %v16732_v14, %v16731_v9  ;;  %v13115_v40 = vrot.slane %v13113_v0, 1  ;;  %v18188_v52 = vld [vmem:[%s24308_s5 + $0xd50] sm:$0xff]   ;;  %v16751_v24 = vpop.f32.mrb[129].mxu1  ;;  %v18193_v14 = vld [vmem:[%s24308_s5 + $0xd60] sm:$0xff]  }
 0x5f3   : > { %13657 = vmatmul.mubr.bf16.vlgmr.msra.gmra.mrb[208].mxu1 %v16044_v31  ;;  %v16053_v45 = vcombine.low %v13127_v30, %v13143_v48  ;;  %v13118_v41 = vrot.slane %v13116_v58, 2  ;;  %v13155_v62 = vrot.slane %v13153_v43, 1  ;;  %v13158_v8 = vrot.slane %v13156_v16, 2  ;;  %v16753_v39 = vpop.f32.mrb[130].mxu1 }
 0x5f4   : > { %17215 = vmatpush3.bf16.msra.mxu1 %v18182_v26  ;;  %13664 = vmatprep.mubr.bf16.mxu1 %v16051_v59  ;;  %v13171_v25 = vrot.slane %v13169_v54, 1  ;;  %v13174_v50 = vrot.slane %v13172_v61, 2  ;;  %v24000_v57 = vadd.f32 %v16733_v42, %v16693_v5  ;;  %v13135_v19 = vor.u32 %v13134_v22, %v13131_v38  ;;  %v18190_v5 = vld [vmem:[%s24308_s5 + $0xd10] sm:$0xff]   ;;  %v16754_v43 = vpop.f32.mrb[131].mxu1  ;;  %v18191_v26 = vld [vmem:[%s24308_s5 + $0xd58] sm:$0xff]   ;;  %v16790_v30 = vpop.f32.mrb[144].mxu0 }
 0x5f5   : > { %17216 = vmatprep.subr.bf16.mxu1 %v18186_v56  ;;  %v13145_v7 = vshrl.u32 %v23998_v29, 16  ;;  %v13148_v35 = vshll.u32 %v23998_v29, 16  ;;  %v16752_v2 = vadd.f32 %v16751_v24, %v16750_v27  ;;  %v13119_v48 = vor.u32 %v13118_v41, %v13115_v40  ;;  %v24016_v54 = vld [vmem:[#allocation3] sm:$0xff]  ;;  %v18194_v40 = vld [vmem:[%s24308_s5 + $0xd20] sm:$0xff]  }
 0x5f6   : > { %13722 = vmatmul.mubr.bf16.vlgmr.msra.gmra.mrb[224].mxu0 %v16046_v60  ;;  %v13159_v0 = vor.u32 %v13158_v8, %v13155_v62  ;;  %v13175_v58 = vor.u32 %v13174_v50, %v13171_v25  ;;  %v16050_v6 = vcombine.low %v23964_v46, %v23956_v36  ;;  %v16755_v55 = vadd.f32 %v16754_v43, %v16753_v39  ;;  %v18196_v50 = vld [vmem:[%s24308_s5 + $0xd28] sm:$0xff]   ;;  %v18197_v27 = vld [vmem:[%s24308_s5 + $0xd70] sm:$0xff]  }
 0x5f7   : > { %13729 = vmatprep.mubr.bf16.mxu0 %v16053_v45  ;;  %v10107_v16 = vadd.f32 %v16752_v2, %v23887_v18  ;;  %v16057_v61 = vcombine.low %v23966_v44, %v24016_v54  ;;  %v16052_v21 = vcombine.low %v13119_v48, %v13135_v19  ;;  %v13147_v9 = vrot.slane %v13145_v7, 1  ;;  %v18192_v18 = vld [vmem:[%s24308_s5 + $0xd18] sm:$0xff]   ;;  %v18198_v39 = vld [vmem:[%s24308_s5 + $0xd30] sm:$0xff]  }
 0x5f8   : > { %17217 = vmatpush3.bf16.msra.mxu1 %v18187_v63  ;;  %v13150_v31 = vrot.slane %v13148_v35, 2  ;;  %v10110_v56 = vadd.f32 %v16755_v55, %v23889_v11  ;;  %v16059_v60 = vcombine.low %v13159_v0, %v13175_v58  ;;  %v16063_v41 = vcombine.low %v24016_v54, %v24016_v54  ;;  %v18195_v63 = vld [vmem:[%s24308_s5 + $0xd68] sm:$0xff]  }
 0x5f9   : > { %17218 = vmatprep.subr.bf16.mxu1 %v18188_v52  ;;  %v24021_v59 = vadd.f32 %v10107_v16, %v23602_v1  ;;  %v16791_v1 = vpop.f32.mrb[145].mxu0  ;;  %v16065_v8 = vcombine.low %v13175_v58, %v13175_v58  ;;  %v13227_v24 = vrot.slane %v23820_v20, 3  ;;  %v13226_v55 = vrot.slane %v23864_v32, 3 }
 0x5fa   : > { %v24031_v38 = vadd.f32 %v10110_v56, %v23626_v3  ;;  %v24033_v11 = vadd.f32 %v16791_v1, %v16790_v30  ;;  %v16793_v22 = vpop.f32.mrb[146].mxu0  ;;  %v13151_v42 = vor.u32 %v13150_v31, %v13147_v9  ;;  %v16056_v3 = vcombine.low %v23998_v29, %v24016_v54 }
 0x5fb   : > { %13665 = vmatmul.mubr.bf16.gmra.mrb[212].mxu1 %v16050_v6  ;;  %v16794_v45 = vpop.f32.mrb[147].mxu0  ;;  %v13224_v9 = vrot.slane %v23900_v53, 3  ;;  %v13229_v56 = vrot.slane %v23919_v37, 3  ;;  %v13230_v32 = vrot.slane %v23956_v36, 3 }
 0x5fc   : > { %17219 = vmatpush3.bf16.msra.mxu1 %v18190_v5  ;;  %13672 = vmatprep.mubr.bf16.mxu1 %v16057_v61  ;;  %v24040_v62 = vadd.f32 %v16794_v45, %v16793_v22  ;;  %v16058_v25 = vcombine.low %v13151_v42, %v13175_v58  ;;  %v16756_v52 = vpop.f32.mrb[132].mxu1  ;;  %v13225_v5 = vrot.slane %v23842_v4, 3  ;;  %v18199_v58 = vld [vmem:[%s24308_s5 + $0xd78] sm:$0xff]   ;;  %v13235_v22 = vrot.slane %v24016_v54, 3 }
 0x5fd   : > { %17220 = vmatprep.subr.bf16.mxu1 %v18191_v26  ;;  %v16757_v19 = vpop.f32.mrb[133].mxu1  ;;  %v18200_v4 = vld [vmem:[%s24308_s5 + $0xd38] sm:$0xff]   ;;  %v13228_v42 = vrot.slane %v23964_v46, 3 }
 0x5fe   : > { %13730 = vmatmul.mubr.bf16.gmra.mrb[228].mxu0 %v16052_v21  ;;  %v16758_v7 = vadd.f32 %v16757_v19, %v16756_v52  ;;  %v16759_v35 = vpop.f32.mrb[134].mxu1  ;;  %v16049_v20 = vcombine.low %v13225_v5, %v13227_v24 }
 0x5ff   : > { %13737 = vmatprep.mubr.bf16.mxu0 %v16059_v60  ;;  %v16760_v2 = vpop.f32.mrb[135].mxu1 }
 0x600   : > { %17221 = vmatpush3.bf16.msra.mxu1 %v18192_v18  ;;  %v10115_v48 = vadd.f32 %v16758_v7, %v23923_v17  ;;  %v16761_v0 = vadd.f32 %v16760_v2, %v16759_v35 }
 0x601   : > { %17222 = vmatprep.subr.bf16.mxu1 %v18193_v14 }
 0x602   : > { %v24063_v43 = vadd.f32 %v10115_v48, %v23682_v47  ;;  %v10118_v6 = vadd.f32 %v16761_v0, %v23925_v51  ;;  %v13231_v51 = vrot.slane %v23906_v49, 3  ;;  %v13233_v49 = vrot.slane %v23966_v44, 3 }
 0x603   : > { %13673 = vmatmul.mubr.bf16.gmra.mrb[216].mxu1 %v16056_v3  ;;  %v16796_v26 = vpop.f32.mrb[148].mxu0 }
 0x604   : > { %17223 = vmatpush3.bf16.msra.mxu1 %v18194_v40  ;;  %13680 = vmatprep.mubr.bf16.mxu1 %v16063_v41  ;;  %v24070_v17 = vadd.f32 %v10118_v6, %v23691_v33  ;;  %v16797_v16 = vpop.f32.mrb[149].mxu0  ;;  %v16048_v33 = vcombine.low %v13224_v9, %v13226_v55  ;;  %v16055_v18 = vcombine.low %v13229_v56, %v13231_v51 }
 0x605   : > { %17224 = vmatprep.subr.bf16.mxu1 %v18195_v63  ;;  %v24073_v47 = vadd.f32 %v16797_v16, %v16796_v26  ;;  %v16799_v61 = vpop.f32.mrb[150].mxu0  ;;  %v16054_v40 = vcombine.low %v13228_v42, %v13230_v32  ;;  %v16061_v63 = vcombine.low %v13233_v49, %v13235_v22 }
 0x606   : > { %13738 = vmatmul.mubr.bf16.gmra.mrb[232].mxu0 %v16058_v25  ;;  %v16800_v21 = vpop.f32.mrb[151].mxu0 }
 0x607   : > { %13745 = vmatprep.mubr.bf16.mxu0 %v16065_v8  ;;  %v24077_v31 = vadd.f32 %v16800_v21, %v16799_v61 }
 0x608   : > { %17225 = vmatpush3.bf16.msra.mxu1 %v18196_v50 }
 0x609   : > { %17226 = vmatprep.subr.bf16.mxu1 %v18197_v27 }
 0x60b   : > { %13681 = vmatmul.mubr.bf16.gmra.mrb[220].mxu1 %v16063_v41 }
 0x60c   : > { %17227 = vmatpush3.bf16.msra.mxu1 %v18198_v39  ;;  %13786 = vmatprep.mubr.bf16.mxu1 %v16049_v20  ;;  %v16762_v60 = vpop.f32.mrb[136].mxu1 }
 0x60d   : > { %17228 = vmatprep.subr.bf16.mxu1 %v18199_v58  ;;  %v16763_v30 = vpop.f32.mrb[137].mxu1 }
 0x60e   : > { %13746 = vmatmul.mubr.bf16.gmra.mrb[236].mxu0 %v16065_v8  ;;  %v16764_v14 = vadd.f32 %v16763_v30, %v16762_v60  ;;  %v16765_v1 = vpop.f32.mrb[138].mxu1 }
 0x60f   : > { %v16766_v53 = vpop.f32.mrb[139].mxu1 }
 0x610   : > { %17229 = vmatpush3.bf16.msra.mxu1 %v18200_v4  ;;  %v10123_v45 = vadd.f32 %v16764_v14, %v23944_v23  ;;  %v16767_v37 = vadd.f32 %v16766_v53, %v16765_v1  ;;  %v13232_v23 = vrot.slane %v23998_v29, 3 }
 0x612   : > { %v24086_v41 = vadd.f32 %v10123_v45, %v23782_v12  ;;  %v10126_v3 = vadd.f32 %v16767_v37, %v23946_v28  ;;  %v16067_v12 = vcombine.low %v13235_v22, %v13235_v22  ;;  %v16060_v52 = vcombine.low %v13232_v23, %v13235_v22 }
 0x613   : > { %13787 = vmatmul.mubr.bf16.vlgmr.msra.gmra.mrb[224].mxu1 %v16048_v33  ;;  %v16802_v36 = vpop.f32.mrb[152].mxu0 }
 0x614   : > { %13794 = vmatprep.mubr.bf16.mxu1 %v16055_v18  ;;  %v24090_v8 = vadd.f32 %v10126_v3, %v23792_v10  ;;  %v16803_v44 = vpop.f32.mrb[153].mxu0 }
 0x615   : > { %v24092_v54 = vadd.f32 %v16803_v44, %v16802_v36  ;;  %v16805_v46 = vpop.f32.mrb[154].mxu0 }
 0x616   : > { %v16806_v25 = vpop.f32.mrb[155].mxu0 }
 0x617   : > { %v24095_v50 = vadd.f32 %v16806_v25, %v16805_v46 }
 0x61a   : > { %v16768_v27 = vpop.f32.mrb[140].mxu1 }
 0x61b   : > { %13795 = vmatmul.mubr.bf16.gmra.mrb[228].mxu1 %v16054_v40  ;;  %v16769_v28 = vpop.f32.mrb[141].mxu1 }
 0x61c   : > { %13802 = vmatprep.mubr.bf16.mxu1 %v16061_v63  ;;  %v16770_v19 = vadd.f32 %v16769_v28, %v16768_v27  ;;  %v16771_v24 = vpop.f32.mrb[142].mxu1 }
 0x61d   : > { %v16772_v10 = vpop.f32.mrb[143].mxu1 }
 0x61e   : > { %v10131_v7 = vadd.f32 %v16770_v19, %v23993_v15  ;;  %v16773_v35 = vadd.f32 %v16772_v10, %v16771_v24 }
 0x620   : > { %v24099_v2 = vadd.f32 %v10131_v7, %v23845_v13  ;;  %v10134_v29 = vadd.f32 %v16773_v35, %v24000_v57 }
 0x622   : > { %v24103_v39 = vadd.f32 %v10134_v29, %v23859_v34 }
 0x623   : > { %13803 = vmatmul.mubr.bf16.gmra.mrb[232].mxu1 %v16060_v52  ;;  %v16830_v5 = vpop.f32.mrb[144].mxu1 }
 0x624   : > { %13810 = vmatprep.mubr.bf16.mxu1 %v16067_v12  ;;  %v16831_v48 = vpop.f32.mrb[145].mxu1 }
 0x625   : > { %v16832_v0 = vadd.f32 %v16831_v48, %v16830_v5  ;;  %v16833_v58 = vpop.f32.mrb[146].mxu1 }
 0x626   : > { %v16834_v20 = vpop.f32.mrb[147].mxu1 }
 0x627   : > { %v11271_v6 = vadd.f32 %v16832_v0, %v24033_v11  ;;  %v16835_v26 = vadd.f32 %v16834_v20, %v16833_v58 }
 0x628   : > { %v16808_v4 = vpop.f32.mrb[156].mxu0 }
 0x629   : > { %v16809_v15 = vpop.f32.mrb[157].mxu0  ;;  %v11274_v16 = vadd.f32 %v16835_v26, %v24040_v62 }
 0x62a   : > { %v16810_v13 = vadd.f32 %v16809_v15, %v16808_v4  ;;  %v16811_v55 = vpop.f32.mrb[158].mxu0 }
 0x62b   : > { %13811 = vmatmul.mubr.bf16.gmra.mrb[236].mxu1 %v16067_v12  ;;  %v16812_v61 = vpop.f32.mrb[159].mxu0 }
 0x62c   : > { %v16813_v57 = vadd.f32 %v16812_v61, %v16811_v55 }
 0x630   : > { %v16870_v51 = vpop.f32.mrb[160].mxu0 }
 0x631   : > { %v16871_v34 = vpop.f32.mrb[161].mxu0 }
 0x632   : > { %v16872_v21 = vadd.f32 %v16871_v34, %v16870_v51  ;;  %v16873_v9 = vpop.f32.mrb[162].mxu0 }
 0x633   : > { %v16874_v56 = vpop.f32.mrb[163].mxu0 }
 0x634   : > { %v11336_v33 = vadd.f32 %v16872_v21, %v11271_v6  ;;  %v16875_v18 = vadd.f32 %v16874_v56, %v16873_v9 }
 0x635   : > { %v16836_v60 = vpop.f32.mrb[148].mxu1 }
 0x636   : > { %v24108_v30 = vadd.f32 %v11336_v33, %v24021_v59  ;;  %v16837_v11 = vpop.f32.mrb[149].mxu1  ;;  %v11339_v32 = vadd.f32 %v16875_v18, %v11274_v16 }
 0x637   : > { %v16838_v14 = vadd.f32 %v16837_v11, %v16836_v60  ;;  %v16839_v1 = vpop.f32.mrb[150].mxu1 }
 0x638   : > { %v24111_v62 = vadd.f32 %v11339_v32, %v24031_v38  ;;  %v16840_v49 = vpop.f32.mrb[151].mxu1 }
 0x639   : > { %v11279_v22 = vadd.f32 %v16838_v14, %v24073_v47  ;;  %v16841_v53 = vadd.f32 %v16840_v49, %v16839_v1 }
 0x63b   : > { %v11282_v42 = vadd.f32 %v16841_v53, %v24077_v31 }
 0x641   : > { %v16876_v45 = vpop.f32.mrb[164].mxu0 }
 0x642   : > { %v16877_v37 = vpop.f32.mrb[165].mxu0 }
 0x643   : > { %v16878_v40 = vadd.f32 %v16877_v37, %v16876_v45  ;;  %v16879_v3 = vpop.f32.mrb[166].mxu0 }
 0x644   : > { %v16880_v63 = vpop.f32.mrb[167].mxu0 }
 0x645   : > { %v11344_v59 = vadd.f32 %v16878_v40, %v11279_v22  ;;  %v16842_v36 = vpop.f32.mrb[152].mxu1  ;;  %v16881_v44 = vadd.f32 %v16880_v63, %v16879_v3 }
 0x646   : > { %v16843_v46 = vpop.f32.mrb[153].mxu1 }
 0x647   : > { %v24116_v23 = vadd.f32 %v11344_v59, %v24063_v43  ;;  %v16844_v38 = vadd.f32 %v16843_v46, %v16842_v36  ;;  %v11347_v25 = vadd.f32 %v16881_v44, %v11282_v42  ;;  %v16845_v12 = vpop.f32.mrb[154].mxu1 }
 0x648   : > { %v16846_v52 = vpop.f32.mrb[155].mxu1 }
 0x649   : > { %v11287_v47 = vadd.f32 %v16844_v38, %v24092_v54  ;;  %v24120_v31 = vadd.f32 %v11347_v25, %v24070_v17  ;;  %v16847_v27 = vadd.f32 %v16846_v52, %v16845_v12 }
 0x64b   : > { %v11290_v28 = vadd.f32 %v16847_v27, %v24095_v50 }
 0x652   : > { %v16882_v19 = vpop.f32.mrb[168].mxu0 }
 0x653   : > { %v16883_v24 = vpop.f32.mrb[169].mxu0 }
 0x654   : > { %v16884_v10 = vadd.f32 %v16883_v24, %v16882_v19  ;;  %v16885_v7 = vpop.f32.mrb[170].mxu0 }
 0x655   : > { %v16886_v35 = vpop.f32.mrb[171].mxu0 }
 0x656   : > { %v11352_v29 = vadd.f32 %v16884_v10, %v11287_v47  ;;  %v16887_v43 = vadd.f32 %v16886_v35, %v16885_v7 }
 0x658   : > { %v24124_v5 = vadd.f32 %v11352_v29, %v24086_v41  ;;  %v11355_v48 = vadd.f32 %v16887_v43, %v11290_v28  ;;  %v16848_v0 = vpop.f32.mrb[156].mxu1 }
 0x659   : > { %v16849_v58 = vpop.f32.mrb[157].mxu1 }
 0x65a   : > { %v24127_v54 = vadd.f32 %v11355_v48, %v24090_v8  ;;  %v16888_v17 = vpop.f32.mrb[172].mxu0  ;;  %v16850_v20 = vadd.f32 %v16849_v58, %v16848_v0  ;;  %v16851_v6 = vpop.f32.mrb[158].mxu1 }
 0x65b   : > { %v16889_v50 = vpop.f32.mrb[173].mxu0  ;;  %v16852_v26 = vpop.f32.mrb[159].mxu1 }
 0x65c   : > { %v16890_v4 = vadd.f32 %v16889_v50, %v16888_v17  ;;  %v16891_v15 = vpop.f32.mrb[174].mxu0  ;;  %v11295_v16 = vadd.f32 %v16850_v20, %v16810_v13  ;;  %v16853_v55 = vadd.f32 %v16852_v26, %v16851_v6 }
 0x65d   : > { %v16892_v61 = vpop.f32.mrb[175].mxu0 }
 0x65e   : > { %v16893_v51 = vadd.f32 %v16892_v61, %v16891_v15  ;;  %v11298_v34 = vadd.f32 %v16853_v55, %v16813_v57  ;;  %v11360_v41 = vadd.f32 %v16890_v4, %v11295_v16 }
 0x660   : > { %v24130_v21 = vadd.f32 %v11360_v41, %v24099_v2  ;;  %v16910_v9 = vpop.f32.mrb[160].mxu1  ;;  %v11363_v56 = vadd.f32 %v16893_v51, %v11298_v34 }
 0x661   : > { %v16911_v8 = vpop.f32.mrb[161].mxu1 }
 0x662   : > { %v24133_v33 = vadd.f32 %v11363_v56, %v24103_v39  ;;  %v16912_v18 = vadd.f32 %v16911_v8, %v16910_v9  ;;  %v16913_v60 = vpop.f32.mrb[162].mxu1  ;;  %v16950_v11 = vpop.f32.mrb[176].mxu0 }
 0x663   : > { %v16914_v32 = vpop.f32.mrb[163].mxu1  ;;  %v16951_v14 = vpop.f32.mrb[177].mxu0 }
 0x664   : > { %v16915_v13 = vadd.f32 %v16914_v32, %v16913_v60  ;;  %v16952_v1 = vadd.f32 %v16951_v14, %v16950_v11  ;;  %v16953_v49 = vpop.f32.mrb[178].mxu0 }
 0x665   : > { %v16954_v22 = vpop.f32.mrb[179].mxu0 }
 0x666   : > { %v12131_v57 = vadd.f32 %v16952_v1, %v16912_v18  ;;  %v16955_v53 = vadd.f32 %v16954_v22, %v16953_v49 }
 0x668   : > { %v16916_v42 = vpop.f32.mrb[164].mxu1  ;;  %v12134_v2 = vadd.f32 %v16955_v53, %v16915_v13 }
 0x669   : > { %v16917_v45 = vpop.f32.mrb[165].mxu1 }
 0x66a   : > { %v16918_v37 = vadd.f32 %v16917_v45, %v16916_v42  ;;  %v16919_v40 = vpop.f32.mrb[166].mxu1  ;;  %v16956_v3 = vpop.f32.mrb[180].mxu0 }
 0x66b   : > { %v16920_v63 = vpop.f32.mrb[167].mxu1  ;;  %v16957_v39 = vpop.f32.mrb[181].mxu0 }
 0x66c   : > { %v16921_v59 = vadd.f32 %v16920_v63, %v16919_v40  ;;  %v16958_v36 = vadd.f32 %v16957_v39, %v16956_v3  ;;  %v16959_v44 = vpop.f32.mrb[182].mxu0 }
 0x66d   : > { %v16960_v46 = vpop.f32.mrb[183].mxu0 }
 0x66e   : > { %v12139_v38 = vadd.f32 %v16958_v36, %v16918_v37  ;;  %v16961_v25 = vadd.f32 %v16960_v46, %v16959_v44 }
 0x670   : > { %v16922_v12 = vpop.f32.mrb[168].mxu1  ;;  %v12142_v52 = vadd.f32 %v16961_v25, %v16921_v59 }
 0x671   : > { %v16923_v47 = vpop.f32.mrb[169].mxu1 }
 0x672   : > { %v16924_v27 = vadd.f32 %v16923_v47, %v16922_v12  ;;  %v16925_v28 = vpop.f32.mrb[170].mxu1  ;;  %v16962_v19 = vpop.f32.mrb[184].mxu0 }
 0x673   : > { %v16926_v24 = vpop.f32.mrb[171].mxu1  ;;  %v16963_v10 = vpop.f32.mrb[185].mxu0 }
 0x674   : > { %v16927_v7 = vadd.f32 %v16926_v24, %v16925_v28  ;;  %v16964_v35 = vadd.f32 %v16963_v10, %v16962_v19  ;;  %v16965_v29 = vpop.f32.mrb[186].mxu0 }
 0x675   : > { %v16966_v43 = vpop.f32.mrb[187].mxu0 }
 0x676   : > { %v12147_v48 = vadd.f32 %v16964_v35, %v16924_v27  ;;  %v16967_v0 = vadd.f32 %v16966_v43, %v16965_v29 }
 0x678   : > { %v16928_v58 = vpop.f32.mrb[172].mxu1  ;;  %v12150_v17 = vadd.f32 %v16967_v0, %v16927_v7 }
 0x679   : > { %v16929_v20 = vpop.f32.mrb[173].mxu1 }
 0x67a   : > { %v16930_v6 = vadd.f32 %v16929_v20, %v16928_v58  ;;  %v16931_v50 = vpop.f32.mrb[174].mxu1  ;;  %v16968_v26 = vpop.f32.mrb[188].mxu0 }
 0x67b   : > { %v16932_v4 = vpop.f32.mrb[175].mxu1  ;;  %v16969_v15 = vpop.f32.mrb[189].mxu0 }
 0x67c   : > { %v16933_v16 = vadd.f32 %v16932_v4, %v16931_v50  ;;  %v16970_v55 = vadd.f32 %v16969_v15, %v16968_v26  ;;  %v16971_v61 = vpop.f32.mrb[190].mxu0 }
 0x67d   : > { %v16972_v51 = vpop.f32.mrb[191].mxu0 }
 0x67e   : > { %v12155_v34 = vadd.f32 %v16970_v55, %v16930_v6  ;;  %v16973_v41 = vadd.f32 %v16972_v51, %v16971_v61 }
 0x680   : > { %v16990_v9 = vpop.f32.mrb[176].mxu1  ;;  %v12158_v56 = vadd.f32 %v16973_v41, %v16933_v16 }
 0x681   : > { %v16991_v8 = vpop.f32.mrb[177].mxu1 }
 0x682   : > { %v16992_v18 = vadd.f32 %v16991_v8, %v16990_v9  ;;  %v16993_v60 = vpop.f32.mrb[178].mxu1  ;;  %v17030_v11 = vpop.f32.mrb[192].mxu0 }
 0x683   : > { %v16994_v32 = vpop.f32.mrb[179].mxu1  ;;  %v17031_v14 = vpop.f32.mrb[193].mxu0 }
 0x684   : > { %v12196_v13 = vadd.f32 %v16992_v18, %v12131_v57  ;;  %v16995_v1 = vadd.f32 %v16994_v32, %v16993_v60  ;;  %v17032_v49 = vadd.f32 %v17031_v14, %v17030_v11  ;;  %v17033_v22 = vpop.f32.mrb[194].mxu0 }
 0x685   : > { %v17034_v53 = vpop.f32.mrb[195].mxu0 }
 0x686   : > { %v24136_v42 = vadd.f32 %v12196_v13, %v24108_v30  ;;  %v12199_v45 = vadd.f32 %v16995_v1, %v12134_v2  ;;  %v17035_v37 = vadd.f32 %v17034_v53, %v17033_v22 }
 0x688   : > { %v24139_v40 = vadd.f32 %v12199_v45, %v24111_v62  ;;  %v16996_v3 = vpop.f32.mrb[180].mxu1 }
 0x689   : > { %v16997_v63 = vpop.f32.mrb[181].mxu1 }
 0x68a   : > { %v16998_v39 = vadd.f32 %v16997_v63, %v16996_v3  ;;  %v16999_v59 = vpop.f32.mrb[182].mxu1  ;;  %v17036_v36 = vpop.f32.mrb[196].mxu0 }
 0x68b   : > { %v17000_v44 = vpop.f32.mrb[183].mxu1  ;;  %v17037_v46 = vpop.f32.mrb[197].mxu0 }
 0x68c   : > { %v12204_v57 = vadd.f32 %v16998_v39, %v12139_v38  ;;  %v17001_v25 = vadd.f32 %v17000_v44, %v16999_v59  ;;  %v24141_v12 = vadd.f32 %v17037_v46, %v17036_v36  ;;  %v17039_v47 = vpop.f32.mrb[198].mxu0 }
 0x68d   : > { %v17040_v27 = vpop.f32.mrb[199].mxu0 }
 0x68e   : > { %v24144_v30 = vadd.f32 %v12204_v57, %v24116_v23  ;;  %v12207_v2 = vadd.f32 %v17001_v25, %v12142_v52  ;;  %v24146_v28 = vadd.f32 %v17040_v27, %v17039_v47 }
 0x690   : > { %v24149_v62 = vadd.f32 %v12207_v2, %v24120_v31  ;;  %v17002_v19 = vpop.f32.mrb[184].mxu1 }
 0x691   : > { %v17003_v24 = vpop.f32.mrb[185].mxu1 }
 0x692   : > { %v17004_v10 = vadd.f32 %v17003_v24, %v17002_v19  ;;  %v17005_v7 = vpop.f32.mrb[186].mxu1 }
 0x693   : > { %v17042_v35 = vpop.f32.mrb[200].mxu0  ;;  %v17006_v38 = vpop.f32.mrb[187].mxu1 }
 0x694   : > { %v17043_v29 = vpop.f32.mrb[201].mxu0  ;;  %v12212_v43 = vadd.f32 %v17004_v10, %v12147_v48  ;;  %v17007_v0 = vadd.f32 %v17006_v38, %v17005_v7 }
 0x695   : > { %v24151_v58 = vadd.f32 %v17043_v29, %v17042_v35  ;;  %v17045_v20 = vpop.f32.mrb[202].mxu0 }
 0x696   : > { %v17046_v23 = vpop.f32.mrb[203].mxu0  ;;  %v24154_v52 = vadd.f32 %v12212_v43, %v24124_v5  ;;  %v12215_v6 = vadd.f32 %v17007_v0, %v12150_v17 }
 0x697   : > { %v24156_v50 = vadd.f32 %v17046_v23, %v17045_v20 }
 0x698   : > { %v24159_v31 = vadd.f32 %v12215_v6, %v24127_v54  ;;  %v17008_v26 = vpop.f32.mrb[188].mxu1 }
 0x699   : > { %v17009_v4 = vpop.f32.mrb[189].mxu1 }
 0x69a   : > { %v17010_v15 = vadd.f32 %v17009_v4, %v17008_v26  ;;  %v17011_v16 = vpop.f32.mrb[190].mxu1 }
 0x69b   : > { %v17048_v55 = vpop.f32.mrb[204].mxu0  ;;  %v17012_v48 = vpop.f32.mrb[191].mxu1 }
 0x69c   : > { %v17049_v61 = vpop.f32.mrb[205].mxu0  ;;  %v12220_v51 = vadd.f32 %v17010_v15, %v12155_v34  ;;  %v17013_v41 = vadd.f32 %v17012_v48, %v17011_v16 }
 0x69d   : > { %v24161_v9 = vadd.f32 %v17049_v61, %v17048_v55  ;;  %v17051_v8 = vpop.f32.mrb[206].mxu0 }
 0x69e   : > { %v17052_v5 = vpop.f32.mrb[207].mxu0  ;;  %v24164_v17 = vadd.f32 %v12220_v51, %v24130_v21  ;;  %v12223_v18 = vadd.f32 %v17013_v41, %v12158_v56 }
 0x69f   : > { %v24166_v60 = vadd.f32 %v17052_v5, %v17051_v8 }
 0x6a0   : > { %v24169_v54 = vadd.f32 %v12223_v18, %v24133_v33 }
 0x6a2   : > { %v17070_v11 = vpop.f32.mrb[192].mxu1 }
 0x6a3   : > { %v17071_v32 = vpop.f32.mrb[193].mxu1 }
 0x6a4   : > { %v17072_v14 = vadd.f32 %v17071_v32, %v17070_v11  ;;  %v17073_v13 = vpop.f32.mrb[194].mxu1 }
 0x6a5   : > { %v17110_v1 = vpop.f32.mrb[208].mxu0  ;;  %v17074_v34 = vpop.f32.mrb[195].mxu1 }
 0x6a6   : > { %v17111_v22 = vpop.f32.mrb[209].mxu0  ;;  %v12863_v53 = vadd.f32 %v17072_v14, %v17032_v49  ;;  %v17075_v45 = vadd.f32 %v17074_v34, %v17073_v13 }
 0x6a7   : > { %v17112_v3 = vadd.f32 %v17111_v22, %v17110_v1  ;;  %v17113_v63 = vpop.f32.mrb[210].mxu0 }
 0x6a8   : > { %v17114_v39 = vpop.f32.mrb[211].mxu0  ;;  %v12866_v21 = vadd.f32 %v17075_v45, %v17035_v37 }
 0x6a9   : > { %v12928_v59 = vadd.f32 %v17112_v3, %v12863_v53  ;;  %v17115_v56 = vadd.f32 %v17114_v39, %v17113_v63 }
 0x6ab   : > { %v24172_v36 = vadd.f32 %v12928_v59, %v24136_v42  ;;  %v12931_v44 = vadd.f32 %v17115_v56, %v12866_v21 }
 0x6ad   : > { %v17076_v33 = vpop.f32.mrb[196].mxu1  ;;  %v24175_v25 = vadd.f32 %v12931_v44, %v24139_v40 }
 0x6ae   : > { %v17077_v46 = vpop.f32.mrb[197].mxu1 }
 0x6af   : > { %v17078_v57 = vadd.f32 %v17077_v46, %v17076_v33  ;;  %v17079_v47 = vpop.f32.mrb[198].mxu1  ;;  %v17116_v27 = vpop.f32.mrb[212].mxu0 }
 0x6b0   : > { %v17080_v49 = vpop.f32.mrb[199].mxu1  ;;  %v17117_v2 = vpop.f32.mrb[213].mxu0 }
 0x6b1   : > { %v12871_v19 = vadd.f32 %v17078_v57, %v24141_v12  ;;  %v17081_v24 = vadd.f32 %v17080_v49, %v17079_v47  ;;  %v17118_v37 = vadd.f32 %v17117_v2, %v17116_v27  ;;  %v17119_v10 = vpop.f32.mrb[214].mxu0 }
 0x6b2   : > { %v17120_v7 = vpop.f32.mrb[215].mxu0 }
 0x6b3   : > { %v12874_v42 = vadd.f32 %v17081_v24, %v24146_v28  ;;  %v12936_v35 = vadd.f32 %v17118_v37, %v12871_v19  ;;  %v17121_v38 = vadd.f32 %v17120_v7, %v17119_v10 }
 0x6b5   : > { %v24180_v29 = vadd.f32 %v12936_v35, %v24144_v30  ;;  %v17082_v43 = vpop.f32.mrb[200].mxu1  ;;  %v12939_v40 = vadd.f32 %v17121_v38, %v12874_v42 }
 0x6b6   : > { %v17083_v0 = vpop.f32.mrb[201].mxu1 }
 0x6b7   : > { %v17084_v20 = vadd.f32 %v17083_v0, %v17082_v43  ;;  %v24183_v23 = vadd.f32 %v12939_v40, %v24149_v62  ;;  %v17085_v6 = vpop.f32.mrb[202].mxu1  ;;  %v17122_v12 = vpop.f32.mrb[216].mxu0 }
 0x6b8   : > { %v17086_v26 = vpop.f32.mrb[203].mxu1  ;;  %v17123_v4 = vpop.f32.mrb[217].mxu0 }
 0x6b9   : > { %v12879_v15 = vadd.f32 %v17084_v20, %v24151_v58  ;;  %v17087_v16 = vadd.f32 %v17086_v26, %v17085_v6  ;;  %v17124_v28 = vadd.f32 %v17123_v4, %v17122_v12  ;;  %v17125_v55 = vpop.f32.mrb[218].mxu0 }
 0x6ba   : > { %v17126_v48 = vpop.f32.mrb[219].mxu0 }
 0x6bb   : > { %v12882_v30 = vadd.f32 %v17087_v16, %v24156_v50  ;;  %v12944_v61 = vadd.f32 %v17124_v28, %v12879_v15  ;;  %v17127_v51 = vadd.f32 %v17126_v48, %v17125_v55 }
 0x6bd   : > { %v24188_v41 = vadd.f32 %v12944_v61, %v24154_v52  ;;  %v12947_v62 = vadd.f32 %v17127_v51, %v12882_v30 }
 0x6be   : > { %v17088_v8 = vpop.f32.mrb[204].mxu1 }
 0x6bf   : > { %v17089_v5 = vpop.f32.mrb[205].mxu1  ;;  %v24191_v11 = vadd.f32 %v12947_v62, %v24159_v31 }
 0x6c0   : > { %v17090_v18 = vadd.f32 %v17089_v5, %v17088_v8  ;;  %v17091_v32 = vpop.f32.mrb[206].mxu1 }
 0x6c1   : > { %v17128_v58 = vpop.f32.mrb[220].mxu0  ;;  %v17092_v14 = vpop.f32.mrb[207].mxu1 }
 0x6c2   : > { %v17129_v13 = vpop.f32.mrb[221].mxu0  ;;  %v12887_v1 = vadd.f32 %v17090_v18, %v24161_v9  ;;  %v17093_v34 = vadd.f32 %v17092_v14, %v17091_v32 }
 0x6c3   : > { %v17130_v50 = vadd.f32 %v17129_v13, %v17128_v58  ;;  %v17131_v22 = vpop.f32.mrb[222].mxu0 }
 0x6c4   : > { %v17132_v53 = vpop.f32.mrb[223].mxu0  ;;  %v12890_v52 = vadd.f32 %v17093_v34, %v24166_v60 }
 0x6c5   : > { %v12952_v45 = vadd.f32 %v17130_v50, %v12887_v1  ;;  %v17133_v3 = vadd.f32 %v17132_v53, %v17131_v22 }
 0x6c6   : > { %v17150_v39 = vpop.f32.mrb[208].mxu1 }
 0x6c7   : > { %v24196_v63 = vadd.f32 %v12952_v45, %v24164_v17  ;;  %v12955_v31 = vadd.f32 %v17133_v3, %v12890_v52  ;;  %v17151_v21 = vpop.f32.mrb[209].mxu1 }
 0x6c8   : > { %v17152_v56 = vadd.f32 %v17151_v21, %v17150_v39  ;;  %v17153_v33 = vpop.f32.mrb[210].mxu1 }
 0x6c9   : > { %v24199_v59 = vadd.f32 %v12955_v31, %v24169_v54  ;;  %v17190_v9 = vpop.f32.mrb[224].mxu0  ;;  %v17154_v44 = vpop.f32.mrb[211].mxu1 }
 0x6ca   : > { %v17191_v46 = vpop.f32.mrb[225].mxu0  ;;  %v17155_v57 = vadd.f32 %v17154_v44, %v17153_v33 }
 0x6cb   : > { %v17192_v47 = vadd.f32 %v17191_v46, %v17190_v9  ;;  %v17193_v27 = vpop.f32.mrb[226].mxu0 }
 0x6cc   : > { %v17194_v60 = vpop.f32.mrb[227].mxu0 }
 0x6cd   : > { %v13724_v49 = vadd.f32 %v17192_v47, %v17152_v56  ;;  %v17195_v2 = vadd.f32 %v17194_v60, %v17193_v27 }
 0x6ce   : > { %v17156_v19 = vpop.f32.mrb[212].mxu1 }
 0x6cf   : > { %v13727_v17 = vadd.f32 %v17195_v2, %v17155_v57  ;;  %v17157_v24 = vpop.f32.mrb[213].mxu1  ;;  %v24208_v57 = vld [vmem:[%s24309_s6] ss:$0 sm:$0xff] }
 0x6d0   : > { %v17158_v37 = vadd.f32 %v17157_v24, %v17156_v19  ;;  %v17159_v10 = vpop.f32.mrb[214].mxu1 }
 0x6d1   : > { %v17196_v7 = vpop.f32.mrb[228].mxu0  ;;  %v17160_v42 = vpop.f32.mrb[215].mxu1 }
 0x6d2   : > { %v17197_v54 = vpop.f32.mrb[229].mxu0  ;;  %v17161_v35 = vadd.f32 %v17160_v42, %v17159_v10 }
 0x6d3   : > { %v17198_v38 = vadd.f32 %v17197_v54, %v17196_v7  ;;  %v17199_v43 = vpop.f32.mrb[230].mxu0 }
 0x6d4   : > { %v17200_v40 = vpop.f32.mrb[231].mxu0 }
 0x6d5   : > { %v13732_v0 = vadd.f32 %v17198_v38, %v17158_v37  ;;  %v17201_v20 = vadd.f32 %v17200_v40, %v17199_v43 }
 0x6d6   : > { %v17162_v6 = vpop.f32.mrb[216].mxu1 }
 0x6d7   : > { %v13735_v12 = vadd.f32 %v17201_v20, %v17161_v35  ;;  %v17163_v26 = vpop.f32.mrb[217].mxu1 }
 0x6d8   : > { %v17164_v4 = vadd.f32 %v17163_v26, %v17162_v6  ;;  %v17165_v15 = vpop.f32.mrb[218].mxu1 }
 0x6d9   : > { %v17202_v16 = vpop.f32.mrb[232].mxu0  ;;  %v17166_v28 = vpop.f32.mrb[219].mxu1 }
 0x6da   : > { %v17203_v55 = vpop.f32.mrb[233].mxu0  ;;  %v17167_v48 = vadd.f32 %v17166_v28, %v17165_v15 }
 0x6db   : > { %v17204_v30 = vadd.f32 %v17203_v55, %v17202_v16  ;;  %v17205_v61 = vpop.f32.mrb[234].mxu0 }
 0x6dc   : > { %v17206_v51 = vpop.f32.mrb[235].mxu0 }
 0x6dd   : > { %v13740_v8 = vadd.f32 %v17204_v30, %v17164_v4  ;;  %v17207_v62 = vadd.f32 %v17206_v51, %v17205_v61 }
 0x6de   : > { %v17168_v5 = vpop.f32.mrb[220].mxu1 }
 0x6df   : > { %v13743_v18 = vadd.f32 %v17207_v62, %v17167_v48  ;;  %v17169_v32 = vpop.f32.mrb[221].mxu1 }
 0x6e0   : > { %v17170_v58 = vadd.f32 %v17169_v32, %v17168_v5  ;;  %v17171_v14 = vpop.f32.mrb[222].mxu1 }
 0x6e1   : > { %v17208_v13 = vpop.f32.mrb[236].mxu0  ;;  %v17172_v1 = vpop.f32.mrb[223].mxu1 }
 0x6e2   : > { %v17209_v34 = vpop.f32.mrb[237].mxu0  ;;  %v17173_v50 = vadd.f32 %v17172_v1, %v17171_v14 }
 0x6e3   : > { %v17210_v22 = vadd.f32 %v17209_v34, %v17208_v13  ;;  %v17211_v53 = vpop.f32.mrb[238].mxu0 }
 0x6e4   : > { %v17212_v52 = vpop.f32.mrb[239].mxu0 }
 0x6e5   : > { %v24201_v45 = vadd.f32 %v17210_v22, %v17170_v58  ;;  %v17213_v3 = vadd.f32 %v17212_v52, %v17211_v53 }
 0x6e6   : > { %v17230_v39 = vpop.f32.mrb[224].mxu1 }
 0x6e7   : > { %v24203_v31 = vadd.f32 %v17213_v3, %v17173_v50  ;;  %v17231_v21 = vpop.f32.mrb[225].mxu1 }
 0x6e8   : > { %v17232_v56 = vadd.f32 %v17231_v21, %v17230_v39  ;;  %v17233_v33 = vpop.f32.mrb[226].mxu1 }
 0x6e9   : > { %v17234_v9 = vpop.f32.mrb[227].mxu1 }
 0x6ea   : > { %v13789_v44 = vadd.f32 %v17232_v56, %v13724_v49  ;;  %v17235_v46 = vadd.f32 %v17234_v9, %v17233_v33 }
 0x6ec   : > { %v13819_v47 = vadd.f32 %v13789_v44, %v24172_v36  ;;  %v13792_v27 = vadd.f32 %v17235_v46, %v13727_v17 }
 0x6ee   : > { %v13834_v60 = vadd.f32 %v24208_v57, %v13819_v47  ;;  %v13820_v2 = vadd.f32 %v13792_v27, %v24175_v25  ;;  %v17236_v19 = vpop.f32.mrb[228].mxu1 }
 0x6ef   : > { %v17237_v24 = vpop.f32.mrb[229].mxu1 }
 0x6f0   : > { %v13835_v37 = vadd.f32 %v24208_v57, %v13820_v2  ;;  %v17238_v10 = vadd.f32 %v17237_v24, %v17236_v19  ;;  %v17239_v49 = vpop.f32.mrb[230].mxu1  ;;  %v13842_v42 = vmax.f32 %v13834_v60, 0.0 }
 0x6f1   : > { %v17240_v7 = vpop.f32.mrb[231].mxu1 }
 0x6f2   : > { %v13843_v54 = vmax.f32 %v13835_v37, 0.0  ;;  %v13797_v35 = vadd.f32 %v17238_v10, %v13732_v0  ;;  %v17241_v38 = vadd.f32 %v17240_v7, %v17239_v49 }
 0x6f4   : > { %v13850_v36 = vmax.f32 %v13842_v42, %v13843_v54  ;;  %v13821_v17 = vadd.f32 %v13797_v35, %v24180_v29  ;;  %v13800_v43 = vadd.f32 %v17241_v38, %v13735_v12 }
 0x6f6   : > { %v13858_v40 = vrot.slane %v13850_v36, 1  ;;  %v13836_v25 = vadd.f32 %v24208_v57, %v13821_v17  ;;  %v13822_v20 = vadd.f32 %v13800_v43, %v24183_v23  ;;  %v17242_v6 = vpop.f32.mrb[232].mxu1 }
 0x6f7   : > { %v17243_v26 = vpop.f32.mrb[233].mxu1 }
 0x6f8   : > { %v13866_v4 = vmax.f32 %v13850_v36, %v13858_v40  ;;  %v13837_v15 = vadd.f32 %v24208_v57, %v13822_v20  ;;  %v17244_v16 = vadd.f32 %v17243_v26, %v17242_v6  ;;  %v17245_v28 = vpop.f32.mrb[234].mxu1  ;;  %v13844_v29 = vmax.f32 %v13836_v25, 0.0 }
 0x6f9   : > { %v17246_v0 = vpop.f32.mrb[235].mxu1 }
 0x6fa   : > { %13870 = vst [vmem:[%s24221_s8] sm:$0x1] %v13866_v4  ;;  %13874 = vst [vmem:[%s24221_s8 - $0x1] sm:$0x4] %v13866_v4  ;;  %v13845_v23 = vmax.f32 %v13837_v15, 0.0  ;;  %v13805_v12 = vadd.f32 %v17244_v16, %v13740_v8  ;;  %v17247_v55 = vadd.f32 %v17246_v0, %v17245_v28 }
 0x6fb   : > { %13878 = vst [vmem:[%s24221_s8 - $0x2] sm:$0x10] %v13866_v4  ;;  %13882 = vst [vmem:[%s24221_s8 - $0x3] sm:$0x40] %v13866_v4 }
 0x6fc   : > { %v13851_v48 = vmax.f32 %v13844_v29, %v13845_v23  ;;  %v13823_v30 = vadd.f32 %v13805_v12, %v24188_v41  ;;  %v13808_v61 = vadd.f32 %v17247_v55, %v13743_v18 }
 0x6fe   : > { %v13859_v51 = vrot.slane %v13851_v48, 1  ;;  %v13838_v62 = vadd.f32 %v24208_v57, %v13823_v30  ;;  %v13824_v5 = vadd.f32 %v13808_v61, %v24191_v11  ;;  %v17248_v32 = vpop.f32.mrb[236].mxu1 }
 0x6ff   : > { %v17249_v58 = vpop.f32.mrb[237].mxu1 }
 0x700   : > { %v13867_v14 = vmax.f32 %v13851_v48, %v13859_v51  ;;  %v13839_v13 = vadd.f32 %v24208_v57, %v13824_v5  ;;  %v17250_v1 = vadd.f32 %v17249_v58, %v17248_v32  ;;  %v17251_v8 = vpop.f32.mrb[238].mxu1  ;;  %v13846_v41 = vmax.f32 %v13838_v62, 0.0 }
 0x701   : > { %v17252_v34 = vpop.f32.mrb[239].mxu1 }
 0x702   : > { %13871 = vst [vmem:[%s24221_s8 + $0x4] sm:$0x1] %v13867_v14  ;;  %13875 = vst [vmem:[%s24221_s8 + $0x3] sm:$0x4] %v13867_v14  ;;  %v13847_v18 = vmax.f32 %v13839_v13, 0.0  ;;  %v13813_v11 = vadd.f32 %v17250_v1, %v24201_v45  ;;  %v17253_v50 = vadd.f32 %v17252_v34, %v17251_v8 }
 0x703   : > { %13879 = vst [vmem:[%s24221_s8 + $0x2] sm:$0x10] %v13867_v14  ;;  %13883 = vst [vmem:[%s24221_s8 + $0x1] sm:$0x40] %v13867_v14 }
 0x704   : > { %v13852_v22 = vmax.f32 %v13846_v41, %v13847_v18  ;;  %v13825_v53 = vadd.f32 %v13813_v11, %v24196_v63  ;;  %v13816_v52 = vadd.f32 %v17253_v50, %v24203_v31 }
 0x706   : > { %v13860_v3 = vrot.slane %v13852_v22, 1  ;;  %v13840_v39 = vadd.f32 %v24208_v57, %v13825_v53  ;;  %v13826_v21 = vadd.f32 %v13816_v52, %v24199_v59 }
 0x708   : > { %v13868_v56 = vmax.f32 %v13852_v22, %v13860_v3  ;;  %v13841_v33 = vadd.f32 %v24208_v57, %v13826_v21  ;;  %v13848_v63 = vmax.f32 %v13840_v39, 0.0 }
 0x70a   : > { %13872 = vst [vmem:[%s24221_s8 + $0x8] sm:$0x1] %v13868_v56  ;;  %13876 = vst [vmem:[%s24221_s8 + $0x7] sm:$0x4] %v13868_v56  ;;  %v13849_v45 = vmax.f32 %v13841_v33, 0.0 }
 0x70b   : > { %13880 = vst [vmem:[%s24221_s8 + $0x6] sm:$0x10] %v13868_v56  ;;  %13884 = vst [vmem:[%s24221_s8 + $0x5] sm:$0x40] %v13868_v56 }
 0x70c   : > { %v13853_v31 = vmax.f32 %v13848_v63, %v13849_v45 }
 0x70e   : > { %v13861_v9 = vrot.slane %v13853_v31, 1 }
 0x710   : > { %v13869_v59 = vmax.f32 %v13853_v31, %v13861_v9 }
 0x712   : > { %13873 = vst [vmem:[%s24221_s8 + $0xc] sm:$0x1] %v13869_v59  ;;  %13877 = vst [vmem:[%s24221_s8 + $0xb] sm:$0x4] %v13869_v59 }
 0x713   : > { %13881 = vst [vmem:[%s24221_s8 + $0xa] sm:$0x10] %v13869_v59  ;;  %13885 = vst [vmem:[%s24221_s8 + $0x9] sm:$0x40] %v13869_v59 }
 0x714   : > { %18305 = shalt.err (!%p18302_p3)
}
 0x715   : > { %s18306_s22 = scalar_lea.hbm %s24250_s16, 256  ;;  %s18310_s8 = scalar_lea.hbm %s24310_s7, 512 }
 0x716   : > { %p18307_p4 = scmp.ne.s32.totalorder %s24250_s16, %s18306_s22  ;;  %p18311_p9 = scmp.lt.u32.totalorder %s24250_s16, %s24310_s7 }
 0x717   : > { %p18312_p10 = scmp.lt.u32.totalorder %s18310_s8, %s18306_s22  ;;  %p18314_p12 = scmp.lt.u32.totalorder %s18306_s22, %s24250_s16 }
 0x718   : > { %p18308_p7 = pnand %p18307_p4, %p18441_p5 }
 0x719   : > { %p18313_p11 = por %p18312_p10, %p18311_p9 }
 0x71a   : > { %p18309_p8 = pneg %p18308_p7 }
 0x71b   : > { %p18315_p13 = por %p18314_p12, %p18313_p11 }
 0x71d   : > { %p18316_p0 = pnand %p18315_p13, %p18309_p8 }
 0x71f   : > { %18319 = shalt.err (!%p18316_p0)
}
 0x720   : > { %s18362_s15 = smov 4  }
 0x721   : > { %17453 = dma.vmem_to_hbm [thread:$0]  (%p18441_p5), %s24252_s13, 256, %s24250_s16, %s24260_s17, %s18360_s18, %s18360_s18, %s18362_s15  }
 0x722 PF: > { %p17459_p1 = scmp.ge.s32.totalorder %s18354_s27, 2  ;;  %s13915_s28 = sand.u32 1, %s18342_s24  }
 0x723   : > { %s13916_s19 = scalar_lea.sflag [#allocation5], %s13915_s28 }
 0x724   : > { %p17456_p2 = pnand %p17459_p1, %p18445_p6 }
 0x726   : > { %18337 = dma.done.wait (!%p17456_p2), %s13916_s19, 256  }
 0x727   : > { %18339 = vsyncadd (!%p17456_p2), %s13916_s19, 4294967040  ;;  %p17_p3 = scmp.ge.s32.totalorder %s18428_s30, 4   ;;  %s24814_s24 = smov %s18346_s25 }
 0x728   : > { %s24815_s25 = smov %s18350_s26  ;;  %s24816_s26 = smov %s18439_s10 }
 0x729   : > { %s24817_s27 = smov %s18428_s30  ;;  %19 = sbr.rel (!%p17_p3) target bundleno = 3 (0x3), region = 105 }
 0x730   :  { %13921 = vsyncpa [#allocation5], 1 }
 0x731   :  { %13923 = vsyncpa [#allocation5 + $0x1], 1 }

</bundles_post_ra>
